<compile_context>
chip_gen: v7x
topology: tpu7x:2x2x1
jax: 0.10.0
libtpu: 0.0.40
codegen_flags: <defaults>
</compile_context>

<pallas_src>
import math
import functools
import numpy as np

import jax
import jax.numpy as jnp
from jax import lax
from jax.experimental import pallas as pl
from jax.experimental.pallas import tpu as pltpu

LAYER_NORM_EPS = 1e-5
NEG_INF = -1e20  # matches neginf() in the reference


# ----------------------------------------------------------------------------
# Shared math helpers.
# ----------------------------------------------------------------------------
def _layer_norm(x, gamma, beta):
    mean = jnp.mean(x, axis=-1, keepdims=True)
    var = jnp.mean((x - mean) ** 2, axis=-1, keepdims=True)
    return (x - mean) * lax.rsqrt(var + LAYER_NORM_EPS) * gamma + beta


def _bmm_nn(a, b):
    """[H, M, K] x [H, K, N] -> [H, M, N], f32 accumulation."""
    return lax.dot_general(a, b, (((2,), (1,)), ((0,), (0,))),
                           preferred_element_type=jnp.float32)


def _bmm_nt(a, b):
    """[H, M, K] x [H, N, K] -> [H, M, N], f32 accumulation."""
    return lax.dot_general(a, b, (((2,), (2,)), ((0,), (0,))),
                           preferred_element_type=jnp.float32)


# ----------------------------------------------------------------------------
# Pallas kernel: one full TransformerDecoderLayer for one (batch, seq-tile) block.
# ----------------------------------------------------------------------------
def decoder_layer_kernel(
    n_heads, block_tq,
    # data refs
    x_ref, enc_ref, mask_ref,
    # self-attention params ([in, out] bf16 weights, f32 biases; scale folded in wq/bq)
    wq_s, bq_s, wkv_s, bkv_s, wo_s, bo_s, g1, be1,
    # encoder-attention params
    wq_e, bq_e, wkv_e, bkv_e, wo_e, bo_e, g2, be2,
    # FFN params + final norm
    w1, b1, w2, b2, g3, be3,
    # output ref
    out_ref,
    # scratch: lane-dense K/V caches, filled once per batch element
    k_self, v_self, k_enc, v_enc,
):
    H = n_heads
    Tq = block_tq
    qi = pl.program_id(1)
    T, D = x_ref.shape[1], x_ref.shape[2]
    S = enc_ref.shape[1]
    dh = D // H

    def split_heads(x2d):
        # [N, D] -> [H, N, dh] via static lane slices (no minor-dim reshape).
        return jnp.concatenate(
            [x2d[None, :, h * dh:(h + 1) * dh] for h in range(H)], axis=0)

    def merge_heads(x3d):
        # [H, N, dh] -> [N, D] (lane concat, head order matches PyTorch view/transpose)
        return jnp.concatenate([x3d[h] for h in range(H)], axis=-1)

    # ---- fused K/V projections, computed once per batch element (first seq tile) ----
    @pl.when(qi == 0)
    def _():
        xf = x_ref[0]                                              # [T, D] bf16
        kv = jnp.dot(xf, wkv_s[...],
                     preferred_element_type=jnp.float32) + bkv_s[...]   # [T, 2D] f32
        k_self[...] = kv[:, :D].astype(jnp.bfloat16)
        v_self[...] = kv[:, D:].astype(jnp.bfloat16)

        enc = enc_ref[0]                                           # [S, D] bf16
        kve = jnp.dot(enc, wkv_e[...],
                      preferred_element_type=jnp.float32) + bkv_e[...]  # [S, 2D] f32
        k_enc[...] = kve[:, :D].astype(jnp.bfloat16)
        v_enc[...] = kve[:, D:].astype(jnp.bfloat16)

    q_start = pl.multiple_of(qi * Tq, Tq)
    x_tile = x_ref[0, pl.ds(q_start, Tq), :]                       # [Tq, D] bf16
    x = x_tile.astype(jnp.float32)

    # ---- causal self-attention: flash-style online softmax over key chunks ----
    def self_attention(x_in):
        q2 = jnp.dot(x_in.astype(jnp.bfloat16), wq_s[...],
                     preferred_element_type=jnp.float32) + bq_s[...]    # [Tq, D], scaled
        q = split_heads(q2.astype(jnp.bfloat16))                        # [H, Tq, dh]
        qpos = qi * Tq + lax.broadcasted_iota(jnp.int32, (1, Tq, Tq), 1)

        def body(kj, carry):
            m, l, acc = carry
            k_start = pl.multiple_of(kj * Tq, Tq)
            k_blk = split_heads(k_self[pl.ds(k_start, Tq), :])          # [H, Tq, dh]
            v_blk = split_heads(v_self[pl.ds(k_start, Tq), :])
            s = _bmm_nt(q, k_blk)                                       # [H, Tq, Tq] f32
            kpos = kj * Tq + lax.broadcasted_iota(jnp.int32, (1, Tq, Tq), 2)
            s = jnp.where(kpos <= qpos, s, NEG_INF)
            m_new = jnp.maximum(m, jnp.max(s, axis=-1, keepdims=True))
            alpha = jnp.exp(m - m_new)
            p = jnp.exp(s - m_new)
            l_new = alpha * l + jnp.sum(p, axis=-1, keepdims=True)
            acc_new = alpha * acc + _bmm_nn(p.astype(jnp.bfloat16), v_blk)
            return m_new, l_new, acc_new

        m0 = jnp.full((H, Tq, 1), -jnp.inf, jnp.float32)
        l0 = jnp.zeros((H, Tq, 1), jnp.float32)
        a0 = jnp.zeros((H, Tq, dh), jnp.float32)
        # causal: only key chunks <= the diagonal chunk are visited
        _, l, acc = lax.fori_loop(0, qi + 1, body, (m0, l0, a0))
        att = merge_heads(acc * pl.reciprocal(l, approx=True)).astype(jnp.bfloat16)
        return jnp.dot(att, wo_s[...],
                       preferred_element_type=jnp.float32) + bo_s[...]  # [Tq, D]

    # ---- encoder/decoder attention (static KV) ----
    def encoder_attention(x_in):
        q2 = jnp.dot(x_in.astype(jnp.bfloat16), wq_e[...],
                     preferred_element_type=jnp.float32) + bq_e[...]
        q = split_heads(q2.astype(jnp.bfloat16))                        # [H, Tq, dh]
        k = split_heads(k_enc[...])                                     # [H, S, dh]
        v = split_heads(v_enc[...])
        s = _bmm_nt(q, k)                                               # [H, Tq, S]
        allow = (mask_ref[0] > 0.0)[None]                               # [1, 1, S]
        s = jnp.where(allow, s, NEG_INF)
        m = jnp.max(s, axis=-1, keepdims=True)
        p = jnp.exp(s - m)
        p = p * pl.reciprocal(jnp.sum(p, axis=-1, keepdims=True), approx=True)
        att = merge_heads(_bmm_nn(p.astype(jnp.bfloat16), v)).astype(jnp.bfloat16)
        return jnp.dot(att, wo_e[...],
                       preferred_element_type=jnp.float32) + bo_e[...]

    # --- self attention + residual + LN1 ---
    sa = self_attention(x)
    x = _layer_norm(sa + x, g1[...], be1[...])

    # --- encoder/decoder attention + residual + LN2 ---
    ea = encoder_attention(x)
    x = _layer_norm(ea + x, g2[...], be2[...])

    # --- FFN (relu) + residual + LN3 ---
    h = jnp.dot(x.astype(jnp.bfloat16), w1[...],
                preferred_element_type=jnp.float32) + b1[...]
    h = jnp.maximum(h, 0.0)
    f = jnp.dot(h.astype(jnp.bfloat16), w2[...],
                preferred_element_type=jnp.float32) + b2[...]
    x = _layer_norm(f + x, g3[...], be3[...])

    out_ref[0] = x.astype(out_ref.dtype)


# ----------------------------------------------------------------------------
# Host-side weight packing (done ONCE at init): PyTorch [out, in] -> [in, out],
# K/V fused to [D, 2D], 1/sqrt(dh) folded into wq/bq, weights bf16, biases f32.
# ----------------------------------------------------------------------------
def pack_layer_params(lp, n_heads):
    (swq, sbq, swk, sbk, swv, sbv, swo, sbo, g1, be1,
     ewq, ebq, ewk, ebk, ewv, ebv, ewo, ebo, g2, be2,
     fw1, fb1, fw2, fb2, g3, be3) = lp
    D = swq.shape[0]
    dh = D // n_heads
    inv_scale = 1.0 / math.sqrt(dh)

    def t(w):  # [out, in] -> [in, out]
        return jnp.transpose(w)

    def pack_attn(wq, bq, wk, bk, wv, bv, wo, bo):
        wq_p = (t(wq) * inv_scale).astype(jnp.bfloat16)                 # [D, D]
        bq_p = (bq * inv_scale).astype(jnp.float32)                     # [1, D]
        wkv_p = jnp.concatenate([t(wk), t(wv)], axis=1).astype(jnp.bfloat16)  # [D, 2D]
        bkv_p = jnp.concatenate([bk, bv], axis=1).astype(jnp.float32)         # [1, 2D]
        wo_p = t(wo).astype(jnp.bfloat16)                               # [D, D]
        return [wq_p, bq_p, wkv_p, bkv_p, wo_p, bo]

    packed = []
    packed += pack_attn(swq, sbq, swk, sbk, swv, sbv, swo, sbo) + [g1, be1]
    packed += pack_attn(ewq, ebq, ewk, ebk, ewv, ebv, ewo, ebo) + [g2, be2]
    packed += [t(fw1).astype(jnp.bfloat16), fb1,
               t(fw2).astype(jnp.bfloat16), fb2, g3, be3]
    return tuple(packed)


# ----------------------------------------------------------------------------
# pallas_call wrapper for one decoder layer.
# ----------------------------------------------------------------------------
_WEIGHT_SINGLE_BUFFER = [True]   # falls back automatically if pipeline_mode unsupported


def _weight_spec(shape, single_buffer):
    nd = len(shape)
    index_map = lambda b, q, _n=nd: (0,) * _n
    if single_buffer:
        return pl.BlockSpec(shape, index_map, pipeline_mode=pl.Buffered(1))
    return pl.BlockSpec(shape, index_map)


def run_decoder_layer(x, enc_out, enc_mask3, packed, n_heads, block_tq=None):
    """x: [B, T, D] bf16; enc_out: [B, S, D] bf16; enc_mask3: [B, 1, S] f32."""
    B, T, D = x.shape
    S = enc_out.shape[1]
    if block_tq is None:
        block_tq = T if T <= 128 else 128   # TODO(synk): sweep 256 on v6e (128 MiB VMEM)
    assert T % block_tq == 0
    n_tq = T // block_tq

    def build_call(single_buffer):
        in_specs = [
            pl.BlockSpec((1, T, D), lambda b, q: (b, 0, 0)),   # full x (resident per b)
            pl.BlockSpec((1, S, D), lambda b, q: (b, 0, 0)),   # encoder output
            pl.BlockSpec((1, 1, S), lambda b, q: (b, 0, 0)),   # encoder mask
        ] + [_weight_spec(p.shape, single_buffer) for p in packed]
        return pl.pallas_call(
            functools.partial(decoder_layer_kernel, n_heads, block_tq),
            out_shape=jax.ShapeDtypeStruct((B, T, D), jnp.bfloat16),
            grid=(B, n_tq),
            in_specs=in_specs,
            out_specs=pl.BlockSpec((1, block_tq, D), lambda b, q: (b, q, 0)),
            scratch_shapes=[
                pltpu.VMEM((T, D), jnp.bfloat16),   # self-attn K cache (lane-dense)
                pltpu.VMEM((T, D), jnp.bfloat16),   # self-attn V cache
                pltpu.VMEM((S, D), jnp.bfloat16),   # enc-attn K cache
                pltpu.VMEM((S, D), jnp.bfloat16),   # enc-attn V cache
            ],
            compiler_params=pltpu.CompilerParams(
                dimension_semantics=("parallel", "arbitrary"),
                vmem_limit_bytes=64 * 1024 * 1024),
        )

    if _WEIGHT_SINGLE_BUFFER[0] and hasattr(pl, "Buffered"):
        try:
            return build_call(True)(x, enc_out, enc_mask3, *packed)
        except Exception:
            _WEIGHT_SINGLE_BUFFER[0] = False   # pipeline_mode unsupported -> fallback
    return build_call(False)(x, enc_out, enc_mask3, *packed)


# ----------------------------------------------------------------------------
# Parameter construction (deterministic, shapes follow the PyTorch __init__;
# kept in PyTorch [out, in] convention — packed for the kernel once, separately).
# ----------------------------------------------------------------------------
def make_sinusoidal_position_codes(n_pos, dim):
    pos = np.arange(n_pos, dtype=np.float64)[:, None]
    j = np.arange(dim // 2, dtype=np.float64)[None, :]
    enc = pos / np.power(10000.0, 2.0 * j / dim)
    out = np.zeros((n_pos, dim), np.float32)
    out[:, 0::2] = np.sin(enc)
    out[:, 1::2] = np.cos(enc)
    return jnp.asarray(out)


def init_params(key, n_layers, n_heads, dim, ffn_dim, vocab, n_positions):
    keys = jax.random.split(key, 1 + n_layers)
    emb = 0.02 * jax.random.normal(keys[0], (vocab, dim), jnp.float32)
    pos_emb = make_sinusoidal_position_codes(n_positions, dim)

    def xavier_normal(k, out_f, in_f):
        std = math.sqrt(2.0 / (in_f + out_f))
        return std * jax.random.normal(k, (out_f, in_f), jnp.float32)

    def xavier_uniform(k, out_f, in_f):
        a = math.sqrt(6.0 / (in_f + out_f))
        return jax.random.uniform(k, (out_f, in_f), jnp.float32, -a, a)

    def lin_bias(k, out_f, in_f):
        bound = 1.0 / math.sqrt(in_f)
        return jax.random.uniform(k, (1, out_f), jnp.float32, -bound, bound)

    ones = jnp.ones((1, dim), jnp.float32)
    zeros = jnp.zeros((1, dim), jnp.float32)

    layers = []
    for l in range(n_layers):
        k = jax.random.split(keys[1 + l], 20)
        params = [
            # self-attention q/k/v/out
            xavier_normal(k[0], dim, dim), lin_bias(k[1], dim, dim),
            xavier_normal(k[2], dim, dim), lin_bias(k[3], dim, dim),
            xavier_normal(k[4], dim, dim), lin_bias(k[5], dim, dim),
            xavier_normal(k[6], dim, dim), lin_bias(k[7], dim, dim),
            ones, zeros,                                         # norm1
            # encoder-attention q/k/v/out
            xavier_normal(k[8], dim, dim), lin_bias(k[9], dim, dim),
            xavier_normal(k[10], dim, dim), lin_bias(k[11], dim, dim),
            xavier_normal(k[12], dim, dim), lin_bias(k[13], dim, dim),
            xavier_normal(k[14], dim, dim), lin_bias(k[15], dim, dim),
            ones, zeros,                                         # norm2
            # FFN lin1 / lin2
            xavier_uniform(k[16], ffn_dim, dim), lin_bias(k[17], ffn_dim, dim),
            xavier_uniform(k[18], dim, ffn_dim), lin_bias(k[19], dim, ffn_dim),
            ones, zeros,                                         # norm3
        ]
        layers.append(params)
    return emb, pos_emb, layers


# ----------------------------------------------------------------------------
# Full decoder forward (embedding/positional glue in plain JAX, layers in Pallas).
# Takes pre-packed per-layer weights (packed once at init, not per forward).
# ----------------------------------------------------------------------------
def transformer_decoder_forward(tokens, enc_out, enc_mask,
                                emb, pos_emb, packed_layers, n_heads,
                                embeddings_scale=True, block_tq=None):
    B, T = tokens.shape
    D = emb.shape[1]
    x = emb[tokens]
    if embeddings_scale:
        x = x * np.sqrt(D)
    x = x + pos_emb[jnp.arange(T)][None, :, :]
    x = x.astype(jnp.bfloat16)                       # bf16 inter-layer activations
    enc_bf = enc_out.astype(jnp.bfloat16)
    enc_mask3 = enc_mask.reshape(B, 1, -1).astype(jnp.float32)
    for packed in packed_layers:
        x = run_decoder_layer(x, enc_bf, enc_mask3, packed, n_heads, block_tq)
    return x.astype(jnp.float32)


# ----------------------------------------------------------------------------
# Pure-JAX reference (mirrors the kernel's bf16-matmul / bf16-activation numerics).
# ----------------------------------------------------------------------------
def _ref_linear(x, w, b):
    return jnp.dot(x.astype(jnp.bfloat16), jnp.transpose(w).astype(jnp.bfloat16),
                   preferred_element_type=jnp.float32) + b


def _ref_mha(q_in, kv_in, allow, wq, bq, wk, bk, wv, bv, wo, bo, n_heads):
    T, D = q_in.shape
    dh = D // n_heads
    scale = math.sqrt(dh)
    q = _ref_linear(q_in, wq, bq)
    k = _ref_linear(kv_in, wk, bk)
    v = _ref_linear(kv_in, wv, bv)
    att_heads = []
    for h in range(n_heads):
        sl = slice(h * dh, (h + 1) * dh)
        qh = (q[:, sl] / scale).astype(jnp.bfloat16)
        kh = k[:, sl].astype(jnp.bfloat16)
        vh = v[:, sl].astype(jnp.bfloat16)
        scores = jnp.dot(qh, kh.T, preferred_element_type=jnp.float32)
        scores = jnp.where(allow, scores, NEG_INF)
        m = jnp.max(scores, -1, keepdims=True)
        e = jnp.exp(scores - m)
        p = e / jnp.sum(e, -1, keepdims=True)
        att_heads.append(jnp.dot(p.astype(jnp.bfloat16), vh,
                                 preferred_element_type=jnp.float32))
    att = jnp.concatenate(att_heads, axis=-1)
    return jnp.dot(att.astype(jnp.bfloat16), jnp.transpose(wo).astype(jnp.bfloat16),
                   preferred_element_type=jnp.float32) + bo


def reference_forward(tokens, enc_out, enc_mask,
                      emb, pos_emb, layer_params, n_heads):
    B, T = tokens.shape
    D = emb.shape[1]
    x = emb[tokens] * np.sqrt(D)
    x = x + pos_emb[jnp.arange(T)][None, :, :]
    x = x.astype(jnp.bfloat16).astype(jnp.float32)   # mirror kernel bf16 activations
    causal = jnp.asarray(np.tril(np.ones((T, T), bool)))
    for lp in layer_params:
        (swq, sbq, swk, sbk, swv, sbv, swo, sbo, g1, be1,
         ewq, ebq, ewk, ebk, ewv, ebv, ewo, ebo, g2, be2,
         fw1, fb1, fw2, fb2, g3, be3) = lp
        outs = []
        for b in range(B):
            xb = x[b]
            eb = enc_out[b]
            allow = (enc_mask[b] > 0)[None, :]
            sa = _ref_mha(xb, xb, causal, swq, sbq, swk, sbk, swv, sbv, swo, sbo,
                          n_heads)
            xb = _layer_norm(sa + xb, g1, be1)
            ea = _ref_mha(xb, eb, allow, ewq, ebq, ewk, ebk, ewv, ebv, ewo, ebo,
                          n_heads)
            xb = _layer_norm(ea + xb, g2, be2)
            h = jnp.maximum(_ref_linear(xb, fw1, fb1), 0.0)
            f = _ref_linear(h, fw2, fb2)
            xb = _layer_norm(f + xb, g3, be3)
            outs.append(xb)
        x = jnp.stack(outs, axis=0)
        x = x.astype(jnp.bfloat16).astype(jnp.float32)   # bf16 inter-layer activations
    return x


# ----------------------------------------------------------------------------
if __name__ == "__main__":
    # small config consistent with the module
    B, T, S = 2, 8, 12
    N_HEADS, N_LAYERS = 4, 2
    DIM, FFN = 32, 64
    VOCAB, N_POS = 50, 16

    key = jax.random.PRNGKey(0)
    k_param, k_tok, k_enc = jax.random.split(key, 3)

    emb, pos_emb, layer_params = init_params(
        k_param, N_LAYERS, N_HEADS, DIM, FFN, VOCAB, N_POS)

    # pack weights once (not inside the forward loop)
    packed_layers = [pack_layer_params(lp, N_HEADS) for lp in layer_params]

    tokens = jax.random.randint(k_tok, (B, T), 0, VOCAB, dtype=jnp.int32)
    encoder_output = 0.5 * jax.random.normal(k_enc, (B, S, DIM), jnp.float32)
    # encoder mask: 1 = attend, 0 = blocked (second batch element has padding)
    enc_mask_np = np.ones((B, S), np.float32)
    enc_mask_np[1, S - 3:] = 0.0
    encoder_mask = jnp.asarray(enc_mask_np)

    out = transformer_decoder_forward(
        tokens, encoder_output, encoder_mask,
        emb, pos_emb, packed_layers, N_HEADS)
    out = jax.block_until_ready(out)

    ref = reference_forward(
        tokens, encoder_output, encoder_mask,
        emb, pos_emb, layer_params, N_HEADS)
    ref = jax.block_until_ready(ref)

    np.testing.assert_allclose(np.asarray(out), np.asarray(ref),
                               rtol=2e-2, atol=2e-2)
    assert out.shape == (B, T, DIM)
    print("KERNEL_OK")
</pallas_src>

<mosaic_0001>
module attributes {stable_mosaic.version = 11 : i64} {
  func.func @decoder_layer_kernel(%arg0: i32, %arg1: i32, %arg2: memref<1x8x32xbf16, #tpu.memory_space<vmem>>, %arg3: memref<1x12x32xbf16, #tpu.memory_space<vmem>>, %arg4: memref<1x1x12xf32, #tpu.memory_space<vmem>>, %arg5: memref<32x32xbf16, #tpu.memory_space<vmem>>, %arg6: memref<1x32xf32, #tpu.memory_space<vmem>>, %arg7: memref<32x64xbf16, #tpu.memory_space<vmem>>, %arg8: memref<1x64xf32, #tpu.memory_space<vmem>>, %arg9: memref<32x32xbf16, #tpu.memory_space<vmem>>, %arg10: memref<1x32xf32, #tpu.memory_space<vmem>>, %arg11: memref<1x32xf32, #tpu.memory_space<vmem>>, %arg12: memref<1x32xf32, #tpu.memory_space<vmem>>, %arg13: memref<32x32xbf16, #tpu.memory_space<vmem>>, %arg14: memref<1x32xf32, #tpu.memory_space<vmem>>, %arg15: memref<32x64xbf16, #tpu.memory_space<vmem>>, %arg16: memref<1x64xf32, #tpu.memory_space<vmem>>, %arg17: memref<32x32xbf16, #tpu.memory_space<vmem>>, %arg18: memref<1x32xf32, #tpu.memory_space<vmem>>, %arg19: memref<1x32xf32, #tpu.memory_space<vmem>>, %arg20: memref<1x32xf32, #tpu.memory_space<vmem>>, %arg21: memref<32x64xbf16, #tpu.memory_space<vmem>>, %arg22: memref<1x64xf32, #tpu.memory_space<vmem>>, %arg23: memref<64x32xbf16, #tpu.memory_space<vmem>>, %arg24: memref<1x32xf32, #tpu.memory_space<vmem>>, %arg25: memref<1x32xf32, #tpu.memory_space<vmem>>, %arg26: memref<1x32xf32, #tpu.memory_space<vmem>>, %arg27: memref<1x8x32xbf16, #tpu.memory_space<vmem>>, %arg28: memref<8x32xbf16, #tpu.memory_space<vmem>>, %arg29: memref<8x32xbf16, #tpu.memory_space<vmem>>, %arg30: memref<12x32xbf16, #tpu.memory_space<vmem>>, %arg31: memref<12x32xbf16, #tpu.memory_space<vmem>>) attributes {dimension_semantics = [#tpu.dimension_semantics<parallel>, #tpu.dimension_semantics<arbitrary>], iteration_bounds = array<i64: 2, 1>, scalar_prefetch = 0 : i64, scratch_operands = 4 : i64, tpu.core_type = #tpu.core_type<tc>, window_params = [{transform_indices = @transform_0, window_bounds = array<i64: 1, 8, 32>}, {transform_indices = @transform_1, window_bounds = array<i64: 1, 12, 32>}, {transform_indices = @transform_2, window_bounds = array<i64: 1, 1, 12>}, {pipeline_mode = #tpu.pipeline_mode<synchronous>, transform_indices = @transform_3, window_bounds = array<i64: 32, 32>}, {pipeline_mode = #tpu.pipeline_mode<synchronous>, transform_indices = @transform_4, window_bounds = array<i64: 1, 32>}, {pipeline_mode = #tpu.pipeline_mode<synchronous>, transform_indices = @transform_5, window_bounds = array<i64: 32, 64>}, {pipeline_mode = #tpu.pipeline_mode<synchronous>, transform_indices = @transform_6, window_bounds = array<i64: 1, 64>}, {pipeline_mode = #tpu.pipeline_mode<synchronous>, transform_indices = @transform_7, window_bounds = array<i64: 32, 32>}, {pipeline_mode = #tpu.pipeline_mode<synchronous>, transform_indices = @transform_8, window_bounds = array<i64: 1, 32>}, {pipeline_mode = #tpu.pipeline_mode<synchronous>, transform_indices = @transform_9, window_bounds = array<i64: 1, 32>}, {pipeline_mode = #tpu.pipeline_mode<synchronous>, transform_indices = @transform_10, window_bounds = array<i64: 1, 32>}, {pipeline_mode = #tpu.pipeline_mode<synchronous>, transform_indices = @transform_11, window_bounds = array<i64: 32, 32>}, {pipeline_mode = #tpu.pipeline_mode<synchronous>, transform_indices = @transform_12, window_bounds = array<i64: 1, 32>}, {pipeline_mode = #tpu.pipeline_mode<synchronous>, transform_indices = @transform_13, window_bounds = array<i64: 32, 64>}, {pipeline_mode = #tpu.pipeline_mode<synchronous>, transform_indices = @transform_14, window_bounds = array<i64: 1, 64>}, {pipeline_mode = #tpu.pipeline_mode<synchronous>, transform_indices = @transform_15, window_bounds = array<i64: 32, 32>}, {pipeline_mode = #tpu.pipeline_mode<synchronous>, transform_indices = @transform_16, window_bounds = array<i64: 1, 32>}, {pipeline_mode = #tpu.pipeline_mode<synchronous>, transform_indices = @transform_17, window_bounds = array<i64: 1, 32>}, {pipeline_mode = #tpu.pipeline_mode<synchronous>, transform_indices = @transform_18, window_bounds = array<i64: 1, 32>}, {pipeline_mode = #tpu.pipeline_mode<synchronous>, transform_indices = @transform_19, window_bounds = array<i64: 32, 64>}, {pipeline_mode = #tpu.pipeline_mode<synchronous>, transform_indices = @transform_20, window_bounds = array<i64: 1, 64>}, {pipeline_mode = #tpu.pipeline_mode<synchronous>, transform_indices = @transform_21, window_bounds = array<i64: 64, 32>}, {pipeline_mode = #tpu.pipeline_mode<synchronous>, transform_indices = @transform_22, window_bounds = array<i64: 1, 32>}, {pipeline_mode = #tpu.pipeline_mode<synchronous>, transform_indices = @transform_23, window_bounds = array<i64: 1, 32>}, {pipeline_mode = #tpu.pipeline_mode<synchronous>, transform_indices = @transform_24, window_bounds = array<i64: 1, 32>}, {transform_indices = @transform_25, window_bounds = array<i64: 1, 8, 32>}]} {
    %c0_i32 = arith.constant 0 : i32
    %0 = arith.cmpi eq, %arg1, %c0_i32 : i32
    %1 = arith.extui %0 : i1 to i32
    %c0_i32_0 = arith.constant 0 : i32
    %2 = arith.cmpi ne, %1, %c0_i32_0 : i32
    scf.if %2 {
      %c0_81 = arith.constant 0 : index
      %c0_82 = arith.constant 0 : index
      %c0_83 = arith.constant 0 : index
      %220 = vector.load %arg2[%c0_81, %c0_82, %c0_83] : memref<1x8x32xbf16, #tpu.memory_space<vmem>>, vector<1x8x32xbf16>
      %221 = vector.shape_cast %220 : vector<1x8x32xbf16> to vector<8x32xbf16>
      %c0_84 = arith.constant 0 : index
      %c0_85 = arith.constant 0 : index
      %222 = vector.load %arg7[%c0_84, %c0_85] : memref<32x64xbf16, #tpu.memory_space<vmem>>, vector<32x64xbf16>
      %cst_86 = arith.constant dense<0.000000e+00> : vector<8x64xf32>
      %223 = tpu.matmul %221, %222, %cst_86 {dimension_numbers = #tpu.dot_dimension_numbers<[1], [0], [0], [1], [0, 0, 1, 1], [], []>} : vector<8x32xbf16>, vector<32x64xbf16>, vector<8x64xf32> -> vector<8x64xf32>
      %c0_87 = arith.constant 0 : index
      %c0_88 = arith.constant 0 : index
      %224 = vector.load %arg8[%c0_87, %c0_88] : memref<1x64xf32, #tpu.memory_space<vmem>>, vector<1x64xf32>
      %225 = vector.broadcast %224 : vector<1x64xf32> to vector<8x64xf32>
      %226 = arith.addf %223, %225 : vector<8x64xf32>
      %227 = vector.extract_strided_slice %226 {offsets = [0, 0], sizes = [8, 32], strides = [1, 1]} : vector<8x64xf32> to vector<8x32xf32>
      %228 = arith.truncf %227 : vector<8x32xf32> to vector<8x32xbf16>
      %c0_89 = arith.constant 0 : index
      %c0_90 = arith.constant 0 : index
      %229 = vector.load %arg28[%c0_89, %c0_90] : memref<8x32xbf16, #tpu.memory_space<vmem>>, vector<8x32xbf16>
      tpu.vector_store %arg28[%c0_89, %c0_90], %228 {strides = array<i32>} : memref<8x32xbf16, #tpu.memory_space<vmem>>, vector<8x32xbf16>,
      %230 = vector.extract_strided_slice %226 {offsets = [0, 32], sizes = [8, 32], strides = [1, 1]} : vector<8x64xf32> to vector<8x32xf32>
      %231 = arith.truncf %230 : vector<8x32xf32> to vector<8x32xbf16>
      %c0_91 = arith.constant 0 : index
      %c0_92 = arith.constant 0 : index
      %232 = vector.load %arg29[%c0_91, %c0_92] : memref<8x32xbf16, #tpu.memory_space<vmem>>, vector<8x32xbf16>
      tpu.vector_store %arg29[%c0_91, %c0_92], %231 {strides = array<i32>} : memref<8x32xbf16, #tpu.memory_space<vmem>>, vector<8x32xbf16>,
      %c0_93 = arith.constant 0 : index
      %c0_94 = arith.constant 0 : index
      %c0_95 = arith.constant 0 : index
      %233 = vector.load %arg3[%c0_93, %c0_94, %c0_95] : memref<1x12x32xbf16, #tpu.memory_space<vmem>>, vector<1x12x32xbf16>
      %234 = vector.shape_cast %233 : vector<1x12x32xbf16> to vector<12x32xbf16>
      %c0_96 = arith.constant 0 : index
      %c0_97 = arith.constant 0 : index
      %235 = vector.load %arg15[%c0_96, %c0_97] : memref<32x64xbf16, #tpu.memory_space<vmem>>, vector<32x64xbf16>
      %cst_98 = arith.constant dense<0.000000e+00> : vector<12x64xf32>
      %236 = tpu.matmul %234, %235, %cst_98 {dimension_numbers = #tpu.dot_dimension_numbers<[1], [0], [0], [1], [0, 0, 1, 1], [], []>} : vector<12x32xbf16>, vector<32x64xbf16>, vector<12x64xf32> -> vector<12x64xf32>
      %c0_99 = arith.constant 0 : index
      %c0_100 = arith.constant 0 : index
      %237 = vector.load %arg16[%c0_99, %c0_100] : memref<1x64xf32, #tpu.memory_space<vmem>>, vector<1x64xf32>
      %238 = vector.broadcast %237 : vector<1x64xf32> to vector<12x64xf32>
      %239 = arith.addf %236, %238 : vector<12x64xf32>
      %240 = vector.extract_strided_slice %239 {offsets = [0, 0], sizes = [12, 32], strides = [1, 1]} : vector<12x64xf32> to vector<12x32xf32>
      %241 = arith.truncf %240 : vector<12x32xf32> to vector<12x32xbf16>
      %c0_101 = arith.constant 0 : index
      %c0_102 = arith.constant 0 : index
      %242 = vector.load %arg30[%c0_101, %c0_102] : memref<12x32xbf16, #tpu.memory_space<vmem>>, vector<12x32xbf16>
      tpu.vector_store %arg30[%c0_101, %c0_102], %241 {strides = array<i32>} : memref<12x32xbf16, #tpu.memory_space<vmem>>, vector<12x32xbf16>,
      %243 = vector.extract_strided_slice %239 {offsets = [0, 32], sizes = [12, 32], strides = [1, 1]} : vector<12x64xf32> to vector<12x32xf32>
      %244 = arith.truncf %243 : vector<12x32xf32> to vector<12x32xbf16>
      %c0_103 = arith.constant 0 : index
      %c0_104 = arith.constant 0 : index
      %245 = vector.load %arg31[%c0_103, %c0_104] : memref<12x32xbf16, #tpu.memory_space<vmem>>, vector<12x32xbf16>
      tpu.vector_store %arg31[%c0_103, %c0_104], %244 {strides = array<i32>} : memref<12x32xbf16, #tpu.memory_space<vmem>>, vector<12x32xbf16>,
    } else {
    }
    %c8_i32 = arith.constant 8 : i32
    %3 = arith.muli %arg1, %c8_i32 : i32
    %4 = tpu.assume_multiple %3, 8 : i32
    %c0 = arith.constant 0 : index
    %5 = arith.index_cast %4 : i32 to index
    %c0_1 = arith.constant 0 : index
    %6 = vector.load %arg2[%c0, %5, %c0_1] : memref<1x8x32xbf16, #tpu.memory_space<vmem>>, vector<1x8x32xbf16>
    %7 = vector.shape_cast %6 : vector<1x8x32xbf16> to vector<8x32xbf16>
    %8 = arith.extf %7 : vector<8x32xbf16> to vector<8x32xf32>
    %9 = arith.truncf %8 : vector<8x32xf32> to vector<8x32xbf16>
    %c0_2 = arith.constant 0 : index
    %c0_3 = arith.constant 0 : index
    %10 = vector.load %arg5[%c0_2, %c0_3] : memref<32x32xbf16, #tpu.memory_space<vmem>>, vector<32x32xbf16>
    %cst = arith.constant dense<0.000000e+00> : vector<8x32xf32>
    %11 = tpu.matmul %9, %10, %cst {dimension_numbers = #tpu.dot_dimension_numbers<[1], [0], [0], [1], [0, 0, 1, 1], [], []>} : vector<8x32xbf16>, vector<32x32xbf16>, vector<8x32xf32> -> vector<8x32xf32>
    %c0_4 = arith.constant 0 : index
    %c0_5 = arith.constant 0 : index
    %12 = vector.load %arg6[%c0_4, %c0_5] : memref<1x32xf32, #tpu.memory_space<vmem>>, vector<1x32xf32>
    %13 = vector.broadcast %12 : vector<1x32xf32> to vector<8x32xf32>
    %14 = arith.addf %11, %13 : vector<8x32xf32>
    %15 = arith.truncf %14 : vector<8x32xf32> to vector<8x32xbf16>
    %16 = vector.extract_strided_slice %15 {offsets = [0, 0], sizes = [8, 8], strides = [1, 1]} : vector<8x32xbf16> to vector<8x8xbf16>
    %17 = vector.shape_cast %16 : vector<8x8xbf16> to vector<1x8x8xbf16>
    %18 = vector.extract_strided_slice %15 {offsets = [0, 8], sizes = [8, 8], strides = [1, 1]} : vector<8x32xbf16> to vector<8x8xbf16>
    %19 = vector.shape_cast %18 : vector<8x8xbf16> to vector<1x8x8xbf16>
    %20 = vector.extract_strided_slice %15 {offsets = [0, 16], sizes = [8, 8], strides = [1, 1]} : vector<8x32xbf16> to vector<8x8xbf16>
    %21 = vector.shape_cast %20 : vector<8x8xbf16> to vector<1x8x8xbf16>
    %22 = vector.extract_strided_slice %15 {offsets = [0, 24], sizes = [8, 8], strides = [1, 1]} : vector<8x32xbf16> to vector<8x8xbf16>
    %23 = vector.shape_cast %22 : vector<8x8xbf16> to vector<1x8x8xbf16>
    %24 = tpu.concatenate %17, %19, %21, %23 in 0 : vector<1x8x8xbf16>, vector<1x8x8xbf16>, vector<1x8x8xbf16>, vector<1x8x8xbf16> -> vector<4x8x8xbf16>
    %c8_i32_6 = arith.constant 8 : i32
    %25 = arith.muli %arg1, %c8_i32_6 : i32
    %26 = tpu.iota {dimensions = array<i32: 1>} : vector<1x8x8xi32>
    %27 = vector.broadcast %25 : i32 to vector<1x8x8xi32>
    %28 = arith.addi %27, %26 : vector<1x8x8xi32>
    %cst_7 = arith.constant 0xFF800000 : f32
    %29 = vector.broadcast %cst_7 : f32 to vector<4x8x1xf32>
    %cst_8 = arith.constant 0.000000e+00 : f32
    %30 = vector.broadcast %cst_8 : f32 to vector<4x8x1xf32>
    %cst_9 = arith.constant 0.000000e+00 : f32
    %31 = vector.broadcast %cst_9 : f32 to vector<4x8x8xf32>
    %c1_i32 = arith.constant 1 : i32
    %32 = arith.addi %arg1, %c1_i32 : i32
    %c0_i32_10 = arith.constant 0 : i32
    %33 = arith.subi %32, %c0_i32_10 : i32
    %34 = arith.addi %c0_i32_10, %33 : i32
    %c1_i32_11 = arith.constant 1 : i32
    %35:3 = scf.for %arg32 = %c0_i32_10 to %34 step %c1_i32_11 iter_args(%arg33 = %29, %arg34 = %30, %arg35 = %31) -> (vector<4x8x1xf32>, vector<4x8x1xf32>, vector<4x8x8xf32>)  : i32 {
      %c8_i32_81 = arith.constant 8 : i32
      %220 = arith.muli %arg32, %c8_i32_81 : i32
      %221 = tpu.assume_multiple %220, 8 : i32
      %222 = arith.index_cast %221 : i32 to index
      %c0_82 = arith.constant 0 : index
      %223 = vector.load %arg28[%222, %c0_82] : memref<8x32xbf16, #tpu.memory_space<vmem>>, vector<8x32xbf16>
      %224 = vector.extract_strided_slice %223 {offsets = [0, 0], sizes = [8, 8], strides = [1, 1]} : vector<8x32xbf16> to vector<8x8xbf16>
      %225 = vector.shape_cast %224 : vector<8x8xbf16> to vector<1x8x8xbf16>
      %226 = vector.extract_strided_slice %223 {offsets = [0, 8], sizes = [8, 8], strides = [1, 1]} : vector<8x32xbf16> to vector<8x8xbf16>
      %227 = vector.shape_cast %226 : vector<8x8xbf16> to vector<1x8x8xbf16>
      %228 = vector.extract_strided_slice %223 {offsets = [0, 16], sizes = [8, 8], strides = [1, 1]} : vector<8x32xbf16> to vector<8x8xbf16>
      %229 = vector.shape_cast %228 : vector<8x8xbf16> to vector<1x8x8xbf16>
      %230 = vector.extract_strided_slice %223 {offsets = [0, 24], sizes = [8, 8], strides = [1, 1]} : vector<8x32xbf16> to vector<8x8xbf16>
      %231 = vector.shape_cast %230 : vector<8x8xbf16> to vector<1x8x8xbf16>
      %232 = tpu.concatenate %225, %227, %229, %231 in 0 : vector<1x8x8xbf16>, vector<1x8x8xbf16>, vector<1x8x8xbf16>, vector<1x8x8xbf16> -> vector<4x8x8xbf16>
      %233 = arith.index_cast %221 : i32 to index
      %c0_83 = arith.constant 0 : index
      %234 = vector.load %arg29[%233, %c0_83] : memref<8x32xbf16, #tpu.memory_space<vmem>>, vector<8x32xbf16>
      %235 = vector.extract_strided_slice %234 {offsets = [0, 0], sizes = [8, 8], strides = [1, 1]} : vector<8x32xbf16> to vector<8x8xbf16>
      %236 = vector.shape_cast %235 : vector<8x8xbf16> to vector<1x8x8xbf16>
      %237 = vector.extract_strided_slice %234 {offsets = [0, 8], sizes = [8, 8], strides = [1, 1]} : vector<8x32xbf16> to vector<8x8xbf16>
      %238 = vector.shape_cast %237 : vector<8x8xbf16> to vector<1x8x8xbf16>
      %239 = vector.extract_strided_slice %234 {offsets = [0, 16], sizes = [8, 8], strides = [1, 1]} : vector<8x32xbf16> to vector<8x8xbf16>
      %240 = vector.shape_cast %239 : vector<8x8xbf16> to vector<1x8x8xbf16>
      %241 = vector.extract_strided_slice %234 {offsets = [0, 24], sizes = [8, 8], strides = [1, 1]} : vector<8x32xbf16> to vector<8x8xbf16>
      %242 = vector.shape_cast %241 : vector<8x8xbf16> to vector<1x8x8xbf16>
      %243 = tpu.concatenate %236, %238, %240, %242 in 0 : vector<1x8x8xbf16>, vector<1x8x8xbf16>, vector<1x8x8xbf16>, vector<1x8x8xbf16> -> vector<4x8x8xbf16>
      %cst_84 = arith.constant dense<0.000000e+00> : vector<4x8x8xf32>
      %244 = tpu.matmul %24, %232, %cst_84 {dimension_numbers = #tpu.dot_dimension_numbers<[2], [2], [1], [1], [0, 0, 0, 1, 1, 1], [0], [0]>} : vector<4x8x8xbf16>, vector<4x8x8xbf16>, vector<4x8x8xf32> -> vector<4x8x8xf32>
      %c8_i32_85 = arith.constant 8 : i32
      %245 = arith.muli %arg32, %c8_i32_85 : i32
      %246 = tpu.iota {dimensions = array<i32: 2>} : vector<1x8x8xi32>
      %247 = vector.broadcast %245 : i32 to vector<1x8x8xi32>
      %248 = arith.addi %247, %246 : vector<1x8x8xi32>
      %249 = arith.cmpi sle, %248, %28 : vector<1x8x8xi32>
      %cst_86 = arith.constant -1.000000e+20 : f32
      %250 = vector.shape_cast %249 : vector<1x8x8xi1> to vector<1x8x8xi1>
      %251 = vector.broadcast %250 : vector<1x8x8xi1> to vector<4x8x8xi1>
      %252 = vector.broadcast %cst_86 : f32 to vector<4x8x8xf32>
      %253 = arith.select %251, %244, %252 : vector<4x8x8xi1>, vector<4x8x8xf32>
      %cst_87 = arith.constant dense<0xFF800000> : vector<4x8xf32>
      %254 = vector.multi_reduction <maximumf>, %253, %cst_87 [2] : vector<4x8x8xf32> to vector<4x8xf32>
      %255 = vector.shape_cast %254 : vector<4x8xf32> to vector<4x8x1xf32>
      %256 = arith.maximumf %arg33, %255 : vector<4x8x1xf32>
      %257 = arith.subf %arg33, %256 : vector<4x8x1xf32>
      %258 = math.exp %257 : vector<4x8x1xf32>
      %259 = vector.broadcast %256 : vector<4x8x1xf32> to vector<4x8x8xf32>
      %260 = arith.subf %253, %259 : vector<4x8x8xf32>
      %261 = math.exp %260 : vector<4x8x8xf32>
      %262 = arith.mulf %258, %arg34 : vector<4x8x1xf32>
      %cst_88 = arith.constant dense<0.000000e+00> : vector<4x8xf32>
      %263 = vector.multi_reduction <add>, %261, %cst_88 [2] : vector<4x8x8xf32> to vector<4x8xf32>
      %264 = vector.shape_cast %263 : vector<4x8xf32> to vector<4x8x1xf32>
      %265 = arith.addf %262, %264 : vector<4x8x1xf32>
      %266 = vector.broadcast %258 : vector<4x8x1xf32> to vector<4x8x8xf32>
      %267 = arith.mulf %266, %arg35 : vector<4x8x8xf32>
      %268 = arith.truncf %261 : vector<4x8x8xf32> to vector<4x8x8xbf16>
      %cst_89 = arith.constant dense<0.000000e+00> : vector<4x8x8xf32>
      %269 = tpu.matmul %268, %243, %cst_89 {dimension_numbers = #tpu.dot_dimension_numbers<[2], [1], [1], [2], [0, 0, 0, 1, 1, 2], [0], [0]>} : vector<4x8x8xbf16>, vector<4x8x8xbf16>, vector<4x8x8xf32> -> vector<4x8x8xf32>
      %270 = arith.addf %267, %269 : vector<4x8x8xf32>
      scf.yield %256, %265, %270 : vector<4x8x1xf32>, vector<4x8x1xf32>, vector<4x8x8xf32>
    }
    %36 = tpu.reciprocal %35#1 {approx = true} : vector<4x8x1xf32> -> vector<4x8x1xf32>
    %37 = vector.broadcast %36 : vector<4x8x1xf32> to vector<4x8x8xf32>
    %38 = arith.mulf %35#2, %37 : vector<4x8x8xf32>
    %39 = vector.extract_strided_slice %38 {offsets = [0, 0, 0], sizes = [1, 8, 8], strides = [1, 1, 1]} : vector<4x8x8xf32> to vector<1x8x8xf32>
    %40 = vector.shape_cast %39 : vector<1x8x8xf32> to vector<8x8xf32>
    %41 = vector.extract_strided_slice %38 {offsets = [1, 0, 0], sizes = [1, 8, 8], strides = [1, 1, 1]} : vector<4x8x8xf32> to vector<1x8x8xf32>
    %42 = vector.shape_cast %41 : vector<1x8x8xf32> to vector<8x8xf32>
    %43 = vector.extract_strided_slice %38 {offsets = [2, 0, 0], sizes = [1, 8, 8], strides = [1, 1, 1]} : vector<4x8x8xf32> to vector<1x8x8xf32>
    %44 = vector.shape_cast %43 : vector<1x8x8xf32> to vector<8x8xf32>
    %45 = vector.extract_strided_slice %38 {offsets = [3, 0, 0], sizes = [1, 8, 8], strides = [1, 1, 1]} : vector<4x8x8xf32> to vector<1x8x8xf32>
    %46 = vector.shape_cast %45 : vector<1x8x8xf32> to vector<8x8xf32>
    %47 = tpu.concatenate %40, %42, %44, %46 in 1 : vector<8x8xf32>, vector<8x8xf32>, vector<8x8xf32>, vector<8x8xf32> -> vector<8x32xf32>
    %48 = arith.truncf %47 : vector<8x32xf32> to vector<8x32xbf16>
    %c0_12 = arith.constant 0 : index
    %c0_13 = arith.constant 0 : index
    %49 = vector.load %arg9[%c0_12, %c0_13] : memref<32x32xbf16, #tpu.memory_space<vmem>>, vector<32x32xbf16>
    %cst_14 = arith.constant dense<0.000000e+00> : vector<8x32xf32>
    %50 = tpu.matmul %48, %49, %cst_14 {dimension_numbers = #tpu.dot_dimension_numbers<[1], [0], [0], [1], [0, 0, 1, 1], [], []>} : vector<8x32xbf16>, vector<32x32xbf16>, vector<8x32xf32> -> vector<8x32xf32>
    %c0_15 = arith.constant 0 : index
    %c0_16 = arith.constant 0 : index
    %51 = vector.load %arg10[%c0_15, %c0_16] : memref<1x32xf32, #tpu.memory_space<vmem>>, vector<1x32xf32>
    %52 = vector.broadcast %51 : vector<1x32xf32> to vector<8x32xf32>
    %53 = arith.addf %50, %52 : vector<8x32xf32>
    %54 = arith.addf %53, %8 : vector<8x32xf32>
    %c0_17 = arith.constant 0 : index
    %c0_18 = arith.constant 0 : index
    %55 = vector.load %arg11[%c0_17, %c0_18] : memref<1x32xf32, #tpu.memory_space<vmem>>, vector<1x32xf32>
    %c0_19 = arith.constant 0 : index
    %c0_20 = arith.constant 0 : index
    %56 = vector.load %arg12[%c0_19, %c0_20] : memref<1x32xf32, #tpu.memory_space<vmem>>, vector<1x32xf32>
    %cst_21 = arith.constant dense<0.000000e+00> : vector<8xf32>
    %57 = vector.multi_reduction <add>, %54, %cst_21 [1] : vector<8x32xf32> to vector<8xf32>
    %58 = vector.shape_cast %57 : vector<8xf32> to vector<8x1xf32>
    %cst_22 = arith.constant 3.200000e+01 : f32
    %59 = vector.broadcast %cst_22 : f32 to vector<8x1xf32>
    %60 = arith.divf %58, %59 : vector<8x1xf32>
    %61 = vector.broadcast %60 : vector<8x1xf32> to vector<8x32xf32>
    %62 = arith.subf %54, %61 : vector<8x32xf32>
    %63 = arith.mulf %62, %62 : vector<8x32xf32>
    %cst_23 = arith.constant dense<0.000000e+00> : vector<8xf32>
    %64 = vector.multi_reduction <add>, %63, %cst_23 [1] : vector<8x32xf32> to vector<8xf32>
    %65 = vector.shape_cast %64 : vector<8xf32> to vector<8x1xf32>
    %cst_24 = arith.constant 3.200000e+01 : f32
    %66 = vector.broadcast %cst_24 : f32 to vector<8x1xf32>
    %67 = arith.divf %65, %66 : vector<8x1xf32>
    %68 = vector.broadcast %60 : vector<8x1xf32> to vector<8x32xf32>
    %69 = arith.subf %54, %68 : vector<8x32xf32>
    %cst_25 = arith.constant 9.99999974E-6 : f32
    %70 = vector.broadcast %cst_25 : f32 to vector<8x1xf32>
    %71 = arith.addf %67, %70 : vector<8x1xf32>
    %72 = math.rsqrt %71 : vector<8x1xf32>
    %73 = vector.broadcast %72 : vector<8x1xf32> to vector<8x32xf32>
    %74 = arith.mulf %69, %73 : vector<8x32xf32>
    %75 = vector.broadcast %55 : vector<1x32xf32> to vector<8x32xf32>
    %76 = arith.mulf %74, %75 : vector<8x32xf32>
    %77 = vector.broadcast %56 : vector<1x32xf32> to vector<8x32xf32>
    %78 = arith.addf %76, %77 : vector<8x32xf32>
    %79 = arith.truncf %78 : vector<8x32xf32> to vector<8x32xbf16>
    %c0_26 = arith.constant 0 : index
    %c0_27 = arith.constant 0 : index
    %80 = vector.load %arg13[%c0_26, %c0_27] : memref<32x32xbf16, #tpu.memory_space<vmem>>, vector<32x32xbf16>
    %cst_28 = arith.constant dense<0.000000e+00> : vector<8x32xf32>
    %81 = tpu.matmul %79, %80, %cst_28 {dimension_numbers = #tpu.dot_dimension_numbers<[1], [0], [0], [1], [0, 0, 1, 1], [], []>} : vector<8x32xbf16>, vector<32x32xbf16>, vector<8x32xf32> -> vector<8x32xf32>
    %c0_29 = arith.constant 0 : index
    %c0_30 = arith.constant 0 : index
    %82 = vector.load %arg14[%c0_29, %c0_30] : memref<1x32xf32, #tpu.memory_space<vmem>>, vector<1x32xf32>
    %83 = vector.broadcast %82 : vector<1x32xf32> to vector<8x32xf32>
    %84 = arith.addf %81, %83 : vector<8x32xf32>
    %85 = arith.truncf %84 : vector<8x32xf32> to vector<8x32xbf16>
    %86 = vector.extract_strided_slice %85 {offsets = [0, 0], sizes = [8, 8], strides = [1, 1]} : vector<8x32xbf16> to vector<8x8xbf16>
    %87 = vector.shape_cast %86 : vector<8x8xbf16> to vector<1x8x8xbf16>
    %88 = vector.extract_strided_slice %85 {offsets = [0, 8], sizes = [8, 8], strides = [1, 1]} : vector<8x32xbf16> to vector<8x8xbf16>
    %89 = vector.shape_cast %88 : vector<8x8xbf16> to vector<1x8x8xbf16>
    %90 = vector.extract_strided_slice %85 {offsets = [0, 16], sizes = [8, 8], strides = [1, 1]} : vector<8x32xbf16> to vector<8x8xbf16>
    %91 = vector.shape_cast %90 : vector<8x8xbf16> to vector<1x8x8xbf16>
    %92 = vector.extract_strided_slice %85 {offsets = [0, 24], sizes = [8, 8], strides = [1, 1]} : vector<8x32xbf16> to vector<8x8xbf16>
    %93 = vector.shape_cast %92 : vector<8x8xbf16> to vector<1x8x8xbf16>
    %94 = tpu.concatenate %87, %89, %91, %93 in 0 : vector<1x8x8xbf16>, vector<1x8x8xbf16>, vector<1x8x8xbf16>, vector<1x8x8xbf16> -> vector<4x8x8xbf16>
    %c0_31 = arith.constant 0 : index
    %c0_32 = arith.constant 0 : index
    %95 = vector.load %arg30[%c0_31, %c0_32] : memref<12x32xbf16, #tpu.memory_space<vmem>>, vector<12x32xbf16>
    %96 = vector.extract_strided_slice %95 {offsets = [0, 0], sizes = [12, 8], strides = [1, 1]} : vector<12x32xbf16> to vector<12x8xbf16>
    %97 = vector.shape_cast %96 : vector<12x8xbf16> to vector<1x12x8xbf16>
    %98 = vector.extract_strided_slice %95 {offsets = [0, 8], sizes = [12, 8], strides = [1, 1]} : vector<12x32xbf16> to vector<12x8xbf16>
    %99 = vector.shape_cast %98 : vector<12x8xbf16> to vector<1x12x8xbf16>
    %100 = vector.extract_strided_slice %95 {offsets = [0, 16], sizes = [12, 8], strides = [1, 1]} : vector<12x32xbf16> to vector<12x8xbf16>
    %101 = vector.shape_cast %100 : vector<12x8xbf16> to vector<1x12x8xbf16>
    %102 = vector.extract_strided_slice %95 {offsets = [0, 24], sizes = [12, 8], strides = [1, 1]} : vector<12x32xbf16> to vector<12x8xbf16>
    %103 = vector.shape_cast %102 : vector<12x8xbf16> to vector<1x12x8xbf16>
    %104 = tpu.concatenate %97, %99, %101, %103 in 0 : vector<1x12x8xbf16>, vector<1x12x8xbf16>, vector<1x12x8xbf16>, vector<1x12x8xbf16> -> vector<4x12x8xbf16>
    %c0_33 = arith.constant 0 : index
    %c0_34 = arith.constant 0 : index
    %105 = vector.load %arg31[%c0_33, %c0_34] : memref<12x32xbf16, #tpu.memory_space<vmem>>, vector<12x32xbf16>
    %106 = vector.extract_strided_slice %105 {offsets = [0, 0], sizes = [12, 8], strides = [1, 1]} : vector<12x32xbf16> to vector<12x8xbf16>
    %107 = vector.shape_cast %106 : vector<12x8xbf16> to vector<1x12x8xbf16>
    %108 = vector.extract_strided_slice %105 {offsets = [0, 8], sizes = [12, 8], strides = [1, 1]} : vector<12x32xbf16> to vector<12x8xbf16>
    %109 = vector.shape_cast %108 : vector<12x8xbf16> to vector<1x12x8xbf16>
    %110 = vector.extract_strided_slice %105 {offsets = [0, 16], sizes = [12, 8], strides = [1, 1]} : vector<12x32xbf16> to vector<12x8xbf16>
    %111 = vector.shape_cast %110 : vector<12x8xbf16> to vector<1x12x8xbf16>
    %112 = vector.extract_strided_slice %105 {offsets = [0, 24], sizes = [12, 8], strides = [1, 1]} : vector<12x32xbf16> to vector<12x8xbf16>
    %113 = vector.shape_cast %112 : vector<12x8xbf16> to vector<1x12x8xbf16>
    %114 = tpu.concatenate %107, %109, %111, %113 in 0 : vector<1x12x8xbf16>, vector<1x12x8xbf16>, vector<1x12x8xbf16>, vector<1x12x8xbf16> -> vector<4x12x8xbf16>
    %cst_35 = arith.constant dense<0.000000e+00> : vector<4x8x12xf32>
    %115 = tpu.matmul %94, %104, %cst_35 {dimension_numbers = #tpu.dot_dimension_numbers<[2], [2], [1], [1], [0, 0, 0, 1, 1, 1], [0], [0]>} : vector<4x8x8xbf16>, vector<4x12x8xbf16>, vector<4x8x12xf32> -> vector<4x8x12xf32>
    %c0_36 = arith.constant 0 : index
    %c0_37 = arith.constant 0 : index
    %c0_38 = arith.constant 0 : index
    %116 = vector.load %arg4[%c0_36, %c0_37, %c0_38] : memref<1x1x12xf32, #tpu.memory_space<vmem>>, vector<1x1x12xf32>
    %117 = vector.shape_cast %116 : vector<1x1x12xf32> to vector<1x12xf32>
    %cst_39 = arith.constant 0.000000e+00 : f32
    %118 = vector.broadcast %cst_39 : f32 to vector<1x12xf32>
    %119 = arith.cmpf ogt, %117, %118 : vector<1x12xf32>
    %120 = vector.shape_cast %119 : vector<1x12xi1> to vector<1x1x12xi1>
    %cst_40 = arith.constant -1.000000e+20 : f32
    %121 = vector.shape_cast %120 : vector<1x1x12xi1> to vector<1x1x12xi1>
    %122 = vector.broadcast %121 : vector<1x1x12xi1> to vector<4x8x12xi1>
    %123 = vector.broadcast %cst_40 : f32 to vector<4x8x12xf32>
    %124 = arith.select %122, %115, %123 : vector<4x8x12xi1>, vector<4x8x12xf32>
    %cst_41 = arith.constant dense<0xFF800000> : vector<4x8xf32>
    %125 = vector.multi_reduction <maximumf>, %124, %cst_41 [2] : vector<4x8x12xf32> to vector<4x8xf32>
    %126 = vector.shape_cast %125 : vector<4x8xf32> to vector<4x8x1xf32>
    %127 = vector.broadcast %126 : vector<4x8x1xf32> to vector<4x8x12xf32>
    %128 = arith.subf %124, %127 : vector<4x8x12xf32>
    %129 = math.exp %128 : vector<4x8x12xf32>
    %cst_42 = arith.constant dense<0.000000e+00> : vector<4x8xf32>
    %130 = vector.multi_reduction <add>, %129, %cst_42 [2] : vector<4x8x12xf32> to vector<4x8xf32>
    %131 = vector.shape_cast %130 : vector<4x8xf32> to vector<4x8x1xf32>
    %132 = tpu.reciprocal %131 {approx = true} : vector<4x8x1xf32> -> vector<4x8x1xf32>
    %133 = vector.broadcast %132 : vector<4x8x1xf32> to vector<4x8x12xf32>
    %134 = arith.mulf %129, %133 : vector<4x8x12xf32>
    %135 = arith.truncf %134 : vector<4x8x12xf32> to vector<4x8x12xbf16>
    %cst_43 = arith.constant dense<0.000000e+00> : vector<4x8x8xf32>
    %136 = tpu.matmul %135, %114, %cst_43 {dimension_numbers = #tpu.dot_dimension_numbers<[2], [1], [1], [2], [0, 0, 0, 1, 1, 2], [0], [0]>} : vector<4x8x12xbf16>, vector<4x12x8xbf16>, vector<4x8x8xf32> -> vector<4x8x8xf32>
    %137 = vector.extract_strided_slice %136 {offsets = [0, 0, 0], sizes = [1, 8, 8], strides = [1, 1, 1]} : vector<4x8x8xf32> to vector<1x8x8xf32>
    %138 = vector.shape_cast %137 : vector<1x8x8xf32> to vector<8x8xf32>
    %139 = vector.extract_strided_slice %136 {offsets = [1, 0, 0], sizes = [1, 8, 8], strides = [1, 1, 1]} : vector<4x8x8xf32> to vector<1x8x8xf32>
    %140 = vector.shape_cast %139 : vector<1x8x8xf32> to vector<8x8xf32>
    %141 = vector.extract_strided_slice %136 {offsets = [2, 0, 0], sizes = [1, 8, 8], strides = [1, 1, 1]} : vector<4x8x8xf32> to vector<1x8x8xf32>
    %142 = vector.shape_cast %141 : vector<1x8x8xf32> to vector<8x8xf32>
    %143 = vector.extract_strided_slice %136 {offsets = [3, 0, 0], sizes = [1, 8, 8], strides = [1, 1, 1]} : vector<4x8x8xf32> to vector<1x8x8xf32>
    %144 = vector.shape_cast %143 : vector<1x8x8xf32> to vector<8x8xf32>
    %145 = tpu.concatenate %138, %140, %142, %144 in 1 : vector<8x8xf32>, vector<8x8xf32>, vector<8x8xf32>, vector<8x8xf32> -> vector<8x32xf32>
    %146 = arith.truncf %145 : vector<8x32xf32> to vector<8x32xbf16>
    %c0_44 = arith.constant 0 : index
    %c0_45 = arith.constant 0 : index
    %147 = vector.load %arg17[%c0_44, %c0_45] : memref<32x32xbf16, #tpu.memory_space<vmem>>, vector<32x32xbf16>
    %cst_46 = arith.constant dense<0.000000e+00> : vector<8x32xf32>
    %148 = tpu.matmul %146, %147, %cst_46 {dimension_numbers = #tpu.dot_dimension_numbers<[1], [0], [0], [1], [0, 0, 1, 1], [], []>} : vector<8x32xbf16>, vector<32x32xbf16>, vector<8x32xf32> -> vector<8x32xf32>
    %c0_47 = arith.constant 0 : index
    %c0_48 = arith.constant 0 : index
    %149 = vector.load %arg18[%c0_47, %c0_48] : memref<1x32xf32, #tpu.memory_space<vmem>>, vector<1x32xf32>
    %150 = vector.broadcast %149 : vector<1x32xf32> to vector<8x32xf32>
    %151 = arith.addf %148, %150 : vector<8x32xf32>
    %152 = arith.addf %151, %78 : vector<8x32xf32>
    %c0_49 = arith.constant 0 : index
    %c0_50 = arith.constant 0 : index
    %153 = vector.load %arg19[%c0_49, %c0_50] : memref<1x32xf32, #tpu.memory_space<vmem>>, vector<1x32xf32>
    %c0_51 = arith.constant 0 : index
    %c0_52 = arith.constant 0 : index
    %154 = vector.load %arg20[%c0_51, %c0_52] : memref<1x32xf32, #tpu.memory_space<vmem>>, vector<1x32xf32>
    %cst_53 = arith.constant dense<0.000000e+00> : vector<8xf32>
    %155 = vector.multi_reduction <add>, %152, %cst_53 [1] : vector<8x32xf32> to vector<8xf32>
    %156 = vector.shape_cast %155 : vector<8xf32> to vector<8x1xf32>
    %cst_54 = arith.constant 3.200000e+01 : f32
    %157 = vector.broadcast %cst_54 : f32 to vector<8x1xf32>
    %158 = arith.divf %156, %157 : vector<8x1xf32>
    %159 = vector.broadcast %158 : vector<8x1xf32> to vector<8x32xf32>
    %160 = arith.subf %152, %159 : vector<8x32xf32>
    %161 = arith.mulf %160, %160 : vector<8x32xf32>
    %cst_55 = arith.constant dense<0.000000e+00> : vector<8xf32>
    %162 = vector.multi_reduction <add>, %161, %cst_55 [1] : vector<8x32xf32> to vector<8xf32>
    %163 = vector.shape_cast %162 : vector<8xf32> to vector<8x1xf32>
    %cst_56 = arith.constant 3.200000e+01 : f32
    %164 = vector.broadcast %cst_56 : f32 to vector<8x1xf32>
    %165 = arith.divf %163, %164 : vector<8x1xf32>
    %166 = vector.broadcast %158 : vector<8x1xf32> to vector<8x32xf32>
    %167 = arith.subf %152, %166 : vector<8x32xf32>
    %cst_57 = arith.constant 9.99999974E-6 : f32
    %168 = vector.broadcast %cst_57 : f32 to vector<8x1xf32>
    %169 = arith.addf %165, %168 : vector<8x1xf32>
    %170 = math.rsqrt %169 : vector<8x1xf32>
    %171 = vector.broadcast %170 : vector<8x1xf32> to vector<8x32xf32>
    %172 = arith.mulf %167, %171 : vector<8x32xf32>
    %173 = vector.broadcast %153 : vector<1x32xf32> to vector<8x32xf32>
    %174 = arith.mulf %172, %173 : vector<8x32xf32>
    %175 = vector.broadcast %154 : vector<1x32xf32> to vector<8x32xf32>
    %176 = arith.addf %174, %175 : vector<8x32xf32>
    %177 = arith.truncf %176 : vector<8x32xf32> to vector<8x32xbf16>
    %c0_58 = arith.constant 0 : index
    %c0_59 = arith.constant 0 : index
    %178 = vector.load %arg21[%c0_58, %c0_59] : memref<32x64xbf16, #tpu.memory_space<vmem>>, vector<32x64xbf16>
    %cst_60 = arith.constant dense<0.000000e+00> : vector<8x64xf32>
    %179 = tpu.matmul %177, %178, %cst_60 {dimension_numbers = #tpu.dot_dimension_numbers<[1], [0], [0], [1], [0, 0, 1, 1], [], []>} : vector<8x32xbf16>, vector<32x64xbf16>, vector<8x64xf32> -> vector<8x64xf32>
    %c0_61 = arith.constant 0 : index
    %c0_62 = arith.constant 0 : index
    %180 = vector.load %arg22[%c0_61, %c0_62] : memref<1x64xf32, #tpu.memory_space<vmem>>, vector<1x64xf32>
    %181 = vector.broadcast %180 : vector<1x64xf32> to vector<8x64xf32>
    %182 = arith.addf %179, %181 : vector<8x64xf32>
    %cst_63 = arith.constant 0.000000e+00 : f32
    %183 = vector.broadcast %cst_63 : f32 to vector<8x64xf32>
    %184 = arith.maximumf %182, %183 : vector<8x64xf32>
    %185 = arith.truncf %184 : vector<8x64xf32> to vector<8x64xbf16>
    %c0_64 = arith.constant 0 : index
    %c0_65 = arith.constant 0 : index
    %186 = vector.load %arg23[%c0_64, %c0_65] : memref<64x32xbf16, #tpu.memory_space<vmem>>, vector<64x32xbf16>
    %cst_66 = arith.constant dense<0.000000e+00> : vector<8x32xf32>
    %187 = tpu.matmul %185, %186, %cst_66 {dimension_numbers = #tpu.dot_dimension_numbers<[1], [0], [0], [1], [0, 0, 1, 1], [], []>} : vector<8x64xbf16>, vector<64x32xbf16>, vector<8x32xf32> -> vector<8x32xf32>
    %c0_67 = arith.constant 0 : index
    %c0_68 = arith.constant 0 : index
    %188 = vector.load %arg24[%c0_67, %c0_68] : memref<1x32xf32, #tpu.memory_space<vmem>>, vector<1x32xf32>
    %189 = vector.broadcast %188 : vector<1x32xf32> to vector<8x32xf32>
    %190 = arith.addf %187, %189 : vector<8x32xf32>
    %191 = arith.addf %190, %176 : vector<8x32xf32>
    %c0_69 = arith.constant 0 : index
    %c0_70 = arith.constant 0 : index
    %192 = vector.load %arg25[%c0_69, %c0_70] : memref<1x32xf32, #tpu.memory_space<vmem>>, vector<1x32xf32>
    %c0_71 = arith.constant 0 : index
    %c0_72 = arith.constant 0 : index
    %193 = vector.load %arg26[%c0_71, %c0_72] : memref<1x32xf32, #tpu.memory_space<vmem>>, vector<1x32xf32>
    %cst_73 = arith.constant dense<0.000000e+00> : vector<8xf32>
    %194 = vector.multi_reduction <add>, %191, %cst_73 [1] : vector<8x32xf32> to vector<8xf32>
    %195 = vector.shape_cast %194 : vector<8xf32> to vector<8x1xf32>
    %cst_74 = arith.constant 3.200000e+01 : f32
    %196 = vector.broadcast %cst_74 : f32 to vector<8x1xf32>
    %197 = arith.divf %195, %196 : vector<8x1xf32>
    %198 = vector.broadcast %197 : vector<8x1xf32> to vector<8x32xf32>
    %199 = arith.subf %191, %198 : vector<8x32xf32>
    %200 = arith.mulf %199, %199 : vector<8x32xf32>
    %cst_75 = arith.constant dense<0.000000e+00> : vector<8xf32>
    %201 = vector.multi_reduction <add>, %200, %cst_75 [1] : vector<8x32xf32> to vector<8xf32>
    %202 = vector.shape_cast %201 : vector<8xf32> to vector<8x1xf32>
    %cst_76 = arith.constant 3.200000e+01 : f32
    %203 = vector.broadcast %cst_76 : f32 to vector<8x1xf32>
    %204 = arith.divf %202, %203 : vector<8x1xf32>
    %205 = vector.broadcast %197 : vector<8x1xf32> to vector<8x32xf32>
    %206 = arith.subf %191, %205 : vector<8x32xf32>
    %cst_77 = arith.constant 9.99999974E-6 : f32
    %207 = vector.broadcast %cst_77 : f32 to vector<8x1xf32>
    %208 = arith.addf %204, %207 : vector<8x1xf32>
    %209 = math.rsqrt %208 : vector<8x1xf32>
    %210 = vector.broadcast %209 : vector<8x1xf32> to vector<8x32xf32>
    %211 = arith.mulf %206, %210 : vector<8x32xf32>
    %212 = vector.broadcast %192 : vector<1x32xf32> to vector<8x32xf32>
    %213 = arith.mulf %211, %212 : vector<8x32xf32>
    %214 = vector.broadcast %193 : vector<1x32xf32> to vector<8x32xf32>
    %215 = arith.addf %213, %214 : vector<8x32xf32>
    %216 = arith.truncf %215 : vector<8x32xf32> to vector<8x32xbf16>
    %c0_78 = arith.constant 0 : index
    %c0_79 = arith.constant 0 : index
    %c0_80 = arith.constant 0 : index
    %217 = vector.load %arg27[%c0_78, %c0_79, %c0_80] : memref<1x8x32xbf16, #tpu.memory_space<vmem>>, vector<1x8x32xbf16>
    %218 = vector.shape_cast %217 : vector<1x8x32xbf16> to vector<8x32xbf16>
    %219 = vector.shape_cast %216 : vector<8x32xbf16> to vector<1x8x32xbf16>
    tpu.vector_store %arg27[%c0_78, %c0_79, %c0_80], %219 {strides = array<i32>} : memref<1x8x32xbf16, #tpu.memory_space<vmem>>, vector<1x8x32xbf16>,
    return
  }
  func.func @transform_0(%arg0: i32, %arg1: i32) -> (i32, i32, i32) {
    %c0_i32 = arith.constant 0 : i32
    %c0_i32_0 = arith.constant 0 : i32
    %c0_i32_1 = arith.constant 0 : i32
    return %arg0, %c0_i32, %c0_i32_0 : i32, i32, i32
  }
  func.func @transform_1(%arg0: i32, %arg1: i32) -> (i32, i32, i32) {
    %c0_i32 = arith.constant 0 : i32
    %c0_i32_0 = arith.constant 0 : i32
    %c0_i32_1 = arith.constant 0 : i32
    return %arg0, %c0_i32, %c0_i32_0 : i32, i32, i32
  }
  func.func @transform_2(%arg0: i32, %arg1: i32) -> (i32, i32, i32) {
    %c0_i32 = arith.constant 0 : i32
    %c0_i32_0 = arith.constant 0 : i32
    %c0_i32_1 = arith.constant 0 : i32
    return %arg0, %c0_i32, %c0_i32_0 : i32, i32, i32
  }
  func.func @transform_3(%arg0: i32, %arg1: i32) -> (i32, i32) {
    %c0_i32 = arith.constant 0 : i32
    %c0_i32_0 = arith.constant 0 : i32
    %c0_i32_1 = arith.constant 0 : i32
    return %c0_i32, %c0_i32_0 : i32, i32
  }
  func.func @transform_4(%arg0: i32, %arg1: i32) -> (i32, i32) {
    %c0_i32 = arith.constant 0 : i32
    %c0_i32_0 = arith.constant 0 : i32
    %c0_i32_1 = arith.constant 0 : i32
    return %c0_i32, %c0_i32_0 : i32, i32
  }
  func.func @transform_5(%arg0: i32, %arg1: i32) -> (i32, i32) {
    %c0_i32 = arith.constant 0 : i32
    %c0_i32_0 = arith.constant 0 : i32
    %c0_i32_1 = arith.constant 0 : i32
    return %c0_i32, %c0_i32_0 : i32, i32
  }
  func.func @transform_6(%arg0: i32, %arg1: i32) -> (i32, i32) {
    %c0_i32 = arith.constant 0 : i32
    %c0_i32_0 = arith.constant 0 : i32
    %c0_i32_1 = arith.constant 0 : i32
    return %c0_i32, %c0_i32_0 : i32, i32
  }
  func.func @transform_7(%arg0: i32, %arg1: i32) -> (i32, i32) {
    %c0_i32 = arith.constant 0 : i32
    %c0_i32_0 = arith.constant 0 : i32
    %c0_i32_1 = arith.constant 0 : i32
    return %c0_i32, %c0_i32_0 : i32, i32
  }
  func.func @transform_8(%arg0: i32, %arg1: i32) -> (i32, i32) {
    %c0_i32 = arith.constant 0 : i32
    %c0_i32_0 = arith.constant 0 : i32
    %c0_i32_1 = arith.constant 0 : i32
    return %c0_i32, %c0_i32_0 : i32, i32
  }
  func.func @transform_9(%arg0: i32, %arg1: i32) -> (i32, i32) {
    %c0_i32 = arith.constant 0 : i32
    %c0_i32_0 = arith.constant 0 : i32
    %c0_i32_1 = arith.constant 0 : i32
    return %c0_i32, %c0_i32_0 : i32, i32
  }
  func.func @transform_10(%arg0: i32, %arg1: i32) -> (i32, i32) {
    %c0_i32 = arith.constant 0 : i32
    %c0_i32_0 = arith.constant 0 : i32
    %c0_i32_1 = arith.constant 0 : i32
    return %c0_i32, %c0_i32_0 : i32, i32
  }
  func.func @transform_11(%arg0: i32, %arg1: i32) -> (i32, i32) {
    %c0_i32 = arith.constant 0 : i32
    %c0_i32_0 = arith.constant 0 : i32
    %c0_i32_1 = arith.constant 0 : i32
    return %c0_i32, %c0_i32_0 : i32, i32
  }
  func.func @transform_12(%arg0: i32, %arg1: i32) -> (i32, i32) {
    %c0_i32 = arith.constant 0 : i32
    %c0_i32_0 = arith.constant 0 : i32
    %c0_i32_1 = arith.constant 0 : i32
    return %c0_i32, %c0_i32_0 : i32, i32
  }
  func.func @transform_13(%arg0: i32, %arg1: i32) -> (i32, i32) {
    %c0_i32 = arith.constant 0 : i32
    %c0_i32_0 = arith.constant 0 : i32
    %c0_i32_1 = arith.constant 0 : i32
    return %c0_i32, %c0_i32_0 : i32, i32
  }
  func.func @transform_14(%arg0: i32, %arg1: i32) -> (i32, i32) {
    %c0_i32 = arith.constant 0 : i32
    %c0_i32_0 = arith.constant 0 : i32
    %c0_i32_1 = arith.constant 0 : i32
    return %c0_i32, %c0_i32_0 : i32, i32
  }
  func.func @transform_15(%arg0: i32, %arg1: i32) -> (i32, i32) {
    %c0_i32 = arith.constant 0 : i32
    %c0_i32_0 = arith.constant 0 : i32
    %c0_i32_1 = arith.constant 0 : i32
    return %c0_i32, %c0_i32_0 : i32, i32
  }
  func.func @transform_16(%arg0: i32, %arg1: i32) -> (i32, i32) {
    %c0_i32 = arith.constant 0 : i32
    %c0_i32_0 = arith.constant 0 : i32
    %c0_i32_1 = arith.constant 0 : i32
    return %c0_i32, %c0_i32_0 : i32, i32
  }
  func.func @transform_17(%arg0: i32, %arg1: i32) -> (i32, i32) {
    %c0_i32 = arith.constant 0 : i32
    %c0_i32_0 = arith.constant 0 : i32
    %c0_i32_1 = arith.constant 0 : i32
    return %c0_i32, %c0_i32_0 : i32, i32
  }
  func.func @transform_18(%arg0: i32, %arg1: i32) -> (i32, i32) {
    %c0_i32 = arith.constant 0 : i32
    %c0_i32_0 = arith.constant 0 : i32
    %c0_i32_1 = arith.constant 0 : i32
    return %c0_i32, %c0_i32_0 : i32, i32
  }
  func.func @transform_19(%arg0: i32, %arg1: i32) -> (i32, i32) {
    %c0_i32 = arith.constant 0 : i32
    %c0_i32_0 = arith.constant 0 : i32
    %c0_i32_1 = arith.constant 0 : i32
    return %c0_i32, %c0_i32_0 : i32, i32
  }
  func.func @transform_20(%arg0: i32, %arg1: i32) -> (i32, i32) {
    %c0_i32 = arith.constant 0 : i32
    %c0_i32_0 = arith.constant 0 : i32
    %c0_i32_1 = arith.constant 0 : i32
    return %c0_i32, %c0_i32_0 : i32, i32
  }
  func.func @transform_21(%arg0: i32, %arg1: i32) -> (i32, i32) {
    %c0_i32 = arith.constant 0 : i32
    %c0_i32_0 = arith.constant 0 : i32
    %c0_i32_1 = arith.constant 0 : i32
    return %c0_i32, %c0_i32_0 : i32, i32
  }
  func.func @transform_22(%arg0: i32, %arg1: i32) -> (i32, i32) {
    %c0_i32 = arith.constant 0 : i32
    %c0_i32_0 = arith.constant 0 : i32
    %c0_i32_1 = arith.constant 0 : i32
    return %c0_i32, %c0_i32_0 : i32, i32
  }
  func.func @transform_23(%arg0: i32, %arg1: i32) -> (i32, i32) {
    %c0_i32 = arith.constant 0 : i32
    %c0_i32_0 = arith.constant 0 : i32
    %c0_i32_1 = arith.constant 0 : i32
    return %c0_i32, %c0_i32_0 : i32, i32
  }
  func.func @transform_24(%arg0: i32, %arg1: i32) -> (i32, i32) {
    %c0_i32 = arith.constant 0 : i32
    %c0_i32_0 = arith.constant 0 : i32
    %c0_i32_1 = arith.constant 0 : i32
    return %c0_i32, %c0_i32_0 : i32, i32
  }
  func.func @transform_25(%arg0: i32, %arg1: i32) -> (i32, i32, i32) {
    %c0_i32 = arith.constant 0 : i32
    %c0_i32_0 = arith.constant 0 : i32
    return %arg0, %arg1, %c0_i32 : i32, i32, i32
  }
}

module attributes {stable_mosaic.version = 11 : i64} {
  func.func @decoder_layer_kernel(%arg0: i32, %arg1: i32, %arg2: memref<1x8x32xbf16, #tpu.memory_space<vmem>>, %arg3: memref<1x12x32xbf16, #tpu.memory_space<vmem>>, %arg4: memref<1x1x12xf32, #tpu.memory_space<vmem>>, %arg5: memref<32x32xbf16, #tpu.memory_space<vmem>>, %arg6: memref<1x32xf32, #tpu.memory_space<vmem>>, %arg7: memref<32x64xbf16, #tpu.memory_space<vmem>>, %arg8: memref<1x64xf32, #tpu.memory_space<vmem>>, %arg9: memref<32x32xbf16, #tpu.memory_space<vmem>>, %arg10: memref<1x32xf32, #tpu.memory_space<vmem>>, %arg11: memref<1x32xf32, #tpu.memory_space<vmem>>, %arg12: memref<1x32xf32, #tpu.memory_space<vmem>>, %arg13: memref<32x32xbf16, #tpu.memory_space<vmem>>, %arg14: memref<1x32xf32, #tpu.memory_space<vmem>>, %arg15: memref<32x64xbf16, #tpu.memory_space<vmem>>, %arg16: memref<1x64xf32, #tpu.memory_space<vmem>>, %arg17: memref<32x32xbf16, #tpu.memory_space<vmem>>, %arg18: memref<1x32xf32, #tpu.memory_space<vmem>>, %arg19: memref<1x32xf32, #tpu.memory_space<vmem>>, %arg20: memref<1x32xf32, #tpu.memory_space<vmem>>, %arg21: memref<32x64xbf16, #tpu.memory_space<vmem>>, %arg22: memref<1x64xf32, #tpu.memory_space<vmem>>, %arg23: memref<64x32xbf16, #tpu.memory_space<vmem>>, %arg24: memref<1x32xf32, #tpu.memory_space<vmem>>, %arg25: memref<1x32xf32, #tpu.memory_space<vmem>>, %arg26: memref<1x32xf32, #tpu.memory_space<vmem>>, %arg27: memref<1x8x32xbf16, #tpu.memory_space<vmem>>, %arg28: memref<8x32xbf16, #tpu.memory_space<vmem>>, %arg29: memref<8x32xbf16, #tpu.memory_space<vmem>>, %arg30: memref<12x32xbf16, #tpu.memory_space<vmem>>, %arg31: memref<12x32xbf16, #tpu.memory_space<vmem>>) attributes {dimension_semantics = [#tpu.dimension_semantics<parallel>, #tpu.dimension_semantics<arbitrary>], iteration_bounds = array<i64: 2, 1>, scalar_prefetch = 0 : i64, scratch_operands = 4 : i64, tpu.core_type = #tpu.core_type<tc>, window_params = [{transform_indices = @transform_0, window_bounds = array<i64: 1, 8, 32>}, {transform_indices = @transform_1, window_bounds = array<i64: 1, 12, 32>}, {transform_indices = @transform_2, window_bounds = array<i64: 1, 1, 12>}, {pipeline_mode = #tpu.pipeline_mode<synchronous>, transform_indices = @transform_3, window_bounds = array<i64: 32, 32>}, {pipeline_mode = #tpu.pipeline_mode<synchronous>, transform_indices = @transform_4, window_bounds = array<i64: 1, 32>}, {pipeline_mode = #tpu.pipeline_mode<synchronous>, transform_indices = @transform_5, window_bounds = array<i64: 32, 64>}, {pipeline_mode = #tpu.pipeline_mode<synchronous>, transform_indices = @transform_6, window_bounds = array<i64: 1, 64>}, {pipeline_mode = #tpu.pipeline_mode<synchronous>, transform_indices = @transform_7, window_bounds = array<i64: 32, 32>}, {pipeline_mode = #tpu.pipeline_mode<synchronous>, transform_indices = @transform_8, window_bounds = array<i64: 1, 32>}, {pipeline_mode = #tpu.pipeline_mode<synchronous>, transform_indices = @transform_9, window_bounds = array<i64: 1, 32>}, {pipeline_mode = #tpu.pipeline_mode<synchronous>, transform_indices = @transform_10, window_bounds = array<i64: 1, 32>}, {pipeline_mode = #tpu.pipeline_mode<synchronous>, transform_indices = @transform_11, window_bounds = array<i64: 32, 32>}, {pipeline_mode = #tpu.pipeline_mode<synchronous>, transform_indices = @transform_12, window_bounds = array<i64: 1, 32>}, {pipeline_mode = #tpu.pipeline_mode<synchronous>, transform_indices = @transform_13, window_bounds = array<i64: 32, 64>}, {pipeline_mode = #tpu.pipeline_mode<synchronous>, transform_indices = @transform_14, window_bounds = array<i64: 1, 64>}, {pipeline_mode = #tpu.pipeline_mode<synchronous>, transform_indices = @transform_15, window_bounds = array<i64: 32, 32>}, {pipeline_mode = #tpu.pipeline_mode<synchronous>, transform_indices = @transform_16, window_bounds = array<i64: 1, 32>}, {pipeline_mode = #tpu.pipeline_mode<synchronous>, transform_indices = @transform_17, window_bounds = array<i64: 1, 32>}, {pipeline_mode = #tpu.pipeline_mode<synchronous>, transform_indices = @transform_18, window_bounds = array<i64: 1, 32>}, {pipeline_mode = #tpu.pipeline_mode<synchronous>, transform_indices = @transform_19, window_bounds = array<i64: 32, 64>}, {pipeline_mode = #tpu.pipeline_mode<synchronous>, transform_indices = @transform_20, window_bounds = array<i64: 1, 64>}, {pipeline_mode = #tpu.pipeline_mode<synchronous>, transform_indices = @transform_21, window_bounds = array<i64: 64, 32>}, {pipeline_mode = #tpu.pipeline_mode<synchronous>, transform_indices = @transform_22, window_bounds = array<i64: 1, 32>}, {pipeline_mode = #tpu.pipeline_mode<synchronous>, transform_indices = @transform_23, window_bounds = array<i64: 1, 32>}, {pipeline_mode = #tpu.pipeline_mode<synchronous>, transform_indices = @transform_24, window_bounds = array<i64: 1, 32>}, {transform_indices = @transform_25, window_bounds = array<i64: 1, 8, 32>}]} {
    %c0_i32 = arith.constant 0 : i32
    %0 = arith.cmpi eq, %arg1, %c0_i32 : i32
    %1 = arith.extui %0 : i1 to i32
    %c0_i32_0 = arith.constant 0 : i32
    %2 = arith.cmpi ne, %1, %c0_i32_0 : i32
    scf.if %2 {
      %c0_81 = arith.constant 0 : index
      %c0_82 = arith.constant 0 : index
      %c0_83 = arith.constant 0 : index
      %220 = vector.load %arg2[%c0_81, %c0_82, %c0_83] : memref<1x8x32xbf16, #tpu.memory_space<vmem>>, vector<1x8x32xbf16>
      %221 = vector.shape_cast %220 : vector<1x8x32xbf16> to vector<8x32xbf16>
      %c0_84 = arith.constant 0 : index
      %c0_85 = arith.constant 0 : index
      %222 = vector.load %arg7[%c0_84, %c0_85] : memref<32x64xbf16, #tpu.memory_space<vmem>>, vector<32x64xbf16>
      %cst_86 = arith.constant dense<0.000000e+00> : vector<8x64xf32>
      %223 = tpu.matmul %221, %222, %cst_86 {dimension_numbers = #tpu.dot_dimension_numbers<[1], [0], [0], [1], [0, 0, 1, 1], [], []>} : vector<8x32xbf16>, vector<32x64xbf16>, vector<8x64xf32> -> vector<8x64xf32>
      %c0_87 = arith.constant 0 : index
      %c0_88 = arith.constant 0 : index
      %224 = vector.load %arg8[%c0_87, %c0_88] : memref<1x64xf32, #tpu.memory_space<vmem>>, vector<1x64xf32>
      %225 = vector.broadcast %224 : vector<1x64xf32> to vector<8x64xf32>
      %226 = arith.addf %223, %225 : vector<8x64xf32>
      %227 = vector.extract_strided_slice %226 {offsets = [0, 0], sizes = [8, 32], strides = [1, 1]} : vector<8x64xf32> to vector<8x32xf32>
      %228 = arith.truncf %227 : vector<8x32xf32> to vector<8x32xbf16>
      %c0_89 = arith.constant 0 : index
      %c0_90 = arith.constant 0 : index
      %229 = vector.load %arg28[%c0_89, %c0_90] : memref<8x32xbf16, #tpu.memory_space<vmem>>, vector<8x32xbf16>
      tpu.vector_store %arg28[%c0_89, %c0_90], %228 {strides = array<i32>} : memref<8x32xbf16, #tpu.memory_space<vmem>>, vector<8x32xbf16>,
      %230 = vector.extract_strided_slice %226 {offsets = [0, 32], sizes = [8, 32], strides = [1, 1]} : vector<8x64xf32> to vector<8x32xf32>
      %231 = arith.truncf %230 : vector<8x32xf32> to vector<8x32xbf16>
      %c0_91 = arith.constant 0 : index
      %c0_92 = arith.constant 0 : index
      %232 = vector.load %arg29[%c0_91, %c0_92] : memref<8x32xbf16, #tpu.memory_space<vmem>>, vector<8x32xbf16>
      tpu.vector_store %arg29[%c0_91, %c0_92], %231 {strides = array<i32>} : memref<8x32xbf16, #tpu.memory_space<vmem>>, vector<8x32xbf16>,
      %c0_93 = arith.constant 0 : index
      %c0_94 = arith.constant 0 : index
      %c0_95 = arith.constant 0 : index
      %233 = vector.load %arg3[%c0_93, %c0_94, %c0_95] : memref<1x12x32xbf16, #tpu.memory_space<vmem>>, vector<1x12x32xbf16>
      %234 = vector.shape_cast %233 : vector<1x12x32xbf16> to vector<12x32xbf16>
      %c0_96 = arith.constant 0 : index
      %c0_97 = arith.constant 0 : index
      %235 = vector.load %arg15[%c0_96, %c0_97] : memref<32x64xbf16, #tpu.memory_space<vmem>>, vector<32x64xbf16>
      %cst_98 = arith.constant dense<0.000000e+00> : vector<12x64xf32>
      %236 = tpu.matmul %234, %235, %cst_98 {dimension_numbers = #tpu.dot_dimension_numbers<[1], [0], [0], [1], [0, 0, 1, 1], [], []>} : vector<12x32xbf16>, vector<32x64xbf16>, vector<12x64xf32> -> vector<12x64xf32>
      %c0_99 = arith.constant 0 : index
      %c0_100 = arith.constant 0 : index
      %237 = vector.load %arg16[%c0_99, %c0_100] : memref<1x64xf32, #tpu.memory_space<vmem>>, vector<1x64xf32>
      %238 = vector.broadcast %237 : vector<1x64xf32> to vector<12x64xf32>
      %239 = arith.addf %236, %238 : vector<12x64xf32>
      %240 = vector.extract_strided_slice %239 {offsets = [0, 0], sizes = [12, 32], strides = [1, 1]} : vector<12x64xf32> to vector<12x32xf32>
      %241 = arith.truncf %240 : vector<12x32xf32> to vector<12x32xbf16>
      %c0_101 = arith.constant 0 : index
      %c0_102 = arith.constant 0 : index
      %242 = vector.load %arg30[%c0_101, %c0_102] : memref<12x32xbf16, #tpu.memory_space<vmem>>, vector<12x32xbf16>
      tpu.vector_store %arg30[%c0_101, %c0_102], %241 {strides = array<i32>} : memref<12x32xbf16, #tpu.memory_space<vmem>>, vector<12x32xbf16>,
      %243 = vector.extract_strided_slice %239 {offsets = [0, 32], sizes = [12, 32], strides = [1, 1]} : vector<12x64xf32> to vector<12x32xf32>
      %244 = arith.truncf %243 : vector<12x32xf32> to vector<12x32xbf16>
      %c0_103 = arith.constant 0 : index
      %c0_104 = arith.constant 0 : index
      %245 = vector.load %arg31[%c0_103, %c0_104] : memref<12x32xbf16, #tpu.memory_space<vmem>>, vector<12x32xbf16>
      tpu.vector_store %arg31[%c0_103, %c0_104], %244 {strides = array<i32>} : memref<12x32xbf16, #tpu.memory_space<vmem>>, vector<12x32xbf16>,
    } else {
    }
    %c8_i32 = arith.constant 8 : i32
    %3 = arith.muli %arg1, %c8_i32 : i32
    %4 = tpu.assume_multiple %3, 8 : i32
    %c0 = arith.constant 0 : index
    %5 = arith.index_cast %4 : i32 to index
    %c0_1 = arith.constant 0 : index
    %6 = vector.load %arg2[%c0, %5, %c0_1] : memref<1x8x32xbf16, #tpu.memory_space<vmem>>, vector<1x8x32xbf16>
    %7 = vector.shape_cast %6 : vector<1x8x32xbf16> to vector<8x32xbf16>
    %8 = arith.extf %7 : vector<8x32xbf16> to vector<8x32xf32>
    %9 = arith.truncf %8 : vector<8x32xf32> to vector<8x32xbf16>
    %c0_2 = arith.constant 0 : index
    %c0_3 = arith.constant 0 : index
    %10 = vector.load %arg5[%c0_2, %c0_3] : memref<32x32xbf16, #tpu.memory_space<vmem>>, vector<32x32xbf16>
    %cst = arith.constant dense<0.000000e+00> : vector<8x32xf32>
    %11 = tpu.matmul %9, %10, %cst {dimension_numbers = #tpu.dot_dimension_numbers<[1], [0], [0], [1], [0, 0, 1, 1], [], []>} : vector<8x32xbf16>, vector<32x32xbf16>, vector<8x32xf32> -> vector<8x32xf32>
    %c0_4 = arith.constant 0 : index
    %c0_5 = arith.constant 0 : index
    %12 = vector.load %arg6[%c0_4, %c0_5] : memref<1x32xf32, #tpu.memory_space<vmem>>, vector<1x32xf32>
    %13 = vector.broadcast %12 : vector<1x32xf32> to vector<8x32xf32>
    %14 = arith.addf %11, %13 : vector<8x32xf32>
    %15 = arith.truncf %14 : vector<8x32xf32> to vector<8x32xbf16>
    %16 = vector.extract_strided_slice %15 {offsets = [0, 0], sizes = [8, 8], strides = [1, 1]} : vector<8x32xbf16> to vector<8x8xbf16>
    %17 = vector.shape_cast %16 : vector<8x8xbf16> to vector<1x8x8xbf16>
    %18 = vector.extract_strided_slice %15 {offsets = [0, 8], sizes = [8, 8], strides = [1, 1]} : vector<8x32xbf16> to vector<8x8xbf16>
    %19 = vector.shape_cast %18 : vector<8x8xbf16> to vector<1x8x8xbf16>
    %20 = vector.extract_strided_slice %15 {offsets = [0, 16], sizes = [8, 8], strides = [1, 1]} : vector<8x32xbf16> to vector<8x8xbf16>
    %21 = vector.shape_cast %20 : vector<8x8xbf16> to vector<1x8x8xbf16>
    %22 = vector.extract_strided_slice %15 {offsets = [0, 24], sizes = [8, 8], strides = [1, 1]} : vector<8x32xbf16> to vector<8x8xbf16>
    %23 = vector.shape_cast %22 : vector<8x8xbf16> to vector<1x8x8xbf16>
    %24 = tpu.concatenate %17, %19, %21, %23 in 0 : vector<1x8x8xbf16>, vector<1x8x8xbf16>, vector<1x8x8xbf16>, vector<1x8x8xbf16> -> vector<4x8x8xbf16>
    %c8_i32_6 = arith.constant 8 : i32
    %25 = arith.muli %arg1, %c8_i32_6 : i32
    %26 = tpu.iota {dimensions = array<i32: 1>} : vector<1x8x8xi32>
    %27 = vector.broadcast %25 : i32 to vector<1x8x8xi32>
    %28 = arith.addi %27, %26 : vector<1x8x8xi32>
    %cst_7 = arith.constant 0xFF800000 : f32
    %29 = vector.broadcast %cst_7 : f32 to vector<4x8x1xf32>
    %cst_8 = arith.constant 0.000000e+00 : f32
    %30 = vector.broadcast %cst_8 : f32 to vector<4x8x1xf32>
    %cst_9 = arith.constant 0.000000e+00 : f32
    %31 = vector.broadcast %cst_9 : f32 to vector<4x8x8xf32>
    %c1_i32 = arith.constant 1 : i32
    %32 = arith.addi %arg1, %c1_i32 : i32
    %c0_i32_10 = arith.constant 0 : i32
    %33 = arith.subi %32, %c0_i32_10 : i32
    %34 = arith.addi %c0_i32_10, %33 : i32
    %c1_i32_11 = arith.constant 1 : i32
    %35:3 = scf.for %arg32 = %c0_i32_10 to %34 step %c1_i32_11 iter_args(%arg33 = %29, %arg34 = %30, %arg35 = %31) -> (vector<4x8x1xf32>, vector<4x8x1xf32>, vector<4x8x8xf32>)  : i32 {
      %c8_i32_81 = arith.constant 8 : i32
      %220 = arith.muli %arg32, %c8_i32_81 : i32
      %221 = tpu.assume_multiple %220, 8 : i32
      %222 = arith.index_cast %221 : i32 to index
      %c0_82 = arith.constant 0 : index
      %223 = vector.load %arg28[%222, %c0_82] : memref<8x32xbf16, #tpu.memory_space<vmem>>, vector<8x32xbf16>
      %224 = vector.extract_strided_slice %223 {offsets = [0, 0], sizes = [8, 8], strides = [1, 1]} : vector<8x32xbf16> to vector<8x8xbf16>
      %225 = vector.shape_cast %224 : vector<8x8xbf16> to vector<1x8x8xbf16>
      %226 = vector.extract_strided_slice %223 {offsets = [0, 8], sizes = [8, 8], strides = [1, 1]} : vector<8x32xbf16> to vector<8x8xbf16>
      %227 = vector.shape_cast %226 : vector<8x8xbf16> to vector<1x8x8xbf16>
      %228 = vector.extract_strided_slice %223 {offsets = [0, 16], sizes = [8, 8], strides = [1, 1]} : vector<8x32xbf16> to vector<8x8xbf16>
      %229 = vector.shape_cast %228 : vector<8x8xbf16> to vector<1x8x8xbf16>
      %230 = vector.extract_strided_slice %223 {offsets = [0, 24], sizes = [8, 8], strides = [1, 1]} : vector<8x32xbf16> to vector<8x8xbf16>
      %231 = vector.shape_cast %230 : vector<8x8xbf16> to vector<1x8x8xbf16>
      %232 = tpu.concatenate %225, %227, %229, %231 in 0 : vector<1x8x8xbf16>, vector<1x8x8xbf16>, vector<1x8x8xbf16>, vector<1x8x8xbf16> -> vector<4x8x8xbf16>
      %233 = arith.index_cast %221 : i32 to index
      %c0_83 = arith.constant 0 : index
      %234 = vector.load %arg29[%233, %c0_83] : memref<8x32xbf16, #tpu.memory_space<vmem>>, vector<8x32xbf16>
      %235 = vector.extract_strided_slice %234 {offsets = [0, 0], sizes = [8, 8], strides = [1, 1]} : vector<8x32xbf16> to vector<8x8xbf16>
      %236 = vector.shape_cast %235 : vector<8x8xbf16> to vector<1x8x8xbf16>
      %237 = vector.extract_strided_slice %234 {offsets = [0, 8], sizes = [8, 8], strides = [1, 1]} : vector<8x32xbf16> to vector<8x8xbf16>
      %238 = vector.shape_cast %237 : vector<8x8xbf16> to vector<1x8x8xbf16>
      %239 = vector.extract_strided_slice %234 {offsets = [0, 16], sizes = [8, 8], strides = [1, 1]} : vector<8x32xbf16> to vector<8x8xbf16>
      %240 = vector.shape_cast %239 : vector<8x8xbf16> to vector<1x8x8xbf16>
      %241 = vector.extract_strided_slice %234 {offsets = [0, 24], sizes = [8, 8], strides = [1, 1]} : vector<8x32xbf16> to vector<8x8xbf16>
      %242 = vector.shape_cast %241 : vector<8x8xbf16> to vector<1x8x8xbf16>
      %243 = tpu.concatenate %236, %238, %240, %242 in 0 : vector<1x8x8xbf16>, vector<1x8x8xbf16>, vector<1x8x8xbf16>, vector<1x8x8xbf16> -> vector<4x8x8xbf16>
      %cst_84 = arith.constant dense<0.000000e+00> : vector<4x8x8xf32>
      %244 = tpu.matmul %24, %232, %cst_84 {dimension_numbers = #tpu.dot_dimension_numbers<[2], [2], [1], [1], [0, 0, 0, 1, 1, 1], [0], [0]>} : vector<4x8x8xbf16>, vector<4x8x8xbf16>, vector<4x8x8xf32> -> vector<4x8x8xf32>
      %c8_i32_85 = arith.constant 8 : i32
      %245 = arith.muli %arg32, %c8_i32_85 : i32
      %246 = tpu.iota {dimensions = array<i32: 2>} : vector<1x8x8xi32>
      %247 = vector.broadcast %245 : i32 to vector<1x8x8xi32>
      %248 = arith.addi %247, %246 : vector<1x8x8xi32>
      %249 = arith.cmpi sle, %248, %28 : vector<1x8x8xi32>
      %cst_86 = arith.constant -1.000000e+20 : f32
      %250 = vector.shape_cast %249 : vector<1x8x8xi1> to vector<1x8x8xi1>
      %251 = vector.broadcast %250 : vector<1x8x8xi1> to vector<4x8x8xi1>
      %252 = vector.broadcast %cst_86 : f32 to vector<4x8x8xf32>
      %253 = arith.select %251, %244, %252 : vector<4x8x8xi1>, vector<4x8x8xf32>
      %cst_87 = arith.constant dense<0xFF800000> : vector<4x8xf32>
      %254 = vector.multi_reduction <maximumf>, %253, %cst_87 [2] : vector<4x8x8xf32> to vector<4x8xf32>
      %255 = vector.shape_cast %254 : vector<4x8xf32> to vector<4x8x1xf32>
      %256 = arith.maximumf %arg33, %255 : vector<4x8x1xf32>
      %257 = arith.subf %arg33, %256 : vector<4x8x1xf32>
      %258 = math.exp %257 : vector<4x8x1xf32>
      %259 = vector.broadcast %256 : vector<4x8x1xf32> to vector<4x8x8xf32>
      %260 = arith.subf %253, %259 : vector<4x8x8xf32>
      %261 = math.exp %260 : vector<4x8x8xf32>
      %262 = arith.mulf %258, %arg34 : vector<4x8x1xf32>
      %cst_88 = arith.constant dense<0.000000e+00> : vector<4x8xf32>
      %263 = vector.multi_reduction <add>, %261, %cst_88 [2] : vector<4x8x8xf32> to vector<4x8xf32>
      %264 = vector.shape_cast %263 : vector<4x8xf32> to vector<4x8x1xf32>
      %265 = arith.addf %262, %264 : vector<4x8x1xf32>
      %266 = vector.broadcast %258 : vector<4x8x1xf32> to vector<4x8x8xf32>
      %267 = arith.mulf %266, %arg35 : vector<4x8x8xf32>
      %268 = arith.truncf %261 : vector<4x8x8xf32> to vector<4x8x8xbf16>
      %cst_89 = arith.constant dense<0.000000e+00> : vector<4x8x8xf32>
      %269 = tpu.matmul %268, %243, %cst_89 {dimension_numbers = #tpu.dot_dimension_numbers<[2], [1], [1], [2], [0, 0, 0, 1, 1, 2], [0], [0]>} : vector<4x8x8xbf16>, vector<4x8x8xbf16>, vector<4x8x8xf32> -> vector<4x8x8xf32>
      %270 = arith.addf %267, %269 : vector<4x8x8xf32>
      scf.yield %256, %265, %270 : vector<4x8x1xf32>, vector<4x8x1xf32>, vector<4x8x8xf32>
    }
    %36 = tpu.reciprocal %35#1 {approx = true} : vector<4x8x1xf32> -> vector<4x8x1xf32>
    %37 = vector.broadcast %36 : vector<4x8x1xf32> to vector<4x8x8xf32>
    %38 = arith.mulf %35#2, %37 : vector<4x8x8xf32>
    %39 = vector.extract_strided_slice %38 {offsets = [0, 0, 0], sizes = [1, 8, 8], strides = [1, 1, 1]} : vector<4x8x8xf32> to vector<1x8x8xf32>
    %40 = vector.shape_cast %39 : vector<1x8x8xf32> to vector<8x8xf32>
    %41 = vector.extract_strided_slice %38 {offsets = [1, 0, 0], sizes = [1, 8, 8], strides = [1, 1, 1]} : vector<4x8x8xf32> to vector<1x8x8xf32>
    %42 = vector.shape_cast %41 : vector<1x8x8xf32> to vector<8x8xf32>
    %43 = vector.extract_strided_slice %38 {offsets = [2, 0, 0], sizes = [1, 8, 8], strides = [1, 1, 1]} : vector<4x8x8xf32> to vector<1x8x8xf32>
    %44 = vector.shape_cast %43 : vector<1x8x8xf32> to vector<8x8xf32>
    %45 = vector.extract_strided_slice %38 {offsets = [3, 0, 0], sizes = [1, 8, 8], strides = [1, 1, 1]} : vector<4x8x8xf32> to vector<1x8x8xf32>
    %46 = vector.shape_cast %45 : vector<1x8x8xf32> to vector<8x8xf32>
    %47 = tpu.concatenate %40, %42, %44, %46 in 1 : vector<8x8xf32>, vector<8x8xf32>, vector<8x8xf32>, vector<8x8xf32> -> vector<8x32xf32>
    %48 = arith.truncf %47 : vector<8x32xf32> to vector<8x32xbf16>
    %c0_12 = arith.constant 0 : index
    %c0_13 = arith.constant 0 : index
    %49 = vector.load %arg9[%c0_12, %c0_13] : memref<32x32xbf16, #tpu.memory_space<vmem>>, vector<32x32xbf16>
    %cst_14 = arith.constant dense<0.000000e+00> : vector<8x32xf32>
    %50 = tpu.matmul %48, %49, %cst_14 {dimension_numbers = #tpu.dot_dimension_numbers<[1], [0], [0], [1], [0, 0, 1, 1], [], []>} : vector<8x32xbf16>, vector<32x32xbf16>, vector<8x32xf32> -> vector<8x32xf32>
    %c0_15 = arith.constant 0 : index
    %c0_16 = arith.constant 0 : index
    %51 = vector.load %arg10[%c0_15, %c0_16] : memref<1x32xf32, #tpu.memory_space<vmem>>, vector<1x32xf32>
    %52 = vector.broadcast %51 : vector<1x32xf32> to vector<8x32xf32>
    %53 = arith.addf %50, %52 : vector<8x32xf32>
    %54 = arith.addf %53, %8 : vector<8x32xf32>
    %c0_17 = arith.constant 0 : index
    %c0_18 = arith.constant 0 : index
    %55 = vector.load %arg11[%c0_17, %c0_18] : memref<1x32xf32, #tpu.memory_space<vmem>>, vector<1x32xf32>
    %c0_19 = arith.constant 0 : index
    %c0_20 = arith.constant 0 : index
    %56 = vector.load %arg12[%c0_19, %c0_20] : memref<1x32xf32, #tpu.memory_space<vmem>>, vector<1x32xf32>
    %cst_21 = arith.constant dense<0.000000e+00> : vector<8xf32>
    %57 = vector.multi_reduction <add>, %54, %cst_21 [1] : vector<8x32xf32> to vector<8xf32>
    %58 = vector.shape_cast %57 : vector<8xf32> to vector<8x1xf32>
    %cst_22 = arith.constant 3.200000e+01 : f32
    %59 = vector.broadcast %cst_22 : f32 to vector<8x1xf32>
    %60 = arith.divf %58, %59 : vector<8x1xf32>
    %61 = vector.broadcast %60 : vector<8x1xf32> to vector<8x32xf32>
    %62 = arith.subf %54, %61 : vector<8x32xf32>
    %63 = arith.mulf %62, %62 : vector<8x32xf32>
    %cst_23 = arith.constant dense<0.000000e+00> : vector<8xf32>
    %64 = vector.multi_reduction <add>, %63, %cst_23 [1] : vector<8x32xf32> to vector<8xf32>
    %65 = vector.shape_cast %64 : vector<8xf32> to vector<8x1xf32>
    %cst_24 = arith.constant 3.200000e+01 : f32
    %66 = vector.broadcast %cst_24 : f32 to vector<8x1xf32>
    %67 = arith.divf %65, %66 : vector<8x1xf32>
    %68 = vector.broadcast %60 : vector<8x1xf32> to vector<8x32xf32>
    %69 = arith.subf %54, %68 : vector<8x32xf32>
    %cst_25 = arith.constant 9.99999974E-6 : f32
    %70 = vector.broadcast %cst_25 : f32 to vector<8x1xf32>
    %71 = arith.addf %67, %70 : vector<8x1xf32>
    %72 = math.rsqrt %71 : vector<8x1xf32>
    %73 = vector.broadcast %72 : vector<8x1xf32> to vector<8x32xf32>
    %74 = arith.mulf %69, %73 : vector<8x32xf32>
    %75 = vector.broadcast %55 : vector<1x32xf32> to vector<8x32xf32>
    %76 = arith.mulf %74, %75 : vector<8x32xf32>
    %77 = vector.broadcast %56 : vector<1x32xf32> to vector<8x32xf32>
    %78 = arith.addf %76, %77 : vector<8x32xf32>
    %79 = arith.truncf %78 : vector<8x32xf32> to vector<8x32xbf16>
    %c0_26 = arith.constant 0 : index
    %c0_27 = arith.constant 0 : index
    %80 = vector.load %arg13[%c0_26, %c0_27] : memref<32x32xbf16, #tpu.memory_space<vmem>>, vector<32x32xbf16>
    %cst_28 = arith.constant dense<0.000000e+00> : vector<8x32xf32>
    %81 = tpu.matmul %79, %80, %cst_28 {dimension_numbers = #tpu.dot_dimension_numbers<[1], [0], [0], [1], [0, 0, 1, 1], [], []>} : vector<8x32xbf16>, vector<32x32xbf16>, vector<8x32xf32> -> vector<8x32xf32>
    %c0_29 = arith.constant 0 : index
    %c0_30 = arith.constant 0 : index
    %82 = vector.load %arg14[%c0_29, %c0_30] : memref<1x32xf32, #tpu.memory_space<vmem>>, vector<1x32xf32>
    %83 = vector.broadcast %82 : vector<1x32xf32> to vector<8x32xf32>
    %84 = arith.addf %81, %83 : vector<8x32xf32>
    %85 = arith.truncf %84 : vector<8x32xf32> to vector<8x32xbf16>
    %86 = vector.extract_strided_slice %85 {offsets = [0, 0], sizes = [8, 8], strides = [1, 1]} : vector<8x32xbf16> to vector<8x8xbf16>
    %87 = vector.shape_cast %86 : vector<8x8xbf16> to vector<1x8x8xbf16>
    %88 = vector.extract_strided_slice %85 {offsets = [0, 8], sizes = [8, 8], strides = [1, 1]} : vector<8x32xbf16> to vector<8x8xbf16>
    %89 = vector.shape_cast %88 : vector<8x8xbf16> to vector<1x8x8xbf16>
    %90 = vector.extract_strided_slice %85 {offsets = [0, 16], sizes = [8, 8], strides = [1, 1]} : vector<8x32xbf16> to vector<8x8xbf16>
    %91 = vector.shape_cast %90 : vector<8x8xbf16> to vector<1x8x8xbf16>
    %92 = vector.extract_strided_slice %85 {offsets = [0, 24], sizes = [8, 8], strides = [1, 1]} : vector<8x32xbf16> to vector<8x8xbf16>
    %93 = vector.shape_cast %92 : vector<8x8xbf16> to vector<1x8x8xbf16>
    %94 = tpu.concatenate %87, %89, %91, %93 in 0 : vector<1x8x8xbf16>, vector<1x8x8xbf16>, vector<1x8x8xbf16>, vector<1x8x8xbf16> -> vector<4x8x8xbf16>
    %c0_31 = arith.constant 0 : index
    %c0_32 = arith.constant 0 : index
    %95 = vector.load %arg30[%c0_31, %c0_32] : memref<12x32xbf16, #tpu.memory_space<vmem>>, vector<12x32xbf16>
    %96 = vector.extract_strided_slice %95 {offsets = [0, 0], sizes = [12, 8], strides = [1, 1]} : vector<12x32xbf16> to vector<12x8xbf16>
    %97 = vector.shape_cast %96 : vector<12x8xbf16> to vector<1x12x8xbf16>
    %98 = vector.extract_strided_slice %95 {offsets = [0, 8], sizes = [12, 8], strides = [1, 1]} : vector<12x32xbf16> to vector<12x8xbf16>
    %99 = vector.shape_cast %98 : vector<12x8xbf16> to vector<1x12x8xbf16>
    %100 = vector.extract_strided_slice %95 {offsets = [0, 16], sizes = [12, 8], strides = [1, 1]} : vector<12x32xbf16> to vector<12x8xbf16>
    %101 = vector.shape_cast %100 : vector<12x8xbf16> to vector<1x12x8xbf16>
    %102 = vector.extract_strided_slice %95 {offsets = [0, 24], sizes = [12, 8], strides = [1, 1]} : vector<12x32xbf16> to vector<12x8xbf16>
    %103 = vector.shape_cast %102 : vector<12x8xbf16> to vector<1x12x8xbf16>
    %104 = tpu.concatenate %97, %99, %101, %103 in 0 : vector<1x12x8xbf16>, vector<1x12x8xbf16>, vector<1x12x8xbf16>, vector<1x12x8xbf16> -> vector<4x12x8xbf16>
    %c0_33 = arith.constant 0 : index
    %c0_34 = arith.constant 0 : index
    %105 = vector.load %arg31[%c0_33, %c0_34] : memref<12x32xbf16, #tpu.memory_space<vmem>>, vector<12x32xbf16>
    %106 = vector.extract_strided_slice %105 {offsets = [0, 0], sizes = [12, 8], strides = [1, 1]} : vector<12x32xbf16> to vector<12x8xbf16>
    %107 = vector.shape_cast %106 : vector<12x8xbf16> to vector<1x12x8xbf16>
    %108 = vector.extract_strided_slice %105 {offsets = [0, 8], sizes = [12, 8], strides = [1, 1]} : vector<12x32xbf16> to vector<12x8xbf16>
    %109 = vector.shape_cast %108 : vector<12x8xbf16> to vector<1x12x8xbf16>
    %110 = vector.extract_strided_slice %105 {offsets = [0, 16], sizes = [12, 8], strides = [1, 1]} : vector<12x32xbf16> to vector<12x8xbf16>
    %111 = vector.shape_cast %110 : vector<12x8xbf16> to vector<1x12x8xbf16>
    %112 = vector.extract_strided_slice %105 {offsets = [0, 24], sizes = [12, 8], strides = [1, 1]} : vector<12x32xbf16> to vector<12x8xbf16>
    %113 = vector.shape_cast %112 : vector<12x8xbf16> to vector<1x12x8xbf16>
    %114 = tpu.concatenate %107, %109, %111, %113 in 0 : vector<1x12x8xbf16>, vector<1x12x8xbf16>, vector<1x12x8xbf16>, vector<1x12x8xbf16> -> vector<4x12x8xbf16>
    %cst_35 = arith.constant dense<0.000000e+00> : vector<4x8x12xf32>
    %115 = tpu.matmul %94, %104, %cst_35 {dimension_numbers = #tpu.dot_dimension_numbers<[2], [2], [1], [1], [0, 0, 0, 1, 1, 1], [0], [0]>} : vector<4x8x8xbf16>, vector<4x12x8xbf16>, vector<4x8x12xf32> -> vector<4x8x12xf32>
    %c0_36 = arith.constant 0 : index
    %c0_37 = arith.constant 0 : index
    %c0_38 = arith.constant 0 : index
    %116 = vector.load %arg4[%c0_36, %c0_37, %c0_38] : memref<1x1x12xf32, #tpu.memory_space<vmem>>, vector<1x1x12xf32>
    %117 = vector.shape_cast %116 : vector<1x1x12xf32> to vector<1x12xf32>
    %cst_39 = arith.constant 0.000000e+00 : f32
    %118 = vector.broadcast %cst_39 : f32 to vector<1x12xf32>
    %119 = arith.cmpf ogt, %117, %118 : vector<1x12xf32>
    %120 = vector.shape_cast %119 : vector<1x12xi1> to vector<1x1x12xi1>
    %cst_40 = arith.constant -1.000000e+20 : f32
    %121 = vector.shape_cast %120 : vector<1x1x12xi1> to vector<1x1x12xi1>
    %122 = vector.broadcast %121 : vector<1x1x12xi1> to vector<4x8x12xi1>
    %123 = vector.broadcast %cst_40 : f32 to vector<4x8x12xf32>
    %124 = arith.select %122, %115, %123 : vector<4x8x12xi1>, vector<4x8x12xf32>
    %cst_41 = arith.constant dense<0xFF800000> : vector<4x8xf32>
    %125 = vector.multi_reduction <maximumf>, %124, %cst_41 [2] : vector<4x8x12xf32> to vector<4x8xf32>
    %126 = vector.shape_cast %125 : vector<4x8xf32> to vector<4x8x1xf32>
    %127 = vector.broadcast %126 : vector<4x8x1xf32> to vector<4x8x12xf32>
    %128 = arith.subf %124, %127 : vector<4x8x12xf32>
    %129 = math.exp %128 : vector<4x8x12xf32>
    %cst_42 = arith.constant dense<0.000000e+00> : vector<4x8xf32>
    %130 = vector.multi_reduction <add>, %129, %cst_42 [2] : vector<4x8x12xf32> to vector<4x8xf32>
    %131 = vector.shape_cast %130 : vector<4x8xf32> to vector<4x8x1xf32>
    %132 = tpu.reciprocal %131 {approx = true} : vector<4x8x1xf32> -> vector<4x8x1xf32>
    %133 = vector.broadcast %132 : vector<4x8x1xf32> to vector<4x8x12xf32>
    %134 = arith.mulf %129, %133 : vector<4x8x12xf32>
    %135 = arith.truncf %134 : vector<4x8x12xf32> to vector<4x8x12xbf16>
    %cst_43 = arith.constant dense<0.000000e+00> : vector<4x8x8xf32>
    %136 = tpu.matmul %135, %114, %cst_43 {dimension_numbers = #tpu.dot_dimension_numbers<[2], [1], [1], [2], [0, 0, 0, 1, 1, 2], [0], [0]>} : vector<4x8x12xbf16>, vector<4x12x8xbf16>, vector<4x8x8xf32> -> vector<4x8x8xf32>
    %137 = vector.extract_strided_slice %136 {offsets = [0, 0, 0], sizes = [1, 8, 8], strides = [1, 1, 1]} : vector<4x8x8xf32> to vector<1x8x8xf32>
    %138 = vector.shape_cast %137 : vector<1x8x8xf32> to vector<8x8xf32>
    %139 = vector.extract_strided_slice %136 {offsets = [1, 0, 0], sizes = [1, 8, 8], strides = [1, 1, 1]} : vector<4x8x8xf32> to vector<1x8x8xf32>
    %140 = vector.shape_cast %139 : vector<1x8x8xf32> to vector<8x8xf32>
    %141 = vector.extract_strided_slice %136 {offsets = [2, 0, 0], sizes = [1, 8, 8], strides = [1, 1, 1]} : vector<4x8x8xf32> to vector<1x8x8xf32>
    %142 = vector.shape_cast %141 : vector<1x8x8xf32> to vector<8x8xf32>
    %143 = vector.extract_strided_slice %136 {offsets = [3, 0, 0], sizes = [1, 8, 8], strides = [1, 1, 1]} : vector<4x8x8xf32> to vector<1x8x8xf32>
    %144 = vector.shape_cast %143 : vector<1x8x8xf32> to vector<8x8xf32>
    %145 = tpu.concatenate %138, %140, %142, %144 in 1 : vector<8x8xf32>, vector<8x8xf32>, vector<8x8xf32>, vector<8x8xf32> -> vector<8x32xf32>
    %146 = arith.truncf %145 : vector<8x32xf32> to vector<8x32xbf16>
    %c0_44 = arith.constant 0 : index
    %c0_45 = arith.constant 0 : index
    %147 = vector.load %arg17[%c0_44, %c0_45] : memref<32x32xbf16, #tpu.memory_space<vmem>>, vector<32x32xbf16>
    %cst_46 = arith.constant dense<0.000000e+00> : vector<8x32xf32>
    %148 = tpu.matmul %146, %147, %cst_46 {dimension_numbers = #tpu.dot_dimension_numbers<[1], [0], [0], [1], [0, 0, 1, 1], [], []>} : vector<8x32xbf16>, vector<32x32xbf16>, vector<8x32xf32> -> vector<8x32xf32>
    %c0_47 = arith.constant 0 : index
    %c0_48 = arith.constant 0 : index
    %149 = vector.load %arg18[%c0_47, %c0_48] : memref<1x32xf32, #tpu.memory_space<vmem>>, vector<1x32xf32>
    %150 = vector.broadcast %149 : vector<1x32xf32> to vector<8x32xf32>
    %151 = arith.addf %148, %150 : vector<8x32xf32>
    %152 = arith.addf %151, %78 : vector<8x32xf32>
    %c0_49 = arith.constant 0 : index
    %c0_50 = arith.constant 0 : index
    %153 = vector.load %arg19[%c0_49, %c0_50] : memref<1x32xf32, #tpu.memory_space<vmem>>, vector<1x32xf32>
    %c0_51 = arith.constant 0 : index
    %c0_52 = arith.constant 0 : index
    %154 = vector.load %arg20[%c0_51, %c0_52] : memref<1x32xf32, #tpu.memory_space<vmem>>, vector<1x32xf32>
    %cst_53 = arith.constant dense<0.000000e+00> : vector<8xf32>
    %155 = vector.multi_reduction <add>, %152, %cst_53 [1] : vector<8x32xf32> to vector<8xf32>
    %156 = vector.shape_cast %155 : vector<8xf32> to vector<8x1xf32>
    %cst_54 = arith.constant 3.200000e+01 : f32
    %157 = vector.broadcast %cst_54 : f32 to vector<8x1xf32>
    %158 = arith.divf %156, %157 : vector<8x1xf32>
    %159 = vector.broadcast %158 : vector<8x1xf32> to vector<8x32xf32>
    %160 = arith.subf %152, %159 : vector<8x32xf32>
    %161 = arith.mulf %160, %160 : vector<8x32xf32>
    %cst_55 = arith.constant dense<0.000000e+00> : vector<8xf32>
    %162 = vector.multi_reduction <add>, %161, %cst_55 [1] : vector<8x32xf32> to vector<8xf32>
    %163 = vector.shape_cast %162 : vector<8xf32> to vector<8x1xf32>
    %cst_56 = arith.constant 3.200000e+01 : f32
    %164 = vector.broadcast %cst_56 : f32 to vector<8x1xf32>
    %165 = arith.divf %163, %164 : vector<8x1xf32>
    %166 = vector.broadcast %158 : vector<8x1xf32> to vector<8x32xf32>
    %167 = arith.subf %152, %166 : vector<8x32xf32>
    %cst_57 = arith.constant 9.99999974E-6 : f32
    %168 = vector.broadcast %cst_57 : f32 to vector<8x1xf32>
    %169 = arith.addf %165, %168 : vector<8x1xf32>
    %170 = math.rsqrt %169 : vector<8x1xf32>
    %171 = vector.broadcast %170 : vector<8x1xf32> to vector<8x32xf32>
    %172 = arith.mulf %167, %171 : vector<8x32xf32>
    %173 = vector.broadcast %153 : vector<1x32xf32> to vector<8x32xf32>
    %174 = arith.mulf %172, %173 : vector<8x32xf32>
    %175 = vector.broadcast %154 : vector<1x32xf32> to vector<8x32xf32>
    %176 = arith.addf %174, %175 : vector<8x32xf32>
    %177 = arith.truncf %176 : vector<8x32xf32> to vector<8x32xbf16>
    %c0_58 = arith.constant 0 : index
    %c0_59 = arith.constant 0 : index
    %178 = vector.load %arg21[%c0_58, %c0_59] : memref<32x64xbf16, #tpu.memory_space<vmem>>, vector<32x64xbf16>
    %cst_60 = arith.constant dense<0.000000e+00> : vector<8x64xf32>
    %179 = tpu.matmul %177, %178, %cst_60 {dimension_numbers = #tpu.dot_dimension_numbers<[1], [0], [0], [1], [0, 0, 1, 1], [], []>} : vector<8x32xbf16>, vector<32x64xbf16>, vector<8x64xf32> -> vector<8x64xf32>
    %c0_61 = arith.constant 0 : index
    %c0_62 = arith.constant 0 : index
    %180 = vector.load %arg22[%c0_61, %c0_62] : memref<1x64xf32, #tpu.memory_space<vmem>>, vector<1x64xf32>
    %181 = vector.broadcast %180 : vector<1x64xf32> to vector<8x64xf32>
    %182 = arith.addf %179, %181 : vector<8x64xf32>
    %cst_63 = arith.constant 0.000000e+00 : f32
    %183 = vector.broadcast %cst_63 : f32 to vector<8x64xf32>
    %184 = arith.maximumf %182, %183 : vector<8x64xf32>
    %185 = arith.truncf %184 : vector<8x64xf32> to vector<8x64xbf16>
    %c0_64 = arith.constant 0 : index
    %c0_65 = arith.constant 0 : index
    %186 = vector.load %arg23[%c0_64, %c0_65] : memref<64x32xbf16, #tpu.memory_space<vmem>>, vector<64x32xbf16>
    %cst_66 = arith.constant dense<0.000000e+00> : vector<8x32xf32>
    %187 = tpu.matmul %185, %186, %cst_66 {dimension_numbers = #tpu.dot_dimension_numbers<[1], [0], [0], [1], [0, 0, 1, 1], [], []>} : vector<8x64xbf16>, vector<64x32xbf16>, vector<8x32xf32> -> vector<8x32xf32>
    %c0_67 = arith.constant 0 : index
    %c0_68 = arith.constant 0 : index
    %188 = vector.load %arg24[%c0_67, %c0_68] : memref<1x32xf32, #tpu.memory_space<vmem>>, vector<1x32xf32>
    %189 = vector.broadcast %188 : vector<1x32xf32> to vector<8x32xf32>
    %190 = arith.addf %187, %189 : vector<8x32xf32>
    %191 = arith.addf %190, %176 : vector<8x32xf32>
    %c0_69 = arith.constant 0 : index
    %c0_70 = arith.constant 0 : index
    %192 = vector.load %arg25[%c0_69, %c0_70] : memref<1x32xf32, #tpu.memory_space<vmem>>, vector<1x32xf32>
    %c0_71 = arith.constant 0 : index
    %c0_72 = arith.constant 0 : index
    %193 = vector.load %arg26[%c0_71, %c0_72] : memref<1x32xf32, #tpu.memory_space<vmem>>, vector<1x32xf32>
    %cst_73 = arith.constant dense<0.000000e+00> : vector<8xf32>
    %194 = vector.multi_reduction <add>, %191, %cst_73 [1] : vector<8x32xf32> to vector<8xf32>
    %195 = vector.shape_cast %194 : vector<8xf32> to vector<8x1xf32>
    %cst_74 = arith.constant 3.200000e+01 : f32
    %196 = vector.broadcast %cst_74 : f32 to vector<8x1xf32>
    %197 = arith.divf %195, %196 : vector<8x1xf32>
    %198 = vector.broadcast %197 : vector<8x1xf32> to vector<8x32xf32>
    %199 = arith.subf %191, %198 : vector<8x32xf32>
    %200 = arith.mulf %199, %199 : vector<8x32xf32>
    %cst_75 = arith.constant dense<0.000000e+00> : vector<8xf32>
    %201 = vector.multi_reduction <add>, %200, %cst_75 [1] : vector<8x32xf32> to vector<8xf32>
    %202 = vector.shape_cast %201 : vector<8xf32> to vector<8x1xf32>
    %cst_76 = arith.constant 3.200000e+01 : f32
    %203 = vector.broadcast %cst_76 : f32 to vector<8x1xf32>
    %204 = arith.divf %202, %203 : vector<8x1xf32>
    %205 = vector.broadcast %197 : vector<8x1xf32> to vector<8x32xf32>
    %206 = arith.subf %191, %205 : vector<8x32xf32>
    %cst_77 = arith.constant 9.99999974E-6 : f32
    %207 = vector.broadcast %cst_77 : f32 to vector<8x1xf32>
    %208 = arith.addf %204, %207 : vector<8x1xf32>
    %209 = math.rsqrt %208 : vector<8x1xf32>
    %210 = vector.broadcast %209 : vector<8x1xf32> to vector<8x32xf32>
    %211 = arith.mulf %206, %210 : vector<8x32xf32>
    %212 = vector.broadcast %192 : vector<1x32xf32> to vector<8x32xf32>
    %213 = arith.mulf %211, %212 : vector<8x32xf32>
    %214 = vector.broadcast %193 : vector<1x32xf32> to vector<8x32xf32>
    %215 = arith.addf %213, %214 : vector<8x32xf32>
    %216 = arith.truncf %215 : vector<8x32xf32> to vector<8x32xbf16>
    %c0_78 = arith.constant 0 : index
    %c0_79 = arith.constant 0 : index
    %c0_80 = arith.constant 0 : index
    %217 = vector.load %arg27[%c0_78, %c0_79, %c0_80] : memref<1x8x32xbf16, #tpu.memory_space<vmem>>, vector<1x8x32xbf16>
    %218 = vector.shape_cast %217 : vector<1x8x32xbf16> to vector<8x32xbf16>
    %219 = vector.shape_cast %216 : vector<8x32xbf16> to vector<1x8x32xbf16>
    tpu.vector_store %arg27[%c0_78, %c0_79, %c0_80], %219 {strides = array<i32>} : memref<1x8x32xbf16, #tpu.memory_space<vmem>>, vector<1x8x32xbf16>,
    return
  }
  func.func @transform_0(%arg0: i32, %arg1: i32) -> (i32, i32, i32) {
    %c0_i32 = arith.constant 0 : i32
    %c0_i32_0 = arith.constant 0 : i32
    %c0_i32_1 = arith.constant 0 : i32
    return %arg0, %c0_i32, %c0_i32_0 : i32, i32, i32
  }
  func.func @transform_1(%arg0: i32, %arg1: i32) -> (i32, i32, i32) {
    %c0_i32 = arith.constant 0 : i32
    %c0_i32_0 = arith.constant 0 : i32
    %c0_i32_1 = arith.constant 0 : i32
    return %arg0, %c0_i32, %c0_i32_0 : i32, i32, i32
  }
  func.func @transform_2(%arg0: i32, %arg1: i32) -> (i32, i32, i32) {
    %c0_i32 = arith.constant 0 : i32
    %c0_i32_0 = arith.constant 0 : i32
    %c0_i32_1 = arith.constant 0 : i32
    return %arg0, %c0_i32, %c0_i32_0 : i32, i32, i32
  }
  func.func @transform_3(%arg0: i32, %arg1: i32) -> (i32, i32) {
    %c0_i32 = arith.constant 0 : i32
    %c0_i32_0 = arith.constant 0 : i32
    %c0_i32_1 = arith.constant 0 : i32
    return %c0_i32, %c0_i32_0 : i32, i32
  }
  func.func @transform_4(%arg0: i32, %arg1: i32) -> (i32, i32) {
    %c0_i32 = arith.constant 0 : i32
    %c0_i32_0 = arith.constant 0 : i32
    %c0_i32_1 = arith.constant 0 : i32
    return %c0_i32, %c0_i32_0 : i32, i32
  }
  func.func @transform_5(%arg0: i32, %arg1: i32) -> (i32, i32) {
    %c0_i32 = arith.constant 0 : i32
    %c0_i32_0 = arith.constant 0 : i32
    %c0_i32_1 = arith.constant 0 : i32
    return %c0_i32, %c0_i32_0 : i32, i32
  }
  func.func @transform_6(%arg0: i32, %arg1: i32) -> (i32, i32) {
    %c0_i32 = arith.constant 0 : i32
    %c0_i32_0 = arith.constant 0 : i32
    %c0_i32_1 = arith.constant 0 : i32
    return %c0_i32, %c0_i32_0 : i32, i32
  }
  func.func @transform_7(%arg0: i32, %arg1: i32) -> (i32, i32) {
    %c0_i32 = arith.constant 0 : i32
    %c0_i32_0 = arith.constant 0 : i32
    %c0_i32_1 = arith.constant 0 : i32
    return %c0_i32, %c0_i32_0 : i32, i32
  }
  func.func @transform_8(%arg0: i32, %arg1: i32) -> (i32, i32) {
    %c0_i32 = arith.constant 0 : i32
    %c0_i32_0 = arith.constant 0 : i32
    %c0_i32_1 = arith.constant 0 : i32
    return %c0_i32, %c0_i32_0 : i32, i32
  }
  func.func @transform_9(%arg0: i32, %arg1: i32) -> (i32, i32) {
    %c0_i32 = arith.constant 0 : i32
    %c0_i32_0 = arith.constant 0 : i32
    %c0_i32_1 = arith.constant 0 : i32
    return %c0_i32, %c0_i32_0 : i32, i32
  }
  func.func @transform_10(%arg0: i32, %arg1: i32) -> (i32, i32) {
    %c0_i32 = arith.constant 0 : i32
    %c0_i32_0 = arith.constant 0 : i32
    %c0_i32_1 = arith.constant 0 : i32
    return %c0_i32, %c0_i32_0 : i32, i32
  }
  func.func @transform_11(%arg0: i32, %arg1: i32) -> (i32, i32) {
    %c0_i32 = arith.constant 0 : i32
    %c0_i32_0 = arith.constant 0 : i32
    %c0_i32_1 = arith.constant 0 : i32
    return %c0_i32, %c0_i32_0 : i32, i32
  }
  func.func @transform_12(%arg0: i32, %arg1: i32) -> (i32, i32) {
    %c0_i32 = arith.constant 0 : i32
    %c0_i32_0 = arith.constant 0 : i32
    %c0_i32_1 = arith.constant 0 : i32
    return %c0_i32, %c0_i32_0 : i32, i32
  }
  func.func @transform_13(%arg0: i32, %arg1: i32) -> (i32, i32) {
    %c0_i32 = arith.constant 0 : i32
    %c0_i32_0 = arith.constant 0 : i32
    %c0_i32_1 = arith.constant 0 : i32
    return %c0_i32, %c0_i32_0 : i32, i32
  }
  func.func @transform_14(%arg0: i32, %arg1: i32) -> (i32, i32) {
    %c0_i32 = arith.constant 0 : i32
    %c0_i32_0 = arith.constant 0 : i32
    %c0_i32_1 = arith.constant 0 : i32
    return %c0_i32, %c0_i32_0 : i32, i32
  }
  func.func @transform_15(%arg0: i32, %arg1: i32) -> (i32, i32) {
    %c0_i32 = arith.constant 0 : i32
    %c0_i32_0 = arith.constant 0 : i32
    %c0_i32_1 = arith.constant 0 : i32
    return %c0_i32, %c0_i32_0 : i32, i32
  }
  func.func @transform_16(%arg0: i32, %arg1: i32) -> (i32, i32) {
    %c0_i32 = arith.constant 0 : i32
    %c0_i32_0 = arith.constant 0 : i32
    %c0_i32_1 = arith.constant 0 : i32
    return %c0_i32, %c0_i32_0 : i32, i32
  }
  func.func @transform_17(%arg0: i32, %arg1: i32) -> (i32, i32) {
    %c0_i32 = arith.constant 0 : i32
    %c0_i32_0 = arith.constant 0 : i32
    %c0_i32_1 = arith.constant 0 : i32
    return %c0_i32, %c0_i32_0 : i32, i32
  }
  func.func @transform_18(%arg0: i32, %arg1: i32) -> (i32, i32) {
    %c0_i32 = arith.constant 0 : i32
    %c0_i32_0 = arith.constant 0 : i32
    %c0_i32_1 = arith.constant 0 : i32
    return %c0_i32, %c0_i32_0 : i32, i32
  }
  func.func @transform_19(%arg0: i32, %arg1: i32) -> (i32, i32) {
    %c0_i32 = arith.constant 0 : i32
    %c0_i32_0 = arith.constant 0 : i32
    %c0_i32_1 = arith.constant 0 : i32
    return %c0_i32, %c0_i32_0 : i32, i32
  }
  func.func @transform_20(%arg0: i32, %arg1: i32) -> (i32, i32) {
    %c0_i32 = arith.constant 0 : i32
    %c0_i32_0 = arith.constant 0 : i32
    %c0_i32_1 = arith.constant 0 : i32
    return %c0_i32, %c0_i32_0 : i32, i32
  }
  func.func @transform_21(%arg0: i32, %arg1: i32) -> (i32, i32) {
    %c0_i32 = arith.constant 0 : i32
    %c0_i32_0 = arith.constant 0 : i32
    %c0_i32_1 = arith.constant 0 : i32
    return %c0_i32, %c0_i32_0 : i32, i32
  }
  func.func @transform_22(%arg0: i32, %arg1: i32) -> (i32, i32) {
    %c0_i32 = arith.constant 0 : i32
    %c0_i32_0 = arith.constant 0 : i32
    %c0_i32_1 = arith.constant 0 : i32
    return %c0_i32, %c0_i32_0 : i32, i32
  }
  func.func @transform_23(%arg0: i32, %arg1: i32) -> (i32, i32) {
    %c0_i32 = arith.constant 0 : i32
    %c0_i32_0 = arith.constant 0 : i32
    %c0_i32_1 = arith.constant 0 : i32
    return %c0_i32, %c0_i32_0 : i32, i32
  }
  func.func @transform_24(%arg0: i32, %arg1: i32) -> (i32, i32) {
    %c0_i32 = arith.constant 0 : i32
    %c0_i32_0 = arith.constant 0 : i32
    %c0_i32_1 = arith.constant 0 : i32
    return %c0_i32, %c0_i32_0 : i32, i32
  }
  func.func @transform_25(%arg0: i32, %arg1: i32) -> (i32, i32, i32) {
    %c0_i32 = arith.constant 0 : i32
    %c0_i32_0 = arith.constant 0 : i32
    return %arg0, %arg1, %c0_i32 : i32, i32, i32
  }
}

</mosaic_0001>

<bundles_post_ra>
// kernel: tpu_custom_call.1
= control target key start
LH: loop header
LB: loop body
LE: loop exit
PB: predicated region body
PF: predicated region fallthrough
CT: control target
= control target key end

     0   :  { %s6419_s0 = inlined_call_operand.hbm [shape: bf16[2,8,32], index: 0, kind: input, shape index: {}]   ;;  %s6420_s1 = inlined_call_operand.hbm [shape: bf16[2,12,32], index: 1, kind: input, shape index: {}]   ;;  %s6421_s2 = inlined_call_operand.hbm [shape: f32[2,1,12], index: 2, kind: input, shape index: {}]   ;;  %s6422_s3 = inlined_call_operand.hbm [shape: bf16[32,32], index: 3, kind: input, shape index: {}]   ;;  %s6423_s4 = inlined_call_operand.hbm [shape: f32[1,32], index: 4, kind: input, shape index: {}]   ;;  %s6424_s5 = inlined_call_operand.hbm [shape: bf16[32,64], index: 5, kind: input, shape index: {}]   ;;  %s6425_s6 = inlined_call_operand.hbm [shape: f32[1,64], index: 6, kind: input, shape index: {}]   ;;  %s6426_s7 = inlined_call_operand.hbm [shape: bf16[32,32], index: 7, kind: input, shape index: {}]   ;;  %s6427_s8 = inlined_call_operand.hbm [shape: f32[1,32], index: 8, kind: input, shape index: {}]   ;;  %s6428_s9 = inlined_call_operand.hbm [shape: f32[1,32], index: 9, kind: input, shape index: {}]   ;;  %s6429_s10 = inlined_call_operand.hbm [shape: f32[1,32], index: 10, kind: input, shape index: {}]   ;;  %s6430_s11 = inlined_call_operand.hbm [shape: bf16[32,32], index: 11, kind: input, shape index: {}]   ;;  %s6431_s12 = inlined_call_operand.hbm [shape: f32[1,32], index: 12, kind: input, shape index: {}]   ;;  %s6432_s13 = inlined_call_operand.hbm [shape: bf16[32,64], index: 13, kind: input, shape index: {}]   ;;  %s6433_s14 = inlined_call_operand.hbm [shape: f32[1,64], index: 14, kind: input, shape index: {}]   ;;  %s6434_s15 = inlined_call_operand.hbm [shape: bf16[32,32], index: 15, kind: input, shape index: {}]   ;;  %s6435_s16 = inlined_call_operand.hbm [shape: f32[1,32], index: 16, kind: input, shape index: {}]   ;;  %s6436_s17 = inlined_call_operand.hbm [shape: f32[1,32], index: 17, kind: input, shape index: {}]   ;;  %s6437_s18 = inlined_call_operand.hbm [shape: f32[1,32], index: 18, kind: input, shape index: {}]   ;;  %s6438_s19 = inlined_call_operand.hbm [shape: bf16[32,64], index: 19, kind: input, shape index: {}]   ;;  %s6439_s20 = inlined_call_operand.hbm [shape: f32[1,64], index: 20, kind: input, shape index: {}]   ;;  %s6440_s21 = inlined_call_operand.hbm [shape: bf16[64,32], index: 21, kind: input, shape index: {}]   ;;  %s6441_s22 = inlined_call_operand.hbm [shape: f32[1,32], index: 22, kind: input, shape index: {}]   ;;  %s6442_s23 = inlined_call_operand.hbm [shape: f32[1,32], index: 23, kind: input, shape index: {}]   ;;  %s6443_s24 = inlined_call_operand.hbm [shape: f32[1,32], index: 24, kind: input, shape index: {}]   ;;  %s6444_s25 = inlined_call_operand.hbm [shape: bf16[2,8,32], index: 25, kind: output, shape index: {}]  }
   0x1   :  { %6495 = sst [smem:[#allocation63_spill]] %s6419_s0 }
   0x2   :  { %6496 = sst [smem:[#allocation64_spill]] %s6420_s1 }
   0x3   :  { %6497 = sst [smem:[#allocation65_spill]] %s6421_s2 }
   0x4   :  { %6498 = sst [smem:[#allocation66_spill]] %s6422_s3 }
   0x5   :  { %6499 = sst [smem:[#allocation67_spill]] %s6423_s4 }
   0x6   :  { %6500 = sst [smem:[#allocation68_spill]] %s6424_s5 }
   0x7   :  { %6501 = sst [smem:[#allocation69_spill]] %s6425_s6 }
   0x8   :  { %6502 = sst [smem:[#allocation70_spill]] %s6426_s7 }
   0x9   :  { %6503 = sst [smem:[#allocation71_spill]] %s6427_s8 }
   0xa   :  { %6504 = sst [smem:[#allocation72_spill]] %s6428_s9 }
   0xb   :  { %6505 = sst [smem:[#allocation73_spill]] %s6429_s10 }
   0xc   :  { %6506 = sst [smem:[#allocation74_spill]] %s6430_s11 }
   0xd   :  { %6507 = sst [smem:[#allocation75_spill]] %s6431_s12 }
   0xe   :  { %6508 = sst [smem:[#allocation76_spill]] %s6432_s13 }
   0xf   :  { %6509 = sst [smem:[#allocation77_spill]] %s6433_s14 }
  0x10   :  { %6510 = sst [smem:[#allocation78_spill]] %s6434_s15 }
  0x11   :  { %6511 = sst [smem:[#allocation79_spill]] %s6435_s16 }
  0x12   :  { %6512 = sst [smem:[#allocation80_spill]] %s6436_s17 }
  0x13   :  { %6513 = sst [smem:[#allocation81_spill]] %s6437_s18 }
  0x14   :  { %6514 = sst [smem:[#allocation82_spill]] %s6438_s19 }
  0x15   :  { %6515 = sst [smem:[#allocation83_spill]] %s6439_s20 }
  0x16   :  { %6516 = sst [smem:[#allocation84_spill]] %s6440_s21 }
  0x17   :  { %6517 = sst [smem:[#allocation85_spill]] %s6441_s22 }
  0x18   :  { %6518 = sst [smem:[#allocation86_spill]] %s6442_s23 }
  0x19   :  { %6519 = sst [smem:[#allocation87_spill]] %s6443_s24 }
  0x1a   :  { %6520 = sst [smem:[#allocation88_spill]] %s6444_s25 }
  0x1b   :  { %30 = vsyncpa [#allocation7], 0 }
  0x1c   :  { %32 = vsyncpa [#allocation7 + $0x1], 0 }
  0x1d   :  { %33 = vsyncpa [#allocation10], 0 }
  0x1e   :  { %35 = vsyncpa [#allocation10 + $0x1], 0 }
  0x1f   :  { %36 = vsyncpa [#allocation13], 0 }
  0x20   :  { %37 = vsyncpa [#allocation16], 0 }
  0x21   :  { %38 = vsyncpa [#allocation19], 0 }
  0x22   :  { %39 = vsyncpa [#allocation22], 0 }
  0x23   :  { %40 = vsyncpa [#allocation25], 0 }
  0x24   :  { %41 = vsyncpa [#allocation28], 0 }
  0x25   :  { %42 = vsyncpa [#allocation31], 0 }
  0x26   :  { %43 = vsyncpa [#allocation34], 0 }
  0x27   :  { %44 = vsyncpa [#allocation37], 0 }
  0x28   :  { %45 = vsyncpa [#allocation40], 0 }
  0x29   :  { %46 = vsyncpa [#allocation43], 0 }
  0x2a   :  { %47 = vsyncpa [#allocation8], 0 }
  0x2b   :  { %49 = vsyncpa [#allocation8 + $0x1], 0  ;;  %s5240_s29 = smov 0   ;;  %s5242_s2 = smov 0  }
  0x2c   :  { %s5244_s6 = smov 0   ;;  %s5246_s30 = smov 0  }
  0x2d   :  { %s5248_s7 = smov 0   ;;  %s5250_s3 = smov 0  }
  0x2e LB: > { %6521 = sst [smem:[#allocation60_spill]] %s5005_s30  ;;  %s5271_s26 = sadd.s32 4294967295, %s5013_s3   ;;  %s5013_s3 = sphi %s5250_s3, %s55_s3   ;;  %s5009_s7 = sphi %s5248_s7, %s6621_s7   ;;  %s5005_s30 = sphi %s5246_s30, %s6620_s30   ;;  %s5001_s6 = sphi %s5244_s6, %s6619_s6   ;;  %s4997_s2 = sphi %s5242_s2, %s6618_s2   ;;  %s4993_s29 = sphi %s5240_s29, %s6617_s29  }
  0x2f   : > { %6522 = sst [smem:[#allocation61_spill]] %s5271_s26  ;;  %p3287_p0 = scmp.ge.s32.totalorder %s5013_s3, 1 }
  0x30   : > { %p6466_p1 = scmp.eq.s32.totalorder %s5271_s26, 0  ;;  %p640_p2 = scmp.lt.s32.totalorder %s5013_s3, 3 }
  0x31   : > { %s5067_s8 = smov [#allocation12]   ;;  %s5068_s28 = smov [#allocation15]  }
  0x32   : > { %p5276_p3 = pnand %p3287_p0, %p640_p2  ;;  %s652_s27 = sshll.u32 %s5067_s8, 4  ;;  %s5280_s27 = int_to_ptr.vmem [resolvable:$true] %s652_s27 }
  0x33   : > { %s676_s9 = sshll.u32 %s5068_s28, 4  ;;  %s5069_s5 = smov [#allocation18]   ;;  %s5291_s9 = int_to_ptr.vmem [resolvable:$true] %s676_s9 }
  0x34   : > { %s6523_s1 = scalar_select %p5276_p3, 1, 0 }
  0x35   : > { %p3740_p4 = pneg %p5276_p3  ;;  %s5293_s0 = sshll.u32 %s5069_s5, 4  ;;  %s701_s0 = int_to_ptr.vmem [resolvable:$true] %s5293_s0 }
  0x36   : > { %6524 = sst [smem:[#allocation62_spill]] %s6523_s1  ;;  %s6526_s30 = sld [smem:[#allocation66_spill]] }
  0x37   : > { %p5287_p6 = pnand %p3740_p4, %p6466_p1 }
  0x39   : > { %s6525_s4 = scalar_select %p5287_p6, 1, 0 }
  0x3a   : > { %p5303_p8 = pneg %p5287_p6 }
  0x3c   : > { %s6527_s24 = smov %s6526_s30  ;;  %s4125_s22 = scalar_lea.hbm %s6526_s30, 256 }
  0x3d   : > { %p4126_p7 = scmp.ne.s32.totalorder %s6527_s24, %s4125_s22  ;;  %p4132_p11 = scmp.lt.u32.totalorder %s4125_s22, %s6527_s24 }
  0x3e   : > { %s6528_s18 = scalar_select %p5303_p8, 1, 0 }
  0x3f   : > { %p4128_p9 = pnand %p5303_p8, %p4126_p7 }
  0x41   : > { %p4129_p10 = pneg %p4128_p9 }
  0x43   : > { %p4134_p12 = pnand %p4132_p11, %p4129_p10 }
  0x45   : > { %4137 = shalt.err (!%p4134_p12)
}
  0x46   : > { %s4138_s20 = scalar_lea.vmem %s5280_s27, 256  ;;  %p4146_p4 = scmp.lt.s32.totalorder %s5280_s27, %s5280_s27 }
  0x47   : > { %p4139_p13 = scmp.ne.s32.totalorder %s5280_s27, %s4138_s20  ;;  %p4147_p5 = scmp.lt.s32.totalorder %s4138_s20, %s4138_s20 }
  0x49   : > { %p4141_p0 = pnand %p4139_p13, %p5303_p8  ;;  %p4148_p7 = por %p4147_p5, %p4146_p4 }
  0x4b   : > { %p4142_p2 = pneg %p4141_p0 }
  0x4d   : > { %p4149_p9 = pnand %p4148_p7, %p4142_p2 }
  0x4f   : > { %4152 = shalt.err (!%p4149_p9)
}
  0x50   : > { %s6472_s25 = smov 64   ;;  %s6473_s22 = smov 4  }
  0x51   : > { %3743 = dma.hbm_to_vmem [thread:$0]  (!%p5287_p6), %s6527_s24, 256, %s5280_s27, [#allocation13], %s6472_s25, %s6472_s25, %s6473_s22  }
  0x52   : > { %s6529_s5 = sld [smem:[#allocation68_spill]] }
  0x58   : > { %s4153_s20 = scalar_lea.hbm %s6529_s5, 256 }
  0x59   : > { %p4154_p5 = scmp.ne.s32.totalorder %s6529_s5, %s4153_s20  ;;  %p4160_p12 = scmp.lt.u32.totalorder %s4153_s20, %s6529_s5 }
  0x5b   : > { %p4156_p10 = pnand %p4154_p5, %p5303_p8 }
  0x5d   : > { %p4157_p11 = pneg %p4156_p10 }
  0x5f   : > { %p4162_p13 = pnand %p4160_p12, %p4157_p11 }
  0x61   : > { %4165 = shalt.err (!%p4162_p13)
}
  0x62   : > { %s4166_s27 = scalar_lea.vmem %s5291_s9, 256  ;;  %p4174_p7 = scmp.lt.s32.totalorder %s5291_s9, %s5291_s9 }
  0x63   : > { %p4167_p0 = scmp.ne.s32.totalorder %s5291_s9, %s4166_s27  ;;  %p4175_p9 = scmp.lt.s32.totalorder %s4166_s27, %s4166_s27 }
  0x65   : > { %p4169_p2 = pnand %p4167_p0, %p5303_p8  ;;  %p4176_p5 = por %p4175_p9, %p4174_p7 }
  0x67   : > { %p4170_p4 = pneg %p4169_p2 }
  0x69   : > { %p4177_p10 = pnand %p4176_p5, %p4170_p4 }
  0x6b   : > { %4180 = shalt.err (!%p4177_p10)
}
  0x6c   : > { %3749 = dma.hbm_to_vmem [thread:$0]  (!%p5287_p6), %s6529_s5, 256, %s5291_s9, [#allocation16], %s6472_s25, %s6472_s25, %s6473_s22  }
  0x6d   : > { %s6530_s30 = sld [smem:[#allocation70_spill]] }
  0x73   : > { %s6531_s1 = smov %s6530_s30  ;;  %s4181_s8 = scalar_lea.hbm %s6530_s30, 256 }
  0x74   : > { %p4182_p11 = scmp.ne.s32.totalorder %s6531_s1, %s4181_s8  ;;  %p4188_p0 = scmp.lt.u32.totalorder %s4181_s8, %s6531_s1 }
  0x76   : > { %p4184_p12 = pnand %p4182_p11, %p5303_p8 }
  0x78   : > { %p4185_p13 = pneg %p4184_p12 }
  0x7a   : > { %p4190_p2 = pnand %p4188_p0, %p4185_p13 }
  0x7c   : > { %4193 = shalt.err (!%p4190_p2)
}
  0x7d   : > { %s4194_s10 = scalar_lea.vmem %s701_s0, 256  ;;  %p4202_p5 = scmp.lt.s32.totalorder %s701_s0, %s701_s0 }
  0x7e   : > { %p4195_p4 = scmp.ne.s32.totalorder %s701_s0, %s4194_s10  ;;  %p4203_p10 = scmp.lt.s32.totalorder %s4194_s10, %s4194_s10 }
  0x80   : > { %p4197_p7 = pnand %p4195_p4, %p5303_p8  ;;  %p4204_p1 = por %p4203_p10, %p4202_p5 }
  0x82   : > { %p4198_p9 = pneg %p4197_p7 }
  0x84   : > { %p4205_p3 = pnand %p4204_p1, %p4198_p9 }
  0x86   : > { %4208 = shalt.err (!%p4205_p3)
}
  0x87   : > { %3755 = dma.hbm_to_vmem [thread:$0]  (!%p5287_p6), %s6531_s1, 256, %s701_s0, [#allocation19], %s6472_s25, %s6472_s25, %s6473_s22  }
  0x88   : > { %s5072_s12 = smov [#allocation21]   ;;  %s5073_s16 = smov [#allocation24]  }
  0x89   : > { %s725_s14 = sshll.u32 %s5072_s12, 4  ;;  %s746_s30 = sshll.u32 %s5073_s16, 4  ;;  %s726_s14 = int_to_ptr.vmem [resolvable:$true] %s725_s14  ;;  %s747_s30 = int_to_ptr.vmem [resolvable:$true] %s746_s30 }
  0x8a   : > { %s6532_s20 = sld [smem:[#allocation72_spill]] }
  0x90   : > { %s4209_s27 = scalar_lea.hbm %s6532_s20, 16 }
  0x91   : > { %p4210_p1 = scmp.ne.s32.totalorder %s6532_s20, %s4209_s27  ;;  %p4216_p12 = scmp.lt.u32.totalorder %s4209_s27, %s6532_s20 }
  0x93   : > { %p4212_p3 = pnand %p4210_p1, %p5303_p8 }
  0x95   : > { %p4213_p11 = pneg %p4212_p3 }
  0x97   : > { %p4218_p13 = pnand %p4216_p12, %p4213_p11 }
  0x99   : > { %4221 = shalt.err (!%p4218_p13)
}
  0x9a   : > { %s4222_s0 = scalar_lea.vmem %s726_s14, 16  ;;  %s4229_s9 = scalar_lea.vmem %s726_s14, 32 }
  0x9b   : > { %p4223_p0 = scmp.ne.s32.totalorder %s726_s14, %s4222_s0  ;;  %p4230_p7 = scmp.lt.s32.totalorder %s726_s14, %s726_s14 }
  0x9c   : > { %p4231_p9 = scmp.lt.s32.totalorder %s4229_s9, %s4222_s0 }
  0x9d   : > { %p4225_p2 = pnand %p4223_p0, %p5303_p8 }
  0x9e   : > { %p4232_p5 = por %p4231_p9, %p4230_p7 }
  0x9f   : > { %p4226_p4 = pneg %p4225_p2 }
  0xa1   : > { %p4233_p10 = pnand %p4232_p5, %p4226_p4 }
  0xa3   : > { %4236 = shalt.err (!%p4233_p10)
}
  0xa4   : > { %3761 = dma.hbm_to_vmem [thread:$0]  (!%p5287_p6), %s6532_s20, 16, %s726_s14, [#allocation22]  }
  0xa5   : > { %s6533_s11 = sld [smem:[#allocation74_spill]] }
  0xab   : > { %s4237_s8 = scalar_lea.hbm %s6533_s11, 256 }
  0xac   : > { %p4238_p1 = scmp.ne.s32.totalorder %s6533_s11, %s4237_s8  ;;  %p4244_p12 = scmp.lt.u32.totalorder %s4237_s8, %s6533_s11 }
  0xae   : > { %p4240_p3 = pnand %p4238_p1, %p5303_p8 }
  0xb0   : > { %p4241_p11 = pneg %p4240_p3 }
  0xb2   : > { %p4246_p13 = pnand %p4244_p12, %p4241_p11 }
  0xb4   : > { %4249 = shalt.err (!%p4246_p13)
}
  0xb5   : > { %s4250_s0 = scalar_lea.vmem %s747_s30, 256  ;;  %p4258_p7 = scmp.lt.s32.totalorder %s747_s30, %s747_s30 }
  0xb6   : > { %p4251_p0 = scmp.ne.s32.totalorder %s747_s30, %s4250_s0  ;;  %p4259_p9 = scmp.lt.s32.totalorder %s4250_s0, %s4250_s0 }
  0xb8   : > { %p4253_p2 = pnand %p4251_p0, %p5303_p8  ;;  %p4260_p5 = por %p4259_p9, %p4258_p7 }
  0xba   : > { %p4254_p4 = pneg %p4253_p2 }
  0xbc   : > { %p4261_p10 = pnand %p4260_p5, %p4254_p4 }
  0xbe   : > { %4264 = shalt.err (!%p4261_p10)
}
  0xbf   : > { %3767 = dma.hbm_to_vmem [thread:$0]  (!%p5287_p6), %s6533_s11, 256, %s747_s30, [#allocation25], %s6472_s25, %s6472_s25, %s6473_s22  }
  0xc0   : > { %s5074_s5 = smov [#allocation27]   ;;  %s5075_s26 = smov [#allocation30]  }
  0xc1   : > { %s770_s12 = sshll.u32 %s5074_s5, 4  ;;  %s794_s16 = sshll.u32 %s5075_s26, 4  ;;  %s771_s12 = int_to_ptr.vmem [resolvable:$true] %s770_s12  ;;  %s795_s16 = int_to_ptr.vmem [resolvable:$true] %s794_s16 }
  0xc2   : > { %s6534_s13 = sld [smem:[#allocation76_spill]] }
  0xc8   : > { %s4265_s27 = scalar_lea.hbm %s6534_s13, 256 }
  0xc9   : > { %p4266_p1 = scmp.ne.s32.totalorder %s6534_s13, %s4265_s27  ;;  %p4272_p12 = scmp.lt.u32.totalorder %s4265_s27, %s6534_s13 }
  0xcb   : > { %p4268_p3 = pnand %p4266_p1, %p5303_p8 }
  0xcd   : > { %p4269_p11 = pneg %p4268_p3 }
  0xcf   : > { %p4274_p13 = pnand %p4272_p12, %p4269_p11 }
  0xd1   : > { %4277 = shalt.err (!%p4274_p13)
}
  0xd2   : > { %s4278_s30 = scalar_lea.vmem %s771_s12, 256  ;;  %p4286_p7 = scmp.lt.s32.totalorder %s771_s12, %s771_s12 }
  0xd3   : > { %p4279_p0 = scmp.ne.s32.totalorder %s771_s12, %s4278_s30  ;;  %p4287_p9 = scmp.lt.s32.totalorder %s4278_s30, %s4278_s30 }
  0xd5   : > { %p4281_p2 = pnand %p4279_p0, %p5303_p8  ;;  %p4288_p5 = por %p4287_p9, %p4286_p7 }
  0xd7   : > { %p4282_p4 = pneg %p4281_p2 }
  0xd9   : > { %p4289_p10 = pnand %p4288_p5, %p4282_p4 }
  0xdb   : > { %4292 = shalt.err (!%p4289_p10)
}
  0xdc   : > { %3773 = dma.hbm_to_vmem [thread:$0]  (!%p5287_p6), %s6534_s13, 256, %s771_s12, [#allocation28], %s6472_s25, %s6472_s25, %s6473_s22  }
  0xdd   : > { %s6535_s15 = sld [smem:[#allocation78_spill]] }
  0xe3   : > { %s4293_s28 = scalar_lea.hbm %s6535_s15, 256 }
  0xe4   : > { %p4294_p1 = scmp.ne.s32.totalorder %s6535_s15, %s4293_s28  ;;  %p4300_p12 = scmp.lt.u32.totalorder %s4293_s28, %s6535_s15 }
  0xe6   : > { %p4296_p3 = pnand %p4294_p1, %p5303_p8 }
  0xe8   : > { %p4297_p11 = pneg %p4296_p3 }
  0xea   : > { %p4302_p13 = pnand %p4300_p12, %p4297_p11 }
  0xec   : > { %4305 = shalt.err (!%p4302_p13)
}
  0xed   : > { %s4306_s14 = scalar_lea.vmem %s795_s16, 256  ;;  %p4314_p7 = scmp.lt.s32.totalorder %s795_s16, %s795_s16 }
  0xee   : > { %p4307_p0 = scmp.ne.s32.totalorder %s795_s16, %s4306_s14  ;;  %p4315_p9 = scmp.lt.s32.totalorder %s4306_s14, %s4306_s14 }
  0xf0   : > { %p4309_p2 = pnand %p4307_p0, %p5303_p8  ;;  %p4316_p5 = por %p4315_p9, %p4314_p7 }
  0xf2   : > { %p4310_p4 = pneg %p4309_p2 }
  0xf4   : > { %p4317_p10 = pnand %p4316_p5, %p4310_p4 }
  0xf6   : > { %4320 = shalt.err (!%p4317_p10)
}
  0xf7   : > { %3779 = dma.hbm_to_vmem [thread:$0]  (!%p5287_p6), %s6535_s15, 256, %s795_s16, [#allocation31], %s6472_s25, %s6472_s25, %s6473_s22  }
  0xf8   : > { %s5076_s9 = smov [#allocation33]   ;;  %s5077_s26 = smov [#allocation36]  }
  0xf9   : > { %s819_s5 = sshll.u32 %s5076_s9, 4  ;;  %s840_s8 = sshll.u32 %s5077_s26, 4  ;;  %s820_s5 = int_to_ptr.vmem [resolvable:$true] %s819_s5  ;;  %s841_s8 = int_to_ptr.vmem [resolvable:$true] %s840_s8 }
  0xfa   : > { %s6536_s17 = sld [smem:[#allocation80_spill]] }
 0x100   : > { %s4321_s10 = scalar_lea.hbm %s6536_s17, 16 }
 0x101   : > { %p4322_p1 = scmp.ne.s32.totalorder %s6536_s17, %s4321_s10  ;;  %p4328_p12 = scmp.lt.u32.totalorder %s4321_s10, %s6536_s17 }
 0x103   : > { %p4324_p3 = pnand %p4322_p1, %p5303_p8 }
 0x105   : > { %p4325_p11 = pneg %p4324_p3 }
 0x107   : > { %p4330_p13 = pnand %p4328_p12, %p4325_p11 }
 0x109   : > { %4333 = shalt.err (!%p4330_p13)
}
 0x10a   : > { %s4334_s16 = scalar_lea.vmem %s820_s5, 16  ;;  %s4341_s30 = scalar_lea.vmem %s820_s5, 32 }
 0x10b   : > { %p4335_p0 = scmp.ne.s32.totalorder %s820_s5, %s4334_s16  ;;  %p4342_p7 = scmp.lt.s32.totalorder %s820_s5, %s820_s5 }
 0x10c   : > { %p4343_p9 = scmp.lt.s32.totalorder %s4341_s30, %s4334_s16 }
 0x10d   : > { %p4337_p2 = pnand %p4335_p0, %p5303_p8 }
 0x10e   : > { %p4344_p5 = por %p4343_p9, %p4342_p7 }
 0x10f   : > { %p4338_p4 = pneg %p4337_p2 }
 0x111   : > { %p4345_p10 = pnand %p4344_p5, %p4338_p4 }
 0x113   : > { %4348 = shalt.err (!%p4345_p10)
}
 0x114   : > { %3785 = dma.hbm_to_vmem [thread:$0]  (!%p5287_p6), %s6536_s17, 16, %s820_s5, [#allocation34]  }
 0x115   : > { %s6537_s19 = sld [smem:[#allocation82_spill]] }
 0x11b   : > { %s4349_s10 = scalar_lea.hbm %s6537_s19, 256 }
 0x11c   : > { %p4350_p1 = scmp.ne.s32.totalorder %s6537_s19, %s4349_s10  ;;  %p4356_p12 = scmp.lt.u32.totalorder %s4349_s10, %s6537_s19 }
 0x11e   : > { %p4352_p3 = pnand %p4350_p1, %p5303_p8 }
 0x120   : > { %p4353_p11 = pneg %p4352_p3 }
 0x122   : > { %p4358_p13 = pnand %p4356_p12, %p4353_p11 }
 0x124   : > { %4361 = shalt.err (!%p4358_p13)
}
 0x125   : > { %s4362_s16 = scalar_lea.vmem %s841_s8, 256  ;;  %p4370_p7 = scmp.lt.s32.totalorder %s841_s8, %s841_s8 }
 0x126   : > { %p4363_p0 = scmp.ne.s32.totalorder %s841_s8, %s4362_s16  ;;  %p4371_p9 = scmp.lt.s32.totalorder %s4362_s16, %s4362_s16 }
 0x128   : > { %p4365_p2 = pnand %p4363_p0, %p5303_p8  ;;  %p4372_p5 = por %p4371_p9, %p4370_p7 }
 0x12a   : > { %p4366_p4 = pneg %p4365_p2 }
 0x12c   : > { %p4373_p10 = pnand %p4372_p5, %p4366_p4 }
 0x12e   : > { %4376 = shalt.err (!%p4373_p10)
}
 0x12f   : > { %3791 = dma.hbm_to_vmem [thread:$0]  (!%p5287_p6), %s6537_s19, 256, %s841_s8, [#allocation37], %s6472_s25, %s6472_s25, %s6473_s22  }
 0x130   : > { %s5078_s9 = smov [#allocation39]   ;;  %s5079_s28 = smov [#allocation42]  }
 0x131   : > { %s864_s26 = sshll.u32 %s5078_s9, 4  ;;  %s889_s27 = sshll.u32 %s5079_s28, 4  ;;  %s865_s26 = int_to_ptr.vmem [resolvable:$true] %s864_s26  ;;  %s890_s27 = int_to_ptr.vmem [resolvable:$true] %s889_s27 }
 0x132   : > { %s6538_s21 = sld [smem:[#allocation84_spill]] }
 0x138   : > { %s4377_s0 = scalar_lea.hbm %s6538_s21, 512 }
 0x139   : > { %p4378_p1 = scmp.ne.s32.totalorder %s6538_s21, %s4377_s0  ;;  %p4384_p12 = scmp.lt.u32.totalorder %s4377_s0, %s6538_s21 }
 0x13b   : > { %p4380_p3 = pnand %p4378_p1, %p5303_p8 }
 0x13d   : > { %p4381_p11 = pneg %p4380_p3 }
 0x13f   : > { %p4386_p13 = pnand %p4384_p12, %p4381_p11 }
 0x141   : > { %4389 = shalt.err (!%p4386_p13)
}
 0x142   : > { %s4390_s8 = scalar_lea.vmem %s865_s26, 512  ;;  %p4398_p7 = scmp.lt.s32.totalorder %s865_s26, %s865_s26 }
 0x143   : > { %p4391_p0 = scmp.ne.s32.totalorder %s865_s26, %s4390_s8  ;;  %p4399_p9 = scmp.lt.s32.totalorder %s4390_s8, %s4390_s8 }
 0x145   : > { %p4393_p2 = pnand %p4391_p0, %p5303_p8  ;;  %p4400_p5 = por %p4399_p9, %p4398_p7 }
 0x147   : > { %p4394_p4 = pneg %p4393_p2 }
 0x149   : > { %p4401_p10 = pnand %p4400_p5, %p4394_p4 }
 0x14b   : > { %4404 = shalt.err (!%p4401_p10)
}
 0x14c   : > { %3797 = dma.hbm_to_vmem [thread:$0]  (!%p5287_p6), %s6538_s21, 512, %s865_s26, [#allocation40], %s6472_s25, %s6472_s25, %s6473_s22  }
 0x14d   : > { %s6539_s23 = sld [smem:[#allocation86_spill]] }
 0x153   : > { %s4405_s24 = scalar_lea.hbm %s6539_s23, 16 }
 0x154   : > { %p4406_p1 = scmp.ne.s32.totalorder %s6539_s23, %s4405_s24  ;;  %p4412_p12 = scmp.lt.u32.totalorder %s4405_s24, %s6539_s23 }
 0x156   : > { %p4408_p3 = pnand %p4406_p1, %p5303_p8 }
 0x158   : > { %p4409_p11 = pneg %p4408_p3 }
 0x15a   : > { %p4414_p13 = pnand %p4412_p12, %p4409_p11 }
 0x15c   : > { %4417 = shalt.err (!%p4414_p13)
}
 0x15d   : > { %s4418_s5 = scalar_lea.vmem %s890_s27, 16  ;;  %s4425_s26 = scalar_lea.vmem %s890_s27, 32 }
 0x15e   : > { %p4419_p0 = scmp.ne.s32.totalorder %s890_s27, %s4418_s5  ;;  %p4426_p7 = scmp.lt.s32.totalorder %s890_s27, %s890_s27 }
 0x15f   : > { %p4427_p9 = scmp.lt.s32.totalorder %s4425_s26, %s4418_s5 }
 0x160   : > { %p4421_p2 = pnand %p4419_p0, %p5303_p8 }
 0x161   : > { %p4428_p5 = por %p4427_p9, %p4426_p7 }
 0x162   : > { %p4422_p4 = pneg %p4421_p2 }
 0x164   : > { %p4429_p10 = pnand %p4428_p5, %p4422_p4 }
 0x166   : > { %4432 = shalt.err (!%p4429_p10)
}
 0x167   : > { %s6540_s9 = sld [smem:[#allocation61_spill]]  ;;  %s3286_s28 = sadd.s32 4294967294, %s5013_s3  }
 0x168   : > { %3803 = dma.hbm_to_vmem [thread:$0]  (!%p5287_p6), %s6539_s23, 16, %s890_s27, [#allocation43]  }
 0x169   : > { %s67_s10 = sadd.s32 1, %s5009_s7  ;;  %s74_s24 = sadd.s32 1, %s5001_s6 }
 0x16a   : > { %p69_p1 = scmp.ge.s32.totalorder %s67_s10, 2  ;;  %p81_p3 = scmp.ne.s32.totalorder %s5001_s6, %s4997_s2 }
 0x16b   : > { %p82_p11 = scmp.eq.s32.totalorder %s5013_s3, 0  ;;  %p87_p12 = scmp.ne.s32.totalorder %s4997_s2, %s4993_s29 }
 0x16c   : > { %s6623_s10 = smov (%p69_p1, %s67_s10), 0  ;;  %p633_p9 = scmp.eq.s32.totalorder %s3286_s28, 1 }
 0x16d   : > { %p83_p13 = por %p82_p11, %p81_p3  ;;  %p6541_p0 = scmp.eq.s32.totalorder %s6540_s9, 0 }
 0x16e   : > { %s71_s27 = ssub.s32 %s5009_s7, %s6623_s10  ;;  %p627_p4 = scmp.eq.s32.totalorder %s6540_s9, 1 }
 0x16f   : > { %p5546_p2 = por %p6541_p0, %p87_p12  ;;  %p72_p7 = scmp.eq.s32.totalorder %s71_s27, 0 }
 0x170   : > { %p5553_p5 = por %p627_p4, %p81_p3  ;;  %p3843_p10 = scmp.lt.s32.totalorder %s5013_s3, 2 }
 0x171   : > { %s6542_s0 = scalar_select %p5546_p2, 1, 0 }
 0x172   : > { %s6543_s14 = scalar_select %p5553_p5, 1, 0 }
 0x173   : > { %s5559_s12 = scalar_select %p72_p7, %s5001_s6, %s74_s24  }
 0x174   : > { %p5561_p1 = por %p633_p9, %p87_p12  ;;  %s5566_s5 = sand.u32 1, %s5001_s6  }
 0x175   : > { %p5568_p11 = pnand %p3843_p10, %p83_p13  ;;  %s929_s8 = sand.u32 1, %s5013_s3  }
 0x176   : > { %s6544_s16 = scalar_select %p5561_p1, 1, 0 }
 0x177   : > { %s6545_s26 = scalar_select %p5568_p11, 1, 0 }
 0x178   : > { %s3313_s30 = sshll.u32 %s5566_s5, 3  ;;  %s3418_s9 = sshll.u32 %s5009_s7, 7 }
 0x179   : > { %s933_s28 = scalar_lea.vmem [#allocation9], %s3313_s30  ;;  %s6546_s22 = sld [smem:[#allocation64_spill]] }
 0x17a   : > { %s940_s27 = sshll.u32 %s933_s28, 4  ;;  %s5582_s11 = scalar_lea.sflag [#allocation10], %s929_s8  ;;  %s5580_s27 = int_to_ptr.vmem [resolvable:$true] %s940_s27 }
 0x17b   : > { %p5588_p12 = pneg %p5568_p11 }
 0x17d   : > { %s6547_s15 = scalar_select %p5588_p12, 1, 0 }
 0x17f   : > { %s5578_s1 = scalar_lea.hbm %s6546_s22, %s3418_s9  ;;  %s4438_s9 = scalar_lea.hbm %s6546_s22, 256 }
 0x180   : > { %s4433_s13 = scalar_lea.hbm %s5578_s1, 128  ;;  %p4439_p4 = scmp.lt.u32.totalorder %s5578_s1, %s6546_s22 }
 0x181   : > { %p4434_p3 = scmp.ne.s32.totalorder %s5578_s1, %s4433_s13  ;;  %p4440_p7 = scmp.lt.u32.totalorder %s4438_s9, %s4433_s13 }
 0x182   : > { %p4442_p10 = scmp.lt.u32.totalorder %s4433_s13, %s5578_s1 }
 0x183   : > { %p4436_p13 = pnand %p5588_p12, %p4434_p3  ;;  %p4441_p9 = por %p4440_p7, %p4439_p4 }
 0x185   : > { %p4437_p0 = pneg %p4436_p13  ;;  %p4443_p1 = por %p4442_p10, %p4441_p9 }
 0x187   : > { %p4444_p5 = pnand %p4443_p1, %p4437_p0 }
 0x189   : > { %4447 = shalt.err (!%p4444_p5)
}
 0x18a   : > { %s4448_s8 = scalar_lea.vmem %s5580_s27, 128  ;;  %s5080_s25 = smov [#allocation9]  }
 0x18b   : > { %p4449_p3 = scmp.ne.s32.totalorder %s5580_s27, %s4448_s8  ;;  %s4453_s30 = sshll.u32 %s5080_s25, 4  ;;  %s4454_s30 = int_to_ptr.vmem [resolvable:$false] %s4453_s30 }
 0x18c   : > { %s4455_s28 = scalar_lea.vmem %s4454_s30, 256  ;;  %p4456_p6 = scmp.lt.s32.totalorder %s5580_s27, %s4454_s30 }
 0x18d   : > { %p4451_p13 = pnand %p4449_p3, %p5588_p12  ;;  %p4457_p8 = scmp.lt.s32.totalorder %s4455_s28, %s4448_s8 }
 0x18f   : > { %p4452_p2 = pneg %p4451_p13  ;;  %p4458_p4 = por %p4457_p8, %p4456_p6 }
 0x191   : > { %p4459_p7 = pnand %p4458_p4, %p4452_p2 }
 0x193   : > { %4462 = shalt.err (!%p4459_p7)
}
 0x194   : > { %s6548_s13 = smov 4   ;;  %s6549_s9 = smov 64  }
 0x195   : > { %3813 = dma.hbm_to_vmem [thread:$0]  (!%p5568_p11), %s5578_s1, 128, %s5580_s27, %s5582_s11, %s6549_s9, %s6549_s9, %s6548_s13  }
 0x196   : > { %s5081_s24 = smov [#allocation14]   ;;  %s5082_s25 = smov [#allocation17]  }
 0x197   : > { %s666_s17 = sshll.u32 %s5081_s24, 4  ;;  %s690_s19 = sshll.u32 %s5082_s25, 4  ;;  %s667_s17 = int_to_ptr.vmem [resolvable:$true] %s666_s17  ;;  %s5615_s19 = int_to_ptr.vmem [resolvable:$true] %s690_s19 }
 0x198   : > { %s6550_s28 = sld [smem:[#allocation67_spill]]  ;;  %p6551_p8 = scmp.ne.s32.totalorder %s6528_s18, 0 }
 0x19e   : > { %s4463_s20 = scalar_lea.hbm %s6550_s28, 16 }
 0x19f   : > { %p4464_p6 = scmp.ne.s32.totalorder %s6550_s28, %s4463_s20  ;;  %p4470_p1 = scmp.lt.u32.totalorder %s4463_s20, %s6550_s28 }
 0x1a1   : > { %p4466_p2 = pnand %p4464_p6, %p6551_p8 }
 0x1a3   : > { %p4467_p5 = pneg %p4466_p2 }
 0x1a5   : > { %p4472_p0 = pnand %p4470_p1, %p4467_p5 }
 0x1a7   : > { %4475 = shalt.err (!%p4472_p0)
}
 0x1a8   : > { %s4476_s27 = scalar_lea.vmem %s667_s17, 16  ;;  %s4483_s13 = scalar_lea.vmem %s667_s17, 32 }
 0x1a9   : > { %p4477_p9 = scmp.ne.s32.totalorder %s667_s17, %s4476_s27  ;;  %p4484_p13 = scmp.lt.s32.totalorder %s667_s17, %s667_s17 }
 0x1aa   : > { %p4485_p4 = scmp.lt.s32.totalorder %s4483_s13, %s4476_s27 }
 0x1ab   : > { %p4479_p10 = pnand %p4477_p9, %p6551_p8 }
 0x1ac   : > { %p4486_p7 = por %p4485_p4, %p4484_p13 }
 0x1ad   : > { %p4480_p3 = pneg %p4479_p10 }
 0x1af   : > { %p4487_p11 = pnand %p4486_p7, %p4480_p3 }
 0x1b1   : > { %4490 = shalt.err (!%p4487_p11)
}
 0x1b2   : > { %p6552_p6 = scmp.ne.s32.totalorder %s6525_s4, 0  ;;  %s6553_s9 = sld [smem:[#allocation69_spill]] }
 0x1b4   : > { %3746 = dma.hbm_to_vmem [thread:$0]  (!%p6552_p6), %s6550_s28, 16, %s667_s17, [#allocation13]  }
 0x1b8   : > { %s4491_s24 = scalar_lea.hbm %s6553_s9, 16 }
 0x1b9   : > { %p4492_p2 = scmp.ne.s32.totalorder %s6553_s9, %s4491_s24  ;;  %p4498_p11 = scmp.lt.u32.totalorder %s4491_s24, %s6553_s9 }
 0x1bb   : > { %p4494_p5 = pnand %p4492_p2, %p6551_p8 }
 0x1bd   : > { %p4495_p1 = pneg %p4494_p5 }
 0x1bf   : > { %p4500_p0 = pnand %p4498_p11, %p4495_p1 }
 0x1c1   : > { %4503 = shalt.err (!%p4500_p0)
}
 0x1c2   : > { %s4504_s17 = scalar_lea.vmem %s5615_s19, 16  ;;  %s4511_s27 = scalar_lea.vmem %s5615_s19, 32 }
 0x1c3   : > { %p4505_p9 = scmp.ne.s32.totalorder %s5615_s19, %s4504_s17  ;;  %p4512_p13 = scmp.lt.s32.totalorder %s5615_s19, %s5615_s19 }
 0x1c4   : > { %p4513_p4 = scmp.lt.s32.totalorder %s4511_s27, %s4504_s17 }
 0x1c5   : > { %p4507_p10 = pnand %p4505_p9, %p6551_p8 }
 0x1c6   : > { %p4514_p7 = por %p4513_p4, %p4512_p13 }
 0x1c7   : > { %p4508_p3 = pneg %p4507_p10 }
 0x1c9   : > { %p4515_p2 = pnand %p4514_p7, %p4508_p3 }
 0x1cb   : > { %4518 = shalt.err (!%p4515_p2)
}
 0x1cc   : > { %3752 = dma.hbm_to_vmem [thread:$0]  (!%p6552_p6), %s6553_s9, 16, %s5615_s19, [#allocation16]  }
 0x1cd   : > { %s5083_s22 = smov [#allocation20]   ;;  %s5084_s20 = smov [#allocation23]  }
 0x1ce   : > { %s714_s23 = sshll.u32 %s5083_s22, 4  ;;  %s736_s24 = sshll.u32 %s5084_s20, 4  ;;  %s715_s23 = int_to_ptr.vmem [resolvable:$true] %s714_s23  ;;  %s5659_s24 = int_to_ptr.vmem [resolvable:$true] %s736_s24 }
 0x1cf   : > { %s6554_s30 = sld [smem:[#allocation71_spill]] }
 0x1d5   : > { %s6555_s1 = smov %s6554_s30  ;;  %s4519_s17 = scalar_lea.hbm %s6554_s30, 16 }
 0x1d6   : > { %p4520_p5 = scmp.ne.s32.totalorder %s6555_s1, %s4519_s17  ;;  %p4526_p0 = scmp.lt.u32.totalorder %s4519_s17, %s6555_s1 }
 0x1d8   : > { %p4522_p1 = pnand %p4520_p5, %p6551_p8 }
 0x1da   : > { %p4523_p11 = pneg %p4522_p1 }
 0x1dc   : > { %p4528_p9 = pnand %p4526_p0, %p4523_p11 }
 0x1de   : > { %4531 = shalt.err (!%p4528_p9)
}
 0x1df   : > { %s4532_s21 = scalar_lea.vmem %s715_s23, 16  ;;  %s4539_s22 = scalar_lea.vmem %s715_s23, 32 }
 0x1e0   : > { %p4533_p10 = scmp.ne.s32.totalorder %s715_s23, %s4532_s21  ;;  %p4540_p4 = scmp.lt.s32.totalorder %s715_s23, %s715_s23 }
 0x1e1   : > { %p4541_p7 = scmp.lt.s32.totalorder %s4539_s22, %s4532_s21 }
 0x1e2   : > { %p4535_p3 = pnand %p4533_p10, %p6551_p8 }
 0x1e3   : > { %p4542_p2 = por %p4541_p7, %p4540_p4 }
 0x1e4   : > { %p4536_p13 = pneg %p4535_p3 }
 0x1e6   : > { %p4543_p12 = pnand %p4542_p2, %p4536_p13 }
 0x1e8   : > { %4546 = shalt.err (!%p4543_p12)
}
 0x1e9   : > { %3758 = dma.hbm_to_vmem [thread:$0]  (!%p6552_p6), %s6555_s1, 16, %s715_s23, [#allocation19]  }
 0x1ea   : > { %s6556_s30 = sld [smem:[#allocation73_spill]] }
 0x1f0   : > { %s6557_s17 = smov %s6556_s30  ;;  %s4547_s27 = scalar_lea.hbm %s6556_s30, 16 }
 0x1f1   : > { %p4548_p5 = scmp.ne.s32.totalorder %s6557_s17, %s4547_s27  ;;  %p4554_p12 = scmp.lt.u32.totalorder %s4547_s27, %s6557_s17 }
 0x1f3   : > { %p4550_p1 = pnand %p4548_p5, %p6551_p8 }
 0x1f5   : > { %p4551_p11 = pneg %p4550_p1 }
 0x1f7   : > { %p4556_p0 = pnand %p4554_p12, %p4551_p11 }
 0x1f9   : > { %4559 = shalt.err (!%p4556_p0)
}
 0x1fa   : > { %s4560_s23 = scalar_lea.vmem %s5659_s24, 16  ;;  %s4567_s28 = scalar_lea.vmem %s5659_s24, 32 }
 0x1fb   : > { %p4561_p9 = scmp.ne.s32.totalorder %s5659_s24, %s4560_s23  ;;  %p4568_p13 = scmp.lt.s32.totalorder %s5659_s24, %s5659_s24 }
 0x1fc   : > { %p4569_p4 = scmp.lt.s32.totalorder %s4567_s28, %s4560_s23 }
 0x1fd   : > { %p4563_p10 = pnand %p4561_p9, %p6551_p8 }
 0x1fe   : > { %p4570_p7 = por %p4569_p4, %p4568_p13 }
 0x1ff   : > { %p4564_p3 = pneg %p4563_p10 }
 0x201   : > { %p4571_p2 = pnand %p4570_p7, %p4564_p3 }
 0x203   : > { %4574 = shalt.err (!%p4571_p2)
}
 0x204   : > { %3764 = dma.hbm_to_vmem [thread:$0]  (!%p6552_p6), %s6557_s17, 16, %s5659_s24, [#allocation22]  }
 0x205   : > { %s5085_s8 = smov [#allocation26]   ;;  %s5086_s27 = smov [#allocation29]  }
 0x206   : > { %s760_s30 = sshll.u32 %s5085_s8, 4  ;;  %s784_s13 = sshll.u32 %s5086_s27, 4  ;;  %s761_s30 = int_to_ptr.vmem [resolvable:$true] %s760_s30  ;;  %s5703_s13 = int_to_ptr.vmem [resolvable:$true] %s784_s13 }
 0x207   : > { %s6558_s22 = sld [smem:[#allocation75_spill]] }
 0x20d   : > { %s4575_s23 = scalar_lea.hbm %s6558_s22, 16 }
 0x20e   : > { %p4576_p5 = scmp.ne.s32.totalorder %s6558_s22, %s4575_s23  ;;  %p4582_p12 = scmp.lt.u32.totalorder %s4575_s23, %s6558_s22 }
 0x210   : > { %p4578_p1 = pnand %p4576_p5, %p6551_p8 }
 0x212   : > { %p4579_p11 = pneg %p4578_p1 }
 0x214   : > { %p4584_p0 = pnand %p4582_p12, %p4579_p11 }
 0x216   : > { %4587 = shalt.err (!%p4584_p0)
}
 0x217   : > { %s4588_s25 = scalar_lea.vmem %s761_s30, 16  ;;  %s4595_s8 = scalar_lea.vmem %s761_s30, 32 }
 0x218   : > { %p4589_p9 = scmp.ne.s32.totalorder %s761_s30, %s4588_s25  ;;  %p4596_p13 = scmp.lt.s32.totalorder %s761_s30, %s761_s30 }
 0x219   : > { %p4597_p4 = scmp.lt.s32.totalorder %s4595_s8, %s4588_s25 }
 0x21a   : > { %p4591_p10 = pnand %p4589_p9, %p6551_p8 }
 0x21b   : > { %p4598_p7 = por %p4597_p4, %p4596_p13 }
 0x21c   : > { %p4592_p3 = pneg %p4591_p10 }
 0x21e   : > { %p4599_p2 = pnand %p4598_p7, %p4592_p3 }
 0x220   : > { %4602 = shalt.err (!%p4599_p2)
}
 0x221   : > { %3770 = dma.hbm_to_vmem [thread:$0]  (!%p6552_p6), %s6558_s22, 16, %s761_s30, [#allocation25]  }
 0x222   : > { %s6559_s23 = sld [smem:[#allocation77_spill]] }
 0x228   : > { %s4603_s28 = scalar_lea.hbm %s6559_s23, 16 }
 0x229   : > { %p4604_p5 = scmp.ne.s32.totalorder %s6559_s23, %s4603_s28  ;;  %p4610_p12 = scmp.lt.u32.totalorder %s4603_s28, %s6559_s23 }
 0x22b   : > { %p4606_p1 = pnand %p4604_p5, %p6551_p8 }
 0x22d   : > { %p4607_p11 = pneg %p4606_p1 }
 0x22f   : > { %p4612_p0 = pnand %p4610_p12, %p4607_p11 }
 0x231   : > { %4615 = shalt.err (!%p4612_p0)
}
 0x232   : > { %s4616_s30 = scalar_lea.vmem %s5703_s13, 16  ;;  %s4623_s1 = scalar_lea.vmem %s5703_s13, 32 }
 0x233   : > { %p4617_p9 = scmp.ne.s32.totalorder %s5703_s13, %s4616_s30  ;;  %p4624_p13 = scmp.lt.s32.totalorder %s5703_s13, %s5703_s13 }
 0x234   : > { %p4625_p4 = scmp.lt.s32.totalorder %s4623_s1, %s4616_s30 }
 0x235   : > { %p4619_p10 = pnand %p4617_p9, %p6551_p8 }
 0x236   : > { %p4626_p7 = por %p4625_p4, %p4624_p13 }
 0x237   : > { %p4620_p3 = pneg %p4619_p10 }
 0x239   : > { %p4627_p2 = pnand %p4626_p7, %p4620_p3 }
 0x23b   : > { %4630 = shalt.err (!%p4627_p2)
}
 0x23c   : > { %3776 = dma.hbm_to_vmem [thread:$0]  (!%p6552_p6), %s6559_s23, 16, %s5703_s13, [#allocation28]  }
 0x23d   : > { %s5087_s21 = smov [#allocation32]   ;;  %s5088_s20 = smov [#allocation35]  }
 0x23e   : > { %s808_s28 = sshll.u32 %s5087_s21, 4  ;;  %s830_s24 = sshll.u32 %s5088_s20, 4  ;;  %s809_s28 = int_to_ptr.vmem [resolvable:$true] %s808_s28  ;;  %s5747_s24 = int_to_ptr.vmem [resolvable:$true] %s830_s24 }
 0x23f   : > { %s6560_s30 = sld [smem:[#allocation79_spill]] }
 0x245   : > { %s6561_s1 = smov %s6560_s30  ;;  %s4631_s9 = scalar_lea.hbm %s6560_s30, 16 }
 0x246   : > { %p4632_p5 = scmp.ne.s32.totalorder %s6561_s1, %s4631_s9  ;;  %p4638_p12 = scmp.lt.u32.totalorder %s4631_s9, %s6561_s1 }
 0x248   : > { %p4634_p1 = pnand %p4632_p5, %p6551_p8 }
 0x24a   : > { %p4635_p11 = pneg %p4634_p1 }
 0x24c   : > { %p4640_p0 = pnand %p4638_p12, %p4635_p11 }
 0x24e   : > { %4643 = shalt.err (!%p4640_p0)
}
 0x24f   : > { %s4644_s19 = scalar_lea.vmem %s809_s28, 16  ;;  %s4651_s21 = scalar_lea.vmem %s809_s28, 32 }
 0x250   : > { %p4645_p9 = scmp.ne.s32.totalorder %s809_s28, %s4644_s19  ;;  %p4652_p13 = scmp.lt.s32.totalorder %s809_s28, %s809_s28 }
 0x251   : > { %p4653_p4 = scmp.lt.s32.totalorder %s4651_s21, %s4644_s19 }
 0x252   : > { %p4647_p10 = pnand %p4645_p9, %p6551_p8 }
 0x253   : > { %p4654_p7 = por %p4653_p4, %p4652_p13 }
 0x254   : > { %p4648_p3 = pneg %p4647_p10 }
 0x256   : > { %p4655_p2 = pnand %p4654_p7, %p4648_p3 }
 0x258   : > { %4658 = shalt.err (!%p4655_p2)
}
 0x259   : > { %3782 = dma.hbm_to_vmem [thread:$0]  (!%p6552_p6), %s6561_s1, 16, %s809_s28, [#allocation31]  }
 0x25a   : > { %s6562_s25 = sld [smem:[#allocation81_spill]] }
 0x260   : > { %s4659_s8 = scalar_lea.hbm %s6562_s25, 16 }
 0x261   : > { %p4660_p5 = scmp.ne.s32.totalorder %s6562_s25, %s4659_s8  ;;  %p4666_p12 = scmp.lt.u32.totalorder %s4659_s8, %s6562_s25 }
 0x263   : > { %p4662_p1 = pnand %p4660_p5, %p6551_p8 }
 0x265   : > { %p4663_p11 = pneg %p4662_p1 }
 0x267   : > { %p4668_p0 = pnand %p4666_p12, %p4663_p11 }
 0x269   : > { %4671 = shalt.err (!%p4668_p0)
}
 0x26a   : > { %s4672_s28 = scalar_lea.vmem %s5747_s24, 16  ;;  %s4679_s21 = scalar_lea.vmem %s5747_s24, 32 }
 0x26b   : > { %p4673_p9 = scmp.ne.s32.totalorder %s5747_s24, %s4672_s28  ;;  %p4680_p13 = scmp.lt.s32.totalorder %s5747_s24, %s5747_s24 }
 0x26c   : > { %p4681_p4 = scmp.lt.s32.totalorder %s4679_s21, %s4672_s28 }
 0x26d   : > { %p4675_p10 = pnand %p4673_p9, %p6551_p8 }
 0x26e   : > { %p4682_p7 = por %p4681_p4, %p4680_p13 }
 0x26f   : > { %p4676_p3 = pneg %p4675_p10 }
 0x271   : > { %p4683_p2 = pnand %p4682_p7, %p4676_p3 }
 0x273   : > { %4686 = shalt.err (!%p4683_p2)
}
 0x274   : > { %3788 = dma.hbm_to_vmem [thread:$0]  (!%p6552_p6), %s6562_s25, 16, %s5747_s24, [#allocation34]  }
 0x275   : > { %s5089_s9 = smov [#allocation38]   ;;  %s5090_s8 = smov [#allocation41]  }
 0x276   : > { %s854_s20 = sshll.u32 %s5089_s9, 4  ;;  %s878_s30 = sshll.u32 %s5090_s8, 4  ;;  %s855_s20 = int_to_ptr.vmem [resolvable:$true] %s854_s20  ;;  %s5791_s30 = int_to_ptr.vmem [resolvable:$true] %s878_s30 }
 0x277   : > { %s6563_s19 = sld [smem:[#allocation83_spill]] }
 0x27d   : > { %s4687_s28 = scalar_lea.hbm %s6563_s19, 16 }
 0x27e   : > { %p4688_p5 = scmp.ne.s32.totalorder %s6563_s19, %s4687_s28  ;;  %p4694_p12 = scmp.lt.u32.totalorder %s4687_s28, %s6563_s19 }
 0x280   : > { %p4690_p1 = pnand %p4688_p5, %p6551_p8 }
 0x282   : > { %p4691_p11 = pneg %p4690_p1 }
 0x284   : > { %p4696_p0 = pnand %p4694_p12, %p4691_p11 }
 0x286   : > { %4699 = shalt.err (!%p4696_p0)
}
 0x287   : > { %s4700_s22 = scalar_lea.vmem %s855_s20, 16  ;;  %s4707_s9 = scalar_lea.vmem %s855_s20, 32 }
 0x288   : > { %p4701_p9 = scmp.ne.s32.totalorder %s855_s20, %s4700_s22  ;;  %p4708_p13 = scmp.lt.s32.totalorder %s855_s20, %s855_s20 }
 0x289   : > { %p4709_p4 = scmp.lt.s32.totalorder %s4707_s9, %s4700_s22 }
 0x28a   : > { %p4703_p10 = pnand %p4701_p9, %p6551_p8 }
 0x28b   : > { %p4710_p7 = por %p4709_p4, %p4708_p13 }
 0x28c   : > { %p4704_p3 = pneg %p4703_p10 }
 0x28e   : > { %p4711_p2 = pnand %p4710_p7, %p4704_p3 }
 0x290   : > { %4714 = shalt.err (!%p4711_p2)
}
 0x291   : > { %3794 = dma.hbm_to_vmem [thread:$0]  (!%p6552_p6), %s6563_s19, 16, %s855_s20, [#allocation37]  }
 0x292   : > { %s6564_s28 = sld [smem:[#allocation85_spill]] }
 0x298   : > { %s4715_s21 = scalar_lea.hbm %s6564_s28, 16 }
 0x299   : > { %p4716_p5 = scmp.ne.s32.totalorder %s6564_s28, %s4715_s21  ;;  %p4722_p12 = scmp.lt.u32.totalorder %s4715_s21, %s6564_s28 }
 0x29b   : > { %p4718_p1 = pnand %p4716_p5, %p6551_p8 }
 0x29d   : > { %p4719_p11 = pneg %p4718_p1 }
 0x29f   : > { %p4724_p0 = pnand %p4722_p12, %p4719_p11 }
 0x2a1   : > { %4727 = shalt.err (!%p4724_p0)
}
 0x2a2   : > { %s4728_s20 = scalar_lea.vmem %s5791_s30, 16  ;;  %s4735_s1 = scalar_lea.vmem %s5791_s30, 32 }
 0x2a3   : > { %p4729_p9 = scmp.ne.s32.totalorder %s5791_s30, %s4728_s20  ;;  %p4736_p13 = scmp.lt.s32.totalorder %s5791_s30, %s5791_s30 }
 0x2a4   : > { %p4737_p4 = scmp.lt.s32.totalorder %s4735_s1, %s4728_s20 }
 0x2a5   : > { %p4731_p10 = pnand %p4729_p9, %p6551_p8 }
 0x2a6   : > { %p4738_p7 = por %p4737_p4, %p4736_p13 }
 0x2a7   : > { %p4732_p3 = pneg %p4731_p10 }
 0x2a9   : > { %p4739_p2 = pnand %p4738_p7, %p4732_p3 }
 0x2ab   : > { %4742 = shalt.err (!%p4739_p2)
}
 0x2ac   : > { %3800 = dma.hbm_to_vmem [thread:$0]  (!%p6552_p6), %s6564_s28, 16, %s5791_s30, [#allocation40]  }
 0x2ad   : > { %s5091_s13 = smov [#allocation44]   ;;  %s3311_s17 = sshll.u32 %s5566_s5, 2 }
 0x2ae   : > { %s900_s21 = sshll.u32 %s5091_s13, 4  ;;  %s6565_s9 = sld [smem:[#allocation87_spill]]  ;;  %s901_s21 = int_to_ptr.vmem [resolvable:$true] %s900_s21 }
 0x2b4   : > { %s4743_s20 = scalar_lea.hbm %s6565_s9, 16 }
 0x2b5   : > { %p4744_p5 = scmp.ne.s32.totalorder %s6565_s9, %s4743_s20  ;;  %p4750_p12 = scmp.lt.u32.totalorder %s4743_s20, %s6565_s9 }
 0x2b7   : > { %p4746_p1 = pnand %p4744_p5, %p6551_p8 }
 0x2b9   : > { %p4747_p11 = pneg %p4746_p1 }
 0x2bb   : > { %p4752_p0 = pnand %p4750_p12, %p4747_p11 }
 0x2bd   : > { %4755 = shalt.err (!%p4752_p0)
}
 0x2be   : > { %s4756_s30 = scalar_lea.vmem %s901_s21, 16  ;;  %s4763_s27 = scalar_lea.vmem %s901_s21, 32 }
 0x2bf   : > { %p4757_p9 = scmp.ne.s32.totalorder %s901_s21, %s4756_s30  ;;  %p4764_p13 = scmp.lt.s32.totalorder %s901_s21, %s901_s21 }
 0x2c0   : > { %p4765_p4 = scmp.lt.s32.totalorder %s4763_s27, %s4756_s30 }
 0x2c1   : > { %p4759_p10 = pnand %p4757_p9, %p6551_p8 }
 0x2c2   : > { %p4766_p7 = por %p4765_p4, %p4764_p13 }
 0x2c3   : > { %p4760_p3 = pneg %p4759_p10 }
 0x2c5   : > { %p4767_p2 = pnand %p4766_p7, %p4760_p3 }
 0x2c7   : > { %4770 = shalt.err (!%p4767_p2)
}
 0x2c8   : > { %3806 = dma.hbm_to_vmem [thread:$0]  (!%p6552_p6), %s6565_s9, 16, %s901_s21, [#allocation43]  }
 0x2c9   : > { %s3312_s23 = sshll.u32 %s5009_s7, 6  ;;  %s915_s24 = scalar_lea.vmem [#allocation6], %s3311_s17 }
 0x2ca   : > { %s922_s18 = sshll.u32 %s915_s24, 4  ;;  %s6566_s1 = sld [smem:[#allocation63_spill]]  ;;  %s923_s18 = int_to_ptr.vmem [resolvable:$true] %s922_s18 }
 0x2cb   : > { %s912_s4 = scalar_lea.sflag [#allocation7], %s5566_s5  ;;  %p6567_p5 = scmp.ne.s32.totalorder %s6547_s15, 0 }
 0x2d0   : > { %s5858_s8 = scalar_lea.hbm %s6566_s1, %s3312_s23  ;;  %s4776_s17 = scalar_lea.hbm %s6566_s1, 128 }
 0x2d1   : > { %s4771_s30 = scalar_lea.hbm %s5858_s8, 64  ;;  %p4777_p6 = scmp.lt.u32.totalorder %s5858_s8, %s6566_s1 }
 0x2d2   : > { %p4772_p8 = scmp.ne.s32.totalorder %s5858_s8, %s4771_s30  ;;  %p4778_p12 = scmp.lt.u32.totalorder %s4776_s17, %s4771_s30 }
 0x2d3   : > { %p4780_p9 = scmp.lt.u32.totalorder %s4771_s30, %s5858_s8 }
 0x2d4   : > { %p4774_p1 = pnand %p4772_p8, %p6567_p5  ;;  %p4779_p0 = por %p4778_p12, %p4777_p6 }
 0x2d6   : > { %p4775_p11 = pneg %p4774_p1  ;;  %p4781_p10 = por %p4780_p9, %p4779_p0 }
 0x2d8   : > { %p4782_p3 = pnand %p4781_p10, %p4775_p11 }
 0x2da   : > { %4785 = shalt.err (!%p4782_p3)
}
 0x2db   : > { %s4786_s23 = scalar_lea.vmem %s923_s18, 64  ;;  %s5092_s24 = smov [#allocation6]  }
 0x2dc   : > { %p4787_p13 = scmp.ne.s32.totalorder %s923_s18, %s4786_s23  ;;  %s4791_s22 = sshll.u32 %s5092_s24, 4  ;;  %s4792_s22 = int_to_ptr.vmem [resolvable:$false] %s4791_s22 }
 0x2dd   : > { %s4793_s20 = scalar_lea.vmem %s4792_s22, 128  ;;  %p4794_p2 = scmp.lt.s32.totalorder %s923_s18, %s4792_s22 }
 0x2de   : > { %p4789_p4 = pnand %p4787_p13, %p6567_p5  ;;  %p4795_p8 = scmp.lt.s32.totalorder %s4793_s20, %s4786_s23 }
 0x2e0   : > { %p4790_p7 = pneg %p4789_p4  ;;  %p4796_p1 = por %p4795_p8, %p4794_p2 }
 0x2e2   : > { %p4797_p6 = pnand %p4796_p1, %p4790_p7 }
 0x2e4   : > { %4800 = shalt.err (!%p4797_p6)
}
 0x2e5   : > { %p6568_p12 = scmp.ne.s32.totalorder %s6545_s26, 0  ;;  %s3316_s30 = sshll.u32 %s5009_s7, 4 }
 0x2e6   : > { %s6569_s17 = sld [smem:[#allocation65_spill]]  ;;  %s953_s13 = scalar_lea.vmem [#allocation11], %s5566_s5 }
 0x2e7   : > { %3810 = dma.hbm_to_vmem [thread:$0]  (!%p6568_p12), %s5858_s8, 64, %s923_s18, %s912_s4  }
 0x2e8   : > { %s960_s23 = sshll.u32 %s953_s13, 4  ;;  %s961_s23 = int_to_ptr.vmem [resolvable:$true] %s960_s23 }
 0x2ec   : > { %s5882_s19 = scalar_lea.hbm %s6569_s17, %s3316_s30  ;;  %s4806_s8 = scalar_lea.hbm %s6569_s17, 32 }
 0x2ed   : > { %s4801_s24 = scalar_lea.hbm %s5882_s19, 16  ;;  %p4807_p10 = scmp.lt.u32.totalorder %s5882_s19, %s6569_s17 }
 0x2ee   : > { %p4802_p11 = scmp.ne.s32.totalorder %s5882_s19, %s4801_s24  ;;  %p4808_p3 = scmp.lt.u32.totalorder %s4806_s8, %s4801_s24 }
 0x2ef   : > { %p4810_p4 = scmp.lt.u32.totalorder %s4801_s24, %s5882_s19 }
 0x2f0   : > { %p4804_p0 = pnand %p4802_p11, %p6567_p5  ;;  %p4809_p13 = por %p4808_p3, %p4807_p10 }
 0x2f2   : > { %p4805_p9 = pneg %p4804_p0  ;;  %p4811_p7 = por %p4810_p4, %p4809_p13 }
 0x2f4   : > { %p4812_p2 = pnand %p4811_p7, %p4805_p9 }
 0x2f6   : > { %4815 = shalt.err (!%p4812_p2)
}
 0x2f7   : > { %s4816_s5 = scalar_lea.vmem %s961_s23, 16  ;;  %s5093_s30 = smov [#allocation11]  }
 0x2f8   : > { %p4817_p8 = scmp.ne.s32.totalorder %s961_s23, %s4816_s5  ;;  %s4821_s21 = sshll.u32 %s5093_s30, 4  ;;  %s4822_s21 = int_to_ptr.vmem [resolvable:$false] %s4821_s21 }
 0x2f9   : > { %s4823_s27 = scalar_lea.vmem %s4822_s21, 32  ;;  %p4824_p11 = scmp.lt.s32.totalorder %s961_s23, %s4822_s21 }
 0x2fa   : > { %p4819_p1 = pnand %p4817_p8, %p6567_p5  ;;  %p4825_p0 = scmp.lt.s32.totalorder %s4823_s27, %s4816_s5 }
 0x2fc   : > { %p4820_p6 = pneg %p4819_p1  ;;  %p4826_p12 = por %p4825_p0, %p4824_p11 }
 0x2fe   : > { %p4827_p3 = pnand %p4826_p12, %p4820_p6 }
 0x300   : > { %4830 = shalt.err (!%p4827_p3)
}
 0x301   : > { %p6570_p10 = scmp.ne.s32.totalorder %s6545_s26, 0  ;;  %s6571_s13 = sld [smem:[#allocation62_spill]] }
 0x303   : > { %3816 = dma.hbm_to_vmem [thread:$0]  (!%p6570_p10), %s5882_s19, 16, %s961_s23, %s5582_s11  }
 0x307   : > { %p6572_p9 = scmp.ne.s32.totalorder %s6571_s13, 0 }
 0x308   : > { %s5906_s15 = sand.u32 (!%p6572_p9), 1, %s4997_s2   ;;  %p6573_p5 = scmp.ne.s32.totalorder (!%p6572_p9), %s6542_s0, 0 }
 0x309   : > { %969 = sbr.rel (%p6572_p9) target bundleno = 5051 (0x13bb), region = 120  ;;  %s3318_s24 = sshll.u32 (!%p6572_p9), %s5906_s15, 2 }
 0x30a   : > { %s972_s22 = scalar_lea.sflag (!%p6572_p9), [#allocation7], %s5906_s15  ;;  %s5912_s18 = scalar_lea.vmem (!%p6572_p9), [#allocation6], %s3318_s24 }
 0x310   : > { %4936 = dma.done.wait (%p6573_p5), %s972_s22, 64  }
 0x311   : > { %4938 = vsyncadd (%p6573_p5), %s972_s22, 4294967232  ;;  %s6574_s11 = sld [smem:[#allocation61_spill]]  ;;  %s3319_s19 = sshll.u32 %s5906_s15, 3 }
 0x312   : > { %s5920_s8 = scalar_lea.vmem [#allocation9], %s3319_s19 }
 0x317   : > { %s980_s26 = sand.u32 1, %s6574_s11  }
 0x318   : > { %s981_s23 = scalar_lea.sflag [#allocation10], %s980_s26 }
 0x319   : > { %4940 = dma.done.wait (%p6573_p5), %s981_s23, 144  }
 0x31a   : > { %4942 = vsyncadd (%p6573_p5), %s981_s23, 4294967152  ;;  %s992_s4 = scalar_lea.vmem [#allocation11], %s5906_s15  ;;  %p6575_p12 = scmp.eq.s32.totalorder %s6574_s11, 0 }
 0x31c   : > { %4944 = dma.done.wait (%p6575_p12), [#allocation13], 272   ;;  %p6576_p13 = pmov %p6575_p12 }
 0x31d   : > { %p6577_p4 = pmov %p6575_p12 }
 0x31e   : > { %4946 = vsyncadd (%p6576_p13), [#allocation13], 4294967024 }
 0x31f   : > { %4948 = dma.done.wait (%p6577_p4), [#allocation16], 272   ;;  %p6578_p7 = pmov %p6577_p4 }
 0x320   : > { %p6579_p2 = pmov %p6577_p4 }
 0x321   : > { %4950 = vsyncadd (%p6578_p7), [#allocation16], 4294967024 }
 0x322   : > { %4952 = dma.done.wait (%p6579_p2), [#allocation19], 272   ;;  %p6580_p8 = pmov %p6579_p2 }
 0x323   : > { %p6581_p1 = pmov %p6579_p2 }
 0x324   : > { %4954 = vsyncadd (%p6580_p8), [#allocation19], 4294967024 }
 0x325   : > { %4956 = dma.done.wait (%p6581_p1), [#allocation22], 32   ;;  %p6582_p6 = pmov %p6581_p1 }
 0x326   : > { %p6583_p11 = pmov %p6581_p1 }
 0x327   : > { %4958 = vsyncadd (%p6582_p6), [#allocation22], 4294967264 }
 0x328   : > { %4960 = dma.done.wait (%p6583_p11), [#allocation25], 272   ;;  %p6584_p0 = pmov %p6581_p1 }
 0x32a   : > { %4962 = vsyncadd (%p6584_p0), [#allocation25], 4294967024  ;;  %p6585_p3 = pmov %p6584_p0 }
 0x32b   : > { %p6586_p10 = pmov %p6584_p0 }
 0x32c   : > { %4964 = dma.done.wait (%p6585_p3), [#allocation28], 272  }
 0x32d   : > { %4966 = vsyncadd (%p6586_p10), [#allocation28], 4294967024  ;;  %p6587_p9 = pmov %p6584_p0 }
 0x32e   : > { %p6588_p5 = pmov %p6584_p0 }
 0x32f   : > { %4968 = dma.done.wait (%p6587_p9), [#allocation31], 272  }
 0x330   : > { %4970 = vsyncadd (%p6588_p5), [#allocation31], 4294967024  ;;  %p6589_p12 = pmov %p6584_p0 }
 0x331   : > { %p6590_p13 = pmov %p6584_p0 }
 0x332   : > { %4972 = dma.done.wait (%p6589_p12), [#allocation34], 32  }
 0x333   : > { %4974 = vsyncadd (%p6590_p13), [#allocation34], 4294967264  ;;  %p6591_p4 = pmov %p6584_p0 }
 0x334   : > { %p6592_p7 = pmov %p6584_p0 }
 0x335   : > { %4976 = dma.done.wait (%p6591_p4), [#allocation37], 272  }
 0x336   : > { %4978 = vsyncadd (%p6592_p7), [#allocation37], 4294967024  ;;  %p6593_p2 = pmov %p6584_p0 }
 0x337   : > { %p6594_p8 = pmov %p6584_p0 }
 0x338   : > { %4980 = dma.done.wait (%p6593_p2), [#allocation40], 528  }
 0x339   : > { %4982 = vsyncadd (%p6594_p8), [#allocation40], 4294966768  ;;  %p6595_p1 = pmov %p6584_p0 }
 0x33a   : > { %p6596_p6 = pmov %p6584_p0 }
 0x33b   : > { %4984 = dma.done.wait (%p6595_p1), [#allocation43], 32  }
 0x33c   : > { %4986 = vsyncadd (%p6596_p6), [#allocation43], 4294967264  ;;  %v5094_v0 = vmov 0.0   ;;  %vm5095_vm0 = vmmov 0   ;;  %v4058_v1 = vld [vmem:[#allocation15] sm:$0xff]   ;;  %v4060_v3 = vld [vmem:[#allocation15 + $0x8] sm:$0xff]   ;;  %v1414_v20 = vlaneseq }
 0x33d   : > { %3480 = vmatprep.subr.bf16.mxu0 %v5094_v0  ;;  %3488 = vmatprep.subr.bf16.mxu1 %v5094_v0  ;;  %v4059_v2 = vld [vmem:[#allocation27] sm:$0xff]   ;;  %v4061_v4 = vld [vmem:[#allocation27 + $0x8] sm:$0xff]   ;;  %vm1185_vm1 = vcmask 261120   ;;  %v4063_v7 = vld [vmem:[#allocation12] sm:$0xff]   ;;  %vm1230_vm2 = vcmask 257024   ;;  %s5096_s0 = smov 96  }
 0x33e   : > { %3484 = vmatprep.mubr.msk.bf16.mxu0 %vm5095_vm0, %v5094_v0  ;;  %3492 = vmatprep.mubr.msk.bf16.mxu1 %vm5095_vm0, %v5094_v0  ;;  %v1161_v5 = vld [vmem:[%s5912_s18] sm:$0xf]  ;;  %v4062_v6 = vld [vmem:[%s5920_s8] sm:$0x3f]   ;;  %v3343_v11 = vld [vmem:[#allocation17] ss:$0 sm:$0xff] }
 0x33f   : > { %3481 = vmatpush3.bf16.msra.mxu0 %v4058_v1  ;;  %3489 = vmatpush3.bf16.msra.mxu1 %v4059_v2  ;;  %v5983_v8 = vld [vmem:[%s5912_s18] sm:$0xf]  ;;  %v3348_v12 = vld [vmem:[#allocation29] ss:$0 sm:$0xff]  ;;  %v5994_v27 = vshrl.u32 %v1414_v20, 7  ;;  %vm1322_vm3 = vcmask 254976  }
 0x340   : > { %3482 = vmatprep.subr.bf16.mxu0 %v5094_v0  ;;  %3490 = vmatprep.subr.bf16.mxu1 %v5094_v0  ;;  %v1338_v9 = vunpack.c.l.bf16 %v5983_v8  ;;  %v4064_v10 = vld [vmem:[#allocation12 + $0x8] sm:$0xff]   ;;  %v3355_v29 = vld [vmem:[#allocation14] ss:$0 sm:$0xff]  ;;  %s5097_s20 = smov 120   ;;  %s5098_s5 = smov 112   ;;  %v6020_v42 = vmov 0.0  }
 0x341   : > { %s5099_s30 = smov 104   ;;  %s6018_s21 = scalar_lea.vmem [#allocation45], %s3318_s24  ;;  %v6022_v43 = vmov 0.0   ;;  %v6024_v44 = vmov 0.0   ;;  %v6026_v45 = vmov 0.0   ;;  %v6028_v46 = vmov 0.0  }
 0x342   : > { %v6030_v47 = vmov 0.0   ;;  %v6032_v48 = vmov 0.0   ;;  %v6034_v49 = vmov 0.0   ;;  %v6036_v50 = vmov -inf   ;;  %s6044_s27 = smov 0  }
 0x343   : > { %3483 = vmatpush3.bf16.msra.mxu0 %v4060_v3  ;;  %3491 = vmatpush3.bf16.msra.mxu1 %v4061_v4  ;;  %v6038_v51 = vmov -inf   ;;  %v6040_v52 = vmov -inf   ;;  %v6042_v53 = vmov -inf  }
 0x344   : > { %3496 = vmatprep.subr.bf16.mxu0 %v5094_v0 }
 0x346   : > { %3485 = vmatmul.mubr.msk.bf16.vlgmr.msra.gmra.mrb[0].mxu0 %vm1185_vm1, %v1161_v5  ;;  %3493 = vmatmul.mubr.msk.bf16.vlgmr.msra.gmra.mrb[0].mxu1 %vm1185_vm1, %v4062_v6 }
 0x347   : > { %3497 = vmatpush3.bf16.msra.mxu0 %v4063_v7  ;;  %3500 = vmatprep.mubr.msk.bf16.mxu0 %vm5095_vm0, %v5094_v0 }
 0x348   : > { %3498 = vmatprep.subr.bf16.mxu0 %v5094_v0 }
 0x34b   : > { %3499 = vmatpush3.bf16.msra.mxu0 %v4064_v10 }
 0x34e   : > { %3501 = vmatmul.mubr.msk.bf16.vlgmr.msra.gmra.mrb[4].mxu0 %vm1185_vm1, %v5983_v8 }
 0x419   : > { %v1223_v13 = vpop.f32.mrb[0].mxu0  ;;  %v1306_v15 = vpop.f32.mrb[0].mxu1 }
 0x41a   : > { %v1224_v14 = vadd.f32 %v3343_v11, %v1223_v13  ;;  %v3486_v16 = vpop.f32.mrb[1].mxu0  ;;  %v1307_v17 = vadd.f32 %v3348_v12, %v1306_v15  ;;  %v3494_v18 = vpop.f32.mrb[1].mxu1 }
 0x41b   : > { %v1226_v19 = vpop.f32.mrb[2].mxu0  ;;  %v1309_v22 = vpop.f32.mrb[2].mxu1 }
 0x41c   : > { %v1229_v21 = vpack.c.bf16 %v1224_v14, %v1224_v14  ;;  %v3487_v23 = vpop.f32.mrb[3].mxu0  ;;  %v3420_v24 = vpack.c.bf16 %v1307_v17, %v1307_v17  ;;  %v1310_v25 = vadd.f32 %v3348_v12, %v1309_v22  ;;  %v3495_v26 = vpop.f32.mrb[3].mxu1 }
 0x41e   : > { %1231 = vst.msk [vmem:[#allocation2] sm:$0xf] %vm1230_vm2, %v1229_v21  ;;  %1235 = vrot.lane.b32.xlu0 %v1229_v21, %s5096_s0  ;;  %1321 = vst.msk [vmem:[#allocation4] sm:$0xf] %vm1230_vm2, %v3420_v24  ;;  %v3421_v28 = vpack.c.bf16 %v1310_v25, %v1310_v25 }
 0x420   : > { %1326 = vrot.lane.b32.xlu1 %v3421_v28, %s5096_s0  ;;  %1323 = vst.msk [vmem:[#allocation4 + $0x4] sm:$0x3] %vm1322_vm3, %v3421_v28 }
 0x421   : > { %v1400_v30 = vpop.f32.mrb[4].mxu0 }
 0x422   : > { %v1401_v31 = vadd.f32 %v3355_v29, %v1400_v30  ;;  %1324 = vrot.lane.b32.xlu0 %v3420_v24, %s5096_s0  ;;  %v3502_v32 = vpop.f32.mrb[5].mxu0 }
 0x423   : > { %v1403_v33 = vpop.f32.mrb[6].mxu0 }
 0x424   : > { %v5999_v34 = vpack.c.bf16 %v1401_v31, %v1401_v31  ;;  %v3503_v35 = vpop.f32.mrb[7].mxu0 }
 0x426   : > { %1408 = vrot.lane.b32.xlu1 %v5999_v34, %s5097_s20  ;;  %1410 = vrot.lane.b32.xlu0 %v5999_v34, %s5098_s5 }
 0x42a   : > { %1412 = vrot.lane.b32.xlu1 %v5999_v34, %s5099_s30 }
 0x490   : > { %v1236_v36 = vpop.permute.xlu0 %1235 }
 0x491   : > { %1238 = vst.msk [vmem:[#allocation3] sm:$0xf] %vm1230_vm2, %v1236_v36 }
 0x492   : > { %v1327_v37 = vpop.permute.xlu1 %1326 }
 0x493   : > { %1331 = vst.msk [vmem:[#allocation5 + $0x4] sm:$0x3] %vm1322_vm3, %v1327_v37 }
 0x494   : > { %v1325_v38 = vpop.permute.xlu0 %1324 }
 0x495   : > { %1330 = vst.msk [vmem:[#allocation5] sm:$0xf] %vm1230_vm2, %v1325_v38 }
 0x498   : > { %v6010_v39 = vpop.permute.xlu1 %1408  ;;  %v6012_v40 = vpop.permute.xlu0 %1410 }
 0x49c   : > { %v6014_v41 = vpop.permute.xlu1 %1412 }
 0x49d LB: >> { %v5100_v54 = vmov 0.0   ;;  %vm5101_vm4 = vmmov 0   ;;  %s3359_s13 = sshll.u32 %s5065_s27, 3  ;;  %vm1460_vm5 = vcmask 64512   ;;  %s5102_s11 = smov 120   ;;  %v1646_v63 = vand.u32 127, %v1414_v20  ;;  %s5065_s27 = sphi %s6044_s27, %s1422_s27   ;;  %v5061_v53 = vphi %v6042_v53, %v6611_v53   ;;  %v5057_v52 = vphi %v6040_v52, %v6610_v52   ;;  %v5053_v51 = vphi %v6038_v51, %v6609_v51   ;;  %v5049_v50 = vphi %v6036_v50, %v6608_v50   ;;  %v5045_v49 = vphi %v6034_v49, %v6607_v49   ;;  %v5041_v48 = vphi %v6032_v48, %v6606_v48   ;;  %v5037_v47 = vphi %v6030_v47, %v6605_v47   ;;  %v5033_v46 = vphi %v6028_v46, %v6604_v46   ;;  %v5029_v45 = vphi %v6026_v45, %v6603_v45   ;;  %v5025_v44 = vphi %v6024_v44, %v6602_v44   ;;  %v5021_v43 = vphi %v6022_v43, %v6601_v43   ;;  %v5017_v42 = vphi %v6020_v42, %v6600_v42  }
 0x49e   : >> { %3504 = vmatprep.subr.bf16.mxu0 %v5100_v54  ;;  %3506 = vmatprep.mubr.msk.bf16.mxu0 %vm5101_vm4, %v5100_v54  ;;  %s6094_s24 = sshra.s32 %s3359_s13, 3  ;;  %s5103_s26 = smov 104   ;;  %v1647_v1 = vstv %s3359_s13  ;;  %vm1727_vm7 = vcmask 1043456  }
 0x49f   : >> { %3510 = vmatprep.subr.bf16.mxu1 %v5100_v54  ;;  %3512 = vmatprep.mubr.msk.bf16.mxu1 %vm5101_vm4, %v5100_v54  ;;  %s3360_s22 = sshll.u32 %s6094_s24, 2  ;;  %s5104_s19 = smov 112   ;;  %v1648_v2 = vadd.s32 %v1647_v1, %v1646_v63 }
 0x4a0   : >> { %s1441_s18 = scalar_lea.vmem [#allocation2], %s3360_s22  ;;  %s1451_s23 = scalar_lea.vmem [#allocation3], %s3360_s22 }
 0x4a1   : >> { %v1442_v55 = vld [vmem:[%s1441_s18] sm:$0xf]  ;;  %vm1649_vm6 = vcmp.le.s32.totalorder %v1648_v2, %v5994_v27  ;;  %s1422_s27 = sadd.s32 1, %s5065_s27  }
 0x4a2   : >> { %1444 = vrot.lane.b32.xlu0 %v1442_v55, %s5102_s11  ;;  %v1465_v56 = vsel %vm1460_vm5, %v1442_v55, 0  ;;  %1448 = vrot.lane.b32.xlu1 %v1442_v55, %s5103_s26  ;;  %v1452_v11 = vld [vmem:[%s1451_s23] sm:$0xf]  ;;  %p6202_p11 = scmp.ge.s32.totalorder %s1422_s27, 1 }
 0x4a3   : >> { %3505 = vmatpush3.bf16.xpose.msra.mxu0 %v1465_v56  ;;  %v1729_v12 = vsel %vm1727_vm7, %v1452_v11, 0  ;;  %s5105_s0 = smov (%p6202_p11), 8   ;;  %s5106_s27 = smov (%p6202_p11), 24   ;;  %vm1935_vm8 = vcmask (%p6202_p11), 130048   ;;  %vm1937_vm9 = vcmask (%p6202_p11), 195584   ;;  %vm2352_vm12 = vcmask (%p6202_p11), 97280  }
 0x4a4   : >> { %3516 = vmatprep.subr.bf16.mxu0 %v5100_v54  ;;  %s5107_s13 = smov (%p6202_p11), 16   ;;  %v2113_v8 = vld [vmem:[#allocation4 + $0x4] sm:$0x3] (%p6202_p11)  ;;  %vm2407_vm13 = vcmask (%p6202_p11), 1045504   ;;  %vm2818_vm14 = vcmask (%p6202_p11), 523264   ;;  %s6613_s22 = sld [smem:[#allocation88_spill]] (%p6202_p11) }
 0x4a5   : > { %p6614_p3 = scmp.ne.s32.totalorder (%p6202_p11), %s6543_s14, 0 }
 0x4a6   : >> { %1446 = vrot.lane.b32.xlu0 %v1442_v55, %s5104_s19 }
 0x4aa   : >> { %3507 = vmatmul.mubr.msk.bf16.vlgmr.msra.gmra.mrb[0].mxu0 %vm1460_vm5, %v5999_v34 }
 0x4ab   : >> { %3518 = vmatprep.mubr.msk.bf16.mxu0 %vm5101_vm4, %v5100_v54 }
 0x514   : >> { %v1445_v57 = vpop.permute.xlu0 %1444  ;;  %v1449_v60 = vpop.permute.xlu1 %1448 }
 0x515   : >> { %v1511_v58 = vsel %vm1460_vm5, %v1445_v57, 0  ;;  %v1603_v62 = vsel %vm1460_vm5, %v1449_v60, 0 }
 0x516   : >> { %3511 = vmatpush3.bf16.xpose.msra.mxu1 %v1511_v58 }
 0x517   : >> { %3522 = vmatprep.subr.bf16.mxu1 %v5100_v54 }
 0x518   : >> { %v1447_v59 = vpop.permute.xlu0 %1446 }
 0x519   : >> { %v1557_v61 = vsel %vm1460_vm5, %v1447_v59, 0 }
 0x51a   : >> { %3517 = vmatpush3.bf16.xpose.msra.mxu0 %v1557_v61 }
 0x51b   : >> { %3528 = vmatprep.subr.bf16.mxu0 %v5100_v54 }
 0x51d   : >> { %3513 = vmatmul.mubr.msk.bf16.vlgmr.msra.gmra.mrb[0].mxu1 %vm1460_vm5, %v6010_v39 }
 0x51e   : >> { %3523 = vmatpush3.bf16.xpose.msra.mxu1 %v1603_v62  ;;  %3524 = vmatprep.mubr.msk.bf16.mxu1 %vm5101_vm4, %v5100_v54 }
 0x51f   : >> { %3534 = vmatprep.subr.bf16.mxu1 %v5100_v54 }
 0x521   : >> { %3519 = vmatmul.mubr.msk.bf16.vlgmr.msra.gmra.mrb[4].mxu0 %vm1460_vm5, %v6012_v40 }
 0x522   : >> { %3530 = vmatprep.mubr.msk.bf16.mxu0 %vm5101_vm4, %v5100_v54  ;;  %3529 = vmatpush3.bf16.msra.mxu0 %v1729_v12 }
 0x523   : >> { %3540 = vmatprep.subr.bf16.mxu0 %v5100_v54 }
 0x525   : >> { %3525 = vmatmul.mubr.msk.bf16.vlgmr.msra.gmra.mrb[4].mxu1 %vm1460_vm5, %v6014_v41 }
 0x526   : >> { %3536 = vmatprep.mubr.msk.bf16.mxu1 %vm5101_vm4, %v5100_v54 }
 0x57d   : >> { %v1501_v3 = vpop.f32.mrb[0].mxu0 }
 0x57e   : >> { %v1652_v4 = vsel %vm1649_vm6, %v1501_v3, -1e+20  ;;  %v3508_v5 = vpop.f32.mrb[1].mxu0 }
 0x57f   : >> { %v1656_v6 = vsel %vm1460_vm5, %v1652_v4, -inf  ;;  %v1504_v7 = vpop.f32.mrb[2].mxu0 }
 0x580   : >> { %1657 = vmax.xlane.f32.xlu1 %v1656_v6  ;;  %v3509_v10 = vpop.f32.mrb[3].mxu0 }
 0x591   : >> { %1456 = vrot.lane.b32.xlu1 %v1452_v11, %s5104_s19  ;;  %s5109_s19 = smov (%p6202_p11), [#allocation45]  }
 0x592   : > { %s4835_s23 = sshll.u32 (%p6202_p11), %s5109_s19, 4  ;;  %s4836_s23 = int_to_ptr.vmem [resolvable:$false] %s4835_s23 }
 0x593   : > { %s4837_s8 = scalar_lea.vmem (%p6202_p11), %s4836_s23, 128 }
 0x5f0   : >> { %v1547_v13 = vpop.f32.mrb[0].mxu1 }
 0x5f1   : >> { %v1653_v14 = vsel %vm1649_vm6, %v1547_v13, -1e+20  ;;  %v3514_v15 = vpop.f32.mrb[1].mxu1 }
 0x5f2   : >> { %v1550_v16 = vpop.f32.mrb[2].mxu1  ;;  %v1659_v17 = vsel %vm1460_vm5, %v1653_v14, -inf }
 0x5f3   : >> { %1660 = vmax.xlane.f32.xlu0 %v1659_v17  ;;  %v3515_v18 = vpop.f32.mrb[3].mxu1 }
 0x5f4   : >> { %v1593_v19 = vpop.f32.mrb[4].mxu0 }
 0x5f5   : >> { %v1654_v21 = vsel %vm1649_vm6, %v1593_v19, -1e+20  ;;  %v3520_v22 = vpop.f32.mrb[5].mxu0 }
 0x5f6   : >> { %v1596_v23 = vpop.f32.mrb[6].mxu0  ;;  %v1662_v24 = vsel %vm1460_vm5, %v1654_v21, -inf }
 0x5f7   : >> { %1663 = vmax.xlane.f32.xlu0 %v1662_v24  ;;  %v3521_v25 = vpop.f32.mrb[7].mxu0 }
 0x5f8   : >> { %v1639_v26 = vpop.f32.mrb[4].mxu1 }
 0x5f9   : >> { %v1655_v28 = vsel %vm1649_vm6, %v1639_v26, -1e+20  ;;  %v3526_v29 = vpop.f32.mrb[5].mxu1 }
 0x5fa   : >> { %v1642_v30 = vpop.f32.mrb[6].mxu1  ;;  %v1665_v31 = vsel %vm1460_vm5, %v1655_v28, -inf }
 0x5fb   : >> { %v3527_v32 = vpop.f32.mrb[7].mxu1  ;;  %1666 = vmax.xlane.f32.xlu1 %v1665_v31 }
 0x60c   : >> { %1458 = vrot.lane.b32.xlu1 %v1452_v11, %s5103_s26 }
 0x60d   : >> { %v1658_v33 = vpop.xlane.xlu1 %1657  ;;  %1454 = vrot.lane.b32.xlu0 %v1452_v11, %s5102_s11  ;;  %s2896_s11 = scalar_lea.sflag (%p6202_p11), [#allocation8], %s5906_s15 }
 0x60e   : >> { %v6150_v35 = vmax.f32 %v5061_v53, %v1658_v33  }
 0x610   : >> { %v1672_v36 = vsub.f32 %v5061_v53, %v6150_v35  ;;  %v1684_v37 = vsub.f32 %v1652_v4, %v6150_v35 }
 0x611   : >> { %v1457_v55 = vpop.permute.xlu1 %1456 }
 0x612   : >> { %v1688_v38 = vmul.f32 1.442695, %v1684_v37  ;;  %v1821_v58 = vsel %vm1727_vm7, %v1457_v55, 0  ;;  %v1676_v24 = vmul.f32 1.442695, %v1672_v36 }
 0x614   : >> { %4065 = vpow2.f32 %v1688_v38 }
 0x61e   : >> { %v4066_v56 = vpop.eup %4065 }
 0x61f   : >> { %v1720_v57 = vpack.c.bf16 %v4066_v56, %v4066_v56  ;;  %v1700_v59 = vsel %vm1460_vm5, %v4066_v56, 0.0 }
 0x621   : >> { %3531 = vmatmul.mubr.msk.bf16.vlgmr.msra.gmra.mrb[8].mxu0 %vm1460_vm5, %v1720_v57 }
 0x622   : >> { %3541 = vmatpush3.bf16.msra.mxu0 %v1821_v58  ;;  %3542 = vmatprep.mubr.msk.bf16.mxu0 %vm5101_vm4, %v5100_v54 }
 0x623   : > { %3568 = vmatprep.subr.bf16.mxu0 (%p6202_p11), %v5094_v0 }
 0x62c   : >> { %1701 = vadd.xlane.f32.xlu0 %v1700_v59 }
 0x680   : >> { %v1661_v60 = vpop.xlane.xlu0 %1660 }
 0x681   : >> { %v6161_v53 = vmax.f32 %v5057_v52, %v1661_v60  }
 0x683   : >> { %v1673_v61 = vsub.f32 %v5057_v52, %v6161_v53  ;;  %v1685_v62 = vsub.f32 %v1653_v14, %v6161_v53 }
 0x684   : >> { %v1664_v63 = vpop.xlane.xlu0 %1663 }
 0x685   : >> { %v1690_v1 = vmul.f32 1.442695, %v1685_v62  ;;  %v6167_v2 = vmax.f32 %v5053_v51, %v1664_v63   ;;  %v1678_v38 = vmul.f32 1.442695, %v1673_v61 }
 0x687   : >> { %v1674_v3 = vsub.f32 %v5053_v51, %v6167_v2  ;;  %v1686_v4 = vsub.f32 %v1654_v21, %v6167_v2  ;;  %4067 = vpow2.f32 %v1690_v1 }
 0x688   : >> { %v1667_v5 = vpop.xlane.xlu1 %1666  ;;  %v1455_v6 = vpop.permute.xlu0 %1454 }
 0x689   : >> { %v1692_v7 = vmul.f32 1.442695, %v1686_v4  ;;  %v6173_v10 = vmax.f32 %v5049_v50, %v1667_v5   ;;  %v1775_v52 = vsel %vm1727_vm7, %v1455_v6, 0  ;;  %v1680_v55 = vmul.f32 1.442695, %v1674_v3 }
 0x68a   : >> { %3535 = vmatpush3.bf16.msra.mxu1 %v1775_v52 }
 0x68b   : >> { %v1675_v11 = vsub.f32 %v5049_v50, %v6173_v10  ;;  %v1687_v12 = vsub.f32 %v1655_v28, %v6173_v10  ;;  %3546 = vmatprep.subr.bf16.mxu1 %v5100_v54  ;;  %4069 = vpow2.f32 %v1692_v7 }
 0x68c   : >> { %v1459_v13 = vpop.permute.xlu1 %1458 }
 0x68d   : >> { %v1694_v51 = vmul.f32 1.442695, %v1687_v12  ;;  %v1867_v15 = vsel %vm1727_vm7, %v1459_v13, 0  ;;  %v1682_v36 = vmul.f32 1.442695, %v1675_v11 }
 0x68f   : >> { %4071 = vpow2.f32 %v1694_v51 }
 0x690   : >> { %4073 = vpow2.f32 %v1676_v24 }
 0x691   : >> { %v4068_v14 = vpop.eup %4067  ;;  %4075 = vpow2.f32 %v1678_v38 }
 0x692   : >> { %v1703_v16 = vsel %vm1460_vm5, %v4068_v14, 0.0  ;;  %v1721_v17 = vpack.c.bf16 %v4068_v14, %v4068_v14  ;;  %4077 = vpow2.f32 %v1680_v55 }
 0x693   : >> { %1704 = vadd.xlane.f32.xlu1 %v1703_v16  ;;  %4079 = vpow2.f32 %v1682_v36 }
 0x694   : >> { %3537 = vmatmul.mubr.msk.bf16.vlgmr.msra.gmra.mrb[8].mxu1 %vm1460_vm5, %v1721_v17 }
 0x695   : >> { %v4070_v18 = vpop.eup %4069  ;;  %3547 = vmatpush3.bf16.msra.mxu1 %v1867_v15  ;;  %3548 = vmatprep.mubr.msk.bf16.mxu1 %vm5101_vm4, %v5100_v54 }
 0x696   : >> { %v1706_v50 = vsel %vm1460_vm5, %v4070_v18, 0.0  ;;  %v1722_v19 = vpack.c.bf16 %v4070_v18, %v4070_v18  ;;  %3552 = vmatprep.subr.bf16.mxu1 (%p6202_p11), %v5094_v0 }
 0x697   : >> { %1707 = vadd.xlane.f32.xlu0 %v1706_v50 }
 0x698   : >> { %3543 = vmatmul.mubr.msk.bf16.vlgmr.msra.gmra.mrb[12].mxu0 %vm1460_vm5, %v1722_v19 }
 0x699   : >> { %v4072_v21 = vpop.eup %4071  ;;  %3570 = vmatprep.mubr.msk.bf16.mxu0 (%p6202_p11), %vm5095_vm0, %v5094_v0 }
 0x69a   : >> { %v1709_v22 = vsel %vm1460_vm5, %v4072_v21, 0.0  ;;  %v1723_v23 = vpack.c.bf16 %v4072_v21, %v4072_v21  ;;  %v4074_v25 = vpop.eup %4073 }
 0x69b   : >> { %1710 = vadd.xlane.f32.xlu0 %v1709_v22  ;;  %v1696_v26 = vmul.f32 %v5045_v49, %v4074_v25  ;;  %v1716_v29 = vmul.f32 %v5029_v45, %v4074_v25  ;;  %v4076_v56 = vpop.eup %4075  ;;  %v3370_v25 = vld [vmem:[#allocation20] ss:$0 sm:$0xff] (%p6202_p11) }
 0x69c   : >> { %3549 = vmatmul.mubr.msk.bf16.vlgmr.msra.gmra.mrb[12].mxu1 %vm1460_vm5, %v1723_v23  ;;  %v1697_v57 = vmul.f32 %v5041_v48, %v4076_v56  ;;  %v4078_v58 = vpop.eup %4077  ;;  %v1717_v3 = vmul.f32 %v5025_v44, %v4076_v56  ;;  %v4083_v56 = vld [vmem:[#allocation24] sm:$0xff] (%p6202_p11)  }
 0x69d   : >> { %v4080_v62 = vpop.eup %4079  ;;  %v1718_v48 = vmul.f32 %v5021_v43, %v4078_v58  ;;  %3556 = vmatprep.mubr.msk.bf16.mxu1 (%p6202_p11), %vm5095_vm0, %v5094_v0 }
 0x69e   : >> { %v1719_v15 = vmul.f32 %v5017_v42, %v4080_v62 }
 0x6b9   : >> { %v1702_v28 = vpop.xlane.xlu0 %1701 }
 0x6ba   : >> { %v6190_v49 = vadd.f32 %v1702_v28, %v1696_v26  }
 0x6bc   : >> { %v6597_v54 = vmov %v6190_v49  ;;  %v1698_v49 = vmul.f32 %v5037_v47, %v4078_v58 }
 0x6f4   : >> { %v1765_v30 = vpop.f32.mrb[8].mxu0 }
 0x6f5   : >> { %v6193_v45 = vadd.f32 %v1765_v30, %v1716_v29   ;;  %v3532_v32 = vpop.f32.mrb[9].mxu0 }
 0x6f6   : >> { %v1768_v33 = vpop.f32.mrb[10].mxu0 }
 0x6f7   : >> { %v6598_v31 = vmov %v6193_v45  ;;  %v3533_v37 = vpop.f32.mrb[11].mxu0  ;;  %v1699_v45 = vmul.f32 %v5033_v46, %v4080_v62 }
 0x720   : >> { %v1705_v59 = vpop.xlane.xlu1 %1704 }
 0x721   : >> { %v1713_v60 = vadd.f32 %v1705_v59, %v1697_v57   ;;  %v4084_v57 = vld [vmem:[#allocation24 + $0x8] sm:$0xff] (%p6202_p11)  }
 0x723   : > { %4095 = vrcp.f32 (%p6202_p11), %v1713_v60 }
 0x724   : >> { %v1708_v63 = vpop.xlane.xlu0 %1707 }
 0x725   : >> { %v1714_v1 = vadd.f32 %v1708_v63, %v1698_v49   ;;  %v6607_v49 = vmov %v6597_v54 }
 0x727   : > { %4097 = vrcp.f32 (%p6202_p11), %v1714_v1 }
 0x728   : >> { %v1711_v4 = vpop.xlane.xlu0 %1710 }
 0x729   : >> { %v1715_v61 = vadd.f32 %v1711_v4, %v1699_v45   ;;  %v6603_v45 = vmov %v6598_v31  ;;  %v3375_v4 = vld [vmem:[#allocation23] ss:$0 sm:$0xff] (%p6202_p11) }
 0x72b   : > { %4099 = vrcp.f32 (%p6202_p11), %v1715_v61 }
 0x72c   : > { %4101 = vrcp.f32 (%p6202_p11), %v6597_v54 }
 0x72d   : > { %v4096_v20 = vpop.eup (%p6202_p11), %4095 }
 0x731   : > { %v4098_v34 = vpop.eup (%p6202_p11), %4097 }
 0x735   : > { %v4100_v40 = vpop.eup (%p6202_p11), %4099 }
 0x767   : >> { %v1811_v5 = vpop.f32.mrb[8].mxu1 }
 0x768   : >> { %v1910_v6 = vadd.f32 %v1811_v5, %v1717_v3   ;;  %v3538_v7 = vpop.f32.mrb[9].mxu1 }
 0x769   : >> { %v1814_v52 = vpop.f32.mrb[10].mxu1 }
 0x76a   : >> { %v3539_v11 = vpop.f32.mrb[11].mxu1  ;;  %v6602_v44 = vmov %v1910_v6  ;;  %v6610_v52 = vmov %v6161_v53  ;;  %v6611_v53 = vmov %v6150_v35  ;;  %v4082_v35 = vld [vmem:[#allocation18 + $0x8] sm:$0xff] (%p6202_p11)   ;;  %v1918_v39 = vmul.f32 (%p6202_p11), %v4096_v20, %v1910_v6 }
 0x76b   : >> { %v1857_v12 = vpop.f32.mrb[12].mxu0 }
 0x76c   : >> { %v1911_v13 = vadd.f32 %v1857_v12, %v1718_v48   ;;  %v3544_v51 = vpop.f32.mrb[13].mxu0  ;;  %v6606_v48 = vmov %v1713_v60  ;;  %1922 = vrot.lane.b32.xlu0 (%p6202_p11), %v1918_v39, %s5105_s0 }
 0x76d   : >> { %v1860_v47 = vpop.f32.mrb[14].mxu0  ;;  %v6609_v51 = vmov %v6167_v2  ;;  %1424 = sbr.rel (!%p6202_p11) target bundleno = 1181 (0x49d), region = 291 }
 0x76e   : >> { %v3545_v14 = vpop.f32.mrb[15].mxu0  ;;  %v6601_v43 = vmov %v1911_v13  ;;  %v6605_v47 = vmov %v1714_v1  ;;  %v1919_v41 = vmul.f32 (%p6202_p11), %v4098_v34, %v1911_v13  ;;  %v3374_v1 = vld [vmem:[#allocation21] ss:$0 sm:$0xff] (%p6202_p11)  ;;  %v3376_v13 = vld [vmem:[#allocation26] ss:$0 sm:$0xff] (%p6202_p11) }
 0x76f   : >> { %v1903_v16 = vpop.f32.mrb[12].mxu1  ;;  %v4102_v43 = vpop.eup (%p6202_p11), %4101 }
 0x770   : >> { %v1912_v17 = vadd.f32 %v1903_v16, %v1719_v15   ;;  %v3550_v46 = vpop.f32.mrb[13].mxu1  ;;  %1926 = vrot.lane.b32.xlu0 (%p6202_p11), %v1919_v41, %s5107_s13  ;;  %v1917_v53 = vmul.f32 (%p6202_p11), %v4102_v43, %v6598_v31  ;;  %v2340_v41 = vld [vmem:[%s992_s4] sm:$0x1] (%p6202_p11)  ;;  %v5108_v43 = vmov (%p6202_p11), 0   ;;  %s6612_s4 = sld [smem:[#allocation60_spill]] (%p6202_p11) }
 0x771   : >> { %v1906_v18 = vpop.f32.mrb[14].mxu1  ;;  %v6604_v46 = vmov %v1715_v61  ;;  %vm2341_vm10 = vcmp.gt.f32.partialorder (%p6202_p11), %v2340_v41, 0.0 }
 0x772   : >> { %v3551_v50 = vpop.f32.mrb[15].mxu1  ;;  %v6600_v42 = vmov %v1912_v17 }
 0x773   : >> { %v6608_v50 = vmov %v6173_v10  ;;  %v4081_v10 = vld [vmem:[#allocation18] sm:$0xff] (%p6202_p11)   ;;  %v1920_v42 = vmul.f32 (%p6202_p11), %v4100_v40, %v1912_v17 }
 0x774   : > { %3553 = vmatpush3.bf16.msra.mxu1 %v4081_v10 }
 0x775   : > { %3554 = vmatprep.subr.bf16.mxu1 %v5094_v0  ;;  %1930 = vrot.lane.b32.xlu1 %v1920_v42, %s5106_s27  ;;  %v2345_v42 = vsub.s32 0, %v5994_v27 }
 0x778   : > { %3555 = vmatpush3.bf16.msra.mxu1 %v4082_v35 }
 0x779   : > { %3560 = vmatprep.subr.bf16.mxu1 %v5094_v0 }
 0x7de   : > { %v1923_v44 = vpop.permute.xlu0 %1922 }
 0x7df   : > { %v1934_v19 = vsel %vm1460_vm5, %v1917_v53, %v1923_v44  ;;  %v2342_v44 = vsel %vm2341_vm10, 1, %v5108_v43 }
 0x7e0   : > { %v2346_v53 = vrot.slane %v2342_v44, %v2345_v42 }
 0x7e2   : > { %v1927_v21 = vpop.permute.xlu0 %1926  ;;  %vm2347_vm11 = vcmp.eq.s32.totalorder %v2346_v53, 1 }
 0x7e3   : > { %v1936_v22 = vsel %vm1935_vm8, %v1934_v19, %v1927_v21 }
 0x7e7   : > { %v1931_v2 = vpop.permute.xlu1 %1930 }
 0x7e8   : > { %v1938_v23 = vsel %vm1937_vm9, %v1936_v22, %v1931_v2 }
 0x7e9   : > { %v1939_v24 = vpack.c.bf16 %v1938_v23, %v1938_v23 }
 0x7eb   : > { %3557 = vmatmul.mubr.msk.bf16.vlgmr.msra.gmra.mrb[0].mxu1 %vm1185_vm1, %v1939_v24 }
 0x7ec   : > { %3564 = vmatprep.mubr.msk.bf16.mxu1 %vm5095_vm0, %v5094_v0  ;;  %3561 = vmatpush3.bf16.msra.mxu1 %v4083_v56 }
 0x7ed   : > { %3562 = vmatprep.subr.bf16.mxu1 %v5094_v0 }
 0x7f0   : > { %3563 = vmatpush3.bf16.msra.mxu1 %v4084_v57 }
 0x7f1   : > { %3574 = vmatprep.subr.bf16.mxu1 %v5094_v0 }
 0x8be   : > { %v2000_v26 = vpop.f32.mrb[0].mxu1 }
 0x8bf   : > { %v2001_v28 = vadd.f32 %v3370_v25, %v2000_v26  ;;  %v3558_v54 = vpop.f32.mrb[1].mxu1 }
 0x8c0   : > { %v2003_v29 = vpop.f32.mrb[2].mxu1 }
 0x8c1   : > { %v2006_v30 = vadd.f32 %v2001_v28, %v1338_v9  ;;  %v3559_v31 = vpop.f32.mrb[3].mxu1  ;;  %v2112_v9 = vld [vmem:[#allocation4] sm:$0xf] }
 0x8c2   : > { %v3380_v58 = vcombine.low %v2112_v9, %v2113_v8 }
 0x8c3   : > { %v2009_v32 = vsel %vm1185_vm1, %v2006_v30, 0.0 }
 0x8c4   : > { %2010 = vadd.xlane.f32.xlu1 %v2009_v32  ;;  %v2151_v59 = vsel %vm1460_vm5, %v3380_v58, 0  ;;  %v2128_v58 = vld [vmem:[#allocation5] sm:$0xf] }
 0x8c5   : > { %3569 = vmatpush3.bf16.xpose.msra.mxu0 %v2151_v59  ;;  %v2129_v59 = vld [vmem:[#allocation5 + $0x4] sm:$0x3] }
 0x8c6   : > { %3580 = vmatprep.subr.bf16.mxu0 %v5094_v0 }
 0x8d5   : > { %2118 = vrot.lane.b32.xlu1 %v2113_v8, %s5097_s20 }
 0x8d9   : > { %2120 = vrot.lane.b32.xlu1 %v2112_v9, %s5098_s5 }
 0x8dd   : > { %2124 = vrot.lane.b32.xlu1 %v2112_v9, %s5099_s30 }
 0x951   : > { %v2011_v33 = vpop.xlane.xlu1 %2010 }
 0x952   : > { %v2013_v37 = vmul.f32 0.03125, %v2011_v33 }
 0x954   : > { %v2014_v38 = vsub.f32 %v2006_v30, %v2013_v37 }
 0x955   : > { %v2119_v7 = vpop.permute.xlu1 %2118 }
 0x956   : > { %v2015_v55 = vmul.f32 %v2014_v38, %v2014_v38 }
 0x958   : > { %v2016_v36 = vsel %vm1185_vm1, %v2015_v55, 0.0 }
 0x959   : > { %2017 = vadd.xlane.f32.xlu0 %v2016_v36  ;;  %v2121_v12 = vpop.permute.xlu1 %2120 }
 0x95d   : > { %v2125_v10 = vpop.permute.xlu1 %2124 }
 0x96f   : > { %2116 = vrot.lane.b32.xlu0 %v2112_v9, %s5097_s20 }
 0x973   : > { %2122 = vrot.lane.b32.xlu0 %v2113_v8, %s5098_s5 }
 0x977   : > { %2126 = vrot.lane.b32.xlu0 %v2113_v8, %s5099_s30 }
 0x9e6   : > { %v2018_v60 = vpop.xlane.xlu0 %2017 }
 0x9e7   : > { %v2019_v49 = vmul.f32 0.03125, %v2018_v60 }
 0x9e9   : > { %v2020_v62 = vadd.f32 1e-05, %v2019_v49 }
 0x9ea   : > { %v2117_v6 = vpop.permute.xlu0 %2116 }
 0x9eb   : > { %4103 = vrsqrt.f32 %v2020_v62  ;;  %v3382_v52 = vcombine.low %v2117_v6, %v2119_v7 }
 0x9ed   : > { %v2200_v11 = vsel %vm1460_vm5, %v3382_v52, 0 }
 0x9ee   : > { %v2123_v48 = vpop.permute.xlu0 %2122 }
 0x9ef   : > { %v3384_v47 = vcombine.low %v2121_v12, %v2123_v48 }
 0x9f1   : > { %v2249_v18 = vsel %vm1460_vm5, %v3384_v47, 0 }
 0x9f2   : > { %v2127_v50 = vpop.permute.xlu0 %2126 }
 0x9f3   : > { %v3386_v35 = vcombine.low %v2125_v10, %v2127_v50 }
 0x9f5   : > { %v4104_v63 = vpop.eup %4103  ;;  %v2298_v20 = vsel %vm1460_vm5, %v3386_v35, 0 }
 0x9f6   : > { %v2022_v45 = vmul.f32 %v4104_v63, %v2014_v38 }
 0x9f8   : > { %v2029_v61 = vmul.f32 %v3374_v1, %v2022_v45  ;;  %v3388_v45 = vcombine.low %v2128_v58, %v2129_v59 }
 0x9fa   : > { %v6273_v3 = vadd.f32 %v3375_v4, %v2029_v61  ;;  %v2409_v4 = vsel %vm2407_vm13, %v3388_v45, 0 }
 0x9fc   : > { %v2037_v5 = vpack.c.bf16 %v6273_v3, %v6273_v3 }
 0x9fe   : > { %3565 = vmatmul.mubr.msk.bf16.vlgmr.msra.gmra.mrb[4].mxu1 %vm1185_vm1, %v2037_v5 }
 0x9ff   : > { %3576 = vmatprep.mubr.msk.bf16.mxu1 %vm5095_vm0, %v5094_v0  ;;  %3575 = vmatpush3.bf16.xpose.msra.mxu1 %v2200_v11 }
 0xa00   : > { %3586 = vmatprep.subr.bf16.mxu1 %v5094_v0 }
 0xad1   : > { %v2098_v51 = vpop.f32.mrb[4].mxu1 }
 0xad2   : > { %v2099_v14 = vadd.f32 %v3376_v13, %v2098_v51  ;;  %v3566_v15 = vpop.f32.mrb[5].mxu1 }
 0xad3   : > { %v2101_v16 = vpop.f32.mrb[6].mxu1 }
 0xad4   : > { %v2104_v17 = vpack.c.bf16 %v2099_v14, %v2099_v14  ;;  %v3567_v46 = vpop.f32.mrb[7].mxu1 }
 0xad6   : > { %2108 = vrot.lane.b32.xlu0 %v2104_v17, %s5098_s5  ;;  %2106 = vrot.lane.b32.xlu1 %v2104_v17, %s5097_s20 }
 0xad7   : > { %3571 = vmatmul.mubr.msk.bf16.vlgmr.msra.gmra.mrb[0].mxu0 %vm1460_vm5, %v2104_v17 }
 0xad8   : > { %3581 = vmatpush3.bf16.xpose.msra.mxu0 %v2249_v18  ;;  %3582 = vmatprep.mubr.msk.bf16.mxu0 %vm5095_vm0, %v5094_v0 }
 0xad9   : > { %3592 = vmatprep.subr.bf16.mxu0 %v5094_v0 }
 0xada   : > { %2110 = vrot.lane.b32.xlu1 %v2104_v17, %s5099_s30 }
 0xb48   : > { %v2109_v34 = vpop.permute.xlu0 %2108  ;;  %v2107_v39 = vpop.permute.xlu1 %2106 }
 0xb49   : > { %3577 = vmatmul.mubr.msk.bf16.vlgmr.msra.gmra.mrb[8].mxu1 %vm1460_vm5, %v2107_v39  ;;  %3583 = vmatmul.mubr.msk.bf16.vlgmr.msra.gmra.mrb[4].mxu0 %vm1460_vm5, %v2109_v34 }
 0xb4a   : > { %3587 = vmatpush3.bf16.xpose.msra.mxu1 %v2298_v20  ;;  %3588 = vmatprep.mubr.msk.bf16.mxu1 %vm5095_vm0, %v5094_v0 }
 0xb4b   : > { %3594 = vmatprep.mubr.msk.bf16.mxu0 %vm5095_vm0, %v5094_v0  ;;  %3598 = vmatprep.subr.bf16.mxu1 %v5094_v0 }
 0xb4c   : > { %v2111_v40 = vpop.permute.xlu1 %2110  ;;  %3593 = vmatpush3.bf16.msra.mxu0 %v2409_v4 }
 0xb4d   : > { %3604 = vmatprep.subr.bf16.mxu0 %v5094_v0 }
 0xb51   : > { %3589 = vmatmul.mubr.msk.bf16.vlgmr.msra.gmra.mrb[12].mxu1 %vm1460_vm5, %v2111_v40 }
 0xb52   : > { %3600 = vmatprep.mubr.msk.bf16.mxu1 %vm5095_vm0, %v5094_v0 }
 0xbaa   : > { %v2187_v2 = vpop.f32.mrb[0].mxu0 }
 0xbab   : > { %v2348_v19 = vsel %vm2347_vm11, %v2187_v2, -1e+20  ;;  %v3572_v21 = vpop.f32.mrb[1].mxu0 }
 0xbac   : > { %v2190_v22 = vpop.f32.mrb[2].mxu0  ;;  %v2353_v23 = vsel %vm2352_vm12, %v2348_v19, -inf }
 0xbad   : > { %2354 = vmax.xlane.f32.xlu0 %v2353_v23  ;;  %v3573_v24 = vpop.f32.mrb[3].mxu0 }
 0xc1c   : > { %v2236_v25 = vpop.f32.mrb[8].mxu1  ;;  %v2285_v26 = vpop.f32.mrb[4].mxu0 }
 0xc1d   : > { %v2349_v28 = vsel %vm2347_vm11, %v2236_v25, -1e+20  ;;  %v2350_v27 = vsel %vm2347_vm11, %v2285_v26, -1e+20  ;;  %v3578_v54 = vpop.f32.mrb[9].mxu1  ;;  %v3584_v29 = vpop.f32.mrb[5].mxu0 }
 0xc1e   : > { %v2239_v30 = vpop.f32.mrb[10].mxu1  ;;  %v2288_v31 = vpop.f32.mrb[6].mxu0  ;;  %v2359_v32 = vsel %vm2352_vm12, %v2350_v27, -inf  ;;  %v2356_v33 = vsel %vm2352_vm12, %v2349_v28, -inf }
 0xc1f   : > { %2360 = vmax.xlane.f32.xlu0 %v2359_v32  ;;  %v3585_v37 = vpop.f32.mrb[7].mxu0  ;;  %2357 = vmax.xlane.f32.xlu1 %v2356_v33  ;;  %v3579_v38 = vpop.f32.mrb[11].mxu1 }
 0xc24   : > { %v2334_v55 = vpop.f32.mrb[12].mxu1 }
 0xc25   : > { %v2351_v36 = vsel %vm2347_vm11, %v2334_v55, -1e+20  ;;  %v3590_v56 = vpop.f32.mrb[13].mxu1  ;;  %v4087_v55 = vld [vmem:[#allocation30] sm:$0xff]  }
 0xc26   : > { %v2337_v57 = vpop.f32.mrb[14].mxu1  ;;  %v2362_v8 = vsel %vm2352_vm12, %v2351_v36, -inf }
 0xc27   : > { %2363 = vmax.xlane.f32.xlu0 %v2362_v8  ;;  %v3591_v9 = vpop.f32.mrb[15].mxu1 }
 0xc30   : > { %2132 = vrot.lane.b32.xlu1 %v2128_v58, %s5097_s20 }
 0xc34   : > { %2136 = vrot.lane.b32.xlu1 %v2128_v58, %s5098_s5 }
 0xc38   : > { %2138 = vrot.lane.b32.xlu1 %v2129_v59, %s5098_s5  ;;  %s2910_s5 = sshll.u32 %s6018_s21, 4  ;;  %s6370_s5 = int_to_ptr.vmem [resolvable:$true] %s2910_s5 }
 0xc39   : > { %s4831_s26 = scalar_lea.vmem %s6370_s5, 64  ;;  %p4838_p5 = scmp.lt.s32.totalorder %s6370_s5, %s4836_s23 }
 0xc3a   : > { %v2355_v60 = vpop.xlane.xlu0 %2354  ;;  %p4832_p0 = scmp.ne.s32.totalorder %s6370_s5, %s4831_s26  ;;  %p4839_p12 = scmp.lt.s32.totalorder %s4837_s8, %s4831_s26 }
 0xc3b   : > { %v2365_v49 = vsub.f32 %v2348_v19, %v2355_v60 }
 0xc3c   : > { %p4833_p10 = pnand %p4832_p0, %p6614_p3  ;;  %p4840_p13 = por %p4839_p12, %p4838_p5 }
 0xc3d   : > { %2134 = vrot.lane.b32.xlu0 %v2129_v59, %s5097_s20  ;;  %v2369_v62 = vmul.f32 1.442695, %v2365_v49  ;;  %s3415_s20 = sshll.u32 %s6612_s4, 6 }
 0xc3e   : > { %s6368_s18 = scalar_lea.hbm %s6613_s22, %s3415_s20  ;;  %p4834_p9 = pneg %p4833_p10 }
 0xc3f   : > { %4105 = vpow2.f32 %v2369_v62 }
 0xc40   : > { %p4841_p4 = pnand %p4840_p13, %p4834_p9 }
 0xc49   : > { %v4106_v63 = vpop.eup %4105 }
 0xc4a   : > { %v2377_v1 = vsel %vm2352_vm12, %v4106_v63, 0.0 }
 0xc5c   : > { %2378 = vadd.xlane.f32.xlu1 %v2377_v1 }
 0xcac   : > { %v2361_v61 = vpop.xlane.xlu0 %2360  ;;  %v2358_v5 = vpop.xlane.xlu1 %2357 }
 0xcad   : > { %v2367_v6 = vsub.f32 %v2350_v27, %v2361_v61  ;;  %v2366_v7 = vsub.f32 %v2349_v28, %v2358_v5 }
 0xcaf   : > { %v2373_v52 = vmul.f32 1.442695, %v2367_v6  ;;  %v2371_v11 = vmul.f32 1.442695, %v2366_v7 }
 0xcb0   : > { %v2133_v51 = vpop.permute.xlu1 %2132 }
 0xcb1   : > { %4107 = vpow2.f32 %v2373_v52 }
 0xcb2   : > { %4109 = vpow2.f32 %v2371_v11 }
 0xcb4   : > { %v2364_v48 = vpop.xlane.xlu0 %2363  ;;  %v2137_v35 = vpop.permute.xlu1 %2136 }
 0xcb5   : > { %v2368_v12 = vsub.f32 %v2351_v36, %v2364_v48  ;;  %v4088_v36 = vld [vmem:[#allocation30 + $0x8] sm:$0xff]   ;;  %v3396_v48 = vld [vmem:[#allocation32] ss:$0 sm:$0xff] }
 0xcb7   : > { %v2375_v13 = vmul.f32 1.442695, %v2368_v12 }
 0xcb8   : > { %v2135_v47 = vpop.permute.xlu0 %2134  ;;  %v2139_v20 = vpop.permute.xlu1 %2138 }
 0xcb9   : > { %4111 = vpow2.f32 %v2375_v13  ;;  %v3390_v14 = vcombine.low %v2133_v51, %v2135_v47  ;;  %v3392_v39 = vcombine.low %v2137_v35, %v2139_v20  ;;  %v4089_v35 = vld [vmem:[#allocation36] sm:$0xff]   ;;  %v4090_v20 = vld [vmem:[#allocation36 + $0x8] sm:$0xff]  }
 0xcbb   : > { %v4108_v15 = vpop.eup %4107  ;;  %v2458_v16 = vsel %vm2407_vm13, %v3390_v14, 0  ;;  %v2507_v42 = vsel %vm2407_vm13, %v3392_v39, 0  ;;  %v4092_v39 = vld [vmem:[#allocation39 + $0x8] sm:$0xff]  }
 0xcbc   : > { %v4110_v17 = vpop.eup %4109  ;;  %v2383_v46 = vsel %vm2352_vm12, %v4108_v15, 0.0  ;;  %3599 = vmatpush3.bf16.msra.mxu1 %v2458_v16 }
 0xcbd   : > { %2384 = vadd.xlane.f32.xlu1 %v2383_v46  ;;  %v2380_v18 = vsel %vm2352_vm12, %v4110_v17, 0.0  ;;  %3610 = vmatprep.subr.bf16.mxu1 %v5094_v0 }
 0xcbe   : > { %2381 = vadd.xlane.f32.xlu0 %v2380_v18 }
 0xcc3   : > { %v4112_v50 = vpop.eup %4111 }
 0xcc4   : > { %v2386_v10 = vsel %vm2352_vm12, %v4112_v50, 0.0 }
 0xcc5   : > { %2387 = vadd.xlane.f32.xlu0 %v2386_v10 }
 0xcce   : > { %2142 = vrot.lane.b32.xlu1 %v2129_v59, %s5099_s30 }
 0xcdb   : > { %2140 = vrot.lane.b32.xlu0 %v2128_v58, %s5099_s30 }
 0xce9   : > { %v2379_v34 = vpop.xlane.xlu1 %2378 }
 0xcea   : > { %4113 = vrcp.f32 %v2379_v34  ;;  %v4091_v34 = vld [vmem:[#allocation39] sm:$0xff]  }
 0xcf4   : > { %v4114_v40 = vpop.eup %4113 }
 0xcf5   : > { %v2393_v41 = vmul.f32 %v4114_v40, %v4106_v63 }
 0xcf7   : > { %v2397_v43 = vpack.c.bf16 %v2393_v41, %v2393_v41 }
 0xcf9   : > { %3595 = vmatmul.mubr.msk.bf16.vlgmr.msra.gmra.mrb[8].mxu0 %vm2352_vm12, %v2397_v43  ;;  %v3400_v43 = vld [vmem:[#allocation33] ss:$0 sm:$0xff] }
 0xcfa   : > { %3605 = vmatpush3.bf16.msra.mxu0 %v2507_v42  ;;  %3606 = vmatprep.mubr.msk.bf16.mxu0 %vm5095_vm0, %v5094_v0 }
 0xcfb   : > { %3616 = vmatprep.subr.bf16.mxu0 %v5094_v0 }
 0xd4a   : > { %v2385_v44 = vpop.xlane.xlu1 %2384 }
 0xd4b   : > { %4115 = vrcp.f32 %v2385_v44  ;;  %v2382_v53 = vpop.xlane.xlu0 %2381 }
 0xd4c   : > { %4117 = vrcp.f32 %v2382_v53  ;;  %v3401_v53 = vld [vmem:[#allocation35] ss:$0 sm:$0xff] }
 0xd4e   : > { %v2143_v19 = vpop.permute.xlu1 %2142 }
 0xd52   : > { %v2388_v2 = vpop.xlane.xlu0 %2387 }
 0xd53   : > { %4119 = vrcp.f32 %v2388_v2 }
 0xd55   : > { %v4116_v21 = vpop.eup %4115 }
 0xd56   : > { %v4118_v22 = vpop.eup %4117  ;;  %v2395_v23 = vmul.f32 %v4116_v21, %v4108_v15  ;;  %v2141_v24 = vpop.permute.xlu0 %2140 }
 0xd57   : > { %v2394_v25 = vmul.f32 %v4118_v22, %v4110_v17  ;;  %v3394_v26 = vcombine.low %v2141_v24, %v2143_v19  ;;  %v4093_v22 = vld [vmem:[#allocation39 + $0x10] sm:$0xff]   ;;  %v3402_v24 = vld [vmem:[#allocation38] ss:$0 sm:$0xff] }
 0xd58   : > { %v2399_v28 = vpack.c.bf16 %v2395_v23, %v2395_v23  ;;  %v4094_v23 = vld [vmem:[#allocation39 + $0x18] sm:$0xff]  }
 0xd59   : > { %v2556_v27 = vsel %vm2407_vm13, %v3394_v26, 0  ;;  %v2398_v54 = vpack.c.bf16 %v2394_v25, %v2394_v25 }
 0xd5a   : > { %3607 = vmatmul.mubr.msk.bf16.vlgmr.msra.gmra.mrb[12].mxu0 %vm2352_vm12, %v2399_v28 }
 0xd5b   : > { %3601 = vmatmul.mubr.msk.bf16.vlgmr.msra.gmra.mrb[16].mxu1 %vm2352_vm12, %v2398_v54  ;;  %3620 = vmatprep.mubr.msk.bf16.mxu0 %vm5095_vm0, %v5094_v0 }
 0xd5c   : > { %3611 = vmatpush3.bf16.msra.mxu1 %v2556_v27  ;;  %3612 = vmatprep.mubr.msk.bf16.mxu1 %vm5095_vm0, %v5094_v0 }
 0xd5d   : > { %v4120_v29 = vpop.eup %4119  ;;  %3624 = vmatprep.subr.bf16.mxu1 %v5094_v0  ;;  %3617 = vmatpush3.bf16.msra.mxu0 %v4087_v55 }
 0xd5e   : > { %v2396_v30 = vmul.f32 %v4120_v29, %v4112_v50  ;;  %3618 = vmatprep.subr.bf16.mxu0 %v5094_v0 }
 0xd60   : > { %v2400_v31 = vpack.c.bf16 %v2396_v30, %v2396_v30 }
 0xd61   : > { %3619 = vmatpush3.bf16.msra.mxu0 %v4088_v36 }
 0xd62   : > { %3632 = vmatprep.subr.bf16.mxu0 %v5094_v0 }
 0xd63   : > { %3613 = vmatmul.mubr.msk.bf16.vlgmr.msra.gmra.mrb[20].mxu1 %vm2352_vm12, %v2400_v31  ;;  %v3406_v31 = vld [vmem:[#allocation41] ss:$0 sm:$0xff] }
 0xd64   : > { %3628 = vmatprep.mubr.msk.bf16.mxu1 %vm5095_vm0, %v5094_v0  ;;  %3625 = vmatpush3.bf16.msra.mxu1 %v4089_v35 }
 0xd65   : > { %3626 = vmatprep.subr.bf16.mxu1 %v5094_v0 }
 0xd68   : > { %3627 = vmatpush3.bf16.msra.mxu1 %v4090_v20 }
 0xdcc   : > { %v2445_v32 = vpop.f32.mrb[8].mxu0 }
 0xdcd   : > { %v3596_v33 = vpop.f32.mrb[9].mxu0 }
 0xdce   : > { %v2448_v37 = vpop.f32.mrb[10].mxu0 }
 0xdcf   : > { %v3597_v38 = vpop.f32.mrb[11].mxu0 }
 0xe2d   : > { %v2543_v56 = vpop.f32.mrb[12].mxu0 }
 0xe2e   : > { %v2494_v57 = vpop.f32.mrb[16].mxu1  ;;  %2603 = vrot.lane.b32.xlu1 %v2543_v56, %s5107_s13  ;;  %v3608_v8 = vpop.f32.mrb[13].mxu0 }
 0xe2f   : > { %2599 = vrot.lane.b32.xlu0 %v2494_v57, %s5105_s0  ;;  %v3602_v9 = vpop.f32.mrb[17].mxu1  ;;  %v2546_v58 = vpop.f32.mrb[14].mxu0 }
 0xe30   : > { %v2497_v59 = vpop.f32.mrb[18].mxu1  ;;  %v3609_v60 = vpop.f32.mrb[15].mxu0 }
 0xe31   : > { %v3603_v49 = vpop.f32.mrb[19].mxu1 }
 0xe36   : > { %v2592_v62 = vpop.f32.mrb[20].mxu1 }
 0xe37   : > { %2607 = vrot.lane.b32.xlu0 %v2592_v62, %s5106_s27  ;;  %v3614_v63 = vpop.f32.mrb[21].mxu1 }
 0xe38   : > { %v2595_v1 = vpop.f32.mrb[22].mxu1  ;;  %v3412_v63 = vld [vmem:[#allocation42] ss:$0 sm:$0xff] }
 0xe39   : > { %v3615_v45 = vpop.f32.mrb[23].mxu1 }
 0xe3a   : > { %v3413_v45 = vld [vmem:[#allocation44] ss:$0 sm:$0xff] }
 0xea0   : > { %v2604_v61 = vpop.permute.xlu1 %2603 }
 0xea1   : > { %v2600_v4 = vpop.permute.xlu0 %2599 }
 0xea2   : > { %v2610_v5 = vsel %vm1460_vm5, %v2445_v32, %v2600_v4 }
 0xea3   : > { %v2611_v6 = vsel %vm1935_vm8, %v2610_v5, %v2604_v61 }
 0xea9   : > { %v2608_v7 = vpop.permute.xlu0 %2607 }
 0xeaa   : > { %v2612_v52 = vsel %vm1937_vm9, %v2611_v6, %v2608_v7 }
 0xeab   : > { %v2613_v11 = vpack.c.bf16 %v2612_v52, %v2612_v52 }
 0xead   : > { %3621 = vmatmul.mubr.msk.bf16.vlgmr.msra.gmra.mrb[16].mxu0 %vm1185_vm1, %v2613_v11 }
 0xeae   : > { %3640 = vmatprep.mubr.msk.bf16.mxu0 %vm5095_vm0, %v5094_v0  ;;  %3633 = vmatpush3.bf16.msra.mxu0 %v4091_v34 }
 0xeaf   : > { %3634 = vmatprep.subr.bf16.mxu0 %v5094_v0 }
 0xeb2   : > { %3635 = vmatpush3.bf16.msra.mxu0 %v4092_v39 }
 0xeb3   : > { %3636 = vmatprep.subr.bf16.mxu0 %v5094_v0 }
 0xeb6   : > { %3637 = vmatpush3.bf16.msra.mxu0 %v4093_v22 }
 0xeb7   : > { %3638 = vmatprep.subr.bf16.mxu0 %v5094_v0 }
 0xeba   : > { %3639 = vmatpush3.bf16.msra.mxu0 %v4094_v23 }
 0xf80   : > { %v2674_v12 = vpop.f32.mrb[16].mxu0 }
 0xf81   : > { %v2675_v13 = vadd.f32 %v3396_v48, %v2674_v12  ;;  %v3622_v51 = vpop.f32.mrb[17].mxu0 }
 0xf82   : > { %v2677_v47 = vpop.f32.mrb[18].mxu0 }
 0xf83   : > { %v3623_v14 = vpop.f32.mrb[19].mxu0  ;;  %v2680_v15 = vadd.f32 %v2675_v13, %v6273_v3 }
 0xf85   : > { %v2683_v16 = vsel %vm1185_vm1, %v2680_v15, 0.0 }
 0xf86   : > { %2684 = vadd.xlane.f32.xlu1 %v2683_v16 }
0x1013   : > { %v2685_v17 = vpop.xlane.xlu1 %2684 }
0x1014   : > { %v2686_v46 = vmul.f32 0.03125, %v2685_v17 }
0x1016   : > { %v2687_v18 = vsub.f32 %v2680_v15, %v2686_v46 }
0x1018   : > { %v2688_v50 = vmul.f32 %v2687_v18, %v2687_v18 }
0x101a   : > { %v2689_v10 = vsel %vm1185_vm1, %v2688_v50, 0.0 }
0x101b   : > { %2690 = vadd.xlane.f32.xlu0 %v2689_v10 }
0x10a8   : > { %v2691_v3 = vpop.xlane.xlu0 %2690 }
0x10a9   : > { %v2692_v40 = vmul.f32 0.03125, %v2691_v3 }
0x10ab   : > { %v2693_v41 = vadd.f32 1e-05, %v2692_v40 }
0x10ad   : > { %4121 = vrsqrt.f32 %v2693_v41 }
0x10b7   : > { %v4122_v42 = vpop.eup %4121 }
0x10b8   : > { %v2695_v44 = vmul.f32 %v4122_v42, %v2687_v18 }
0x10ba   : > { %v2702_v2 = vmul.f32 %v3400_v43, %v2695_v44 }
0x10bc   : > { %v2709_v19 = vadd.f32 %v3401_v53, %v2702_v2 }
0x10be   : > { %v2710_v21 = vpack.c.bf16 %v2709_v19, %v2709_v19 }
0x10c0   : > { %3629 = vmatmul.mubr.msk.bf16.vlgmr.msra.gmra.mrb[24].mxu1 %vm1185_vm1, %v2710_v21 }
0x1193   : > { %v2771_v25 = vpop.f32.mrb[24].mxu1 }
0x1194   : > { %v2772_v26 = vadd.f32 %v3402_v24, %v2771_v25  ;;  %v3630_v28 = vpop.f32.mrb[25].mxu1 }
0x1195   : > { %v2774_v27 = vpop.f32.mrb[26].mxu1 }
0x1196   : > { %v2777_v54 = vmax.f32 %v2772_v26, 0.0  ;;  %v3631_v29 = vpop.f32.mrb[27].mxu1 }
0x1198   : > { %v2778_v30 = vpack.c.bf16 %v2777_v54, %v2777_v54 }
0x119a   : > { %3641 = vmatmul.mubr.msk.bf16.vlgmr.msra.gmra.mrb[20].mxu0 %vm2818_vm14, %v2778_v30 }
0x126d   : > { %v2856_v32 = vpop.f32.mrb[20].mxu0 }
0x126e   : > { %v2857_v33 = vadd.f32 %v3406_v31, %v2856_v32  ;;  %v3642_v37 = vpop.f32.mrb[21].mxu0 }
0x126f   : > { %v2859_v38 = vpop.f32.mrb[22].mxu0 }
0x1270   : > { %v3643_v55 = vpop.f32.mrb[23].mxu0  ;;  %v2862_v36 = vadd.f32 %v2857_v33, %v2709_v19 }
0x1272   : > { %v2865_v0 = vsel %vm1185_vm1, %v2862_v36, 0.0 }
0x1273   : > { %2866 = vadd.xlane.f32.xlu0 %v2865_v0 }
0x1300   : > { %v2867_v56 = vpop.xlane.xlu0 %2866 }
0x1301   : > { %v2868_v57 = vmul.f32 0.03125, %v2867_v56 }
0x1303   : > { %v2869_v8 = vsub.f32 %v2862_v36, %v2868_v57 }
0x1305   : > { %v2870_v9 = vmul.f32 %v2869_v8, %v2869_v8 }
0x1307   : > { %v2871_v58 = vsel %vm1185_vm1, %v2870_v9, 0.0 }
0x1308   : > { %2872 = vadd.xlane.f32.xlu1 %v2871_v58 }
0x1395   : > { %v2873_v59 = vpop.xlane.xlu1 %2872 }
0x1396   : > { %v2874_v60 = vmul.f32 0.03125, %v2873_v59 }
0x1398   : > { %v2875_v49 = vadd.f32 1e-05, %v2874_v60 }
0x139a   : > { %4123 = vrsqrt.f32 %v2875_v49 }
0x13a4   : > { %v4124_v62 = vpop.eup %4123 }
0x13a5   : > { %v2877_v1 = vmul.f32 %v4124_v62, %v2869_v8 }
0x13a7   : > { %v2884_v4 = vmul.f32 %v3412_v63, %v2877_v1 }
0x13a9   : > { %v2891_v61 = vadd.f32 %v3413_v45, %v2884_v4 }
0x13ab   : > { %v2892_v5 = vpack.c.bf16 %v2891_v61, %v2891_v61 }
0x13ad   : > { %2894 = vst.msk [vmem:[%s6018_s21] sm:$0xf] %vm1230_vm2, %v2892_v5 }
0x13ae   : > { %4844 = shalt.err (!%p4841_p4)
}
0x13af   : > { %s4845_s15 = scalar_lea.hbm %s6368_s18, 64  ;;  %s4849_s27 = scalar_lea.hbm %s6613_s22, 128 }
0x13b0   : > { %p4846_p7 = scmp.ne.s32.totalorder %s6368_s18, %s4845_s15  ;;  %p4850_p1 = scmp.lt.u32.totalorder %s6368_s18, %s6613_s22 }
0x13b1   : > { %p4851_p6 = scmp.lt.u32.totalorder %s4849_s27, %s4845_s15  ;;  %p4853_p0 = scmp.lt.u32.totalorder %s4845_s15, %s6368_s18 }
0x13b2   : > { %p4847_p2 = pnand %p4846_p7, %p6614_p3 }
0x13b3   : > { %p4852_p11 = por %p4851_p6, %p4850_p1 }
0x13b4   : > { %p4848_p8 = pneg %p4847_p2 }
0x13b5   : > { %p4854_p10 = por %p4853_p0, %p4852_p11 }
0x13b7   : > { %p4855_p9 = pnand %p4854_p10, %p4848_p8 }
0x13b9   : > { %4858 = shalt.err (!%p4855_p9)
}
0x13ba   : > { %3738 = dma.vmem_to_hbm [thread:$0]  (%p6614_p3), %s6370_s5, 64, %s6368_s18, %s2896_s11  }
0x13bb PF: > { %s2922_s20 = sand.u32 1, %s4993_s29   ;;  %p6615_p5 = scmp.ne.s32.totalorder %s6544_s16, 0 }
0x13bc   : > { %p6616_p12 = scmp.ge.s32.totalorder %s5013_s3, 2  ;;  %s2923_s30 = scalar_lea.sflag [#allocation8], %s2922_s20 }
0x13be   : > { %p3818_p13 = pnand %p6616_p12, %p6615_p5 }
0x13c0   : > { %4988 = dma.done.wait (!%p3818_p13), %s2923_s30, 64  }
0x13c1   : > { %4990 = vsyncadd (!%p3818_p13), %s2923_s30, 4294967232  ;;  %s55_s3 = sadd.s32 1, %s5013_s3   ;;  %s6617_s29 = smov %s4997_s2 }
0x13c2   : > { %p52_p4 = scmp.ge.s32.totalorder %s55_s3, 4   ;;  %s6618_s2 = smov %s5001_s6 }
0x13c3   : > { %s6619_s6 = smov %s5559_s12  ;;  %s6620_s30 = smov %s5009_s7 }
0x13c4   : > { %s6621_s7 = smov %s6623_s10  ;;  %54 = sbr.rel (!%p52_p4) target bundleno = 46 (0x2e), region = 302 }
0x13cb   :  { %2928 = vsyncpa [#allocation7], 1 }
0x13cc   :  { %2930 = vsyncpa [#allocation7 + $0x1], 1 }
0x13cd   :  { %2931 = vsyncpa [#allocation10], 1 }
0x13ce   :  { %2933 = vsyncpa [#allocation10 + $0x1], 1 }
0x13cf   :  { %2934 = vsyncpa [#allocation13], 1 }
0x13d0   :  { %2935 = vsyncpa [#allocation16], 1 }
0x13d1   :  { %2936 = vsyncpa [#allocation19], 1 }
0x13d2   :  { %2937 = vsyncpa [#allocation22], 1 }
0x13d3   :  { %2938 = vsyncpa [#allocation25], 1 }
0x13d4   :  { %2939 = vsyncpa [#allocation28], 1 }
0x13d5   :  { %2940 = vsyncpa [#allocation31], 1 }
0x13d6   :  { %2941 = vsyncpa [#allocation34], 1 }
0x13d7   :  { %2942 = vsyncpa [#allocation37], 1 }
0x13d8   :  { %2943 = vsyncpa [#allocation40], 1 }
0x13d9   :  { %2944 = vsyncpa [#allocation43], 1 }
0x13da   :  { %2945 = vsyncpa [#allocation8], 1 }
0x13db   :  { %2947 = vsyncpa [#allocation8 + $0x1], 1 }

// kernel: tpu_custom_call.1
= control target key start
LH: loop header
LB: loop body
LE: loop exit
PB: predicated region body
PF: predicated region fallthrough
CT: control target
= control target key end

     0   :  { %s6419_s0 = inlined_call_operand.hbm [shape: bf16[2,8,32], index: 0, kind: input, shape index: {}]   ;;  %s6420_s1 = inlined_call_operand.hbm [shape: bf16[2,12,32], index: 1, kind: input, shape index: {}]   ;;  %s6421_s2 = inlined_call_operand.hbm [shape: f32[2,1,12], index: 2, kind: input, shape index: {}]   ;;  %s6422_s3 = inlined_call_operand.hbm [shape: bf16[32,32], index: 3, kind: input, shape index: {}]   ;;  %s6423_s4 = inlined_call_operand.hbm [shape: f32[1,32], index: 4, kind: input, shape index: {}]   ;;  %s6424_s5 = inlined_call_operand.hbm [shape: bf16[32,64], index: 5, kind: input, shape index: {}]   ;;  %s6425_s6 = inlined_call_operand.hbm [shape: f32[1,64], index: 6, kind: input, shape index: {}]   ;;  %s6426_s7 = inlined_call_operand.hbm [shape: bf16[32,32], index: 7, kind: input, shape index: {}]   ;;  %s6427_s8 = inlined_call_operand.hbm [shape: f32[1,32], index: 8, kind: input, shape index: {}]   ;;  %s6428_s9 = inlined_call_operand.hbm [shape: f32[1,32], index: 9, kind: input, shape index: {}]   ;;  %s6429_s10 = inlined_call_operand.hbm [shape: f32[1,32], index: 10, kind: input, shape index: {}]   ;;  %s6430_s11 = inlined_call_operand.hbm [shape: bf16[32,32], index: 11, kind: input, shape index: {}]   ;;  %s6431_s12 = inlined_call_operand.hbm [shape: f32[1,32], index: 12, kind: input, shape index: {}]   ;;  %s6432_s13 = inlined_call_operand.hbm [shape: bf16[32,64], index: 13, kind: input, shape index: {}]   ;;  %s6433_s14 = inlined_call_operand.hbm [shape: f32[1,64], index: 14, kind: input, shape index: {}]   ;;  %s6434_s15 = inlined_call_operand.hbm [shape: bf16[32,32], index: 15, kind: input, shape index: {}]   ;;  %s6435_s16 = inlined_call_operand.hbm [shape: f32[1,32], index: 16, kind: input, shape index: {}]   ;;  %s6436_s17 = inlined_call_operand.hbm [shape: f32[1,32], index: 17, kind: input, shape index: {}]   ;;  %s6437_s18 = inlined_call_operand.hbm [shape: f32[1,32], index: 18, kind: input, shape index: {}]   ;;  %s6438_s19 = inlined_call_operand.hbm [shape: bf16[32,64], index: 19, kind: input, shape index: {}]   ;;  %s6439_s20 = inlined_call_operand.hbm [shape: f32[1,64], index: 20, kind: input, shape index: {}]   ;;  %s6440_s21 = inlined_call_operand.hbm [shape: bf16[64,32], index: 21, kind: input, shape index: {}]   ;;  %s6441_s22 = inlined_call_operand.hbm [shape: f32[1,32], index: 22, kind: input, shape index: {}]   ;;  %s6442_s23 = inlined_call_operand.hbm [shape: f32[1,32], index: 23, kind: input, shape index: {}]   ;;  %s6443_s24 = inlined_call_operand.hbm [shape: f32[1,32], index: 24, kind: input, shape index: {}]   ;;  %s6444_s25 = inlined_call_operand.hbm [shape: bf16[2,8,32], index: 25, kind: output, shape index: {}]  }
   0x1   :  { %6495 = sst [smem:[#allocation63_spill]] %s6419_s0 }
   0x2   :  { %6496 = sst [smem:[#allocation64_spill]] %s6420_s1 }
   0x3   :  { %6497 = sst [smem:[#allocation65_spill]] %s6421_s2 }
   0x4   :  { %6498 = sst [smem:[#allocation66_spill]] %s6422_s3 }
   0x5   :  { %6499 = sst [smem:[#allocation67_spill]] %s6423_s4 }
   0x6   :  { %6500 = sst [smem:[#allocation68_spill]] %s6424_s5 }
   0x7   :  { %6501 = sst [smem:[#allocation69_spill]] %s6425_s6 }
   0x8   :  { %6502 = sst [smem:[#allocation70_spill]] %s6426_s7 }
   0x9   :  { %6503 = sst [smem:[#allocation71_spill]] %s6427_s8 }
   0xa   :  { %6504 = sst [smem:[#allocation72_spill]] %s6428_s9 }
   0xb   :  { %6505 = sst [smem:[#allocation73_spill]] %s6429_s10 }
   0xc   :  { %6506 = sst [smem:[#allocation74_spill]] %s6430_s11 }
   0xd   :  { %6507 = sst [smem:[#allocation75_spill]] %s6431_s12 }
   0xe   :  { %6508 = sst [smem:[#allocation76_spill]] %s6432_s13 }
   0xf   :  { %6509 = sst [smem:[#allocation77_spill]] %s6433_s14 }
  0x10   :  { %6510 = sst [smem:[#allocation78_spill]] %s6434_s15 }
  0x11   :  { %6511 = sst [smem:[#allocation79_spill]] %s6435_s16 }
  0x12   :  { %6512 = sst [smem:[#allocation80_spill]] %s6436_s17 }
  0x13   :  { %6513 = sst [smem:[#allocation81_spill]] %s6437_s18 }
  0x14   :  { %6514 = sst [smem:[#allocation82_spill]] %s6438_s19 }
  0x15   :  { %6515 = sst [smem:[#allocation83_spill]] %s6439_s20 }
  0x16   :  { %6516 = sst [smem:[#allocation84_spill]] %s6440_s21 }
  0x17   :  { %6517 = sst [smem:[#allocation85_spill]] %s6441_s22 }
  0x18   :  { %6518 = sst [smem:[#allocation86_spill]] %s6442_s23 }
  0x19   :  { %6519 = sst [smem:[#allocation87_spill]] %s6443_s24 }
  0x1a   :  { %6520 = sst [smem:[#allocation88_spill]] %s6444_s25 }
  0x1b   :  { %30 = vsyncpa [#allocation7], 0 }
  0x1c   :  { %32 = vsyncpa [#allocation7 + $0x1], 0 }
  0x1d   :  { %33 = vsyncpa [#allocation10], 0 }
  0x1e   :  { %35 = vsyncpa [#allocation10 + $0x1], 0 }
  0x1f   :  { %36 = vsyncpa [#allocation13], 0 }
  0x20   :  { %37 = vsyncpa [#allocation16], 0 }
  0x21   :  { %38 = vsyncpa [#allocation19], 0 }
  0x22   :  { %39 = vsyncpa [#allocation22], 0 }
  0x23   :  { %40 = vsyncpa [#allocation25], 0 }
  0x24   :  { %41 = vsyncpa [#allocation28], 0 }
  0x25   :  { %42 = vsyncpa [#allocation31], 0 }
  0x26   :  { %43 = vsyncpa [#allocation34], 0 }
  0x27   :  { %44 = vsyncpa [#allocation37], 0 }
  0x28   :  { %45 = vsyncpa [#allocation40], 0 }
  0x29   :  { %46 = vsyncpa [#allocation43], 0 }
  0x2a   :  { %47 = vsyncpa [#allocation8], 0 }
  0x2b   :  { %49 = vsyncpa [#allocation8 + $0x1], 0  ;;  %s5240_s29 = smov 0   ;;  %s5242_s2 = smov 0  }
  0x2c   :  { %s5244_s6 = smov 0   ;;  %s5246_s30 = smov 0  }
  0x2d   :  { %s5248_s7 = smov 0   ;;  %s5250_s3 = smov 0  }
  0x2e LB: > { %6521 = sst [smem:[#allocation60_spill]] %s5005_s30  ;;  %s5271_s26 = sadd.s32 4294967295, %s5013_s3   ;;  %s5013_s3 = sphi %s5250_s3, %s55_s3   ;;  %s5009_s7 = sphi %s5248_s7, %s6621_s7   ;;  %s5005_s30 = sphi %s5246_s30, %s6620_s30   ;;  %s5001_s6 = sphi %s5244_s6, %s6619_s6   ;;  %s4997_s2 = sphi %s5242_s2, %s6618_s2   ;;  %s4993_s29 = sphi %s5240_s29, %s6617_s29  }
  0x2f   : > { %6522 = sst [smem:[#allocation61_spill]] %s5271_s26  ;;  %p3287_p0 = scmp.ge.s32.totalorder %s5013_s3, 1 }
  0x30   : > { %p6466_p1 = scmp.eq.s32.totalorder %s5271_s26, 0  ;;  %p640_p2 = scmp.lt.s32.totalorder %s5013_s3, 3 }
  0x31   : > { %s5067_s8 = smov [#allocation12]   ;;  %s5068_s28 = smov [#allocation15]  }
  0x32   : > { %p5276_p3 = pnand %p3287_p0, %p640_p2  ;;  %s652_s27 = sshll.u32 %s5067_s8, 4  ;;  %s5280_s27 = int_to_ptr.vmem [resolvable:$true] %s652_s27 }
  0x33   : > { %s676_s9 = sshll.u32 %s5068_s28, 4  ;;  %s5069_s5 = smov [#allocation18]   ;;  %s5291_s9 = int_to_ptr.vmem [resolvable:$true] %s676_s9 }
  0x34   : > { %s6523_s1 = scalar_select %p5276_p3, 1, 0 }
  0x35   : > { %p3740_p4 = pneg %p5276_p3  ;;  %s5293_s0 = sshll.u32 %s5069_s5, 4  ;;  %s701_s0 = int_to_ptr.vmem [resolvable:$true] %s5293_s0 }
  0x36   : > { %6524 = sst [smem:[#allocation62_spill]] %s6523_s1  ;;  %s6526_s30 = sld [smem:[#allocation66_spill]] }
  0x37   : > { %p5287_p6 = pnand %p3740_p4, %p6466_p1 }
  0x39   : > { %s6525_s4 = scalar_select %p5287_p6, 1, 0 }
  0x3a   : > { %p5303_p8 = pneg %p5287_p6 }
  0x3c   : > { %s6527_s24 = smov %s6526_s30  ;;  %s4125_s22 = scalar_lea.hbm %s6526_s30, 256 }
  0x3d   : > { %p4126_p7 = scmp.ne.s32.totalorder %s6527_s24, %s4125_s22  ;;  %p4132_p11 = scmp.lt.u32.totalorder %s4125_s22, %s6527_s24 }
  0x3e   : > { %s6528_s18 = scalar_select %p5303_p8, 1, 0 }
  0x3f   : > { %p4128_p9 = pnand %p5303_p8, %p4126_p7 }
  0x41   : > { %p4129_p10 = pneg %p4128_p9 }
  0x43   : > { %p4134_p12 = pnand %p4132_p11, %p4129_p10 }
  0x45   : > { %4137 = shalt.err (!%p4134_p12)
}
  0x46   : > { %s4138_s20 = scalar_lea.vmem %s5280_s27, 256  ;;  %p4146_p4 = scmp.lt.s32.totalorder %s5280_s27, %s5280_s27 }
  0x47   : > { %p4139_p13 = scmp.ne.s32.totalorder %s5280_s27, %s4138_s20  ;;  %p4147_p5 = scmp.lt.s32.totalorder %s4138_s20, %s4138_s20 }
  0x49   : > { %p4141_p0 = pnand %p4139_p13, %p5303_p8  ;;  %p4148_p7 = por %p4147_p5, %p4146_p4 }
  0x4b   : > { %p4142_p2 = pneg %p4141_p0 }
  0x4d   : > { %p4149_p9 = pnand %p4148_p7, %p4142_p2 }
  0x4f   : > { %4152 = shalt.err (!%p4149_p9)
}
  0x50   : > { %s6472_s25 = smov 64   ;;  %s6473_s22 = smov 4  }
  0x51   : > { %3743 = dma.hbm_to_vmem [thread:$0]  (!%p5287_p6), %s6527_s24, 256, %s5280_s27, [#allocation13], %s6472_s25, %s6472_s25, %s6473_s22  }
  0x52   : > { %s6529_s5 = sld [smem:[#allocation68_spill]] }
  0x58   : > { %s4153_s20 = scalar_lea.hbm %s6529_s5, 256 }
  0x59   : > { %p4154_p5 = scmp.ne.s32.totalorder %s6529_s5, %s4153_s20  ;;  %p4160_p12 = scmp.lt.u32.totalorder %s4153_s20, %s6529_s5 }
  0x5b   : > { %p4156_p10 = pnand %p4154_p5, %p5303_p8 }
  0x5d   : > { %p4157_p11 = pneg %p4156_p10 }
  0x5f   : > { %p4162_p13 = pnand %p4160_p12, %p4157_p11 }
  0x61   : > { %4165 = shalt.err (!%p4162_p13)
}
  0x62   : > { %s4166_s27 = scalar_lea.vmem %s5291_s9, 256  ;;  %p4174_p7 = scmp.lt.s32.totalorder %s5291_s9, %s5291_s9 }
  0x63   : > { %p4167_p0 = scmp.ne.s32.totalorder %s5291_s9, %s4166_s27  ;;  %p4175_p9 = scmp.lt.s32.totalorder %s4166_s27, %s4166_s27 }
  0x65   : > { %p4169_p2 = pnand %p4167_p0, %p5303_p8  ;;  %p4176_p5 = por %p4175_p9, %p4174_p7 }
  0x67   : > { %p4170_p4 = pneg %p4169_p2 }
  0x69   : > { %p4177_p10 = pnand %p4176_p5, %p4170_p4 }
  0x6b   : > { %4180 = shalt.err (!%p4177_p10)
}
  0x6c   : > { %3749 = dma.hbm_to_vmem [thread:$0]  (!%p5287_p6), %s6529_s5, 256, %s5291_s9, [#allocation16], %s6472_s25, %s6472_s25, %s6473_s22  }
  0x6d   : > { %s6530_s30 = sld [smem:[#allocation70_spill]] }
  0x73   : > { %s6531_s1 = smov %s6530_s30  ;;  %s4181_s8 = scalar_lea.hbm %s6530_s30, 256 }
  0x74   : > { %p4182_p11 = scmp.ne.s32.totalorder %s6531_s1, %s4181_s8  ;;  %p4188_p0 = scmp.lt.u32.totalorder %s4181_s8, %s6531_s1 }
  0x76   : > { %p4184_p12 = pnand %p4182_p11, %p5303_p8 }
  0x78   : > { %p4185_p13 = pneg %p4184_p12 }
  0x7a   : > { %p4190_p2 = pnand %p4188_p0, %p4185_p13 }
  0x7c   : > { %4193 = shalt.err (!%p4190_p2)
}
  0x7d   : > { %s4194_s10 = scalar_lea.vmem %s701_s0, 256  ;;  %p4202_p5 = scmp.lt.s32.totalorder %s701_s0, %s701_s0 }
  0x7e   : > { %p4195_p4 = scmp.ne.s32.totalorder %s701_s0, %s4194_s10  ;;  %p4203_p10 = scmp.lt.s32.totalorder %s4194_s10, %s4194_s10 }
  0x80   : > { %p4197_p7 = pnand %p4195_p4, %p5303_p8  ;;  %p4204_p1 = por %p4203_p10, %p4202_p5 }
  0x82   : > { %p4198_p9 = pneg %p4197_p7 }
  0x84   : > { %p4205_p3 = pnand %p4204_p1, %p4198_p9 }
  0x86   : > { %4208 = shalt.err (!%p4205_p3)
}
  0x87   : > { %3755 = dma.hbm_to_vmem [thread:$0]  (!%p5287_p6), %s6531_s1, 256, %s701_s0, [#allocation19], %s6472_s25, %s6472_s25, %s6473_s22  }
  0x88   : > { %s5072_s12 = smov [#allocation21]   ;;  %s5073_s16 = smov [#allocation24]  }
  0x89   : > { %s725_s14 = sshll.u32 %s5072_s12, 4  ;;  %s746_s30 = sshll.u32 %s5073_s16, 4  ;;  %s726_s14 = int_to_ptr.vmem [resolvable:$true] %s725_s14  ;;  %s747_s30 = int_to_ptr.vmem [resolvable:$true] %s746_s30 }
  0x8a   : > { %s6532_s20 = sld [smem:[#allocation72_spill]] }
  0x90   : > { %s4209_s27 = scalar_lea.hbm %s6532_s20, 16 }
  0x91   : > { %p4210_p1 = scmp.ne.s32.totalorder %s6532_s20, %s4209_s27  ;;  %p4216_p12 = scmp.lt.u32.totalorder %s4209_s27, %s6532_s20 }
  0x93   : > { %p4212_p3 = pnand %p4210_p1, %p5303_p8 }
  0x95   : > { %p4213_p11 = pneg %p4212_p3 }
  0x97   : > { %p4218_p13 = pnand %p4216_p12, %p4213_p11 }
  0x99   : > { %4221 = shalt.err (!%p4218_p13)
}
  0x9a   : > { %s4222_s0 = scalar_lea.vmem %s726_s14, 16  ;;  %s4229_s9 = scalar_lea.vmem %s726_s14, 32 }
  0x9b   : > { %p4223_p0 = scmp.ne.s32.totalorder %s726_s14, %s4222_s0  ;;  %p4230_p7 = scmp.lt.s32.totalorder %s726_s14, %s726_s14 }
  0x9c   : > { %p4231_p9 = scmp.lt.s32.totalorder %s4229_s9, %s4222_s0 }
  0x9d   : > { %p4225_p2 = pnand %p4223_p0, %p5303_p8 }
  0x9e   : > { %p4232_p5 = por %p4231_p9, %p4230_p7 }
  0x9f   : > { %p4226_p4 = pneg %p4225_p2 }
  0xa1   : > { %p4233_p10 = pnand %p4232_p5, %p4226_p4 }
  0xa3   : > { %4236 = shalt.err (!%p4233_p10)
}
  0xa4   : > { %3761 = dma.hbm_to_vmem [thread:$0]  (!%p5287_p6), %s6532_s20, 16, %s726_s14, [#allocation22]  }
  0xa5   : > { %s6533_s11 = sld [smem:[#allocation74_spill]] }
  0xab   : > { %s4237_s8 = scalar_lea.hbm %s6533_s11, 256 }
  0xac   : > { %p4238_p1 = scmp.ne.s32.totalorder %s6533_s11, %s4237_s8  ;;  %p4244_p12 = scmp.lt.u32.totalorder %s4237_s8, %s6533_s11 }
  0xae   : > { %p4240_p3 = pnand %p4238_p1, %p5303_p8 }
  0xb0   : > { %p4241_p11 = pneg %p4240_p3 }
  0xb2   : > { %p4246_p13 = pnand %p4244_p12, %p4241_p11 }
  0xb4   : > { %4249 = shalt.err (!%p4246_p13)
}
  0xb5   : > { %s4250_s0 = scalar_lea.vmem %s747_s30, 256  ;;  %p4258_p7 = scmp.lt.s32.totalorder %s747_s30, %s747_s30 }
  0xb6   : > { %p4251_p0 = scmp.ne.s32.totalorder %s747_s30, %s4250_s0  ;;  %p4259_p9 = scmp.lt.s32.totalorder %s4250_s0, %s4250_s0 }
  0xb8   : > { %p4253_p2 = pnand %p4251_p0, %p5303_p8  ;;  %p4260_p5 = por %p4259_p9, %p4258_p7 }
  0xba   : > { %p4254_p4 = pneg %p4253_p2 }
  0xbc   : > { %p4261_p10 = pnand %p4260_p5, %p4254_p4 }
  0xbe   : > { %4264 = shalt.err (!%p4261_p10)
}
  0xbf   : > { %3767 = dma.hbm_to_vmem [thread:$0]  (!%p5287_p6), %s6533_s11, 256, %s747_s30, [#allocation25], %s6472_s25, %s6472_s25, %s6473_s22  }
  0xc0   : > { %s5074_s5 = smov [#allocation27]   ;;  %s5075_s26 = smov [#allocation30]  }
  0xc1   : > { %s770_s12 = sshll.u32 %s5074_s5, 4  ;;  %s794_s16 = sshll.u32 %s5075_s26, 4  ;;  %s771_s12 = int_to_ptr.vmem [resolvable:$true] %s770_s12  ;;  %s795_s16 = int_to_ptr.vmem [resolvable:$true] %s794_s16 }
  0xc2   : > { %s6534_s13 = sld [smem:[#allocation76_spill]] }
  0xc8   : > { %s4265_s27 = scalar_lea.hbm %s6534_s13, 256 }
  0xc9   : > { %p4266_p1 = scmp.ne.s32.totalorder %s6534_s13, %s4265_s27  ;;  %p4272_p12 = scmp.lt.u32.totalorder %s4265_s27, %s6534_s13 }
  0xcb   : > { %p4268_p3 = pnand %p4266_p1, %p5303_p8 }
  0xcd   : > { %p4269_p11 = pneg %p4268_p3 }
  0xcf   : > { %p4274_p13 = pnand %p4272_p12, %p4269_p11 }
  0xd1   : > { %4277 = shalt.err (!%p4274_p13)
}
  0xd2   : > { %s4278_s30 = scalar_lea.vmem %s771_s12, 256  ;;  %p4286_p7 = scmp.lt.s32.totalorder %s771_s12, %s771_s12 }
  0xd3   : > { %p4279_p0 = scmp.ne.s32.totalorder %s771_s12, %s4278_s30  ;;  %p4287_p9 = scmp.lt.s32.totalorder %s4278_s30, %s4278_s30 }
  0xd5   : > { %p4281_p2 = pnand %p4279_p0, %p5303_p8  ;;  %p4288_p5 = por %p4287_p9, %p4286_p7 }
  0xd7   : > { %p4282_p4 = pneg %p4281_p2 }
  0xd9   : > { %p4289_p10 = pnand %p4288_p5, %p4282_p4 }
  0xdb   : > { %4292 = shalt.err (!%p4289_p10)
}
  0xdc   : > { %3773 = dma.hbm_to_vmem [thread:$0]  (!%p5287_p6), %s6534_s13, 256, %s771_s12, [#allocation28], %s6472_s25, %s6472_s25, %s6473_s22  }
  0xdd   : > { %s6535_s15 = sld [smem:[#allocation78_spill]] }
  0xe3   : > { %s4293_s28 = scalar_lea.hbm %s6535_s15, 256 }
  0xe4   : > { %p4294_p1 = scmp.ne.s32.totalorder %s6535_s15, %s4293_s28  ;;  %p4300_p12 = scmp.lt.u32.totalorder %s4293_s28, %s6535_s15 }
  0xe6   : > { %p4296_p3 = pnand %p4294_p1, %p5303_p8 }
  0xe8   : > { %p4297_p11 = pneg %p4296_p3 }
  0xea   : > { %p4302_p13 = pnand %p4300_p12, %p4297_p11 }
  0xec   : > { %4305 = shalt.err (!%p4302_p13)
}
  0xed   : > { %s4306_s14 = scalar_lea.vmem %s795_s16, 256  ;;  %p4314_p7 = scmp.lt.s32.totalorder %s795_s16, %s795_s16 }
  0xee   : > { %p4307_p0 = scmp.ne.s32.totalorder %s795_s16, %s4306_s14  ;;  %p4315_p9 = scmp.lt.s32.totalorder %s4306_s14, %s4306_s14 }
  0xf0   : > { %p4309_p2 = pnand %p4307_p0, %p5303_p8  ;;  %p4316_p5 = por %p4315_p9, %p4314_p7 }
  0xf2   : > { %p4310_p4 = pneg %p4309_p2 }
  0xf4   : > { %p4317_p10 = pnand %p4316_p5, %p4310_p4 }
  0xf6   : > { %4320 = shalt.err (!%p4317_p10)
}
  0xf7   : > { %3779 = dma.hbm_to_vmem [thread:$0]  (!%p5287_p6), %s6535_s15, 256, %s795_s16, [#allocation31], %s6472_s25, %s6472_s25, %s6473_s22  }
  0xf8   : > { %s5076_s9 = smov [#allocation33]   ;;  %s5077_s26 = smov [#allocation36]  }
  0xf9   : > { %s819_s5 = sshll.u32 %s5076_s9, 4  ;;  %s840_s8 = sshll.u32 %s5077_s26, 4  ;;  %s820_s5 = int_to_ptr.vmem [resolvable:$true] %s819_s5  ;;  %s841_s8 = int_to_ptr.vmem [resolvable:$true] %s840_s8 }
  0xfa   : > { %s6536_s17 = sld [smem:[#allocation80_spill]] }
 0x100   : > { %s4321_s10 = scalar_lea.hbm %s6536_s17, 16 }
 0x101   : > { %p4322_p1 = scmp.ne.s32.totalorder %s6536_s17, %s4321_s10  ;;  %p4328_p12 = scmp.lt.u32.totalorder %s4321_s10, %s6536_s17 }
 0x103   : > { %p4324_p3 = pnand %p4322_p1, %p5303_p8 }
 0x105   : > { %p4325_p11 = pneg %p4324_p3 }
 0x107   : > { %p4330_p13 = pnand %p4328_p12, %p4325_p11 }
 0x109   : > { %4333 = shalt.err (!%p4330_p13)
}
 0x10a   : > { %s4334_s16 = scalar_lea.vmem %s820_s5, 16  ;;  %s4341_s30 = scalar_lea.vmem %s820_s5, 32 }
 0x10b   : > { %p4335_p0 = scmp.ne.s32.totalorder %s820_s5, %s4334_s16  ;;  %p4342_p7 = scmp.lt.s32.totalorder %s820_s5, %s820_s5 }
 0x10c   : > { %p4343_p9 = scmp.lt.s32.totalorder %s4341_s30, %s4334_s16 }
 0x10d   : > { %p4337_p2 = pnand %p4335_p0, %p5303_p8 }
 0x10e   : > { %p4344_p5 = por %p4343_p9, %p4342_p7 }
 0x10f   : > { %p4338_p4 = pneg %p4337_p2 }
 0x111   : > { %p4345_p10 = pnand %p4344_p5, %p4338_p4 }
 0x113   : > { %4348 = shalt.err (!%p4345_p10)
}
 0x114   : > { %3785 = dma.hbm_to_vmem [thread:$0]  (!%p5287_p6), %s6536_s17, 16, %s820_s5, [#allocation34]  }
 0x115   : > { %s6537_s19 = sld [smem:[#allocation82_spill]] }
 0x11b   : > { %s4349_s10 = scalar_lea.hbm %s6537_s19, 256 }
 0x11c   : > { %p4350_p1 = scmp.ne.s32.totalorder %s6537_s19, %s4349_s10  ;;  %p4356_p12 = scmp.lt.u32.totalorder %s4349_s10, %s6537_s19 }
 0x11e   : > { %p4352_p3 = pnand %p4350_p1, %p5303_p8 }
 0x120   : > { %p4353_p11 = pneg %p4352_p3 }
 0x122   : > { %p4358_p13 = pnand %p4356_p12, %p4353_p11 }
 0x124   : > { %4361 = shalt.err (!%p4358_p13)
}
 0x125   : > { %s4362_s16 = scalar_lea.vmem %s841_s8, 256  ;;  %p4370_p7 = scmp.lt.s32.totalorder %s841_s8, %s841_s8 }
 0x126   : > { %p4363_p0 = scmp.ne.s32.totalorder %s841_s8, %s4362_s16  ;;  %p4371_p9 = scmp.lt.s32.totalorder %s4362_s16, %s4362_s16 }
 0x128   : > { %p4365_p2 = pnand %p4363_p0, %p5303_p8  ;;  %p4372_p5 = por %p4371_p9, %p4370_p7 }
 0x12a   : > { %p4366_p4 = pneg %p4365_p2 }
 0x12c   : > { %p4373_p10 = pnand %p4372_p5, %p4366_p4 }
 0x12e   : > { %4376 = shalt.err (!%p4373_p10)
}
 0x12f   : > { %3791 = dma.hbm_to_vmem [thread:$0]  (!%p5287_p6), %s6537_s19, 256, %s841_s8, [#allocation37], %s6472_s25, %s6472_s25, %s6473_s22  }
 0x130   : > { %s5078_s9 = smov [#allocation39]   ;;  %s5079_s28 = smov [#allocation42]  }
 0x131   : > { %s864_s26 = sshll.u32 %s5078_s9, 4  ;;  %s889_s27 = sshll.u32 %s5079_s28, 4  ;;  %s865_s26 = int_to_ptr.vmem [resolvable:$true] %s864_s26  ;;  %s890_s27 = int_to_ptr.vmem [resolvable:$true] %s889_s27 }
 0x132   : > { %s6538_s21 = sld [smem:[#allocation84_spill]] }
 0x138   : > { %s4377_s0 = scalar_lea.hbm %s6538_s21, 512 }
 0x139   : > { %p4378_p1 = scmp.ne.s32.totalorder %s6538_s21, %s4377_s0  ;;  %p4384_p12 = scmp.lt.u32.totalorder %s4377_s0, %s6538_s21 }
 0x13b   : > { %p4380_p3 = pnand %p4378_p1, %p5303_p8 }
 0x13d   : > { %p4381_p11 = pneg %p4380_p3 }
 0x13f   : > { %p4386_p13 = pnand %p4384_p12, %p4381_p11 }
 0x141   : > { %4389 = shalt.err (!%p4386_p13)
}
 0x142   : > { %s4390_s8 = scalar_lea.vmem %s865_s26, 512  ;;  %p4398_p7 = scmp.lt.s32.totalorder %s865_s26, %s865_s26 }
 0x143   : > { %p4391_p0 = scmp.ne.s32.totalorder %s865_s26, %s4390_s8  ;;  %p4399_p9 = scmp.lt.s32.totalorder %s4390_s8, %s4390_s8 }
 0x145   : > { %p4393_p2 = pnand %p4391_p0, %p5303_p8  ;;  %p4400_p5 = por %p4399_p9, %p4398_p7 }
 0x147   : > { %p4394_p4 = pneg %p4393_p2 }
 0x149   : > { %p4401_p10 = pnand %p4400_p5, %p4394_p4 }
 0x14b   : > { %4404 = shalt.err (!%p4401_p10)
}
 0x14c   : > { %3797 = dma.hbm_to_vmem [thread:$0]  (!%p5287_p6), %s6538_s21, 512, %s865_s26, [#allocation40], %s6472_s25, %s6472_s25, %s6473_s22  }
 0x14d   : > { %s6539_s23 = sld [smem:[#allocation86_spill]] }
 0x153   : > { %s4405_s24 = scalar_lea.hbm %s6539_s23, 16 }
 0x154   : > { %p4406_p1 = scmp.ne.s32.totalorder %s6539_s23, %s4405_s24  ;;  %p4412_p12 = scmp.lt.u32.totalorder %s4405_s24, %s6539_s23 }
 0x156   : > { %p4408_p3 = pnand %p4406_p1, %p5303_p8 }
 0x158   : > { %p4409_p11 = pneg %p4408_p3 }
 0x15a   : > { %p4414_p13 = pnand %p4412_p12, %p4409_p11 }
 0x15c   : > { %4417 = shalt.err (!%p4414_p13)
}
 0x15d   : > { %s4418_s5 = scalar_lea.vmem %s890_s27, 16  ;;  %s4425_s26 = scalar_lea.vmem %s890_s27, 32 }
 0x15e   : > { %p4419_p0 = scmp.ne.s32.totalorder %s890_s27, %s4418_s5  ;;  %p4426_p7 = scmp.lt.s32.totalorder %s890_s27, %s890_s27 }
 0x15f   : > { %p4427_p9 = scmp.lt.s32.totalorder %s4425_s26, %s4418_s5 }
 0x160   : > { %p4421_p2 = pnand %p4419_p0, %p5303_p8 }
 0x161   : > { %p4428_p5 = por %p4427_p9, %p4426_p7 }
 0x162   : > { %p4422_p4 = pneg %p4421_p2 }
 0x164   : > { %p4429_p10 = pnand %p4428_p5, %p4422_p4 }
 0x166   : > { %4432 = shalt.err (!%p4429_p10)
}
 0x167   : > { %s6540_s9 = sld [smem:[#allocation61_spill]]  ;;  %s3286_s28 = sadd.s32 4294967294, %s5013_s3  }
 0x168   : > { %3803 = dma.hbm_to_vmem [thread:$0]  (!%p5287_p6), %s6539_s23, 16, %s890_s27, [#allocation43]  }
 0x169   : > { %s67_s10 = sadd.s32 1, %s5009_s7  ;;  %s74_s24 = sadd.s32 1, %s5001_s6 }
 0x16a   : > { %p69_p1 = scmp.ge.s32.totalorder %s67_s10, 2  ;;  %p81_p3 = scmp.ne.s32.totalorder %s5001_s6, %s4997_s2 }
 0x16b   : > { %p82_p11 = scmp.eq.s32.totalorder %s5013_s3, 0  ;;  %p87_p12 = scmp.ne.s32.totalorder %s4997_s2, %s4993_s29 }
 0x16c   : > { %s6623_s10 = smov (%p69_p1, %s67_s10), 0  ;;  %p633_p9 = scmp.eq.s32.totalorder %s3286_s28, 1 }
 0x16d   : > { %p83_p13 = por %p82_p11, %p81_p3  ;;  %p6541_p0 = scmp.eq.s32.totalorder %s6540_s9, 0 }
 0x16e   : > { %s71_s27 = ssub.s32 %s5009_s7, %s6623_s10  ;;  %p627_p4 = scmp.eq.s32.totalorder %s6540_s9, 1 }
 0x16f   : > { %p5546_p2 = por %p6541_p0, %p87_p12  ;;  %p72_p7 = scmp.eq.s32.totalorder %s71_s27, 0 }
 0x170   : > { %p5553_p5 = por %p627_p4, %p81_p3  ;;  %p3843_p10 = scmp.lt.s32.totalorder %s5013_s3, 2 }
 0x171   : > { %s6542_s0 = scalar_select %p5546_p2, 1, 0 }
 0x172   : > { %s6543_s14 = scalar_select %p5553_p5, 1, 0 }
 0x173   : > { %s5559_s12 = scalar_select %p72_p7, %s5001_s6, %s74_s24  }
 0x174   : > { %p5561_p1 = por %p633_p9, %p87_p12  ;;  %s5566_s5 = sand.u32 1, %s5001_s6  }
 0x175   : > { %p5568_p11 = pnand %p3843_p10, %p83_p13  ;;  %s929_s8 = sand.u32 1, %s5013_s3  }
 0x176   : > { %s6544_s16 = scalar_select %p5561_p1, 1, 0 }
 0x177   : > { %s6545_s26 = scalar_select %p5568_p11, 1, 0 }
 0x178   : > { %s3313_s30 = sshll.u32 %s5566_s5, 3  ;;  %s3418_s9 = sshll.u32 %s5009_s7, 7 }
 0x179   : > { %s933_s28 = scalar_lea.vmem [#allocation9], %s3313_s30  ;;  %s6546_s22 = sld [smem:[#allocation64_spill]] }
 0x17a   : > { %s940_s27 = sshll.u32 %s933_s28, 4  ;;  %s5582_s11 = scalar_lea.sflag [#allocation10], %s929_s8  ;;  %s5580_s27 = int_to_ptr.vmem [resolvable:$true] %s940_s27 }
 0x17b   : > { %p5588_p12 = pneg %p5568_p11 }
 0x17d   : > { %s6547_s15 = scalar_select %p5588_p12, 1, 0 }
 0x17f   : > { %s5578_s1 = scalar_lea.hbm %s6546_s22, %s3418_s9  ;;  %s4438_s9 = scalar_lea.hbm %s6546_s22, 256 }
 0x180   : > { %s4433_s13 = scalar_lea.hbm %s5578_s1, 128  ;;  %p4439_p4 = scmp.lt.u32.totalorder %s5578_s1, %s6546_s22 }
 0x181   : > { %p4434_p3 = scmp.ne.s32.totalorder %s5578_s1, %s4433_s13  ;;  %p4440_p7 = scmp.lt.u32.totalorder %s4438_s9, %s4433_s13 }
 0x182   : > { %p4442_p10 = scmp.lt.u32.totalorder %s4433_s13, %s5578_s1 }
 0x183   : > { %p4436_p13 = pnand %p5588_p12, %p4434_p3  ;;  %p4441_p9 = por %p4440_p7, %p4439_p4 }
 0x185   : > { %p4437_p0 = pneg %p4436_p13  ;;  %p4443_p1 = por %p4442_p10, %p4441_p9 }
 0x187   : > { %p4444_p5 = pnand %p4443_p1, %p4437_p0 }
 0x189   : > { %4447 = shalt.err (!%p4444_p5)
}
 0x18a   : > { %s4448_s8 = scalar_lea.vmem %s5580_s27, 128  ;;  %s5080_s25 = smov [#allocation9]  }
 0x18b   : > { %p4449_p3 = scmp.ne.s32.totalorder %s5580_s27, %s4448_s8  ;;  %s4453_s30 = sshll.u32 %s5080_s25, 4  ;;  %s4454_s30 = int_to_ptr.vmem [resolvable:$false] %s4453_s30 }
 0x18c   : > { %s4455_s28 = scalar_lea.vmem %s4454_s30, 256  ;;  %p4456_p6 = scmp.lt.s32.totalorder %s5580_s27, %s4454_s30 }
 0x18d   : > { %p4451_p13 = pnand %p4449_p3, %p5588_p12  ;;  %p4457_p8 = scmp.lt.s32.totalorder %s4455_s28, %s4448_s8 }
 0x18f   : > { %p4452_p2 = pneg %p4451_p13  ;;  %p4458_p4 = por %p4457_p8, %p4456_p6 }
 0x191   : > { %p4459_p7 = pnand %p4458_p4, %p4452_p2 }
 0x193   : > { %4462 = shalt.err (!%p4459_p7)
}
 0x194   : > { %s6548_s13 = smov 4   ;;  %s6549_s9 = smov 64  }
 0x195   : > { %3813 = dma.hbm_to_vmem [thread:$0]  (!%p5568_p11), %s5578_s1, 128, %s5580_s27, %s5582_s11, %s6549_s9, %s6549_s9, %s6548_s13  }
 0x196   : > { %s5081_s24 = smov [#allocation14]   ;;  %s5082_s25 = smov [#allocation17]  }
 0x197   : > { %s666_s17 = sshll.u32 %s5081_s24, 4  ;;  %s690_s19 = sshll.u32 %s5082_s25, 4  ;;  %s667_s17 = int_to_ptr.vmem [resolvable:$true] %s666_s17  ;;  %s5615_s19 = int_to_ptr.vmem [resolvable:$true] %s690_s19 }
 0x198   : > { %s6550_s28 = sld [smem:[#allocation67_spill]]  ;;  %p6551_p8 = scmp.ne.s32.totalorder %s6528_s18, 0 }
 0x19e   : > { %s4463_s20 = scalar_lea.hbm %s6550_s28, 16 }
 0x19f   : > { %p4464_p6 = scmp.ne.s32.totalorder %s6550_s28, %s4463_s20  ;;  %p4470_p1 = scmp.lt.u32.totalorder %s4463_s20, %s6550_s28 }
 0x1a1   : > { %p4466_p2 = pnand %p4464_p6, %p6551_p8 }
 0x1a3   : > { %p4467_p5 = pneg %p4466_p2 }
 0x1a5   : > { %p4472_p0 = pnand %p4470_p1, %p4467_p5 }
 0x1a7   : > { %4475 = shalt.err (!%p4472_p0)
}
 0x1a8   : > { %s4476_s27 = scalar_lea.vmem %s667_s17, 16  ;;  %s4483_s13 = scalar_lea.vmem %s667_s17, 32 }
 0x1a9   : > { %p4477_p9 = scmp.ne.s32.totalorder %s667_s17, %s4476_s27  ;;  %p4484_p13 = scmp.lt.s32.totalorder %s667_s17, %s667_s17 }
 0x1aa   : > { %p4485_p4 = scmp.lt.s32.totalorder %s4483_s13, %s4476_s27 }
 0x1ab   : > { %p4479_p10 = pnand %p4477_p9, %p6551_p8 }
 0x1ac   : > { %p4486_p7 = por %p4485_p4, %p4484_p13 }
 0x1ad   : > { %p4480_p3 = pneg %p4479_p10 }
 0x1af   : > { %p4487_p11 = pnand %p4486_p7, %p4480_p3 }
 0x1b1   : > { %4490 = shalt.err (!%p4487_p11)
}
 0x1b2   : > { %p6552_p6 = scmp.ne.s32.totalorder %s6525_s4, 0  ;;  %s6553_s9 = sld [smem:[#allocation69_spill]] }
 0x1b4   : > { %3746 = dma.hbm_to_vmem [thread:$0]  (!%p6552_p6), %s6550_s28, 16, %s667_s17, [#allocation13]  }
 0x1b8   : > { %s4491_s24 = scalar_lea.hbm %s6553_s9, 16 }
 0x1b9   : > { %p4492_p2 = scmp.ne.s32.totalorder %s6553_s9, %s4491_s24  ;;  %p4498_p11 = scmp.lt.u32.totalorder %s4491_s24, %s6553_s9 }
 0x1bb   : > { %p4494_p5 = pnand %p4492_p2, %p6551_p8 }
 0x1bd   : > { %p4495_p1 = pneg %p4494_p5 }
 0x1bf   : > { %p4500_p0 = pnand %p4498_p11, %p4495_p1 }
 0x1c1   : > { %4503 = shalt.err (!%p4500_p0)
}
 0x1c2   : > { %s4504_s17 = scalar_lea.vmem %s5615_s19, 16  ;;  %s4511_s27 = scalar_lea.vmem %s5615_s19, 32 }
 0x1c3   : > { %p4505_p9 = scmp.ne.s32.totalorder %s5615_s19, %s4504_s17  ;;  %p4512_p13 = scmp.lt.s32.totalorder %s5615_s19, %s5615_s19 }
 0x1c4   : > { %p4513_p4 = scmp.lt.s32.totalorder %s4511_s27, %s4504_s17 }
 0x1c5   : > { %p4507_p10 = pnand %p4505_p9, %p6551_p8 }
 0x1c6   : > { %p4514_p7 = por %p4513_p4, %p4512_p13 }
 0x1c7   : > { %p4508_p3 = pneg %p4507_p10 }
 0x1c9   : > { %p4515_p2 = pnand %p4514_p7, %p4508_p3 }
 0x1cb   : > { %4518 = shalt.err (!%p4515_p2)
}
 0x1cc   : > { %3752 = dma.hbm_to_vmem [thread:$0]  (!%p6552_p6), %s6553_s9, 16, %s5615_s19, [#allocation16]  }
 0x1cd   : > { %s5083_s22 = smov [#allocation20]   ;;  %s5084_s20 = smov [#allocation23]  }
 0x1ce   : > { %s714_s23 = sshll.u32 %s5083_s22, 4  ;;  %s736_s24 = sshll.u32 %s5084_s20, 4  ;;  %s715_s23 = int_to_ptr.vmem [resolvable:$true] %s714_s23  ;;  %s5659_s24 = int_to_ptr.vmem [resolvable:$true] %s736_s24 }
 0x1cf   : > { %s6554_s30 = sld [smem:[#allocation71_spill]] }
 0x1d5   : > { %s6555_s1 = smov %s6554_s30  ;;  %s4519_s17 = scalar_lea.hbm %s6554_s30, 16 }
 0x1d6   : > { %p4520_p5 = scmp.ne.s32.totalorder %s6555_s1, %s4519_s17  ;;  %p4526_p0 = scmp.lt.u32.totalorder %s4519_s17, %s6555_s1 }
 0x1d8   : > { %p4522_p1 = pnand %p4520_p5, %p6551_p8 }
 0x1da   : > { %p4523_p11 = pneg %p4522_p1 }
 0x1dc   : > { %p4528_p9 = pnand %p4526_p0, %p4523_p11 }
 0x1de   : > { %4531 = shalt.err (!%p4528_p9)
}
 0x1df   : > { %s4532_s21 = scalar_lea.vmem %s715_s23, 16  ;;  %s4539_s22 = scalar_lea.vmem %s715_s23, 32 }
 0x1e0   : > { %p4533_p10 = scmp.ne.s32.totalorder %s715_s23, %s4532_s21  ;;  %p4540_p4 = scmp.lt.s32.totalorder %s715_s23, %s715_s23 }
 0x1e1   : > { %p4541_p7 = scmp.lt.s32.totalorder %s4539_s22, %s4532_s21 }
 0x1e2   : > { %p4535_p3 = pnand %p4533_p10, %p6551_p8 }
 0x1e3   : > { %p4542_p2 = por %p4541_p7, %p4540_p4 }
 0x1e4   : > { %p4536_p13 = pneg %p4535_p3 }
 0x1e6   : > { %p4543_p12 = pnand %p4542_p2, %p4536_p13 }
 0x1e8   : > { %4546 = shalt.err (!%p4543_p12)
}
 0x1e9   : > { %3758 = dma.hbm_to_vmem [thread:$0]  (!%p6552_p6), %s6555_s1, 16, %s715_s23, [#allocation19]  }
 0x1ea   : > { %s6556_s30 = sld [smem:[#allocation73_spill]] }
 0x1f0   : > { %s6557_s17 = smov %s6556_s30  ;;  %s4547_s27 = scalar_lea.hbm %s6556_s30, 16 }
 0x1f1   : > { %p4548_p5 = scmp.ne.s32.totalorder %s6557_s17, %s4547_s27  ;;  %p4554_p12 = scmp.lt.u32.totalorder %s4547_s27, %s6557_s17 }
 0x1f3   : > { %p4550_p1 = pnand %p4548_p5, %p6551_p8 }
 0x1f5   : > { %p4551_p11 = pneg %p4550_p1 }
 0x1f7   : > { %p4556_p0 = pnand %p4554_p12, %p4551_p11 }
 0x1f9   : > { %4559 = shalt.err (!%p4556_p0)
}
 0x1fa   : > { %s4560_s23 = scalar_lea.vmem %s5659_s24, 16  ;;  %s4567_s28 = scalar_lea.vmem %s5659_s24, 32 }
 0x1fb   : > { %p4561_p9 = scmp.ne.s32.totalorder %s5659_s24, %s4560_s23  ;;  %p4568_p13 = scmp.lt.s32.totalorder %s5659_s24, %s5659_s24 }
 0x1fc   : > { %p4569_p4 = scmp.lt.s32.totalorder %s4567_s28, %s4560_s23 }
 0x1fd   : > { %p4563_p10 = pnand %p4561_p9, %p6551_p8 }
 0x1fe   : > { %p4570_p7 = por %p4569_p4, %p4568_p13 }
 0x1ff   : > { %p4564_p3 = pneg %p4563_p10 }
 0x201   : > { %p4571_p2 = pnand %p4570_p7, %p4564_p3 }
 0x203   : > { %4574 = shalt.err (!%p4571_p2)
}
 0x204   : > { %3764 = dma.hbm_to_vmem [thread:$0]  (!%p6552_p6), %s6557_s17, 16, %s5659_s24, [#allocation22]  }
 0x205   : > { %s5085_s8 = smov [#allocation26]   ;;  %s5086_s27 = smov [#allocation29]  }
 0x206   : > { %s760_s30 = sshll.u32 %s5085_s8, 4  ;;  %s784_s13 = sshll.u32 %s5086_s27, 4  ;;  %s761_s30 = int_to_ptr.vmem [resolvable:$true] %s760_s30  ;;  %s5703_s13 = int_to_ptr.vmem [resolvable:$true] %s784_s13 }
 0x207   : > { %s6558_s22 = sld [smem:[#allocation75_spill]] }
 0x20d   : > { %s4575_s23 = scalar_lea.hbm %s6558_s22, 16 }
 0x20e   : > { %p4576_p5 = scmp.ne.s32.totalorder %s6558_s22, %s4575_s23  ;;  %p4582_p12 = scmp.lt.u32.totalorder %s4575_s23, %s6558_s22 }
 0x210   : > { %p4578_p1 = pnand %p4576_p5, %p6551_p8 }
 0x212   : > { %p4579_p11 = pneg %p4578_p1 }
 0x214   : > { %p4584_p0 = pnand %p4582_p12, %p4579_p11 }
 0x216   : > { %4587 = shalt.err (!%p4584_p0)
}
 0x217   : > { %s4588_s25 = scalar_lea.vmem %s761_s30, 16  ;;  %s4595_s8 = scalar_lea.vmem %s761_s30, 32 }
 0x218   : > { %p4589_p9 = scmp.ne.s32.totalorder %s761_s30, %s4588_s25  ;;  %p4596_p13 = scmp.lt.s32.totalorder %s761_s30, %s761_s30 }
 0x219   : > { %p4597_p4 = scmp.lt.s32.totalorder %s4595_s8, %s4588_s25 }
 0x21a   : > { %p4591_p10 = pnand %p4589_p9, %p6551_p8 }
 0x21b   : > { %p4598_p7 = por %p4597_p4, %p4596_p13 }
 0x21c   : > { %p4592_p3 = pneg %p4591_p10 }
 0x21e   : > { %p4599_p2 = pnand %p4598_p7, %p4592_p3 }
 0x220   : > { %4602 = shalt.err (!%p4599_p2)
}
 0x221   : > { %3770 = dma.hbm_to_vmem [thread:$0]  (!%p6552_p6), %s6558_s22, 16, %s761_s30, [#allocation25]  }
 0x222   : > { %s6559_s23 = sld [smem:[#allocation77_spill]] }
 0x228   : > { %s4603_s28 = scalar_lea.hbm %s6559_s23, 16 }
 0x229   : > { %p4604_p5 = scmp.ne.s32.totalorder %s6559_s23, %s4603_s28  ;;  %p4610_p12 = scmp.lt.u32.totalorder %s4603_s28, %s6559_s23 }
 0x22b   : > { %p4606_p1 = pnand %p4604_p5, %p6551_p8 }
 0x22d   : > { %p4607_p11 = pneg %p4606_p1 }
 0x22f   : > { %p4612_p0 = pnand %p4610_p12, %p4607_p11 }
 0x231   : > { %4615 = shalt.err (!%p4612_p0)
}
 0x232   : > { %s4616_s30 = scalar_lea.vmem %s5703_s13, 16  ;;  %s4623_s1 = scalar_lea.vmem %s5703_s13, 32 }
 0x233   : > { %p4617_p9 = scmp.ne.s32.totalorder %s5703_s13, %s4616_s30  ;;  %p4624_p13 = scmp.lt.s32.totalorder %s5703_s13, %s5703_s13 }
 0x234   : > { %p4625_p4 = scmp.lt.s32.totalorder %s4623_s1, %s4616_s30 }
 0x235   : > { %p4619_p10 = pnand %p4617_p9, %p6551_p8 }
 0x236   : > { %p4626_p7 = por %p4625_p4, %p4624_p13 }
 0x237   : > { %p4620_p3 = pneg %p4619_p10 }
 0x239   : > { %p4627_p2 = pnand %p4626_p7, %p4620_p3 }
 0x23b   : > { %4630 = shalt.err (!%p4627_p2)
}
 0x23c   : > { %3776 = dma.hbm_to_vmem [thread:$0]  (!%p6552_p6), %s6559_s23, 16, %s5703_s13, [#allocation28]  }
 0x23d   : > { %s5087_s21 = smov [#allocation32]   ;;  %s5088_s20 = smov [#allocation35]  }
 0x23e   : > { %s808_s28 = sshll.u32 %s5087_s21, 4  ;;  %s830_s24 = sshll.u32 %s5088_s20, 4  ;;  %s809_s28 = int_to_ptr.vmem [resolvable:$true] %s808_s28  ;;  %s5747_s24 = int_to_ptr.vmem [resolvable:$true] %s830_s24 }
 0x23f   : > { %s6560_s30 = sld [smem:[#allocation79_spill]] }
 0x245   : > { %s6561_s1 = smov %s6560_s30  ;;  %s4631_s9 = scalar_lea.hbm %s6560_s30, 16 }
 0x246   : > { %p4632_p5 = scmp.ne.s32.totalorder %s6561_s1, %s4631_s9  ;;  %p4638_p12 = scmp.lt.u32.totalorder %s4631_s9, %s6561_s1 }
 0x248   : > { %p4634_p1 = pnand %p4632_p5, %p6551_p8 }
 0x24a   : > { %p4635_p11 = pneg %p4634_p1 }
 0x24c   : > { %p4640_p0 = pnand %p4638_p12, %p4635_p11 }
 0x24e   : > { %4643 = shalt.err (!%p4640_p0)
}
 0x24f   : > { %s4644_s19 = scalar_lea.vmem %s809_s28, 16  ;;  %s4651_s21 = scalar_lea.vmem %s809_s28, 32 }
 0x250   : > { %p4645_p9 = scmp.ne.s32.totalorder %s809_s28, %s4644_s19  ;;  %p4652_p13 = scmp.lt.s32.totalorder %s809_s28, %s809_s28 }
 0x251   : > { %p4653_p4 = scmp.lt.s32.totalorder %s4651_s21, %s4644_s19 }
 0x252   : > { %p4647_p10 = pnand %p4645_p9, %p6551_p8 }
 0x253   : > { %p4654_p7 = por %p4653_p4, %p4652_p13 }
 0x254   : > { %p4648_p3 = pneg %p4647_p10 }
 0x256   : > { %p4655_p2 = pnand %p4654_p7, %p4648_p3 }
 0x258   : > { %4658 = shalt.err (!%p4655_p2)
}
 0x259   : > { %3782 = dma.hbm_to_vmem [thread:$0]  (!%p6552_p6), %s6561_s1, 16, %s809_s28, [#allocation31]  }
 0x25a   : > { %s6562_s25 = sld [smem:[#allocation81_spill]] }
 0x260   : > { %s4659_s8 = scalar_lea.hbm %s6562_s25, 16 }
 0x261   : > { %p4660_p5 = scmp.ne.s32.totalorder %s6562_s25, %s4659_s8  ;;  %p4666_p12 = scmp.lt.u32.totalorder %s4659_s8, %s6562_s25 }
 0x263   : > { %p4662_p1 = pnand %p4660_p5, %p6551_p8 }
 0x265   : > { %p4663_p11 = pneg %p4662_p1 }
 0x267   : > { %p4668_p0 = pnand %p4666_p12, %p4663_p11 }
 0x269   : > { %4671 = shalt.err (!%p4668_p0)
}
 0x26a   : > { %s4672_s28 = scalar_lea.vmem %s5747_s24, 16  ;;  %s4679_s21 = scalar_lea.vmem %s5747_s24, 32 }
 0x26b   : > { %p4673_p9 = scmp.ne.s32.totalorder %s5747_s24, %s4672_s28  ;;  %p4680_p13 = scmp.lt.s32.totalorder %s5747_s24, %s5747_s24 }
 0x26c   : > { %p4681_p4 = scmp.lt.s32.totalorder %s4679_s21, %s4672_s28 }
 0x26d   : > { %p4675_p10 = pnand %p4673_p9, %p6551_p8 }
 0x26e   : > { %p4682_p7 = por %p4681_p4, %p4680_p13 }
 0x26f   : > { %p4676_p3 = pneg %p4675_p10 }
 0x271   : > { %p4683_p2 = pnand %p4682_p7, %p4676_p3 }
 0x273   : > { %4686 = shalt.err (!%p4683_p2)
}
 0x274   : > { %3788 = dma.hbm_to_vmem [thread:$0]  (!%p6552_p6), %s6562_s25, 16, %s5747_s24, [#allocation34]  }
 0x275   : > { %s5089_s9 = smov [#allocation38]   ;;  %s5090_s8 = smov [#allocation41]  }
 0x276   : > { %s854_s20 = sshll.u32 %s5089_s9, 4  ;;  %s878_s30 = sshll.u32 %s5090_s8, 4  ;;  %s855_s20 = int_to_ptr.vmem [resolvable:$true] %s854_s20  ;;  %s5791_s30 = int_to_ptr.vmem [resolvable:$true] %s878_s30 }
 0x277   : > { %s6563_s19 = sld [smem:[#allocation83_spill]] }
 0x27d   : > { %s4687_s28 = scalar_lea.hbm %s6563_s19, 16 }
 0x27e   : > { %p4688_p5 = scmp.ne.s32.totalorder %s6563_s19, %s4687_s28  ;;  %p4694_p12 = scmp.lt.u32.totalorder %s4687_s28, %s6563_s19 }
 0x280   : > { %p4690_p1 = pnand %p4688_p5, %p6551_p8 }
 0x282   : > { %p4691_p11 = pneg %p4690_p1 }
 0x284   : > { %p4696_p0 = pnand %p4694_p12, %p4691_p11 }
 0x286   : > { %4699 = shalt.err (!%p4696_p0)
}
 0x287   : > { %s4700_s22 = scalar_lea.vmem %s855_s20, 16  ;;  %s4707_s9 = scalar_lea.vmem %s855_s20, 32 }
 0x288   : > { %p4701_p9 = scmp.ne.s32.totalorder %s855_s20, %s4700_s22  ;;  %p4708_p13 = scmp.lt.s32.totalorder %s855_s20, %s855_s20 }
 0x289   : > { %p4709_p4 = scmp.lt.s32.totalorder %s4707_s9, %s4700_s22 }
 0x28a   : > { %p4703_p10 = pnand %p4701_p9, %p6551_p8 }
 0x28b   : > { %p4710_p7 = por %p4709_p4, %p4708_p13 }
 0x28c   : > { %p4704_p3 = pneg %p4703_p10 }
 0x28e   : > { %p4711_p2 = pnand %p4710_p7, %p4704_p3 }
 0x290   : > { %4714 = shalt.err (!%p4711_p2)
}
 0x291   : > { %3794 = dma.hbm_to_vmem [thread:$0]  (!%p6552_p6), %s6563_s19, 16, %s855_s20, [#allocation37]  }
 0x292   : > { %s6564_s28 = sld [smem:[#allocation85_spill]] }
 0x298   : > { %s4715_s21 = scalar_lea.hbm %s6564_s28, 16 }
 0x299   : > { %p4716_p5 = scmp.ne.s32.totalorder %s6564_s28, %s4715_s21  ;;  %p4722_p12 = scmp.lt.u32.totalorder %s4715_s21, %s6564_s28 }
 0x29b   : > { %p4718_p1 = pnand %p4716_p5, %p6551_p8 }
 0x29d   : > { %p4719_p11 = pneg %p4718_p1 }
 0x29f   : > { %p4724_p0 = pnand %p4722_p12, %p4719_p11 }
 0x2a1   : > { %4727 = shalt.err (!%p4724_p0)
}
 0x2a2   : > { %s4728_s20 = scalar_lea.vmem %s5791_s30, 16  ;;  %s4735_s1 = scalar_lea.vmem %s5791_s30, 32 }
 0x2a3   : > { %p4729_p9 = scmp.ne.s32.totalorder %s5791_s30, %s4728_s20  ;;  %p4736_p13 = scmp.lt.s32.totalorder %s5791_s30, %s5791_s30 }
 0x2a4   : > { %p4737_p4 = scmp.lt.s32.totalorder %s4735_s1, %s4728_s20 }
 0x2a5   : > { %p4731_p10 = pnand %p4729_p9, %p6551_p8 }
 0x2a6   : > { %p4738_p7 = por %p4737_p4, %p4736_p13 }
 0x2a7   : > { %p4732_p3 = pneg %p4731_p10 }
 0x2a9   : > { %p4739_p2 = pnand %p4738_p7, %p4732_p3 }
 0x2ab   : > { %4742 = shalt.err (!%p4739_p2)
}
 0x2ac   : > { %3800 = dma.hbm_to_vmem [thread:$0]  (!%p6552_p6), %s6564_s28, 16, %s5791_s30, [#allocation40]  }
 0x2ad   : > { %s5091_s13 = smov [#allocation44]   ;;  %s3311_s17 = sshll.u32 %s5566_s5, 2 }
 0x2ae   : > { %s900_s21 = sshll.u32 %s5091_s13, 4  ;;  %s6565_s9 = sld [smem:[#allocation87_spill]]  ;;  %s901_s21 = int_to_ptr.vmem [resolvable:$true] %s900_s21 }
 0x2b4   : > { %s4743_s20 = scalar_lea.hbm %s6565_s9, 16 }
 0x2b5   : > { %p4744_p5 = scmp.ne.s32.totalorder %s6565_s9, %s4743_s20  ;;  %p4750_p12 = scmp.lt.u32.totalorder %s4743_s20, %s6565_s9 }
 0x2b7   : > { %p4746_p1 = pnand %p4744_p5, %p6551_p8 }
 0x2b9   : > { %p4747_p11 = pneg %p4746_p1 }
 0x2bb   : > { %p4752_p0 = pnand %p4750_p12, %p4747_p11 }
 0x2bd   : > { %4755 = shalt.err (!%p4752_p0)
}
 0x2be   : > { %s4756_s30 = scalar_lea.vmem %s901_s21, 16  ;;  %s4763_s27 = scalar_lea.vmem %s901_s21, 32 }
 0x2bf   : > { %p4757_p9 = scmp.ne.s32.totalorder %s901_s21, %s4756_s30  ;;  %p4764_p13 = scmp.lt.s32.totalorder %s901_s21, %s901_s21 }
 0x2c0   : > { %p4765_p4 = scmp.lt.s32.totalorder %s4763_s27, %s4756_s30 }
 0x2c1   : > { %p4759_p10 = pnand %p4757_p9, %p6551_p8 }
 0x2c2   : > { %p4766_p7 = por %p4765_p4, %p4764_p13 }
 0x2c3   : > { %p4760_p3 = pneg %p4759_p10 }
 0x2c5   : > { %p4767_p2 = pnand %p4766_p7, %p4760_p3 }
 0x2c7   : > { %4770 = shalt.err (!%p4767_p2)
}
 0x2c8   : > { %3806 = dma.hbm_to_vmem [thread:$0]  (!%p6552_p6), %s6565_s9, 16, %s901_s21, [#allocation43]  }
 0x2c9   : > { %s3312_s23 = sshll.u32 %s5009_s7, 6  ;;  %s915_s24 = scalar_lea.vmem [#allocation6], %s3311_s17 }
 0x2ca   : > { %s922_s18 = sshll.u32 %s915_s24, 4  ;;  %s6566_s1 = sld [smem:[#allocation63_spill]]  ;;  %s923_s18 = int_to_ptr.vmem [resolvable:$true] %s922_s18 }
 0x2cb   : > { %s912_s4 = scalar_lea.sflag [#allocation7], %s5566_s5  ;;  %p6567_p5 = scmp.ne.s32.totalorder %s6547_s15, 0 }
 0x2d0   : > { %s5858_s8 = scalar_lea.hbm %s6566_s1, %s3312_s23  ;;  %s4776_s17 = scalar_lea.hbm %s6566_s1, 128 }
 0x2d1   : > { %s4771_s30 = scalar_lea.hbm %s5858_s8, 64  ;;  %p4777_p6 = scmp.lt.u32.totalorder %s5858_s8, %s6566_s1 }
 0x2d2   : > { %p4772_p8 = scmp.ne.s32.totalorder %s5858_s8, %s4771_s30  ;;  %p4778_p12 = scmp.lt.u32.totalorder %s4776_s17, %s4771_s30 }
 0x2d3   : > { %p4780_p9 = scmp.lt.u32.totalorder %s4771_s30, %s5858_s8 }
 0x2d4   : > { %p4774_p1 = pnand %p4772_p8, %p6567_p5  ;;  %p4779_p0 = por %p4778_p12, %p4777_p6 }
 0x2d6   : > { %p4775_p11 = pneg %p4774_p1  ;;  %p4781_p10 = por %p4780_p9, %p4779_p0 }
 0x2d8   : > { %p4782_p3 = pnand %p4781_p10, %p4775_p11 }
 0x2da   : > { %4785 = shalt.err (!%p4782_p3)
}
 0x2db   : > { %s4786_s23 = scalar_lea.vmem %s923_s18, 64  ;;  %s5092_s24 = smov [#allocation6]  }
 0x2dc   : > { %p4787_p13 = scmp.ne.s32.totalorder %s923_s18, %s4786_s23  ;;  %s4791_s22 = sshll.u32 %s5092_s24, 4  ;;  %s4792_s22 = int_to_ptr.vmem [resolvable:$false] %s4791_s22 }
 0x2dd   : > { %s4793_s20 = scalar_lea.vmem %s4792_s22, 128  ;;  %p4794_p2 = scmp.lt.s32.totalorder %s923_s18, %s4792_s22 }
 0x2de   : > { %p4789_p4 = pnand %p4787_p13, %p6567_p5  ;;  %p4795_p8 = scmp.lt.s32.totalorder %s4793_s20, %s4786_s23 }
 0x2e0   : > { %p4790_p7 = pneg %p4789_p4  ;;  %p4796_p1 = por %p4795_p8, %p4794_p2 }
 0x2e2   : > { %p4797_p6 = pnand %p4796_p1, %p4790_p7 }
 0x2e4   : > { %4800 = shalt.err (!%p4797_p6)
}
 0x2e5   : > { %p6568_p12 = scmp.ne.s32.totalorder %s6545_s26, 0  ;;  %s3316_s30 = sshll.u32 %s5009_s7, 4 }
 0x2e6   : > { %s6569_s17 = sld [smem:[#allocation65_spill]]  ;;  %s953_s13 = scalar_lea.vmem [#allocation11], %s5566_s5 }
 0x2e7   : > { %3810 = dma.hbm_to_vmem [thread:$0]  (!%p6568_p12), %s5858_s8, 64, %s923_s18, %s912_s4  }
 0x2e8   : > { %s960_s23 = sshll.u32 %s953_s13, 4  ;;  %s961_s23 = int_to_ptr.vmem [resolvable:$true] %s960_s23 }
 0x2ec   : > { %s5882_s19 = scalar_lea.hbm %s6569_s17, %s3316_s30  ;;  %s4806_s8 = scalar_lea.hbm %s6569_s17, 32 }
 0x2ed   : > { %s4801_s24 = scalar_lea.hbm %s5882_s19, 16  ;;  %p4807_p10 = scmp.lt.u32.totalorder %s5882_s19, %s6569_s17 }
 0x2ee   : > { %p4802_p11 = scmp.ne.s32.totalorder %s5882_s19, %s4801_s24  ;;  %p4808_p3 = scmp.lt.u32.totalorder %s4806_s8, %s4801_s24 }
 0x2ef   : > { %p4810_p4 = scmp.lt.u32.totalorder %s4801_s24, %s5882_s19 }
 0x2f0   : > { %p4804_p0 = pnand %p4802_p11, %p6567_p5  ;;  %p4809_p13 = por %p4808_p3, %p4807_p10 }
 0x2f2   : > { %p4805_p9 = pneg %p4804_p0  ;;  %p4811_p7 = por %p4810_p4, %p4809_p13 }
 0x2f4   : > { %p4812_p2 = pnand %p4811_p7, %p4805_p9 }
 0x2f6   : > { %4815 = shalt.err (!%p4812_p2)
}
 0x2f7   : > { %s4816_s5 = scalar_lea.vmem %s961_s23, 16  ;;  %s5093_s30 = smov [#allocation11]  }
 0x2f8   : > { %p4817_p8 = scmp.ne.s32.totalorder %s961_s23, %s4816_s5  ;;  %s4821_s21 = sshll.u32 %s5093_s30, 4  ;;  %s4822_s21 = int_to_ptr.vmem [resolvable:$false] %s4821_s21 }
 0x2f9   : > { %s4823_s27 = scalar_lea.vmem %s4822_s21, 32  ;;  %p4824_p11 = scmp.lt.s32.totalorder %s961_s23, %s4822_s21 }
 0x2fa   : > { %p4819_p1 = pnand %p4817_p8, %p6567_p5  ;;  %p4825_p0 = scmp.lt.s32.totalorder %s4823_s27, %s4816_s5 }
 0x2fc   : > { %p4820_p6 = pneg %p4819_p1  ;;  %p4826_p12 = por %p4825_p0, %p4824_p11 }
 0x2fe   : > { %p4827_p3 = pnand %p4826_p12, %p4820_p6 }
 0x300   : > { %4830 = shalt.err (!%p4827_p3)
}
 0x301   : > { %p6570_p10 = scmp.ne.s32.totalorder %s6545_s26, 0  ;;  %s6571_s13 = sld [smem:[#allocation62_spill]] }
 0x303   : > { %3816 = dma.hbm_to_vmem [thread:$0]  (!%p6570_p10), %s5882_s19, 16, %s961_s23, %s5582_s11  }
 0x307   : > { %p6572_p9 = scmp.ne.s32.totalorder %s6571_s13, 0 }
 0x308   : > { %s5906_s15 = sand.u32 (!%p6572_p9), 1, %s4997_s2   ;;  %p6573_p5 = scmp.ne.s32.totalorder (!%p6572_p9), %s6542_s0, 0 }
 0x309   : > { %969 = sbr.rel (%p6572_p9) target bundleno = 5051 (0x13bb), region = 120  ;;  %s3318_s24 = sshll.u32 (!%p6572_p9), %s5906_s15, 2 }
 0x30a   : > { %s972_s22 = scalar_lea.sflag (!%p6572_p9), [#allocation7], %s5906_s15  ;;  %s5912_s18 = scalar_lea.vmem (!%p6572_p9), [#allocation6], %s3318_s24 }
 0x310   : > { %4936 = dma.done.wait (%p6573_p5), %s972_s22, 64  }
 0x311   : > { %4938 = vsyncadd (%p6573_p5), %s972_s22, 4294967232  ;;  %s6574_s11 = sld [smem:[#allocation61_spill]]  ;;  %s3319_s19 = sshll.u32 %s5906_s15, 3 }
 0x312   : > { %s5920_s8 = scalar_lea.vmem [#allocation9], %s3319_s19 }
 0x317   : > { %s980_s26 = sand.u32 1, %s6574_s11  }
 0x318   : > { %s981_s23 = scalar_lea.sflag [#allocation10], %s980_s26 }
 0x319   : > { %4940 = dma.done.wait (%p6573_p5), %s981_s23, 144  }
 0x31a   : > { %4942 = vsyncadd (%p6573_p5), %s981_s23, 4294967152  ;;  %s992_s4 = scalar_lea.vmem [#allocation11], %s5906_s15  ;;  %p6575_p12 = scmp.eq.s32.totalorder %s6574_s11, 0 }
 0x31c   : > { %4944 = dma.done.wait (%p6575_p12), [#allocation13], 272   ;;  %p6576_p13 = pmov %p6575_p12 }
 0x31d   : > { %p6577_p4 = pmov %p6575_p12 }
 0x31e   : > { %4946 = vsyncadd (%p6576_p13), [#allocation13], 4294967024 }
 0x31f   : > { %4948 = dma.done.wait (%p6577_p4), [#allocation16], 272   ;;  %p6578_p7 = pmov %p6577_p4 }
 0x320   : > { %p6579_p2 = pmov %p6577_p4 }
 0x321   : > { %4950 = vsyncadd (%p6578_p7), [#allocation16], 4294967024 }
 0x322   : > { %4952 = dma.done.wait (%p6579_p2), [#allocation19], 272   ;;  %p6580_p8 = pmov %p6579_p2 }
 0x323   : > { %p6581_p1 = pmov %p6579_p2 }
 0x324   : > { %4954 = vsyncadd (%p6580_p8), [#allocation19], 4294967024 }
 0x325   : > { %4956 = dma.done.wait (%p6581_p1), [#allocation22], 32   ;;  %p6582_p6 = pmov %p6581_p1 }
 0x326   : > { %p6583_p11 = pmov %p6581_p1 }
 0x327   : > { %4958 = vsyncadd (%p6582_p6), [#allocation22], 4294967264 }
 0x328   : > { %4960 = dma.done.wait (%p6583_p11), [#allocation25], 272   ;;  %p6584_p0 = pmov %p6581_p1 }
 0x32a   : > { %4962 = vsyncadd (%p6584_p0), [#allocation25], 4294967024  ;;  %p6585_p3 = pmov %p6584_p0 }
 0x32b   : > { %p6586_p10 = pmov %p6584_p0 }
 0x32c   : > { %4964 = dma.done.wait (%p6585_p3), [#allocation28], 272  }
 0x32d   : > { %4966 = vsyncadd (%p6586_p10), [#allocation28], 4294967024  ;;  %p6587_p9 = pmov %p6584_p0 }
 0x32e   : > { %p6588_p5 = pmov %p6584_p0 }
 0x32f   : > { %4968 = dma.done.wait (%p6587_p9), [#allocation31], 272  }
 0x330   : > { %4970 = vsyncadd (%p6588_p5), [#allocation31], 4294967024  ;;  %p6589_p12 = pmov %p6584_p0 }
 0x331   : > { %p6590_p13 = pmov %p6584_p0 }
 0x332   : > { %4972 = dma.done.wait (%p6589_p12), [#allocation34], 32  }
 0x333   : > { %4974 = vsyncadd (%p6590_p13), [#allocation34], 4294967264  ;;  %p6591_p4 = pmov %p6584_p0 }
 0x334   : > { %p6592_p7 = pmov %p6584_p0 }
 0x335   : > { %4976 = dma.done.wait (%p6591_p4), [#allocation37], 272  }
 0x336   : > { %4978 = vsyncadd (%p6592_p7), [#allocation37], 4294967024  ;;  %p6593_p2 = pmov %p6584_p0 }
 0x337   : > { %p6594_p8 = pmov %p6584_p0 }
 0x338   : > { %4980 = dma.done.wait (%p6593_p2), [#allocation40], 528  }
 0x339   : > { %4982 = vsyncadd (%p6594_p8), [#allocation40], 4294966768  ;;  %p6595_p1 = pmov %p6584_p0 }
 0x33a   : > { %p6596_p6 = pmov %p6584_p0 }
 0x33b   : > { %4984 = dma.done.wait (%p6595_p1), [#allocation43], 32  }
 0x33c   : > { %4986 = vsyncadd (%p6596_p6), [#allocation43], 4294967264  ;;  %v5094_v0 = vmov 0.0   ;;  %vm5095_vm0 = vmmov 0   ;;  %v4058_v1 = vld [vmem:[#allocation15] sm:$0xff]   ;;  %v4060_v3 = vld [vmem:[#allocation15 + $0x8] sm:$0xff]   ;;  %v1414_v20 = vlaneseq }
 0x33d   : > { %3480 = vmatprep.subr.bf16.mxu0 %v5094_v0  ;;  %3488 = vmatprep.subr.bf16.mxu1 %v5094_v0  ;;  %v4059_v2 = vld [vmem:[#allocation27] sm:$0xff]   ;;  %v4061_v4 = vld [vmem:[#allocation27 + $0x8] sm:$0xff]   ;;  %vm1185_vm1 = vcmask 261120   ;;  %v4063_v7 = vld [vmem:[#allocation12] sm:$0xff]   ;;  %vm1230_vm2 = vcmask 257024   ;;  %s5096_s0 = smov 96  }
 0x33e   : > { %3484 = vmatprep.mubr.msk.bf16.mxu0 %vm5095_vm0, %v5094_v0  ;;  %3492 = vmatprep.mubr.msk.bf16.mxu1 %vm5095_vm0, %v5094_v0  ;;  %v1161_v5 = vld [vmem:[%s5912_s18] sm:$0xf]  ;;  %v4062_v6 = vld [vmem:[%s5920_s8] sm:$0x3f]   ;;  %v3343_v11 = vld [vmem:[#allocation17] ss:$0 sm:$0xff] }
 0x33f   : > { %3481 = vmatpush3.bf16.msra.mxu0 %v4058_v1  ;;  %3489 = vmatpush3.bf16.msra.mxu1 %v4059_v2  ;;  %v5983_v8 = vld [vmem:[%s5912_s18] sm:$0xf]  ;;  %v3348_v12 = vld [vmem:[#allocation29] ss:$0 sm:$0xff]  ;;  %v5994_v27 = vshrl.u32 %v1414_v20, 7  ;;  %vm1322_vm3 = vcmask 254976  }
 0x340   : > { %3482 = vmatprep.subr.bf16.mxu0 %v5094_v0  ;;  %3490 = vmatprep.subr.bf16.mxu1 %v5094_v0  ;;  %v1338_v9 = vunpack.c.l.bf16 %v5983_v8  ;;  %v4064_v10 = vld [vmem:[#allocation12 + $0x8] sm:$0xff]   ;;  %v3355_v29 = vld [vmem:[#allocation14] ss:$0 sm:$0xff]  ;;  %s5097_s20 = smov 120   ;;  %s5098_s5 = smov 112   ;;  %v6020_v42 = vmov 0.0  }
 0x341   : > { %s5099_s30 = smov 104   ;;  %s6018_s21 = scalar_lea.vmem [#allocation45], %s3318_s24  ;;  %v6022_v43 = vmov 0.0   ;;  %v6024_v44 = vmov 0.0   ;;  %v6026_v45 = vmov 0.0   ;;  %v6028_v46 = vmov 0.0  }
 0x342   : > { %v6030_v47 = vmov 0.0   ;;  %v6032_v48 = vmov 0.0   ;;  %v6034_v49 = vmov 0.0   ;;  %v6036_v50 = vmov -inf   ;;  %s6044_s27 = smov 0  }
 0x343   : > { %3483 = vmatpush3.bf16.msra.mxu0 %v4060_v3  ;;  %3491 = vmatpush3.bf16.msra.mxu1 %v4061_v4  ;;  %v6038_v51 = vmov -inf   ;;  %v6040_v52 = vmov -inf   ;;  %v6042_v53 = vmov -inf  }
 0x344   : > { %3496 = vmatprep.subr.bf16.mxu0 %v5094_v0 }
 0x346   : > { %3485 = vmatmul.mubr.msk.bf16.vlgmr.msra.gmra.mrb[0].mxu0 %vm1185_vm1, %v1161_v5  ;;  %3493 = vmatmul.mubr.msk.bf16.vlgmr.msra.gmra.mrb[0].mxu1 %vm1185_vm1, %v4062_v6 }
 0x347   : > { %3497 = vmatpush3.bf16.msra.mxu0 %v4063_v7  ;;  %3500 = vmatprep.mubr.msk.bf16.mxu0 %vm5095_vm0, %v5094_v0 }
 0x348   : > { %3498 = vmatprep.subr.bf16.mxu0 %v5094_v0 }
 0x34b   : > { %3499 = vmatpush3.bf16.msra.mxu0 %v4064_v10 }
 0x34e   : > { %3501 = vmatmul.mubr.msk.bf16.vlgmr.msra.gmra.mrb[4].mxu0 %vm1185_vm1, %v5983_v8 }
 0x419   : > { %v1223_v13 = vpop.f32.mrb[0].mxu0  ;;  %v1306_v15 = vpop.f32.mrb[0].mxu1 }
 0x41a   : > { %v1224_v14 = vadd.f32 %v3343_v11, %v1223_v13  ;;  %v3486_v16 = vpop.f32.mrb[1].mxu0  ;;  %v1307_v17 = vadd.f32 %v3348_v12, %v1306_v15  ;;  %v3494_v18 = vpop.f32.mrb[1].mxu1 }
 0x41b   : > { %v1226_v19 = vpop.f32.mrb[2].mxu0  ;;  %v1309_v22 = vpop.f32.mrb[2].mxu1 }
 0x41c   : > { %v1229_v21 = vpack.c.bf16 %v1224_v14, %v1224_v14  ;;  %v3487_v23 = vpop.f32.mrb[3].mxu0  ;;  %v3420_v24 = vpack.c.bf16 %v1307_v17, %v1307_v17  ;;  %v1310_v25 = vadd.f32 %v3348_v12, %v1309_v22  ;;  %v3495_v26 = vpop.f32.mrb[3].mxu1 }
 0x41e   : > { %1231 = vst.msk [vmem:[#allocation2] sm:$0xf] %vm1230_vm2, %v1229_v21  ;;  %1235 = vrot.lane.b32.xlu0 %v1229_v21, %s5096_s0  ;;  %1321 = vst.msk [vmem:[#allocation4] sm:$0xf] %vm1230_vm2, %v3420_v24  ;;  %v3421_v28 = vpack.c.bf16 %v1310_v25, %v1310_v25 }
 0x420   : > { %1326 = vrot.lane.b32.xlu1 %v3421_v28, %s5096_s0  ;;  %1323 = vst.msk [vmem:[#allocation4 + $0x4] sm:$0x3] %vm1322_vm3, %v3421_v28 }
 0x421   : > { %v1400_v30 = vpop.f32.mrb[4].mxu0 }
 0x422   : > { %v1401_v31 = vadd.f32 %v3355_v29, %v1400_v30  ;;  %1324 = vrot.lane.b32.xlu0 %v3420_v24, %s5096_s0  ;;  %v3502_v32 = vpop.f32.mrb[5].mxu0 }
 0x423   : > { %v1403_v33 = vpop.f32.mrb[6].mxu0 }
 0x424   : > { %v5999_v34 = vpack.c.bf16 %v1401_v31, %v1401_v31  ;;  %v3503_v35 = vpop.f32.mrb[7].mxu0 }
 0x426   : > { %1408 = vrot.lane.b32.xlu1 %v5999_v34, %s5097_s20  ;;  %1410 = vrot.lane.b32.xlu0 %v5999_v34, %s5098_s5 }
 0x42a   : > { %1412 = vrot.lane.b32.xlu1 %v5999_v34, %s5099_s30 }
 0x490   : > { %v1236_v36 = vpop.permute.xlu0 %1235 }
 0x491   : > { %1238 = vst.msk [vmem:[#allocation3] sm:$0xf] %vm1230_vm2, %v1236_v36 }
 0x492   : > { %v1327_v37 = vpop.permute.xlu1 %1326 }
 0x493   : > { %1331 = vst.msk [vmem:[#allocation5 + $0x4] sm:$0x3] %vm1322_vm3, %v1327_v37 }
 0x494   : > { %v1325_v38 = vpop.permute.xlu0 %1324 }
 0x495   : > { %1330 = vst.msk [vmem:[#allocation5] sm:$0xf] %vm1230_vm2, %v1325_v38 }
 0x498   : > { %v6010_v39 = vpop.permute.xlu1 %1408  ;;  %v6012_v40 = vpop.permute.xlu0 %1410 }
 0x49c   : > { %v6014_v41 = vpop.permute.xlu1 %1412 }
 0x49d LB: >> { %v5100_v54 = vmov 0.0   ;;  %vm5101_vm4 = vmmov 0   ;;  %s3359_s13 = sshll.u32 %s5065_s27, 3  ;;  %vm1460_vm5 = vcmask 64512   ;;  %s5102_s11 = smov 120   ;;  %v1646_v63 = vand.u32 127, %v1414_v20  ;;  %s5065_s27 = sphi %s6044_s27, %s1422_s27   ;;  %v5061_v53 = vphi %v6042_v53, %v6611_v53   ;;  %v5057_v52 = vphi %v6040_v52, %v6610_v52   ;;  %v5053_v51 = vphi %v6038_v51, %v6609_v51   ;;  %v5049_v50 = vphi %v6036_v50, %v6608_v50   ;;  %v5045_v49 = vphi %v6034_v49, %v6607_v49   ;;  %v5041_v48 = vphi %v6032_v48, %v6606_v48   ;;  %v5037_v47 = vphi %v6030_v47, %v6605_v47   ;;  %v5033_v46 = vphi %v6028_v46, %v6604_v46   ;;  %v5029_v45 = vphi %v6026_v45, %v6603_v45   ;;  %v5025_v44 = vphi %v6024_v44, %v6602_v44   ;;  %v5021_v43 = vphi %v6022_v43, %v6601_v43   ;;  %v5017_v42 = vphi %v6020_v42, %v6600_v42  }
 0x49e   : >> { %3504 = vmatprep.subr.bf16.mxu0 %v5100_v54  ;;  %3506 = vmatprep.mubr.msk.bf16.mxu0 %vm5101_vm4, %v5100_v54  ;;  %s6094_s24 = sshra.s32 %s3359_s13, 3  ;;  %s5103_s26 = smov 104   ;;  %v1647_v1 = vstv %s3359_s13  ;;  %vm1727_vm7 = vcmask 1043456  }
 0x49f   : >> { %3510 = vmatprep.subr.bf16.mxu1 %v5100_v54  ;;  %3512 = vmatprep.mubr.msk.bf16.mxu1 %vm5101_vm4, %v5100_v54  ;;  %s3360_s22 = sshll.u32 %s6094_s24, 2  ;;  %s5104_s19 = smov 112   ;;  %v1648_v2 = vadd.s32 %v1647_v1, %v1646_v63 }
 0x4a0   : >> { %s1441_s18 = scalar_lea.vmem [#allocation2], %s3360_s22  ;;  %s1451_s23 = scalar_lea.vmem [#allocation3], %s3360_s22 }
 0x4a1   : >> { %v1442_v55 = vld [vmem:[%s1441_s18] sm:$0xf]  ;;  %vm1649_vm6 = vcmp.le.s32.totalorder %v1648_v2, %v5994_v27  ;;  %s1422_s27 = sadd.s32 1, %s5065_s27  }
 0x4a2   : >> { %1444 = vrot.lane.b32.xlu0 %v1442_v55, %s5102_s11  ;;  %v1465_v56 = vsel %vm1460_vm5, %v1442_v55, 0  ;;  %1448 = vrot.lane.b32.xlu1 %v1442_v55, %s5103_s26  ;;  %v1452_v11 = vld [vmem:[%s1451_s23] sm:$0xf]  ;;  %p6202_p11 = scmp.ge.s32.totalorder %s1422_s27, 1 }
 0x4a3   : >> { %3505 = vmatpush3.bf16.xpose.msra.mxu0 %v1465_v56  ;;  %v1729_v12 = vsel %vm1727_vm7, %v1452_v11, 0  ;;  %s5105_s0 = smov (%p6202_p11), 8   ;;  %s5106_s27 = smov (%p6202_p11), 24   ;;  %vm1935_vm8 = vcmask (%p6202_p11), 130048   ;;  %vm1937_vm9 = vcmask (%p6202_p11), 195584   ;;  %vm2352_vm12 = vcmask (%p6202_p11), 97280  }
 0x4a4   : >> { %3516 = vmatprep.subr.bf16.mxu0 %v5100_v54  ;;  %s5107_s13 = smov (%p6202_p11), 16   ;;  %v2113_v8 = vld [vmem:[#allocation4 + $0x4] sm:$0x3] (%p6202_p11)  ;;  %vm2407_vm13 = vcmask (%p6202_p11), 1045504   ;;  %vm2818_vm14 = vcmask (%p6202_p11), 523264   ;;  %s6613_s22 = sld [smem:[#allocation88_spill]] (%p6202_p11) }
 0x4a5   : > { %p6614_p3 = scmp.ne.s32.totalorder (%p6202_p11), %s6543_s14, 0 }
 0x4a6   : >> { %1446 = vrot.lane.b32.xlu0 %v1442_v55, %s5104_s19 }
 0x4aa   : >> { %3507 = vmatmul.mubr.msk.bf16.vlgmr.msra.gmra.mrb[0].mxu0 %vm1460_vm5, %v5999_v34 }
 0x4ab   : >> { %3518 = vmatprep.mubr.msk.bf16.mxu0 %vm5101_vm4, %v5100_v54 }
 0x514   : >> { %v1445_v57 = vpop.permute.xlu0 %1444  ;;  %v1449_v60 = vpop.permute.xlu1 %1448 }
 0x515   : >> { %v1511_v58 = vsel %vm1460_vm5, %v1445_v57, 0  ;;  %v1603_v62 = vsel %vm1460_vm5, %v1449_v60, 0 }
 0x516   : >> { %3511 = vmatpush3.bf16.xpose.msra.mxu1 %v1511_v58 }
 0x517   : >> { %3522 = vmatprep.subr.bf16.mxu1 %v5100_v54 }
 0x518   : >> { %v1447_v59 = vpop.permute.xlu0 %1446 }
 0x519   : >> { %v1557_v61 = vsel %vm1460_vm5, %v1447_v59, 0 }
 0x51a   : >> { %3517 = vmatpush3.bf16.xpose.msra.mxu0 %v1557_v61 }
 0x51b   : >> { %3528 = vmatprep.subr.bf16.mxu0 %v5100_v54 }
 0x51d   : >> { %3513 = vmatmul.mubr.msk.bf16.vlgmr.msra.gmra.mrb[0].mxu1 %vm1460_vm5, %v6010_v39 }
 0x51e   : >> { %3523 = vmatpush3.bf16.xpose.msra.mxu1 %v1603_v62  ;;  %3524 = vmatprep.mubr.msk.bf16.mxu1 %vm5101_vm4, %v5100_v54 }
 0x51f   : >> { %3534 = vmatprep.subr.bf16.mxu1 %v5100_v54 }
 0x521   : >> { %3519 = vmatmul.mubr.msk.bf16.vlgmr.msra.gmra.mrb[4].mxu0 %vm1460_vm5, %v6012_v40 }
 0x522   : >> { %3530 = vmatprep.mubr.msk.bf16.mxu0 %vm5101_vm4, %v5100_v54  ;;  %3529 = vmatpush3.bf16.msra.mxu0 %v1729_v12 }
 0x523   : >> { %3540 = vmatprep.subr.bf16.mxu0 %v5100_v54 }
 0x525   : >> { %3525 = vmatmul.mubr.msk.bf16.vlgmr.msra.gmra.mrb[4].mxu1 %vm1460_vm5, %v6014_v41 }
 0x526   : >> { %3536 = vmatprep.mubr.msk.bf16.mxu1 %vm5101_vm4, %v5100_v54 }
 0x57d   : >> { %v1501_v3 = vpop.f32.mrb[0].mxu0 }
 0x57e   : >> { %v1652_v4 = vsel %vm1649_vm6, %v1501_v3, -1e+20  ;;  %v3508_v5 = vpop.f32.mrb[1].mxu0 }
 0x57f   : >> { %v1656_v6 = vsel %vm1460_vm5, %v1652_v4, -inf  ;;  %v1504_v7 = vpop.f32.mrb[2].mxu0 }
 0x580   : >> { %1657 = vmax.xlane.f32.xlu1 %v1656_v6  ;;  %v3509_v10 = vpop.f32.mrb[3].mxu0 }
 0x591   : >> { %1456 = vrot.lane.b32.xlu1 %v1452_v11, %s5104_s19  ;;  %s5109_s19 = smov (%p6202_p11), [#allocation45]  }
 0x592   : > { %s4835_s23 = sshll.u32 (%p6202_p11), %s5109_s19, 4  ;;  %s4836_s23 = int_to_ptr.vmem [resolvable:$false] %s4835_s23 }
 0x593   : > { %s4837_s8 = scalar_lea.vmem (%p6202_p11), %s4836_s23, 128 }
 0x5f0   : >> { %v1547_v13 = vpop.f32.mrb[0].mxu1 }
 0x5f1   : >> { %v1653_v14 = vsel %vm1649_vm6, %v1547_v13, -1e+20  ;;  %v3514_v15 = vpop.f32.mrb[1].mxu1 }
 0x5f2   : >> { %v1550_v16 = vpop.f32.mrb[2].mxu1  ;;  %v1659_v17 = vsel %vm1460_vm5, %v1653_v14, -inf }
 0x5f3   : >> { %1660 = vmax.xlane.f32.xlu0 %v1659_v17  ;;  %v3515_v18 = vpop.f32.mrb[3].mxu1 }
 0x5f4   : >> { %v1593_v19 = vpop.f32.mrb[4].mxu0 }
 0x5f5   : >> { %v1654_v21 = vsel %vm1649_vm6, %v1593_v19, -1e+20  ;;  %v3520_v22 = vpop.f32.mrb[5].mxu0 }
 0x5f6   : >> { %v1596_v23 = vpop.f32.mrb[6].mxu0  ;;  %v1662_v24 = vsel %vm1460_vm5, %v1654_v21, -inf }
 0x5f7   : >> { %1663 = vmax.xlane.f32.xlu0 %v1662_v24  ;;  %v3521_v25 = vpop.f32.mrb[7].mxu0 }
 0x5f8   : >> { %v1639_v26 = vpop.f32.mrb[4].mxu1 }
 0x5f9   : >> { %v1655_v28 = vsel %vm1649_vm6, %v1639_v26, -1e+20  ;;  %v3526_v29 = vpop.f32.mrb[5].mxu1 }
 0x5fa   : >> { %v1642_v30 = vpop.f32.mrb[6].mxu1  ;;  %v1665_v31 = vsel %vm1460_vm5, %v1655_v28, -inf }
 0x5fb   : >> { %v3527_v32 = vpop.f32.mrb[7].mxu1  ;;  %1666 = vmax.xlane.f32.xlu1 %v1665_v31 }
 0x60c   : >> { %1458 = vrot.lane.b32.xlu1 %v1452_v11, %s5103_s26 }
 0x60d   : >> { %v1658_v33 = vpop.xlane.xlu1 %1657  ;;  %1454 = vrot.lane.b32.xlu0 %v1452_v11, %s5102_s11  ;;  %s2896_s11 = scalar_lea.sflag (%p6202_p11), [#allocation8], %s5906_s15 }
 0x60e   : >> { %v6150_v35 = vmax.f32 %v5061_v53, %v1658_v33  }
 0x610   : >> { %v1672_v36 = vsub.f32 %v5061_v53, %v6150_v35  ;;  %v1684_v37 = vsub.f32 %v1652_v4, %v6150_v35 }
 0x611   : >> { %v1457_v55 = vpop.permute.xlu1 %1456 }
 0x612   : >> { %v1688_v38 = vmul.f32 1.442695, %v1684_v37  ;;  %v1821_v58 = vsel %vm1727_vm7, %v1457_v55, 0  ;;  %v1676_v24 = vmul.f32 1.442695, %v1672_v36 }
 0x614   : >> { %4065 = vpow2.f32 %v1688_v38 }
 0x61e   : >> { %v4066_v56 = vpop.eup %4065 }
 0x61f   : >> { %v1720_v57 = vpack.c.bf16 %v4066_v56, %v4066_v56  ;;  %v1700_v59 = vsel %vm1460_vm5, %v4066_v56, 0.0 }
 0x621   : >> { %3531 = vmatmul.mubr.msk.bf16.vlgmr.msra.gmra.mrb[8].mxu0 %vm1460_vm5, %v1720_v57 }
 0x622   : >> { %3541 = vmatpush3.bf16.msra.mxu0 %v1821_v58  ;;  %3542 = vmatprep.mubr.msk.bf16.mxu0 %vm5101_vm4, %v5100_v54 }
 0x623   : > { %3568 = vmatprep.subr.bf16.mxu0 (%p6202_p11), %v5094_v0 }
 0x62c   : >> { %1701 = vadd.xlane.f32.xlu0 %v1700_v59 }
 0x680   : >> { %v1661_v60 = vpop.xlane.xlu0 %1660 }
 0x681   : >> { %v6161_v53 = vmax.f32 %v5057_v52, %v1661_v60  }
 0x683   : >> { %v1673_v61 = vsub.f32 %v5057_v52, %v6161_v53  ;;  %v1685_v62 = vsub.f32 %v1653_v14, %v6161_v53 }
 0x684   : >> { %v1664_v63 = vpop.xlane.xlu0 %1663 }
 0x685   : >> { %v1690_v1 = vmul.f32 1.442695, %v1685_v62  ;;  %v6167_v2 = vmax.f32 %v5053_v51, %v1664_v63   ;;  %v1678_v38 = vmul.f32 1.442695, %v1673_v61 }
 0x687   : >> { %v1674_v3 = vsub.f32 %v5053_v51, %v6167_v2  ;;  %v1686_v4 = vsub.f32 %v1654_v21, %v6167_v2  ;;  %4067 = vpow2.f32 %v1690_v1 }
 0x688   : >> { %v1667_v5 = vpop.xlane.xlu1 %1666  ;;  %v1455_v6 = vpop.permute.xlu0 %1454 }
 0x689   : >> { %v1692_v7 = vmul.f32 1.442695, %v1686_v4  ;;  %v6173_v10 = vmax.f32 %v5049_v50, %v1667_v5   ;;  %v1775_v52 = vsel %vm1727_vm7, %v1455_v6, 0  ;;  %v1680_v55 = vmul.f32 1.442695, %v1674_v3 }
 0x68a   : >> { %3535 = vmatpush3.bf16.msra.mxu1 %v1775_v52 }
 0x68b   : >> { %v1675_v11 = vsub.f32 %v5049_v50, %v6173_v10  ;;  %v1687_v12 = vsub.f32 %v1655_v28, %v6173_v10  ;;  %3546 = vmatprep.subr.bf16.mxu1 %v5100_v54  ;;  %4069 = vpow2.f32 %v1692_v7 }
 0x68c   : >> { %v1459_v13 = vpop.permute.xlu1 %1458 }
 0x68d   : >> { %v1694_v51 = vmul.f32 1.442695, %v1687_v12  ;;  %v1867_v15 = vsel %vm1727_vm7, %v1459_v13, 0  ;;  %v1682_v36 = vmul.f32 1.442695, %v1675_v11 }
 0x68f   : >> { %4071 = vpow2.f32 %v1694_v51 }
 0x690   : >> { %4073 = vpow2.f32 %v1676_v24 }
 0x691   : >> { %v4068_v14 = vpop.eup %4067  ;;  %4075 = vpow2.f32 %v1678_v38 }
 0x692   : >> { %v1703_v16 = vsel %vm1460_vm5, %v4068_v14, 0.0  ;;  %v1721_v17 = vpack.c.bf16 %v4068_v14, %v4068_v14  ;;  %4077 = vpow2.f32 %v1680_v55 }
 0x693   : >> { %1704 = vadd.xlane.f32.xlu1 %v1703_v16  ;;  %4079 = vpow2.f32 %v1682_v36 }
 0x694   : >> { %3537 = vmatmul.mubr.msk.bf16.vlgmr.msra.gmra.mrb[8].mxu1 %vm1460_vm5, %v1721_v17 }
 0x695   : >> { %v4070_v18 = vpop.eup %4069  ;;  %3547 = vmatpush3.bf16.msra.mxu1 %v1867_v15  ;;  %3548 = vmatprep.mubr.msk.bf16.mxu1 %vm5101_vm4, %v5100_v54 }
 0x696   : >> { %v1706_v50 = vsel %vm1460_vm5, %v4070_v18, 0.0  ;;  %v1722_v19 = vpack.c.bf16 %v4070_v18, %v4070_v18  ;;  %3552 = vmatprep.subr.bf16.mxu1 (%p6202_p11), %v5094_v0 }
 0x697   : >> { %1707 = vadd.xlane.f32.xlu0 %v1706_v50 }
 0x698   : >> { %3543 = vmatmul.mubr.msk.bf16.vlgmr.msra.gmra.mrb[12].mxu0 %vm1460_vm5, %v1722_v19 }
 0x699   : >> { %v4072_v21 = vpop.eup %4071  ;;  %3570 = vmatprep.mubr.msk.bf16.mxu0 (%p6202_p11), %vm5095_vm0, %v5094_v0 }
 0x69a   : >> { %v1709_v22 = vsel %vm1460_vm5, %v4072_v21, 0.0  ;;  %v1723_v23 = vpack.c.bf16 %v4072_v21, %v4072_v21  ;;  %v4074_v25 = vpop.eup %4073 }
 0x69b   : >> { %1710 = vadd.xlane.f32.xlu0 %v1709_v22  ;;  %v1696_v26 = vmul.f32 %v5045_v49, %v4074_v25  ;;  %v1716_v29 = vmul.f32 %v5029_v45, %v4074_v25  ;;  %v4076_v56 = vpop.eup %4075  ;;  %v3370_v25 = vld [vmem:[#allocation20] ss:$0 sm:$0xff] (%p6202_p11) }
 0x69c   : >> { %3549 = vmatmul.mubr.msk.bf16.vlgmr.msra.gmra.mrb[12].mxu1 %vm1460_vm5, %v1723_v23  ;;  %v1697_v57 = vmul.f32 %v5041_v48, %v4076_v56  ;;  %v4078_v58 = vpop.eup %4077  ;;  %v1717_v3 = vmul.f32 %v5025_v44, %v4076_v56  ;;  %v4083_v56 = vld [vmem:[#allocation24] sm:$0xff] (%p6202_p11)  }
 0x69d   : >> { %v4080_v62 = vpop.eup %4079  ;;  %v1718_v48 = vmul.f32 %v5021_v43, %v4078_v58  ;;  %3556 = vmatprep.mubr.msk.bf16.mxu1 (%p6202_p11), %vm5095_vm0, %v5094_v0 }
 0x69e   : >> { %v1719_v15 = vmul.f32 %v5017_v42, %v4080_v62 }
 0x6b9   : >> { %v1702_v28 = vpop.xlane.xlu0 %1701 }
 0x6ba   : >> { %v6190_v49 = vadd.f32 %v1702_v28, %v1696_v26  }
 0x6bc   : >> { %v6597_v54 = vmov %v6190_v49  ;;  %v1698_v49 = vmul.f32 %v5037_v47, %v4078_v58 }
 0x6f4   : >> { %v1765_v30 = vpop.f32.mrb[8].mxu0 }
 0x6f5   : >> { %v6193_v45 = vadd.f32 %v1765_v30, %v1716_v29   ;;  %v3532_v32 = vpop.f32.mrb[9].mxu0 }
 0x6f6   : >> { %v1768_v33 = vpop.f32.mrb[10].mxu0 }
 0x6f7   : >> { %v6598_v31 = vmov %v6193_v45  ;;  %v3533_v37 = vpop.f32.mrb[11].mxu0  ;;  %v1699_v45 = vmul.f32 %v5033_v46, %v4080_v62 }
 0x720   : >> { %v1705_v59 = vpop.xlane.xlu1 %1704 }
 0x721   : >> { %v1713_v60 = vadd.f32 %v1705_v59, %v1697_v57   ;;  %v4084_v57 = vld [vmem:[#allocation24 + $0x8] sm:$0xff] (%p6202_p11)  }
 0x723   : > { %4095 = vrcp.f32 (%p6202_p11), %v1713_v60 }
 0x724   : >> { %v1708_v63 = vpop.xlane.xlu0 %1707 }
 0x725   : >> { %v1714_v1 = vadd.f32 %v1708_v63, %v1698_v49   ;;  %v6607_v49 = vmov %v6597_v54 }
 0x727   : > { %4097 = vrcp.f32 (%p6202_p11), %v1714_v1 }
 0x728   : >> { %v1711_v4 = vpop.xlane.xlu0 %1710 }
 0x729   : >> { %v1715_v61 = vadd.f32 %v1711_v4, %v1699_v45   ;;  %v6603_v45 = vmov %v6598_v31  ;;  %v3375_v4 = vld [vmem:[#allocation23] ss:$0 sm:$0xff] (%p6202_p11) }
 0x72b   : > { %4099 = vrcp.f32 (%p6202_p11), %v1715_v61 }
 0x72c   : > { %4101 = vrcp.f32 (%p6202_p11), %v6597_v54 }
 0x72d   : > { %v4096_v20 = vpop.eup (%p6202_p11), %4095 }
 0x731   : > { %v4098_v34 = vpop.eup (%p6202_p11), %4097 }
 0x735   : > { %v4100_v40 = vpop.eup (%p6202_p11), %4099 }
 0x767   : >> { %v1811_v5 = vpop.f32.mrb[8].mxu1 }
 0x768   : >> { %v1910_v6 = vadd.f32 %v1811_v5, %v1717_v3   ;;  %v3538_v7 = vpop.f32.mrb[9].mxu1 }
 0x769   : >> { %v1814_v52 = vpop.f32.mrb[10].mxu1 }
 0x76a   : >> { %v3539_v11 = vpop.f32.mrb[11].mxu1  ;;  %v6602_v44 = vmov %v1910_v6  ;;  %v6610_v52 = vmov %v6161_v53  ;;  %v6611_v53 = vmov %v6150_v35  ;;  %v4082_v35 = vld [vmem:[#allocation18 + $0x8] sm:$0xff] (%p6202_p11)   ;;  %v1918_v39 = vmul.f32 (%p6202_p11), %v4096_v20, %v1910_v6 }
 0x76b   : >> { %v1857_v12 = vpop.f32.mrb[12].mxu0 }
 0x76c   : >> { %v1911_v13 = vadd.f32 %v1857_v12, %v1718_v48   ;;  %v3544_v51 = vpop.f32.mrb[13].mxu0  ;;  %v6606_v48 = vmov %v1713_v60  ;;  %1922 = vrot.lane.b32.xlu0 (%p6202_p11), %v1918_v39, %s5105_s0 }
 0x76d   : >> { %v1860_v47 = vpop.f32.mrb[14].mxu0  ;;  %v6609_v51 = vmov %v6167_v2  ;;  %1424 = sbr.rel (!%p6202_p11) target bundleno = 1181 (0x49d), region = 291 }
 0x76e   : >> { %v3545_v14 = vpop.f32.mrb[15].mxu0  ;;  %v6601_v43 = vmov %v1911_v13  ;;  %v6605_v47 = vmov %v1714_v1  ;;  %v1919_v41 = vmul.f32 (%p6202_p11), %v4098_v34, %v1911_v13  ;;  %v3374_v1 = vld [vmem:[#allocation21] ss:$0 sm:$0xff] (%p6202_p11)  ;;  %v3376_v13 = vld [vmem:[#allocation26] ss:$0 sm:$0xff] (%p6202_p11) }
 0x76f   : >> { %v1903_v16 = vpop.f32.mrb[12].mxu1  ;;  %v4102_v43 = vpop.eup (%p6202_p11), %4101 }
 0x770   : >> { %v1912_v17 = vadd.f32 %v1903_v16, %v1719_v15   ;;  %v3550_v46 = vpop.f32.mrb[13].mxu1  ;;  %1926 = vrot.lane.b32.xlu0 (%p6202_p11), %v1919_v41, %s5107_s13  ;;  %v1917_v53 = vmul.f32 (%p6202_p11), %v4102_v43, %v6598_v31  ;;  %v2340_v41 = vld [vmem:[%s992_s4] sm:$0x1] (%p6202_p11)  ;;  %v5108_v43 = vmov (%p6202_p11), 0   ;;  %s6612_s4 = sld [smem:[#allocation60_spill]] (%p6202_p11) }
 0x771   : >> { %v1906_v18 = vpop.f32.mrb[14].mxu1  ;;  %v6604_v46 = vmov %v1715_v61  ;;  %vm2341_vm10 = vcmp.gt.f32.partialorder (%p6202_p11), %v2340_v41, 0.0 }
 0x772   : >> { %v3551_v50 = vpop.f32.mrb[15].mxu1  ;;  %v6600_v42 = vmov %v1912_v17 }
 0x773   : >> { %v6608_v50 = vmov %v6173_v10  ;;  %v4081_v10 = vld [vmem:[#allocation18] sm:$0xff] (%p6202_p11)   ;;  %v1920_v42 = vmul.f32 (%p6202_p11), %v4100_v40, %v1912_v17 }
 0x774   : > { %3553 = vmatpush3.bf16.msra.mxu1 %v4081_v10 }
 0x775   : > { %3554 = vmatprep.subr.bf16.mxu1 %v5094_v0  ;;  %1930 = vrot.lane.b32.xlu1 %v1920_v42, %s5106_s27  ;;  %v2345_v42 = vsub.s32 0, %v5994_v27 }
 0x778   : > { %3555 = vmatpush3.bf16.msra.mxu1 %v4082_v35 }
 0x779   : > { %3560 = vmatprep.subr.bf16.mxu1 %v5094_v0 }
 0x7de   : > { %v1923_v44 = vpop.permute.xlu0 %1922 }
 0x7df   : > { %v1934_v19 = vsel %vm1460_vm5, %v1917_v53, %v1923_v44  ;;  %v2342_v44 = vsel %vm2341_vm10, 1, %v5108_v43 }
 0x7e0   : > { %v2346_v53 = vrot.slane %v2342_v44, %v2345_v42 }
 0x7e2   : > { %v1927_v21 = vpop.permute.xlu0 %1926  ;;  %vm2347_vm11 = vcmp.eq.s32.totalorder %v2346_v53, 1 }
 0x7e3   : > { %v1936_v22 = vsel %vm1935_vm8, %v1934_v19, %v1927_v21 }
 0x7e7   : > { %v1931_v2 = vpop.permute.xlu1 %1930 }
 0x7e8   : > { %v1938_v23 = vsel %vm1937_vm9, %v1936_v22, %v1931_v2 }
 0x7e9   : > { %v1939_v24 = vpack.c.bf16 %v1938_v23, %v1938_v23 }
 0x7eb   : > { %3557 = vmatmul.mubr.msk.bf16.vlgmr.msra.gmra.mrb[0].mxu1 %vm1185_vm1, %v1939_v24 }
 0x7ec   : > { %3564 = vmatprep.mubr.msk.bf16.mxu1 %vm5095_vm0, %v5094_v0  ;;  %3561 = vmatpush3.bf16.msra.mxu1 %v4083_v56 }
 0x7ed   : > { %3562 = vmatprep.subr.bf16.mxu1 %v5094_v0 }
 0x7f0   : > { %3563 = vmatpush3.bf16.msra.mxu1 %v4084_v57 }
 0x7f1   : > { %3574 = vmatprep.subr.bf16.mxu1 %v5094_v0 }
 0x8be   : > { %v2000_v26 = vpop.f32.mrb[0].mxu1 }
 0x8bf   : > { %v2001_v28 = vadd.f32 %v3370_v25, %v2000_v26  ;;  %v3558_v54 = vpop.f32.mrb[1].mxu1 }
 0x8c0   : > { %v2003_v29 = vpop.f32.mrb[2].mxu1 }
 0x8c1   : > { %v2006_v30 = vadd.f32 %v2001_v28, %v1338_v9  ;;  %v3559_v31 = vpop.f32.mrb[3].mxu1  ;;  %v2112_v9 = vld [vmem:[#allocation4] sm:$0xf] }
 0x8c2   : > { %v3380_v58 = vcombine.low %v2112_v9, %v2113_v8 }
 0x8c3   : > { %v2009_v32 = vsel %vm1185_vm1, %v2006_v30, 0.0 }
 0x8c4   : > { %2010 = vadd.xlane.f32.xlu1 %v2009_v32  ;;  %v2151_v59 = vsel %vm1460_vm5, %v3380_v58, 0  ;;  %v2128_v58 = vld [vmem:[#allocation5] sm:$0xf] }
 0x8c5   : > { %3569 = vmatpush3.bf16.xpose.msra.mxu0 %v2151_v59  ;;  %v2129_v59 = vld [vmem:[#allocation5 + $0x4] sm:$0x3] }
 0x8c6   : > { %3580 = vmatprep.subr.bf16.mxu0 %v5094_v0 }
 0x8d5   : > { %2118 = vrot.lane.b32.xlu1 %v2113_v8, %s5097_s20 }
 0x8d9   : > { %2120 = vrot.lane.b32.xlu1 %v2112_v9, %s5098_s5 }
 0x8dd   : > { %2124 = vrot.lane.b32.xlu1 %v2112_v9, %s5099_s30 }
 0x951   : > { %v2011_v33 = vpop.xlane.xlu1 %2010 }
 0x952   : > { %v2013_v37 = vmul.f32 0.03125, %v2011_v33 }
 0x954   : > { %v2014_v38 = vsub.f32 %v2006_v30, %v2013_v37 }
 0x955   : > { %v2119_v7 = vpop.permute.xlu1 %2118 }
 0x956   : > { %v2015_v55 = vmul.f32 %v2014_v38, %v2014_v38 }
 0x958   : > { %v2016_v36 = vsel %vm1185_vm1, %v2015_v55, 0.0 }
 0x959   : > { %2017 = vadd.xlane.f32.xlu0 %v2016_v36  ;;  %v2121_v12 = vpop.permute.xlu1 %2120 }
 0x95d   : > { %v2125_v10 = vpop.permute.xlu1 %2124 }
 0x96f   : > { %2116 = vrot.lane.b32.xlu0 %v2112_v9, %s5097_s20 }
 0x973   : > { %2122 = vrot.lane.b32.xlu0 %v2113_v8, %s5098_s5 }
 0x977   : > { %2126 = vrot.lane.b32.xlu0 %v2113_v8, %s5099_s30 }
 0x9e6   : > { %v2018_v60 = vpop.xlane.xlu0 %2017 }
 0x9e7   : > { %v2019_v49 = vmul.f32 0.03125, %v2018_v60 }
 0x9e9   : > { %v2020_v62 = vadd.f32 1e-05, %v2019_v49 }
 0x9ea   : > { %v2117_v6 = vpop.permute.xlu0 %2116 }
 0x9eb   : > { %4103 = vrsqrt.f32 %v2020_v62  ;;  %v3382_v52 = vcombine.low %v2117_v6, %v2119_v7 }
 0x9ed   : > { %v2200_v11 = vsel %vm1460_vm5, %v3382_v52, 0 }
 0x9ee   : > { %v2123_v48 = vpop.permute.xlu0 %2122 }
 0x9ef   : > { %v3384_v47 = vcombine.low %v2121_v12, %v2123_v48 }
 0x9f1   : > { %v2249_v18 = vsel %vm1460_vm5, %v3384_v47, 0 }
 0x9f2   : > { %v2127_v50 = vpop.permute.xlu0 %2126 }
 0x9f3   : > { %v3386_v35 = vcombine.low %v2125_v10, %v2127_v50 }
 0x9f5   : > { %v4104_v63 = vpop.eup %4103  ;;  %v2298_v20 = vsel %vm1460_vm5, %v3386_v35, 0 }
 0x9f6   : > { %v2022_v45 = vmul.f32 %v4104_v63, %v2014_v38 }
 0x9f8   : > { %v2029_v61 = vmul.f32 %v3374_v1, %v2022_v45  ;;  %v3388_v45 = vcombine.low %v2128_v58, %v2129_v59 }
 0x9fa   : > { %v6273_v3 = vadd.f32 %v3375_v4, %v2029_v61  ;;  %v2409_v4 = vsel %vm2407_vm13, %v3388_v45, 0 }
 0x9fc   : > { %v2037_v5 = vpack.c.bf16 %v6273_v3, %v6273_v3 }
 0x9fe   : > { %3565 = vmatmul.mubr.msk.bf16.vlgmr.msra.gmra.mrb[4].mxu1 %vm1185_vm1, %v2037_v5 }
 0x9ff   : > { %3576 = vmatprep.mubr.msk.bf16.mxu1 %vm5095_vm0, %v5094_v0  ;;  %3575 = vmatpush3.bf16.xpose.msra.mxu1 %v2200_v11 }
 0xa00   : > { %3586 = vmatprep.subr.bf16.mxu1 %v5094_v0 }
 0xad1   : > { %v2098_v51 = vpop.f32.mrb[4].mxu1 }
 0xad2   : > { %v2099_v14 = vadd.f32 %v3376_v13, %v2098_v51  ;;  %v3566_v15 = vpop.f32.mrb[5].mxu1 }
 0xad3   : > { %v2101_v16 = vpop.f32.mrb[6].mxu1 }
 0xad4   : > { %v2104_v17 = vpack.c.bf16 %v2099_v14, %v2099_v14  ;;  %v3567_v46 = vpop.f32.mrb[7].mxu1 }
 0xad6   : > { %2108 = vrot.lane.b32.xlu0 %v2104_v17, %s5098_s5  ;;  %2106 = vrot.lane.b32.xlu1 %v2104_v17, %s5097_s20 }
 0xad7   : > { %3571 = vmatmul.mubr.msk.bf16.vlgmr.msra.gmra.mrb[0].mxu0 %vm1460_vm5, %v2104_v17 }
 0xad8   : > { %3581 = vmatpush3.bf16.xpose.msra.mxu0 %v2249_v18  ;;  %3582 = vmatprep.mubr.msk.bf16.mxu0 %vm5095_vm0, %v5094_v0 }
 0xad9   : > { %3592 = vmatprep.subr.bf16.mxu0 %v5094_v0 }
 0xada   : > { %2110 = vrot.lane.b32.xlu1 %v2104_v17, %s5099_s30 }
 0xb48   : > { %v2109_v34 = vpop.permute.xlu0 %2108  ;;  %v2107_v39 = vpop.permute.xlu1 %2106 }
 0xb49   : > { %3577 = vmatmul.mubr.msk.bf16.vlgmr.msra.gmra.mrb[8].mxu1 %vm1460_vm5, %v2107_v39  ;;  %3583 = vmatmul.mubr.msk.bf16.vlgmr.msra.gmra.mrb[4].mxu0 %vm1460_vm5, %v2109_v34 }
 0xb4a   : > { %3587 = vmatpush3.bf16.xpose.msra.mxu1 %v2298_v20  ;;  %3588 = vmatprep.mubr.msk.bf16.mxu1 %vm5095_vm0, %v5094_v0 }
 0xb4b   : > { %3594 = vmatprep.mubr.msk.bf16.mxu0 %vm5095_vm0, %v5094_v0  ;;  %3598 = vmatprep.subr.bf16.mxu1 %v5094_v0 }
 0xb4c   : > { %v2111_v40 = vpop.permute.xlu1 %2110  ;;  %3593 = vmatpush3.bf16.msra.mxu0 %v2409_v4 }
 0xb4d   : > { %3604 = vmatprep.subr.bf16.mxu0 %v5094_v0 }
 0xb51   : > { %3589 = vmatmul.mubr.msk.bf16.vlgmr.msra.gmra.mrb[12].mxu1 %vm1460_vm5, %v2111_v40 }
 0xb52   : > { %3600 = vmatprep.mubr.msk.bf16.mxu1 %vm5095_vm0, %v5094_v0 }
 0xbaa   : > { %v2187_v2 = vpop.f32.mrb[0].mxu0 }
 0xbab   : > { %v2348_v19 = vsel %vm2347_vm11, %v2187_v2, -1e+20  ;;  %v3572_v21 = vpop.f32.mrb[1].mxu0 }
 0xbac   : > { %v2190_v22 = vpop.f32.mrb[2].mxu0  ;;  %v2353_v23 = vsel %vm2352_vm12, %v2348_v19, -inf }
 0xbad   : > { %2354 = vmax.xlane.f32.xlu0 %v2353_v23  ;;  %v3573_v24 = vpop.f32.mrb[3].mxu0 }
 0xc1c   : > { %v2236_v25 = vpop.f32.mrb[8].mxu1  ;;  %v2285_v26 = vpop.f32.mrb[4].mxu0 }
 0xc1d   : > { %v2349_v28 = vsel %vm2347_vm11, %v2236_v25, -1e+20  ;;  %v2350_v27 = vsel %vm2347_vm11, %v2285_v26, -1e+20  ;;  %v3578_v54 = vpop.f32.mrb[9].mxu1  ;;  %v3584_v29 = vpop.f32.mrb[5].mxu0 }
 0xc1e   : > { %v2239_v30 = vpop.f32.mrb[10].mxu1  ;;  %v2288_v31 = vpop.f32.mrb[6].mxu0  ;;  %v2359_v32 = vsel %vm2352_vm12, %v2350_v27, -inf  ;;  %v2356_v33 = vsel %vm2352_vm12, %v2349_v28, -inf }
 0xc1f   : > { %2360 = vmax.xlane.f32.xlu0 %v2359_v32  ;;  %v3585_v37 = vpop.f32.mrb[7].mxu0  ;;  %2357 = vmax.xlane.f32.xlu1 %v2356_v33  ;;  %v3579_v38 = vpop.f32.mrb[11].mxu1 }
 0xc24   : > { %v2334_v55 = vpop.f32.mrb[12].mxu1 }
 0xc25   : > { %v2351_v36 = vsel %vm2347_vm11, %v2334_v55, -1e+20  ;;  %v3590_v56 = vpop.f32.mrb[13].mxu1  ;;  %v4087_v55 = vld [vmem:[#allocation30] sm:$0xff]  }
 0xc26   : > { %v2337_v57 = vpop.f32.mrb[14].mxu1  ;;  %v2362_v8 = vsel %vm2352_vm12, %v2351_v36, -inf }
 0xc27   : > { %2363 = vmax.xlane.f32.xlu0 %v2362_v8  ;;  %v3591_v9 = vpop.f32.mrb[15].mxu1 }
 0xc30   : > { %2132 = vrot.lane.b32.xlu1 %v2128_v58, %s5097_s20 }
 0xc34   : > { %2136 = vrot.lane.b32.xlu1 %v2128_v58, %s5098_s5 }
 0xc38   : > { %2138 = vrot.lane.b32.xlu1 %v2129_v59, %s5098_s5  ;;  %s2910_s5 = sshll.u32 %s6018_s21, 4  ;;  %s6370_s5 = int_to_ptr.vmem [resolvable:$true] %s2910_s5 }
 0xc39   : > { %s4831_s26 = scalar_lea.vmem %s6370_s5, 64  ;;  %p4838_p5 = scmp.lt.s32.totalorder %s6370_s5, %s4836_s23 }
 0xc3a   : > { %v2355_v60 = vpop.xlane.xlu0 %2354  ;;  %p4832_p0 = scmp.ne.s32.totalorder %s6370_s5, %s4831_s26  ;;  %p4839_p12 = scmp.lt.s32.totalorder %s4837_s8, %s4831_s26 }
 0xc3b   : > { %v2365_v49 = vsub.f32 %v2348_v19, %v2355_v60 }
 0xc3c   : > { %p4833_p10 = pnand %p4832_p0, %p6614_p3  ;;  %p4840_p13 = por %p4839_p12, %p4838_p5 }
 0xc3d   : > { %2134 = vrot.lane.b32.xlu0 %v2129_v59, %s5097_s20  ;;  %v2369_v62 = vmul.f32 1.442695, %v2365_v49  ;;  %s3415_s20 = sshll.u32 %s6612_s4, 6 }
 0xc3e   : > { %s6368_s18 = scalar_lea.hbm %s6613_s22, %s3415_s20  ;;  %p4834_p9 = pneg %p4833_p10 }
 0xc3f   : > { %4105 = vpow2.f32 %v2369_v62 }
 0xc40   : > { %p4841_p4 = pnand %p4840_p13, %p4834_p9 }
 0xc49   : > { %v4106_v63 = vpop.eup %4105 }
 0xc4a   : > { %v2377_v1 = vsel %vm2352_vm12, %v4106_v63, 0.0 }
 0xc5c   : > { %2378 = vadd.xlane.f32.xlu1 %v2377_v1 }
 0xcac   : > { %v2361_v61 = vpop.xlane.xlu0 %2360  ;;  %v2358_v5 = vpop.xlane.xlu1 %2357 }
 0xcad   : > { %v2367_v6 = vsub.f32 %v2350_v27, %v2361_v61  ;;  %v2366_v7 = vsub.f32 %v2349_v28, %v2358_v5 }
 0xcaf   : > { %v2373_v52 = vmul.f32 1.442695, %v2367_v6  ;;  %v2371_v11 = vmul.f32 1.442695, %v2366_v7 }
 0xcb0   : > { %v2133_v51 = vpop.permute.xlu1 %2132 }
 0xcb1   : > { %4107 = vpow2.f32 %v2373_v52 }
 0xcb2   : > { %4109 = vpow2.f32 %v2371_v11 }
 0xcb4   : > { %v2364_v48 = vpop.xlane.xlu0 %2363  ;;  %v2137_v35 = vpop.permute.xlu1 %2136 }
 0xcb5   : > { %v2368_v12 = vsub.f32 %v2351_v36, %v2364_v48  ;;  %v4088_v36 = vld [vmem:[#allocation30 + $0x8] sm:$0xff]   ;;  %v3396_v48 = vld [vmem:[#allocation32] ss:$0 sm:$0xff] }
 0xcb7   : > { %v2375_v13 = vmul.f32 1.442695, %v2368_v12 }
 0xcb8   : > { %v2135_v47 = vpop.permute.xlu0 %2134  ;;  %v2139_v20 = vpop.permute.xlu1 %2138 }
 0xcb9   : > { %4111 = vpow2.f32 %v2375_v13  ;;  %v3390_v14 = vcombine.low %v2133_v51, %v2135_v47  ;;  %v3392_v39 = vcombine.low %v2137_v35, %v2139_v20  ;;  %v4089_v35 = vld [vmem:[#allocation36] sm:$0xff]   ;;  %v4090_v20 = vld [vmem:[#allocation36 + $0x8] sm:$0xff]  }
 0xcbb   : > { %v4108_v15 = vpop.eup %4107  ;;  %v2458_v16 = vsel %vm2407_vm13, %v3390_v14, 0  ;;  %v2507_v42 = vsel %vm2407_vm13, %v3392_v39, 0  ;;  %v4092_v39 = vld [vmem:[#allocation39 + $0x8] sm:$0xff]  }
 0xcbc   : > { %v4110_v17 = vpop.eup %4109  ;;  %v2383_v46 = vsel %vm2352_vm12, %v4108_v15, 0.0  ;;  %3599 = vmatpush3.bf16.msra.mxu1 %v2458_v16 }
 0xcbd   : > { %2384 = vadd.xlane.f32.xlu1 %v2383_v46  ;;  %v2380_v18 = vsel %vm2352_vm12, %v4110_v17, 0.0  ;;  %3610 = vmatprep.subr.bf16.mxu1 %v5094_v0 }
 0xcbe   : > { %2381 = vadd.xlane.f32.xlu0 %v2380_v18 }
 0xcc3   : > { %v4112_v50 = vpop.eup %4111 }
 0xcc4   : > { %v2386_v10 = vsel %vm2352_vm12, %v4112_v50, 0.0 }
 0xcc5   : > { %2387 = vadd.xlane.f32.xlu0 %v2386_v10 }
 0xcce   : > { %2142 = vrot.lane.b32.xlu1 %v2129_v59, %s5099_s30 }
 0xcdb   : > { %2140 = vrot.lane.b32.xlu0 %v2128_v58, %s5099_s30 }
 0xce9   : > { %v2379_v34 = vpop.xlane.xlu1 %2378 }
 0xcea   : > { %4113 = vrcp.f32 %v2379_v34  ;;  %v4091_v34 = vld [vmem:[#allocation39] sm:$0xff]  }
 0xcf4   : > { %v4114_v40 = vpop.eup %4113 }
 0xcf5   : > { %v2393_v41 = vmul.f32 %v4114_v40, %v4106_v63 }
 0xcf7   : > { %v2397_v43 = vpack.c.bf16 %v2393_v41, %v2393_v41 }
 0xcf9   : > { %3595 = vmatmul.mubr.msk.bf16.vlgmr.msra.gmra.mrb[8].mxu0 %vm2352_vm12, %v2397_v43  ;;  %v3400_v43 = vld [vmem:[#allocation33] ss:$0 sm:$0xff] }
 0xcfa   : > { %3605 = vmatpush3.bf16.msra.mxu0 %v2507_v42  ;;  %3606 = vmatprep.mubr.msk.bf16.mxu0 %vm5095_vm0, %v5094_v0 }
 0xcfb   : > { %3616 = vmatprep.subr.bf16.mxu0 %v5094_v0 }
 0xd4a   : > { %v2385_v44 = vpop.xlane.xlu1 %2384 }
 0xd4b   : > { %4115 = vrcp.f32 %v2385_v44  ;;  %v2382_v53 = vpop.xlane.xlu0 %2381 }
 0xd4c   : > { %4117 = vrcp.f32 %v2382_v53  ;;  %v3401_v53 = vld [vmem:[#allocation35] ss:$0 sm:$0xff] }
 0xd4e   : > { %v2143_v19 = vpop.permute.xlu1 %2142 }
 0xd52   : > { %v2388_v2 = vpop.xlane.xlu0 %2387 }
 0xd53   : > { %4119 = vrcp.f32 %v2388_v2 }
 0xd55   : > { %v4116_v21 = vpop.eup %4115 }
 0xd56   : > { %v4118_v22 = vpop.eup %4117  ;;  %v2395_v23 = vmul.f32 %v4116_v21, %v4108_v15  ;;  %v2141_v24 = vpop.permute.xlu0 %2140 }
 0xd57   : > { %v2394_v25 = vmul.f32 %v4118_v22, %v4110_v17  ;;  %v3394_v26 = vcombine.low %v2141_v24, %v2143_v19  ;;  %v4093_v22 = vld [vmem:[#allocation39 + $0x10] sm:$0xff]   ;;  %v3402_v24 = vld [vmem:[#allocation38] ss:$0 sm:$0xff] }
 0xd58   : > { %v2399_v28 = vpack.c.bf16 %v2395_v23, %v2395_v23  ;;  %v4094_v23 = vld [vmem:[#allocation39 + $0x18] sm:$0xff]  }
 0xd59   : > { %v2556_v27 = vsel %vm2407_vm13, %v3394_v26, 0  ;;  %v2398_v54 = vpack.c.bf16 %v2394_v25, %v2394_v25 }
 0xd5a   : > { %3607 = vmatmul.mubr.msk.bf16.vlgmr.msra.gmra.mrb[12].mxu0 %vm2352_vm12, %v2399_v28 }
 0xd5b   : > { %3601 = vmatmul.mubr.msk.bf16.vlgmr.msra.gmra.mrb[16].mxu1 %vm2352_vm12, %v2398_v54  ;;  %3620 = vmatprep.mubr.msk.bf16.mxu0 %vm5095_vm0, %v5094_v0 }
 0xd5c   : > { %3611 = vmatpush3.bf16.msra.mxu1 %v2556_v27  ;;  %3612 = vmatprep.mubr.msk.bf16.mxu1 %vm5095_vm0, %v5094_v0 }
 0xd5d   : > { %v4120_v29 = vpop.eup %4119  ;;  %3624 = vmatprep.subr.bf16.mxu1 %v5094_v0  ;;  %3617 = vmatpush3.bf16.msra.mxu0 %v4087_v55 }
 0xd5e   : > { %v2396_v30 = vmul.f32 %v4120_v29, %v4112_v50  ;;  %3618 = vmatprep.subr.bf16.mxu0 %v5094_v0 }
 0xd60   : > { %v2400_v31 = vpack.c.bf16 %v2396_v30, %v2396_v30 }
 0xd61   : > { %3619 = vmatpush3.bf16.msra.mxu0 %v4088_v36 }
 0xd62   : > { %3632 = vmatprep.subr.bf16.mxu0 %v5094_v0 }
 0xd63   : > { %3613 = vmatmul.mubr.msk.bf16.vlgmr.msra.gmra.mrb[20].mxu1 %vm2352_vm12, %v2400_v31  ;;  %v3406_v31 = vld [vmem:[#allocation41] ss:$0 sm:$0xff] }
 0xd64   : > { %3628 = vmatprep.mubr.msk.bf16.mxu1 %vm5095_vm0, %v5094_v0  ;;  %3625 = vmatpush3.bf16.msra.mxu1 %v4089_v35 }
 0xd65   : > { %3626 = vmatprep.subr.bf16.mxu1 %v5094_v0 }
 0xd68   : > { %3627 = vmatpush3.bf16.msra.mxu1 %v4090_v20 }
 0xdcc   : > { %v2445_v32 = vpop.f32.mrb[8].mxu0 }
 0xdcd   : > { %v3596_v33 = vpop.f32.mrb[9].mxu0 }
 0xdce   : > { %v2448_v37 = vpop.f32.mrb[10].mxu0 }
 0xdcf   : > { %v3597_v38 = vpop.f32.mrb[11].mxu0 }
 0xe2d   : > { %v2543_v56 = vpop.f32.mrb[12].mxu0 }
 0xe2e   : > { %v2494_v57 = vpop.f32.mrb[16].mxu1  ;;  %2603 = vrot.lane.b32.xlu1 %v2543_v56, %s5107_s13  ;;  %v3608_v8 = vpop.f32.mrb[13].mxu0 }
 0xe2f   : > { %2599 = vrot.lane.b32.xlu0 %v2494_v57, %s5105_s0  ;;  %v3602_v9 = vpop.f32.mrb[17].mxu1  ;;  %v2546_v58 = vpop.f32.mrb[14].mxu0 }
 0xe30   : > { %v2497_v59 = vpop.f32.mrb[18].mxu1  ;;  %v3609_v60 = vpop.f32.mrb[15].mxu0 }
 0xe31   : > { %v3603_v49 = vpop.f32.mrb[19].mxu1 }
 0xe36   : > { %v2592_v62 = vpop.f32.mrb[20].mxu1 }
 0xe37   : > { %2607 = vrot.lane.b32.xlu0 %v2592_v62, %s5106_s27  ;;  %v3614_v63 = vpop.f32.mrb[21].mxu1 }
 0xe38   : > { %v2595_v1 = vpop.f32.mrb[22].mxu1  ;;  %v3412_v63 = vld [vmem:[#allocation42] ss:$0 sm:$0xff] }
 0xe39   : > { %v3615_v45 = vpop.f32.mrb[23].mxu1 }
 0xe3a   : > { %v3413_v45 = vld [vmem:[#allocation44] ss:$0 sm:$0xff] }
 0xea0   : > { %v2604_v61 = vpop.permute.xlu1 %2603 }
 0xea1   : > { %v2600_v4 = vpop.permute.xlu0 %2599 }
 0xea2   : > { %v2610_v5 = vsel %vm1460_vm5, %v2445_v32, %v2600_v4 }
 0xea3   : > { %v2611_v6 = vsel %vm1935_vm8, %v2610_v5, %v2604_v61 }
 0xea9   : > { %v2608_v7 = vpop.permute.xlu0 %2607 }
 0xeaa   : > { %v2612_v52 = vsel %vm1937_vm9, %v2611_v6, %v2608_v7 }
 0xeab   : > { %v2613_v11 = vpack.c.bf16 %v2612_v52, %v2612_v52 }
 0xead   : > { %3621 = vmatmul.mubr.msk.bf16.vlgmr.msra.gmra.mrb[16].mxu0 %vm1185_vm1, %v2613_v11 }
 0xeae   : > { %3640 = vmatprep.mubr.msk.bf16.mxu0 %vm5095_vm0, %v5094_v0  ;;  %3633 = vmatpush3.bf16.msra.mxu0 %v4091_v34 }
 0xeaf   : > { %3634 = vmatprep.subr.bf16.mxu0 %v5094_v0 }
 0xeb2   : > { %3635 = vmatpush3.bf16.msra.mxu0 %v4092_v39 }
 0xeb3   : > { %3636 = vmatprep.subr.bf16.mxu0 %v5094_v0 }
 0xeb6   : > { %3637 = vmatpush3.bf16.msra.mxu0 %v4093_v22 }
 0xeb7   : > { %3638 = vmatprep.subr.bf16.mxu0 %v5094_v0 }
 0xeba   : > { %3639 = vmatpush3.bf16.msra.mxu0 %v4094_v23 }
 0xf80   : > { %v2674_v12 = vpop.f32.mrb[16].mxu0 }
 0xf81   : > { %v2675_v13 = vadd.f32 %v3396_v48, %v2674_v12  ;;  %v3622_v51 = vpop.f32.mrb[17].mxu0 }
 0xf82   : > { %v2677_v47 = vpop.f32.mrb[18].mxu0 }
 0xf83   : > { %v3623_v14 = vpop.f32.mrb[19].mxu0  ;;  %v2680_v15 = vadd.f32 %v2675_v13, %v6273_v3 }
 0xf85   : > { %v2683_v16 = vsel %vm1185_vm1, %v2680_v15, 0.0 }
 0xf86   : > { %2684 = vadd.xlane.f32.xlu1 %v2683_v16 }
0x1013   : > { %v2685_v17 = vpop.xlane.xlu1 %2684 }
0x1014   : > { %v2686_v46 = vmul.f32 0.03125, %v2685_v17 }
0x1016   : > { %v2687_v18 = vsub.f32 %v2680_v15, %v2686_v46 }
0x1018   : > { %v2688_v50 = vmul.f32 %v2687_v18, %v2687_v18 }
0x101a   : > { %v2689_v10 = vsel %vm1185_vm1, %v2688_v50, 0.0 }
0x101b   : > { %2690 = vadd.xlane.f32.xlu0 %v2689_v10 }
0x10a8   : > { %v2691_v3 = vpop.xlane.xlu0 %2690 }
0x10a9   : > { %v2692_v40 = vmul.f32 0.03125, %v2691_v3 }
0x10ab   : > { %v2693_v41 = vadd.f32 1e-05, %v2692_v40 }
0x10ad   : > { %4121 = vrsqrt.f32 %v2693_v41 }
0x10b7   : > { %v4122_v42 = vpop.eup %4121 }
0x10b8   : > { %v2695_v44 = vmul.f32 %v4122_v42, %v2687_v18 }
0x10ba   : > { %v2702_v2 = vmul.f32 %v3400_v43, %v2695_v44 }
0x10bc   : > { %v2709_v19 = vadd.f32 %v3401_v53, %v2702_v2 }
0x10be   : > { %v2710_v21 = vpack.c.bf16 %v2709_v19, %v2709_v19 }
0x10c0   : > { %3629 = vmatmul.mubr.msk.bf16.vlgmr.msra.gmra.mrb[24].mxu1 %vm1185_vm1, %v2710_v21 }
0x1193   : > { %v2771_v25 = vpop.f32.mrb[24].mxu1 }
0x1194   : > { %v2772_v26 = vadd.f32 %v3402_v24, %v2771_v25  ;;  %v3630_v28 = vpop.f32.mrb[25].mxu1 }
0x1195   : > { %v2774_v27 = vpop.f32.mrb[26].mxu1 }
0x1196   : > { %v2777_v54 = vmax.f32 %v2772_v26, 0.0  ;;  %v3631_v29 = vpop.f32.mrb[27].mxu1 }
0x1198   : > { %v2778_v30 = vpack.c.bf16 %v2777_v54, %v2777_v54 }
0x119a   : > { %3641 = vmatmul.mubr.msk.bf16.vlgmr.msra.gmra.mrb[20].mxu0 %vm2818_vm14, %v2778_v30 }
0x126d   : > { %v2856_v32 = vpop.f32.mrb[20].mxu0 }
0x126e   : > { %v2857_v33 = vadd.f32 %v3406_v31, %v2856_v32  ;;  %v3642_v37 = vpop.f32.mrb[21].mxu0 }
0x126f   : > { %v2859_v38 = vpop.f32.mrb[22].mxu0 }
0x1270   : > { %v3643_v55 = vpop.f32.mrb[23].mxu0  ;;  %v2862_v36 = vadd.f32 %v2857_v33, %v2709_v19 }
0x1272   : > { %v2865_v0 = vsel %vm1185_vm1, %v2862_v36, 0.0 }
0x1273   : > { %2866 = vadd.xlane.f32.xlu0 %v2865_v0 }
0x1300   : > { %v2867_v56 = vpop.xlane.xlu0 %2866 }
0x1301   : > { %v2868_v57 = vmul.f32 0.03125, %v2867_v56 }
0x1303   : > { %v2869_v8 = vsub.f32 %v2862_v36, %v2868_v57 }
0x1305   : > { %v2870_v9 = vmul.f32 %v2869_v8, %v2869_v8 }
0x1307   : > { %v2871_v58 = vsel %vm1185_vm1, %v2870_v9, 0.0 }
0x1308   : > { %2872 = vadd.xlane.f32.xlu1 %v2871_v58 }
0x1395   : > { %v2873_v59 = vpop.xlane.xlu1 %2872 }
0x1396   : > { %v2874_v60 = vmul.f32 0.03125, %v2873_v59 }
0x1398   : > { %v2875_v49 = vadd.f32 1e-05, %v2874_v60 }
0x139a   : > { %4123 = vrsqrt.f32 %v2875_v49 }
0x13a4   : > { %v4124_v62 = vpop.eup %4123 }
0x13a5   : > { %v2877_v1 = vmul.f32 %v4124_v62, %v2869_v8 }
0x13a7   : > { %v2884_v4 = vmul.f32 %v3412_v63, %v2877_v1 }
0x13a9   : > { %v2891_v61 = vadd.f32 %v3413_v45, %v2884_v4 }
0x13ab   : > { %v2892_v5 = vpack.c.bf16 %v2891_v61, %v2891_v61 }
0x13ad   : > { %2894 = vst.msk [vmem:[%s6018_s21] sm:$0xf] %vm1230_vm2, %v2892_v5 }
0x13ae   : > { %4844 = shalt.err (!%p4841_p4)
}
0x13af   : > { %s4845_s15 = scalar_lea.hbm %s6368_s18, 64  ;;  %s4849_s27 = scalar_lea.hbm %s6613_s22, 128 }
0x13b0   : > { %p4846_p7 = scmp.ne.s32.totalorder %s6368_s18, %s4845_s15  ;;  %p4850_p1 = scmp.lt.u32.totalorder %s6368_s18, %s6613_s22 }
0x13b1   : > { %p4851_p6 = scmp.lt.u32.totalorder %s4849_s27, %s4845_s15  ;;  %p4853_p0 = scmp.lt.u32.totalorder %s4845_s15, %s6368_s18 }
0x13b2   : > { %p4847_p2 = pnand %p4846_p7, %p6614_p3 }
0x13b3   : > { %p4852_p11 = por %p4851_p6, %p4850_p1 }
0x13b4   : > { %p4848_p8 = pneg %p4847_p2 }
0x13b5   : > { %p4854_p10 = por %p4853_p0, %p4852_p11 }
0x13b7   : > { %p4855_p9 = pnand %p4854_p10, %p4848_p8 }
0x13b9   : > { %4858 = shalt.err (!%p4855_p9)
}
0x13ba   : > { %3738 = dma.vmem_to_hbm [thread:$0]  (%p6614_p3), %s6370_s5, 64, %s6368_s18, %s2896_s11  }
0x13bb PF: > { %s2922_s20 = sand.u32 1, %s4993_s29   ;;  %p6615_p5 = scmp.ne.s32.totalorder %s6544_s16, 0 }
0x13bc   : > { %p6616_p12 = scmp.ge.s32.totalorder %s5013_s3, 2  ;;  %s2923_s30 = scalar_lea.sflag [#allocation8], %s2922_s20 }
0x13be   : > { %p3818_p13 = pnand %p6616_p12, %p6615_p5 }
0x13c0   : > { %4988 = dma.done.wait (!%p3818_p13), %s2923_s30, 64  }
0x13c1   : > { %4990 = vsyncadd (!%p3818_p13), %s2923_s30, 4294967232  ;;  %s55_s3 = sadd.s32 1, %s5013_s3   ;;  %s6617_s29 = smov %s4997_s2 }
0x13c2   : > { %p52_p4 = scmp.ge.s32.totalorder %s55_s3, 4   ;;  %s6618_s2 = smov %s5001_s6 }
0x13c3   : > { %s6619_s6 = smov %s5559_s12  ;;  %s6620_s30 = smov %s5009_s7 }
0x13c4   : > { %s6621_s7 = smov %s6623_s10  ;;  %54 = sbr.rel (!%p52_p4) target bundleno = 46 (0x2e), region = 302 }
0x13cb   :  { %2928 = vsyncpa [#allocation7], 1 }
0x13cc   :  { %2930 = vsyncpa [#allocation7 + $0x1], 1 }
0x13cd   :  { %2931 = vsyncpa [#allocation10], 1 }
0x13ce   :  { %2933 = vsyncpa [#allocation10 + $0x1], 1 }
0x13cf   :  { %2934 = vsyncpa [#allocation13], 1 }
0x13d0   :  { %2935 = vsyncpa [#allocation16], 1 }
0x13d1   :  { %2936 = vsyncpa [#allocation19], 1 }
0x13d2   :  { %2937 = vsyncpa [#allocation22], 1 }
0x13d3   :  { %2938 = vsyncpa [#allocation25], 1 }
0x13d4   :  { %2939 = vsyncpa [#allocation28], 1 }
0x13d5   :  { %2940 = vsyncpa [#allocation31], 1 }
0x13d6   :  { %2941 = vsyncpa [#allocation34], 1 }
0x13d7   :  { %2942 = vsyncpa [#allocation37], 1 }
0x13d8   :  { %2943 = vsyncpa [#allocation40], 1 }
0x13d9   :  { %2944 = vsyncpa [#allocation43], 1 }
0x13da   :  { %2945 = vsyncpa [#allocation8], 1 }
0x13db   :  { %2947 = vsyncpa [#allocation8 + $0x1], 1 }

</bundles_post_ra>
